<compile_context>
chip_gen: v6e
topology: v6e:2x2x1
jax: 0.10.0
libtpu: 0.0.40
codegen_flags: <defaults>
</compile_context>

<pallas_src>
import jax
import jax.numpy as jnp
from jax.experimental import pallas as pl
from jax.experimental.pallas import tpu as pltpu


# ---------------------------------------------------------------------------
# Fused Pallas kernel: conv1 + ReLU + conv2 + bias + residual + ReLU
# ---------------------------------------------------------------------------
def _residual_block_kernel(x_ref, w1_ref, w2_ref, b1_ref, b2_ref, o_ref,
                           p_ref, cat_ref):
    """Fused ResidualBlock forward for one NHWC image.

    x_ref   : (1, H, W, Cp)         input image (channel-padded, original dtype)
    w1_ref  : (3, 3*Cp, Cp) bf16    conv1 weights, K index = kw*Cp + ci
    w2_ref  : (3, 3*Cp, Cp) bf16    conv2 weights
    b1_ref  : (1, Cp) f32           conv1 bias
    b2_ref  : (1, Cp) f32           conv2 bias
    o_ref   : (1, H, W, Cp)         output
    p_ref   : VMEM (H+2, W+2, Cp) bf16   halo-padded activation staging (zero ring)
    cat_ref : VMEM ((H+2)*W, 3*Cp) bf16  K-fused conv LHS (3 shifted slabs)
    """
    Hp, Wp, Cp = p_ref.shape
    H, W = Hp - 2, Wp - 2
    HW = H * W

    def conv3x3(w_ref):
        # Build the K-fused LHS from the halo-padded activation in p_ref:
        #   cat[:, kw*Cp:(kw+1)*Cp] = p[:, kw:kw+W, :]   (3 slab copies, not 9)
        for kw in range(3):                                     # static, unrolled
            cat_ref[:, kw * Cp:(kw + 1) * Cp] = (
                p_ref[:, kw:kw + W, :].reshape((H + 2) * W, Cp))
        # 3 deep matmuls (M=H*W, K=3*Cp, N=Cp), f32 *value* accumulation.
        # Row offsets kh*W are static and sublane-aligned when W % 8 == 0.
        acc = jnp.dot(cat_ref[0:HW, :], w_ref[0],
                      preferred_element_type=jnp.float32)
        for kh in range(1, 3):
            acc = acc + jnp.dot(cat_ref[kh * W:kh * W + HW, :], w_ref[kh],
                                preferred_element_type=jnp.float32)
        return acc                                              # (H*W, Cp) f32

    # Stage x with a zero halo ring (this IS the conv's 'same' zero padding).
    # Full zero-init every step: cheap in bf16 and keeps the ring correct on
    # every core (scratch is per-TensorCore under megacore sharding).
    p_ref[...] = jnp.zeros_like(p_ref)
    p_ref[1:H + 1, 1:W + 1, :] = x_ref[0].astype(p_ref.dtype)

    # ---- conv1 + bias + ReLU (f32 elementwise) -----------------------------
    y1 = jnp.maximum(conv3x3(w1_ref) + b1_ref[...], 0.0)

    # Re-stage y1 under the same zero ring (interior overwrite only).
    p_ref[1:H + 1, 1:W + 1, :] = y1.reshape(H, W, Cp).astype(p_ref.dtype)

    # ---- conv2 + bias + residual + ReLU ------------------------------------
    resid = x_ref[0].reshape(HW, Cp).astype(jnp.float32)   # residual read in f32
    out = jnp.maximum(conv3x3(w2_ref) + b2_ref[...] + resid, 0.0)
    o_ref[0] = out.reshape(H, W, Cp).astype(o_ref.dtype)


# ---------------------------------------------------------------------------
# Wrapper
# ---------------------------------------------------------------------------
def residual_block(x_nhwc, w1, b1, w2, b2):
    """Equivalent of ResidualBlock.forward on NHWC input.

    x_nhwc: (N, H, W, C); w1, w2: (3, 3, C, C) HWIO; b1, b2: (C,)
    """
    N, H, W, C = x_nhwc.shape
    Cp = ((C + 127) // 128) * 128          # lane-dense channel count
    dt = x_nhwc.dtype
    # NOTE: for very small C (e.g. the C=4 test) MXU utilization is ~(C/Cp)^2;
    # this path is really meant for C >= ~64.  Correctness is unaffected.

    def cpad(a, axis):
        if Cp == C:
            return a
        widths = [(0, 0)] * a.ndim
        widths[axis] = (0, Cp - C)
        return jnp.pad(a, widths)

    # Host-side prep: channel pad only (the spatial halo is built in-kernel).
    xp = cpad(x_nhwc, 3)                                            # (N,H,W,Cp)
    # HWIO -> (kh, kw*Cin, Cout); bf16 for the MXU.
    w1p = cpad(cpad(w1, 2), 3).reshape(3, 3 * Cp, Cp).astype(jnp.bfloat16)
    w2p = cpad(cpad(w2, 2), 3).reshape(3, 3 * Cp, Cp).astype(jnp.bfloat16)
    b1p = cpad(b1.reshape(1, C), 1).astype(jnp.float32)
    b2p = cpad(b2.reshape(1, C), 1).astype(jnp.float32)

    itemsize = jnp.dtype(dt).itemsize
    # Per-step VMEM: double-buffered in/out image blocks + 2 resident bf16
    # weight slabs + bf16 staging/cat scratches (+ tiny biases).
    blk_bytes = H * W * Cp * itemsize
    w_bytes = 2 * (3 * 3 * Cp * Cp) * 2                             # both convs, bf16
    scratch_bytes = ((H + 2) * (W + 2) * Cp + (H + 2) * W * 3 * Cp) * 2
    need = 2 * 2 * blk_bytes + 2 * w_bytes + scratch_bytes + 4 * Cp * 4
    vmem_limit = int(min(64 * 1024 * 1024,
                         max(32 * 1024 * 1024, 2 * need + (16 << 20))))
    # TODO(synk): for large H*W, add a row-tile grid axis with a 1-row halo
    # (second "parallel" axis -> uses both v7x TensorCores even at N == 1).

    cost = pl.CostEstimate(
        flops=2 * 2 * N * H * W * 9 * Cp * Cp,          # 2 convs x 2 flops/MAC
        transcendentals=0,
        bytes_accessed=2 * N * H * W * Cp * itemsize + w_bytes,
    )

    out_p = pl.pallas_call(
        _residual_block_kernel,
        out_shape=jax.ShapeDtypeStruct((N, H, W, Cp), dt),
        grid=(N,),
        in_specs=[
            pl.BlockSpec((1, H, W, Cp), lambda n: (n, 0, 0, 0)),    # x
            pl.BlockSpec((3, 3 * Cp, Cp), lambda n: (0, 0, 0)),     # w1 (resident)
            pl.BlockSpec((3, 3 * Cp, Cp), lambda n: (0, 0, 0)),     # w2 (resident)
            pl.BlockSpec((1, Cp), lambda n: (0, 0)),                # b1
            pl.BlockSpec((1, Cp), lambda n: (0, 0)),                # b2
        ],
        out_specs=pl.BlockSpec((1, H, W, Cp), lambda n: (n, 0, 0, 0)),
        scratch_shapes=[
            pltpu.VMEM((H + 2, W + 2, Cp), jnp.bfloat16),           # halo staging
            pltpu.VMEM(((H + 2) * W, 3 * Cp), jnp.bfloat16),        # K-fused LHS
        ],
        compiler_params=pltpu.CompilerParams(
            dimension_semantics=("parallel",),
            vmem_limit_bytes=vmem_limit,
        ),
        cost_estimate=cost,
    )(xp, w1p, w2p, b1p, b2p)

    return out_p[..., :C] if Cp != C else out_p


# ---------------------------------------------------------------------------
# Pure-JAX reference (for correctness check)
# ---------------------------------------------------------------------------
def _reference(x_nhwc, w1, b1, w2, b2):
    dn = ("NHWC", "HWIO", "NHWC")
    y = jax.lax.conv_general_dilated(x_nhwc, w1, (1, 1), "SAME",
                                     dimension_numbers=dn) + b1
    y = jnp.maximum(y, 0.0)
    y = jax.lax.conv_general_dilated(y, w2, (1, 1), "SAME",
                                     dimension_numbers=dn) + b2
    return jnp.maximum(x_nhwc + y, 0.0)


# ---------------------------------------------------------------------------
if __name__ == "__main__":
    N, C, H, W = 2, 4, 16, 16
    key = jax.random.PRNGKey(0)
    k1, k2, k3, k4, k5 = jax.random.split(key, 5)

    x_nchw = jax.random.normal(k1, (N, C, H, W), jnp.float32)   # PyTorch layout
    w1 = jax.random.normal(k2, (3, 3, C, C), jnp.float32) * 0.1
    b1 = jax.random.normal(k3, (C,), jnp.float32) * 0.1
    w2 = jax.random.normal(k4, (3, 3, C, C), jnp.float32) * 0.1
    b2 = jax.random.normal(k5, (C,), jnp.float32) * 0.1

    x_nhwc = jnp.transpose(x_nchw, (0, 2, 3, 1))                # NCHW -> NHWC

    out = residual_block(x_nhwc, w1, b1, w2, b2)
    out = jax.block_until_ready(out)

    ref = _reference(x_nhwc, w1, b1, w2, b2)
    assert out.shape == (N, H, W, C)
    max_err = float(jnp.max(jnp.abs(out - ref)))
    # bf16 matmul operands -> loosened tolerance vs the f32 reference.
    assert jnp.allclose(out, ref, atol=5e-2, rtol=5e-2), \
        f"mismatch vs reference conv (max abs err {max_err})"

    print("KERNEL_OK")
</pallas_src>

<mosaic_0001>
module attributes {stable_mosaic.version = 11 : i64} {
  func.func @_residual_block_kernel(%arg0: i32, %arg1: memref<1x16x16x128xf32, #tpu.memory_space<vmem>>, %arg2: memref<3x384x128xbf16, #tpu.memory_space<vmem>>, %arg3: memref<3x384x128xbf16, #tpu.memory_space<vmem>>, %arg4: memref<1x128xf32, #tpu.memory_space<vmem>>, %arg5: memref<1x128xf32, #tpu.memory_space<vmem>>, %arg6: memref<1x16x16x128xf32, #tpu.memory_space<vmem>>, %arg7: memref<18x18x128xbf16, #tpu.memory_space<vmem>>, %arg8: memref<288x384xbf16, #tpu.memory_space<vmem>>) attributes {dimension_semantics = [#tpu.dimension_semantics<parallel>], iteration_bounds = array<i64: 2>, scalar_prefetch = 0 : i64, scratch_operands = 2 : i64, tpu.core_type = #tpu.core_type<tc>, window_params = [{transform_indices = @transform_0, window_bounds = array<i64: 1, 16, 16, 128>}, {pipeline_mode = #tpu.pipeline_mode<synchronous>, transform_indices = @transform_1, window_bounds = array<i64: 3, 384, 128>}, {pipeline_mode = #tpu.pipeline_mode<synchronous>, transform_indices = @transform_2, window_bounds = array<i64: 3, 384, 128>}, {pipeline_mode = #tpu.pipeline_mode<synchronous>, transform_indices = @transform_3, window_bounds = array<i64: 1, 128>}, {pipeline_mode = #tpu.pipeline_mode<synchronous>, transform_indices = @transform_4, window_bounds = array<i64: 1, 128>}, {transform_indices = @transform_5, window_bounds = array<i64: 1, 16, 16, 128>}]} {
    %cst = arith.constant 0.000000e+00 : bf16
    %0 = vector.broadcast %cst : bf16 to vector<18x18x128xbf16>
    %c0 = arith.constant 0 : index
    %c0_0 = arith.constant 0 : index
    %c0_1 = arith.constant 0 : index
    %1 = vector.load %arg7[%c0, %c0_0, %c0_1] : memref<18x18x128xbf16, #tpu.memory_space<vmem>>, vector<18x18x128xbf16>
    tpu.vector_store %arg7[%c0, %c0_0, %c0_1], %0 {strides = array<i32>} : memref<18x18x128xbf16, #tpu.memory_space<vmem>>, vector<18x18x128xbf16>,
    %c0_2 = arith.constant 0 : index
    %c0_3 = arith.constant 0 : index
    %c0_4 = arith.constant 0 : index
    %c0_5 = arith.constant 0 : index
    %2 = vector.load %arg1[%c0_2, %c0_3, %c0_4, %c0_5] : memref<1x16x16x128xf32, #tpu.memory_space<vmem>>, vector<1x16x16x128xf32>
    %3 = vector.shape_cast %2 : vector<1x16x16x128xf32> to vector<16x16x128xf32>
    %4 = arith.truncf %3 : vector<16x16x128xf32> to vector<16x16x128xbf16>
    %c1 = arith.constant 1 : index
    %c1_6 = arith.constant 1 : index
    %c0_7 = arith.constant 0 : index
    %5 = vector.load %arg7[%c1, %c1_6, %c0_7] : memref<18x18x128xbf16, #tpu.memory_space<vmem>>, vector<16x16x128xbf16>
    tpu.vector_store %arg7[%c1, %c1_6, %c0_7], %4 {strides = array<i32>} : memref<18x18x128xbf16, #tpu.memory_space<vmem>>, vector<16x16x128xbf16>,
    %c0_8 = arith.constant 0 : index
    %c0_9 = arith.constant 0 : index
    %c0_10 = arith.constant 0 : index
    %6 = vector.load %arg7[%c0_8, %c0_9, %c0_10] : memref<18x18x128xbf16, #tpu.memory_space<vmem>>, vector<18x16x128xbf16>
    %7 = vector.shape_cast %6 : vector<18x16x128xbf16> to vector<288x128xbf16>
    %c0_11 = arith.constant 0 : index
    %c0_12 = arith.constant 0 : index
    %8 = vector.load %arg8[%c0_11, %c0_12] : memref<288x384xbf16, #tpu.memory_space<vmem>>, vector<288x128xbf16>
    tpu.vector_store %arg8[%c0_11, %c0_12], %7 {strides = array<i32>} : memref<288x384xbf16, #tpu.memory_space<vmem>>, vector<288x128xbf16>,
    %c0_13 = arith.constant 0 : index
    %c1_14 = arith.constant 1 : index
    %c0_15 = arith.constant 0 : index
    %9 = vector.load %arg7[%c0_13, %c1_14, %c0_15] : memref<18x18x128xbf16, #tpu.memory_space<vmem>>, vector<18x16x128xbf16>
    %10 = vector.shape_cast %9 : vector<18x16x128xbf16> to vector<288x128xbf16>
    %c0_16 = arith.constant 0 : index
    %c128 = arith.constant 128 : index
    %11 = vector.load %arg8[%c0_16, %c128] : memref<288x384xbf16, #tpu.memory_space<vmem>>, vector<288x128xbf16>
    tpu.vector_store %arg8[%c0_16, %c128], %10 {strides = array<i32>} : memref<288x384xbf16, #tpu.memory_space<vmem>>, vector<288x128xbf16>,
    %c0_17 = arith.constant 0 : index
    %c2 = arith.constant 2 : index
    %c0_18 = arith.constant 0 : index
    %12 = vector.load %arg7[%c0_17, %c2, %c0_18] : memref<18x18x128xbf16, #tpu.memory_space<vmem>>, vector<18x16x128xbf16>
    %13 = vector.shape_cast %12 : vector<18x16x128xbf16> to vector<288x128xbf16>
    %c0_19 = arith.constant 0 : index
    %c256 = arith.constant 256 : index
    %14 = vector.load %arg8[%c0_19, %c256] : memref<288x384xbf16, #tpu.memory_space<vmem>>, vector<288x128xbf16>
    tpu.vector_store %arg8[%c0_19, %c256], %13 {strides = array<i32>} : memref<288x384xbf16, #tpu.memory_space<vmem>>, vector<288x128xbf16>,
    %c0_20 = arith.constant 0 : index
    %c0_21 = arith.constant 0 : index
    %15 = vector.load %arg8[%c0_20, %c0_21] : memref<288x384xbf16, #tpu.memory_space<vmem>>, vector<256x384xbf16>
    %c0_22 = arith.constant 0 : index
    %c0_23 = arith.constant 0 : index
    %c0_24 = arith.constant 0 : index
    %16 = vector.load %arg2[%c0_22, %c0_23, %c0_24] : memref<3x384x128xbf16, #tpu.memory_space<vmem>>, vector<1x384x128xbf16>
    %17 = vector.shape_cast %16 : vector<1x384x128xbf16> to vector<384x128xbf16>
    %cst_25 = arith.constant dense<0.000000e+00> : vector<256x128xf32>
    %18 = tpu.matmul %15, %17, %cst_25 {dimension_numbers = #tpu.dot_dimension_numbers<[1], [0], [0], [1], [0, 0, 1, 1], [], []>} : vector<256x384xbf16>, vector<384x128xbf16>, vector<256x128xf32> -> vector<256x128xf32>
    %c16 = arith.constant 16 : index
    %c0_26 = arith.constant 0 : index
    %19 = vector.load %arg8[%c16, %c0_26] : memref<288x384xbf16, #tpu.memory_space<vmem>>, vector<256x384xbf16>
    %c1_27 = arith.constant 1 : index
    %c0_28 = arith.constant 0 : index
    %c0_29 = arith.constant 0 : index
    %20 = vector.load %arg2[%c1_27, %c0_28, %c0_29] : memref<3x384x128xbf16, #tpu.memory_space<vmem>>, vector<1x384x128xbf16>
    %21 = vector.shape_cast %20 : vector<1x384x128xbf16> to vector<384x128xbf16>
    %cst_30 = arith.constant dense<0.000000e+00> : vector<256x128xf32>
    %22 = tpu.matmul %19, %21, %cst_30 {dimension_numbers = #tpu.dot_dimension_numbers<[1], [0], [0], [1], [0, 0, 1, 1], [], []>} : vector<256x384xbf16>, vector<384x128xbf16>, vector<256x128xf32> -> vector<256x128xf32>
    %23 = arith.addf %18, %22 : vector<256x128xf32>
    %c32 = arith.constant 32 : index
    %c0_31 = arith.constant 0 : index
    %24 = vector.load %arg8[%c32, %c0_31] : memref<288x384xbf16, #tpu.memory_space<vmem>>, vector<256x384xbf16>
    %c2_32 = arith.constant 2 : index
    %c0_33 = arith.constant 0 : index
    %c0_34 = arith.constant 0 : index
    %25 = vector.load %arg2[%c2_32, %c0_33, %c0_34] : memref<3x384x128xbf16, #tpu.memory_space<vmem>>, vector<1x384x128xbf16>
    %26 = vector.shape_cast %25 : vector<1x384x128xbf16> to vector<384x128xbf16>
    %cst_35 = arith.constant dense<0.000000e+00> : vector<256x128xf32>
    %27 = tpu.matmul %24, %26, %cst_35 {dimension_numbers = #tpu.dot_dimension_numbers<[1], [0], [0], [1], [0, 0, 1, 1], [], []>} : vector<256x384xbf16>, vector<384x128xbf16>, vector<256x128xf32> -> vector<256x128xf32>
    %28 = arith.addf %23, %27 : vector<256x128xf32>
    %c0_36 = arith.constant 0 : index
    %c0_37 = arith.constant 0 : index
    %29 = vector.load %arg4[%c0_36, %c0_37] : memref<1x128xf32, #tpu.memory_space<vmem>>, vector<1x128xf32>
    %30 = vector.broadcast %29 : vector<1x128xf32> to vector<256x128xf32>
    %31 = arith.addf %28, %30 : vector<256x128xf32>
    %cst_38 = arith.constant 0.000000e+00 : f32
    %32 = vector.broadcast %cst_38 : f32 to vector<256x128xf32>
    %33 = arith.maximumf %31, %32 : vector<256x128xf32>
    %34 = vector.shape_cast %33 : vector<256x128xf32> to vector<16x16x128xf32>
    %35 = arith.truncf %34 : vector<16x16x128xf32> to vector<16x16x128xbf16>
    %c1_39 = arith.constant 1 : index
    %c1_40 = arith.constant 1 : index
    %c0_41 = arith.constant 0 : index
    %36 = vector.load %arg7[%c1_39, %c1_40, %c0_41] : memref<18x18x128xbf16, #tpu.memory_space<vmem>>, vector<16x16x128xbf16>
    tpu.vector_store %arg7[%c1_39, %c1_40, %c0_41], %35 {strides = array<i32>} : memref<18x18x128xbf16, #tpu.memory_space<vmem>>, vector<16x16x128xbf16>,
    %c0_42 = arith.constant 0 : index
    %c0_43 = arith.constant 0 : index
    %c0_44 = arith.constant 0 : index
    %c0_45 = arith.constant 0 : index
    %37 = vector.load %arg1[%c0_42, %c0_43, %c0_44, %c0_45] : memref<1x16x16x128xf32, #tpu.memory_space<vmem>>, vector<1x16x16x128xf32>
    %38 = vector.shape_cast %37 : vector<1x16x16x128xf32> to vector<16x16x128xf32>
    %39 = vector.shape_cast %38 : vector<16x16x128xf32> to vector<256x128xf32>
    %c0_46 = arith.constant 0 : index
    %c0_47 = arith.constant 0 : index
    %c0_48 = arith.constant 0 : index
    %40 = vector.load %arg7[%c0_46, %c0_47, %c0_48] : memref<18x18x128xbf16, #tpu.memory_space<vmem>>, vector<18x16x128xbf16>
    %41 = vector.shape_cast %40 : vector<18x16x128xbf16> to vector<288x128xbf16>
    %c0_49 = arith.constant 0 : index
    %c0_50 = arith.constant 0 : index
    %42 = vector.load %arg8[%c0_49, %c0_50] : memref<288x384xbf16, #tpu.memory_space<vmem>>, vector<288x128xbf16>
    tpu.vector_store %arg8[%c0_49, %c0_50], %41 {strides = array<i32>} : memref<288x384xbf16, #tpu.memory_space<vmem>>, vector<288x128xbf16>,
    %c0_51 = arith.constant 0 : index
    %c1_52 = arith.constant 1 : index
    %c0_53 = arith.constant 0 : index
    %43 = vector.load %arg7[%c0_51, %c1_52, %c0_53] : memref<18x18x128xbf16, #tpu.memory_space<vmem>>, vector<18x16x128xbf16>
    %44 = vector.shape_cast %43 : vector<18x16x128xbf16> to vector<288x128xbf16>
    %c0_54 = arith.constant 0 : index
    %c128_55 = arith.constant 128 : index
    %45 = vector.load %arg8[%c0_54, %c128_55] : memref<288x384xbf16, #tpu.memory_space<vmem>>, vector<288x128xbf16>
    tpu.vector_store %arg8[%c0_54, %c128_55], %44 {strides = array<i32>} : memref<288x384xbf16, #tpu.memory_space<vmem>>, vector<288x128xbf16>,
    %c0_56 = arith.constant 0 : index
    %c2_57 = arith.constant 2 : index
    %c0_58 = arith.constant 0 : index
    %46 = vector.load %arg7[%c0_56, %c2_57, %c0_58] : memref<18x18x128xbf16, #tpu.memory_space<vmem>>, vector<18x16x128xbf16>
    %47 = vector.shape_cast %46 : vector<18x16x128xbf16> to vector<288x128xbf16>
    %c0_59 = arith.constant 0 : index
    %c256_60 = arith.constant 256 : index
    %48 = vector.load %arg8[%c0_59, %c256_60] : memref<288x384xbf16, #tpu.memory_space<vmem>>, vector<288x128xbf16>
    tpu.vector_store %arg8[%c0_59, %c256_60], %47 {strides = array<i32>} : memref<288x384xbf16, #tpu.memory_space<vmem>>, vector<288x128xbf16>,
    %c0_61 = arith.constant 0 : index
    %c0_62 = arith.constant 0 : index
    %49 = vector.load %arg8[%c0_61, %c0_62] : memref<288x384xbf16, #tpu.memory_space<vmem>>, vector<256x384xbf16>
    %c0_63 = arith.constant 0 : index
    %c0_64 = arith.constant 0 : index
    %c0_65 = arith.constant 0 : index
    %50 = vector.load %arg3[%c0_63, %c0_64, %c0_65] : memref<3x384x128xbf16, #tpu.memory_space<vmem>>, vector<1x384x128xbf16>
    %51 = vector.shape_cast %50 : vector<1x384x128xbf16> to vector<384x128xbf16>
    %cst_66 = arith.constant dense<0.000000e+00> : vector<256x128xf32>
    %52 = tpu.matmul %49, %51, %cst_66 {dimension_numbers = #tpu.dot_dimension_numbers<[1], [0], [0], [1], [0, 0, 1, 1], [], []>} : vector<256x384xbf16>, vector<384x128xbf16>, vector<256x128xf32> -> vector<256x128xf32>
    %c16_67 = arith.constant 16 : index
    %c0_68 = arith.constant 0 : index
    %53 = vector.load %arg8[%c16_67, %c0_68] : memref<288x384xbf16, #tpu.memory_space<vmem>>, vector<256x384xbf16>
    %c1_69 = arith.constant 1 : index
    %c0_70 = arith.constant 0 : index
    %c0_71 = arith.constant 0 : index
    %54 = vector.load %arg3[%c1_69, %c0_70, %c0_71] : memref<3x384x128xbf16, #tpu.memory_space<vmem>>, vector<1x384x128xbf16>
    %55 = vector.shape_cast %54 : vector<1x384x128xbf16> to vector<384x128xbf16>
    %cst_72 = arith.constant dense<0.000000e+00> : vector<256x128xf32>
    %56 = tpu.matmul %53, %55, %cst_72 {dimension_numbers = #tpu.dot_dimension_numbers<[1], [0], [0], [1], [0, 0, 1, 1], [], []>} : vector<256x384xbf16>, vector<384x128xbf16>, vector<256x128xf32> -> vector<256x128xf32>
    %57 = arith.addf %52, %56 : vector<256x128xf32>
    %c32_73 = arith.constant 32 : index
    %c0_74 = arith.constant 0 : index
    %58 = vector.load %arg8[%c32_73, %c0_74] : memref<288x384xbf16, #tpu.memory_space<vmem>>, vector<256x384xbf16>
    %c2_75 = arith.constant 2 : index
    %c0_76 = arith.constant 0 : index
    %c0_77 = arith.constant 0 : index
    %59 = vector.load %arg3[%c2_75, %c0_76, %c0_77] : memref<3x384x128xbf16, #tpu.memory_space<vmem>>, vector<1x384x128xbf16>
    %60 = vector.shape_cast %59 : vector<1x384x128xbf16> to vector<384x128xbf16>
    %cst_78 = arith.constant dense<0.000000e+00> : vector<256x128xf32>
    %61 = tpu.matmul %58, %60, %cst_78 {dimension_numbers = #tpu.dot_dimension_numbers<[1], [0], [0], [1], [0, 0, 1, 1], [], []>} : vector<256x384xbf16>, vector<384x128xbf16>, vector<256x128xf32> -> vector<256x128xf32>
    %62 = arith.addf %57, %61 : vector<256x128xf32>
    %c0_79 = arith.constant 0 : index
    %c0_80 = arith.constant 0 : index
    %63 = vector.load %arg5[%c0_79, %c0_80] : memref<1x128xf32, #tpu.memory_space<vmem>>, vector<1x128xf32>
    %64 = vector.broadcast %63 : vector<1x128xf32> to vector<256x128xf32>
    %65 = arith.addf %62, %64 : vector<256x128xf32>
    %66 = arith.addf %65, %39 : vector<256x128xf32>
    %cst_81 = arith.constant 0.000000e+00 : f32
    %67 = vector.broadcast %cst_81 : f32 to vector<256x128xf32>
    %68 = arith.maximumf %66, %67 : vector<256x128xf32>
    %69 = vector.shape_cast %68 : vector<256x128xf32> to vector<16x16x128xf32>
    %c0_82 = arith.constant 0 : index
    %c0_83 = arith.constant 0 : index
    %c0_84 = arith.constant 0 : index
    %c0_85 = arith.constant 0 : index
    %70 = vector.load %arg6[%c0_82, %c0_83, %c0_84, %c0_85] : memref<1x16x16x128xf32, #tpu.memory_space<vmem>>, vector<1x16x16x128xf32>
    %71 = vector.shape_cast %70 : vector<1x16x16x128xf32> to vector<16x16x128xf32>
    %72 = vector.shape_cast %69 : vector<16x16x128xf32> to vector<1x16x16x128xf32>
    tpu.vector_store %arg6[%c0_82, %c0_83, %c0_84, %c0_85], %72 {strides = array<i32>} : memref<1x16x16x128xf32, #tpu.memory_space<vmem>>, vector<1x16x16x128xf32>,
    return
  }
  func.func @transform_0(%arg0: i32) -> (i32, i32, i32, i32) {
    %c0_i32 = arith.constant 0 : i32
    %c0_i32_0 = arith.constant 0 : i32
    %c0_i32_1 = arith.constant 0 : i32
    %c0_i32_2 = arith.constant 0 : i32
    return %arg0, %c0_i32, %c0_i32_0, %c0_i32_1 : i32, i32, i32, i32
  }
  func.func @transform_1(%arg0: i32) -> (i32, i32, i32) {
    %c0_i32 = arith.constant 0 : i32
    %c0_i32_0 = arith.constant 0 : i32
    %c0_i32_1 = arith.constant 0 : i32
    %c0_i32_2 = arith.constant 0 : i32
    return %c0_i32, %c0_i32_0, %c0_i32_1 : i32, i32, i32
  }
  func.func @transform_2(%arg0: i32) -> (i32, i32, i32) {
    %c0_i32 = arith.constant 0 : i32
    %c0_i32_0 = arith.constant 0 : i32
    %c0_i32_1 = arith.constant 0 : i32
    %c0_i32_2 = arith.constant 0 : i32
    return %c0_i32, %c0_i32_0, %c0_i32_1 : i32, i32, i32
  }
  func.func @transform_3(%arg0: i32) -> (i32, i32) {
    %c0_i32 = arith.constant 0 : i32
    %c0_i32_0 = arith.constant 0 : i32
    %c0_i32_1 = arith.constant 0 : i32
    return %c0_i32, %c0_i32_0 : i32, i32
  }
  func.func @transform_4(%arg0: i32) -> (i32, i32) {
    %c0_i32 = arith.constant 0 : i32
    %c0_i32_0 = arith.constant 0 : i32
    %c0_i32_1 = arith.constant 0 : i32
    return %c0_i32, %c0_i32_0 : i32, i32
  }
  func.func @transform_5(%arg0: i32) -> (i32, i32, i32, i32) {
    %c0_i32 = arith.constant 0 : i32
    %c0_i32_0 = arith.constant 0 : i32
    %c0_i32_1 = arith.constant 0 : i32
    %c0_i32_2 = arith.constant 0 : i32
    return %arg0, %c0_i32, %c0_i32_0, %c0_i32_1 : i32, i32, i32, i32
  }
}

</mosaic_0001>

<bundles_post_ra>
// kernel: tpu_custom_call.1
= control target key start
LH: loop header
LB: loop body
LE: loop exit
PB: predicated region body
PF: predicated region fallthrough
CT: control target
= control target key end

     0   :  { %10 = vsyncpa [#allocation5], 0  ;;  %s12516_s0 = inlined_call_operand.hbm [shape: f32[2,16,16,128], index: 0, kind: input, shape index: {}]   ;;  %s12517_s1 = inlined_call_operand.hbm [shape: bf16[3,384,128], index: 1, kind: input, shape index: {}]   ;;  %s12518_s2 = inlined_call_operand.hbm [shape: bf16[3,384,128], index: 2, kind: input, shape index: {}]   ;;  %s12519_s3 = inlined_call_operand.vmem [shape: f32[1,128], index: 3, kind: input, shape index: {}]   ;;  %s12520_s4 = inlined_call_operand.vmem [shape: f32[1,128], index: 4, kind: input, shape index: {}]   ;;  %s12521_s5 = inlined_call_operand.hbm [shape: f32[2,16,16,128], index: 5, kind: output, shape index: {}]  }
   0x1   :  { %12 = vsyncpa [#allocation5 + $0x1], 0 }
   0x2   :  { %13 = vsyncpa [#allocation8], 0 }
   0x3   :  { %14 = vsyncpa [#allocation6], 0 }
   0x4   :  { %16 = vsyncpa [#allocation6 + $0x1], 0  ;;  %s10462_s18 = smov 0   ;;  %s10464_s19 = smov 0  }
   0x5   :  { %s10466_s20 = smov 0   ;;  %s10468_s21 = smov 0  }
   0x6 LB: > { %s10483_s22 = sadd.s32 4294967295, %s10419_s21   ;;  %s8118_s23 = sadd.s32 4294967294, %s10419_s21   ;;  %s10419_s21 = sphi %s10468_s21, %s12583_s21   ;;  %s10415_s20 = sphi %s10466_s20, %s12582_s20   ;;  %s10411_s19 = sphi %s10464_s19, %s12581_s19   ;;  %s10407_s18 = sphi %s10462_s18, %s12580_s18  }
   0x7   : > { %p42_p0 = scmp.ne.s32.totalorder %s10411_s19, %s10407_s18  ;;  %p12522_p1 = scmp.eq.s32.totalorder %s10483_s22, 0 }
   0x8   : > { %p156_p3 = scmp.eq.s32.totalorder %s8118_s23, 1  ;;  %p8119_p5 = scmp.ge.s32.totalorder %s10419_s21, 1 }
   0x9   : > { %p10492_p4 = por %p12522_p1, %p42_p0  ;;  %p163_p7 = scmp.lt.s32.totalorder %s10419_s21, 3 }
   0xa   : > { %p10497_p6 = por %p156_p3, %p42_p0  ;;  %s10421_s27 = smov [#allocation7]  }
   0xb   : > { %s12534_s24 = scalar_select %p10492_p4, 1, 0 }
   0xc   : > { %s12535_s25 = scalar_select %p10497_p6, 1, 0 }
   0xd   : > { %p10502_p8 = pnand %p8119_p5, %p163_p7  ;;  %s175_s28 = sshll.u32 %s10421_s27, 4  ;;  %s176_s28 = int_to_ptr.vmem [resolvable:$true] %s175_s28 }
   0xe   : > { %s10422_s30 = smov [#allocation9]   ;;  %s10282_s7 = scalar_lea.vmem %s176_s28, 9216 }
   0xf   : > { %s12536_s26 = scalar_select %p10502_p8, 1, 0 }
  0x10   : > { %p9762_p9 = pneg %p10502_p8  ;;  %s188_s6 = sshll.u32 %s10422_s30, 4  ;;  %s189_s6 = int_to_ptr.vmem [resolvable:$true] %s188_s6 }
  0x11   : > { %p10283_p13 = scmp.ne.s32.totalorder %s176_s28, %s10282_s7  ;;  %p10290_p5 = scmp.lt.s32.totalorder %s176_s28, %s176_s28 }
  0x12   : > { %p10511_p11 = pnand %p9762_p9, %p12522_p1  ;;  %p10291_p7 = scmp.lt.s32.totalorder %s10282_s7, %s10282_s7 }
  0x14   : > { %p10273_p12 = pneg %p10511_p11  ;;  %p10292_p10 = por %p10291_p7, %p10290_p5 }
  0x16   : > { %p10285_p0 = pnand %p10283_p13, %p10273_p12 }
  0x18   : > { %p10286_p3 = pneg %p10285_p0 }
  0x1a   : > { %p10293_p9 = pnand %p10292_p10, %p10286_p3 }
  0x1c   : > { %10296 = shalt.err (!%p10293_p9)
}
  0x1d   : > { %s10423_s8 = smov 64   ;;  %s10424_s9 = smov 4  }
  0x1e   : > { %9765 = dma.hbm_to_vmem [thread:$0]  (!%p10511_p11), %s12517_s1, 9216, %s176_s28, [#allocation8], %s10423_s8, %s10423_s8, %s10424_s9  }
  0x1f   : > { %s10308_s12 = scalar_lea.vmem %s189_s6, 9216  ;;  %p10316_p2 = scmp.lt.s32.totalorder %s189_s6, %s189_s6 }
  0x20   : > { %p10309_p1 = scmp.ne.s32.totalorder %s189_s6, %s10308_s12  ;;  %p10317_p6 = scmp.lt.s32.totalorder %s10308_s12, %s10308_s12 }
  0x22   : > { %p10311_p13 = pnand %p10309_p1, %p10273_p12  ;;  %p10318_p5 = por %p10317_p6, %p10316_p2 }
  0x24   : > { %p10312_p0 = pneg %p10311_p13 }
  0x26   : > { %p10319_p10 = pnand %p10318_p5, %p10312_p0 }
  0x28   : > { %10322 = shalt.err (!%p10319_p10)
}
  0x29   : > { %9768 = dma.hbm_to_vmem [thread:$0]  (!%p10511_p11), %s12518_s2, 9216, %s189_s6, [#allocation8], %s10423_s8, %s10423_s8, %s10424_s9  }
  0x2a   : > { %s10534_s15 = sadd.s32 1, %s10419_s21   ;;  %s29_s16 = sadd.s32 1, %s10415_s20 }
  0x2b   : > { %s26_s17 = ssub.s32 %s10419_s21, %s10534_s15  ;;  %p36_p1 = scmp.ne.s32.totalorder %s10415_s20, %s10411_s19 }
  0x2c   : > { %p27_p2 = scmp.eq.s32.totalorder %s26_s17, 0  ;;  %p37_p6 = scmp.eq.s32.totalorder %s10419_s21, 0 }
  0x2d   : > { %p12538_p12 = scmp.eq.s32.totalorder %s10483_s22, 1  ;;  %p9779_p7 = scmp.lt.s32.totalorder %s10419_s21, 2 }
  0x2e   : > { %s10550_s27 = scalar_select %p27_p2, %s10415_s20, %s29_s16  }
  0x2f   : > { %p10544_p3 = por %p12538_p12, %p36_p1  ;;  %p38_p9 = por %p37_p6, %p36_p1 }
  0x30   : > { %s208_s28 = sand.u32 1, %s10415_s20   ;;  %s8580_s30 = sshll.u32 %s10419_s21, 12 }
  0x31   : > { %s12539_s23 = scalar_select %p10544_p3, 1, 0 }
  0x32   : > { %s8123_s29 = sshll.u32 %s208_s28, 8  ;;  %s10557_s8 = scalar_lea.hbm %s12516_s0, %s8580_s30 }
  0x33   : > { %s212_s9 = scalar_lea.vmem [#allocation4], %s8123_s29  ;;  %p10561_p11 = pnand %p9779_p7, %p38_p9 }
  0x34   : > { %s219_s10 = sshll.u32 %s212_s9, 4  ;;  %s10565_s12 = scalar_lea.sflag [#allocation5], %s208_s28  ;;  %s10559_s10 = int_to_ptr.vmem [resolvable:$true] %s219_s10 }
  0x35   : > { %s10323_s13 = scalar_lea.hbm %s10557_s8, 4096  ;;  %p10325_p0 = pneg %p10561_p11 }
  0x36   : > { %p10324_p13 = scmp.ne.s32.totalorder %s10557_s8, %s10323_s13  ;;  %s10328_s17 = scalar_lea.hbm %s12516_s0, 8192 }
  0x37   : > { %p10329_p1 = scmp.lt.s32.totalorder %s10557_s8, %s12516_s0  ;;  %p10330_p2 = scmp.lt.s32.totalorder %s10328_s17, %s10323_s13 }
  0x38   : > { %p10326_p5 = pnand %p10325_p0, %p10324_p13 }
  0x39   : > { %p10331_p6 = por %p10330_p2, %p10329_p1 }
  0x3a   : > { %p10327_p10 = pneg %p10326_p5 }
  0x3c   : > { %p10332_p12 = pnand %p10331_p6, %p10327_p10 }
  0x3e   : > { %10335 = shalt.err (!%p10332_p12)
}
  0x3f   : > { %s10336_s28 = scalar_lea.vmem %s10559_s10, 4096  ;;  %s10425_s6 = smov [#allocation4]  }
  0x40   : > { %p10337_p7 = scmp.ne.s32.totalorder %s10559_s10, %s10336_s28  ;;  %s10341_s7 = sshll.u32 %s10425_s6, 4  ;;  %s10342_s7 = int_to_ptr.vmem [resolvable:$false] %s10341_s7 }
  0x41   : > { %s10343_s9 = scalar_lea.vmem %s10342_s7, 8192  ;;  %p10344_p5 = scmp.lt.s32.totalorder %s10559_s10, %s10342_s7 }
  0x42   : > { %p10339_p9 = pnand %p10337_p7, %p10325_p0  ;;  %p10345_p3 = scmp.lt.s32.totalorder %s10343_s9, %s10336_s28 }
  0x44   : > { %p10340_p13 = pneg %p10339_p9  ;;  %p10346_p4 = por %p10345_p3, %p10344_p5 }
  0x46   : > { %p10347_p8 = pnand %p10346_p4, %p10340_p13 }
  0x48   : > { %10350 = shalt.err (!%p10347_p8)
}
  0x49   : > { %s10426_s13 = smov 128   ;;  %s10427_s14 = smov 8  }
  0x4a   : > { %9772 = dma.hbm_to_vmem [thread:$0]  (!%p10561_p11), %s10557_s8, 4096, %s10559_s10, %s10565_s12, %s10426_s13, %s10426_s13, %s10427_s14  }
  0x4b   : > { %p12541_p0 = scmp.ne.s32.totalorder %s12536_s26, 0 }
  0x4d   : > { %231 = sbr.rel (%p12541_p0) target bundleno = 1278 (0x4fe), region = 40 }
  0x52   : > { %s10589_s16 = sand.u32 1, %s10411_s19   ;;  %p12542_p4 = scmp.ne.s32.totalorder %s12534_s24, 0 }
  0x53   : > { %s8127_s17 = sshll.u32 %s10589_s16, 8  ;;  %s234_s29 = scalar_lea.sflag [#allocation5], %s10589_s16 }
  0x54   : > { %s10595_s30 = scalar_lea.vmem [#allocation4], %s8127_s17 }
  0x55   : > { %10394 = dma.done.wait (%p12542_p4), %s234_s29, 4096  }
  0x56   : > { %10396 = vsyncadd (%p12542_p4), %s234_s29, 4294963200  ;;  %p12543_p8 = scmp.eq.s32.totalorder %s10483_s22, 0 }
  0x58   : > { %10398 = dma.done.wait (%p12543_p8), [#allocation8], 18432   ;;  %p12544_p3 = pmov %p12543_p8 }
  0x59   : > { %v10428_v0 = vmov 0   ;;  %v9824_v1 = vld [vmem:[#allocation7 + $0x178] sm:$0xff]   ;;  %v9827_v4 = vld [vmem:[#allocation7 + $0x170] sm:$0xff]   ;;  %v9830_v7 = vld [vmem:[#allocation7 + $0x168] sm:$0xff]   ;;  %vm455_vm0 = vsmask.f32 256 }
  0x5a   : > { %10400 = vsyncadd (%p12544_p3), [#allocation8], 4294948864  ;;  %276 = vst [vmem:[#allocation2 + $0xc] sm:$0xf] %v10428_v0  ;;  %v9825_v2 = vld [vmem:[#allocation7 + $0x138] sm:$0xff]   ;;  %9462 = vmatprep.subr.bf16.mxu1 %v9824_v1  ;;  %v9828_v5 = vld [vmem:[#allocation7 + $0x130] sm:$0xff]  }
  0x5b   : > { %277 = vst [vmem:[#allocation2 + $0x10] sm:$0xf] %v10428_v0  ;;  %278 = vst [vmem:[#allocation2 + $0x14] sm:$0x1] %v10428_v0  ;;  %v9826_v3 = vld [vmem:[#allocation7 + $0xf8] sm:$0xff]   ;;  %9463 = vmatpush3.bf16.msra.mxu1 %v9824_v1  ;;  %8646 = vmatprep.subr.bf16.mxu0 %v9825_v2  ;;  %v9829_v6 = vld [vmem:[#allocation7 + $0xf0] sm:$0xff]  }
  0x5c   : > { %273 = vst [vmem:[#allocation2] sm:$0xf] %v10428_v0  ;;  %274 = vst [vmem:[#allocation2 + $0x4] sm:$0xf] %v10428_v0  ;;  %8647 = vmatpush3.bf16.msra.mxu0 %v9826_v3  ;;  %9464 = vmatprep.subr.bf16.mxu1 %v9827_v4  ;;  %v9831_v8 = vld [vmem:[#allocation7 + $0x128] sm:$0xff]   ;;  %v9833_v10 = vld [vmem:[#allocation7 + $0x160] sm:$0xff]  }
  0x5d   : > { %275 = vst [vmem:[#allocation2 + $0x8] sm:$0x1] %v10428_v0  ;;  %279 = vst [vmem:[#allocation2 + $0x18] sm:$0xf] %v10428_v0  ;;  %8648 = vmatprep.subr.bf16.mxu0 %v9828_v5  ;;  %v9832_v9 = vld [vmem:[#allocation7 + $0xe8] sm:$0xff]   ;;  %v9834_v11 = vld [vmem:[#allocation7 + $0x120] sm:$0xff]  }
  0x5e   : > { %280 = vst [vmem:[#allocation2 + $0x1c] sm:$0xf] %v10428_v0  ;;  %281 = vst [vmem:[#allocation2 + $0x20] sm:$0x1] %v10428_v0  ;;  %v9835_v12 = vld [vmem:[#allocation7 + $0xe0] sm:$0xff]   ;;  %v9836_v13 = vld [vmem:[#allocation7 + $0x158] sm:$0xff]  }
  0x5f   : > { %282 = vst [vmem:[#allocation2 + $0x24] sm:$0xf] %v10428_v0  ;;  %283 = vst [vmem:[#allocation2 + $0x28] sm:$0xf] %v10428_v0  ;;  %9465 = vmatpush3.bf16.msra.mxu1 %v9827_v4  ;;  %v9837_v14 = vld [vmem:[#allocation7 + $0x118] sm:$0xff]   ;;  %v9839_v16 = vld [vmem:[#allocation7 + $0x150] sm:$0xff]  }
  0x60   : > { %284 = vst [vmem:[#allocation2 + $0x2c] sm:$0x1] %v10428_v0  ;;  %285 = vst [vmem:[#allocation2 + $0x30] sm:$0xf] %v10428_v0  ;;  %8649 = vmatpush3.bf16.msra.mxu0 %v9829_v6  ;;  %9466 = vmatprep.subr.bf16.mxu1 %v9830_v7  ;;  %v9838_v15 = vld [vmem:[#allocation7 + $0xd8] sm:$0xff]   ;;  %v9840_v17 = vld [vmem:[#allocation7 + $0x110] sm:$0xff]  }
  0x61   : > { %286 = vst [vmem:[#allocation2 + $0x34] sm:$0xf] %v10428_v0  ;;  %287 = vst [vmem:[#allocation2 + $0x38] sm:$0x1] %v10428_v0  ;;  %8650 = vmatprep.subr.bf16.mxu0 %v9831_v8  ;;  %v9841_v18 = vld [vmem:[#allocation7 + $0xd0] sm:$0xff]   ;;  %v9842_v19 = vld [vmem:[#allocation7 + $0x148] sm:$0xff]  }
  0x62   : > { %288 = vst [vmem:[#allocation2 + $0x3c] sm:$0xf] %v10428_v0  ;;  %289 = vst [vmem:[#allocation2 + $0x40] sm:$0xf] %v10428_v0  ;;  %v9843_v20 = vld [vmem:[#allocation7 + $0x108] sm:$0xff]   ;;  %v9845_v22 = vld [vmem:[#allocation7 + $0x140] sm:$0xff]  }
  0x63   : > { %290 = vst [vmem:[#allocation2 + $0x44] sm:$0x1] %v10428_v0  ;;  %291 = vst [vmem:[#allocation2 + $0x48] sm:$0xf] %v10428_v0  ;;  %9467 = vmatpush3.bf16.msra.mxu1 %v9830_v7  ;;  %v9844_v21 = vld [vmem:[#allocation7 + $0xc8] sm:$0xff]   ;;  %v327_v23 = vld [vmem:[%s10595_s30] sm:$0xff] }
  0x64   : > { %292 = vst [vmem:[#allocation2 + $0x4c] sm:$0xf] %v10428_v0  ;;  %293 = vst [vmem:[#allocation2 + $0x50] sm:$0x1] %v10428_v0  ;;  %8651 = vmatpush3.bf16.msra.mxu0 %v9832_v9  ;;  %9468 = vmatprep.subr.bf16.mxu1 %v9833_v10  ;;  %v328_v24 = vld [vmem:[%s10595_s30 + $0x8] sm:$0xff]  ;;  %v9846_v25 = vld [vmem:[#allocation7 + $0x100] sm:$0xff]   ;;  %v8581_v26 = vpack.c.bf16 %v327_v23, %v327_v23 }
  0x65   : > { %294 = vst [vmem:[#allocation2 + $0x54] sm:$0xf] %v10428_v0  ;;  %295 = vst [vmem:[#allocation2 + $0x58] sm:$0xf] %v10428_v0  ;;  %8652 = vmatprep.subr.bf16.mxu0 %v9834_v11  ;;  %v8582_v27 = vpack.c.bf16 %v328_v24, %v328_v24  ;;  %vm456_vm1 = vsmask.f32 4368 }
  0x66   : > { %296 = vst [vmem:[#allocation2 + $0x5c] sm:$0x1] %v10428_v0  ;;  %297 = vst [vmem:[#allocation2 + $0x60] sm:$0xf] %v10428_v0  ;;  %vm779_vm2 = vcmask 1043456   ;;  %v329_v28 = vld [vmem:[%s10595_s30 + $0x10] sm:$0xff] }
  0x67   : > { %298 = vst [vmem:[#allocation2 + $0x64] sm:$0xf] %v10428_v0  ;;  %299 = vst [vmem:[#allocation2 + $0x68] sm:$0x1] %v10428_v0  ;;  %9469 = vmatpush3.bf16.msra.mxu1 %v9833_v10  ;;  %v330_v29 = vld [vmem:[%s10595_s30 + $0x18] sm:$0xff]  ;;  %v9847_v30 = vld [vmem:[#allocation7 + $0xc0] sm:$0xff]   ;;  %v8583_v31 = vpack.c.bf16 %v329_v28, %v329_v28 }
  0x68   : > { %300 = vst [vmem:[#allocation2 + $0x6c] sm:$0xf] %v10428_v0  ;;  %301 = vst [vmem:[#allocation2 + $0x70] sm:$0xf] %v10428_v0  ;;  %8653 = vmatpush3.bf16.msra.mxu0 %v9835_v12  ;;  %9470 = vmatprep.subr.bf16.mxu1 %v9836_v13  ;;  %vm780_vm3 = vsmask.f32 7938  ;;  %v8584_v32 = vpack.c.bf16 %v330_v29, %v330_v29 }
  0x69   : > { %302 = vst [vmem:[#allocation2 + $0x74] sm:$0x1] %v10428_v0  ;;  %303 = vst [vmem:[#allocation2 + $0x78] sm:$0xf] %v10428_v0  ;;  %8654 = vmatprep.subr.bf16.mxu0 %v9837_v14  ;;  %vm786_vm4 = vcmask 1040384   ;;  %v459_v33 = vshrl.u32 %v8581_v26, 16 }
  0x6a   : > { %304 = vst [vmem:[#allocation2 + $0x7c] sm:$0xf] %v10428_v0  ;;  %305 = vst [vmem:[#allocation2 + $0x80] sm:$0x1] %v10428_v0  ;;  %v462_v34 = vshll.u32 %v8581_v26, 16  ;;  %v467_v35 = vshrl.u32 %v8582_v27, 16 }
  0x6b   : > { %306 = vst [vmem:[#allocation2 + $0x84] sm:$0xf] %v10428_v0  ;;  %307 = vst [vmem:[#allocation2 + $0x88] sm:$0xf] %v10428_v0  ;;  %9471 = vmatpush3.bf16.msra.mxu1 %v9836_v13  ;;  %v470_v36 = vshll.u32 %v8582_v27, 16  ;;  %v12545_v37 = vmov 0 }
  0x6c   : > { %308 = vst [vmem:[#allocation2 + $0x8c] sm:$0x1] %v10428_v0  ;;  %309 = vst [vmem:[#allocation2 + $0x90] sm:$0xf] %v10428_v0  ;;  %8655 = vmatpush3.bf16.msra.mxu0 %v9838_v15  ;;  %9472 = vmatprep.subr.bf16.mxu1 %v9839_v16  ;;  %v782_v38 = vld [vmem:[#allocation2 + $0xc] sm:$0xf] }
  0x6d   : > { %310 = vst [vmem:[#allocation2 + $0x94] sm:$0xf] %v10428_v0  ;;  %311 = vst [vmem:[#allocation2 + $0x98] sm:$0x1] %v10428_v0  ;;  %8656 = vmatprep.subr.bf16.mxu0 %v9840_v17  ;;  %v788_v39 = vld [vmem:[#allocation2 + $0x14] sm:$0x1] }
  0x6e   : > { %312 = vst [vmem:[#allocation2 + $0x9c] sm:$0xf] %v10428_v0  ;;  %313 = vst [vmem:[#allocation2 + $0xa0] sm:$0xf] %v10428_v0  ;;  %v476_v40 = vshrl.u32 %v8583_v31, 16  ;;  %v479_v41 = vshll.u32 %v8583_v31, 16 }
  0x6f   : > { %314 = vst [vmem:[#allocation2 + $0xa4] sm:$0x1] %v10428_v0  ;;  %315 = vst [vmem:[#allocation2 + $0xa8] sm:$0xf] %v10428_v0  ;;  %9473 = vmatpush3.bf16.msra.mxu1 %v9839_v16  ;;  %v484_v42 = vshrl.u32 %v8584_v32, 16  ;;  %v487_v43 = vshll.u32 %v8584_v32, 16 }
  0x70   : > { %316 = vst [vmem:[#allocation2 + $0xac] sm:$0xf] %v10428_v0  ;;  %317 = vst [vmem:[#allocation2 + $0xb0] sm:$0x1] %v10428_v0  ;;  %8657 = vmatpush3.bf16.msra.mxu0 %v9841_v18  ;;  %9474 = vmatprep.subr.bf16.mxu1 %v9842_v19  ;;  %v10615_v44 = vld [vmem:[#allocation7 + $0xb8] sm:$0xff]   ;;  %v461_v46 = vrot.slane %v459_v33, 7 }
  0x71   : > { %318 = vst [vmem:[#allocation2 + $0xb4] sm:$0xf] %v10428_v0  ;;  %319 = vst [vmem:[#allocation2 + $0xb8] sm:$0xf] %v10428_v0  ;;  %8658 = vmatprep.subr.bf16.mxu0 %v9843_v20  ;;  %v9854_v45 = vld [vmem:[#allocation7 + $0x78] sm:$0xff]   ;;  %v469_v47 = vrot.slane %v467_v35, 7 }
  0x72   : > { %320 = vst [vmem:[#allocation2 + $0xbc] sm:$0x1] %v10428_v0  ;;  %321 = vst [vmem:[#allocation2 + $0xc0] sm:$0xf] %v10428_v0  ;;  %vm1637_vm7 = vcmask 1042432   ;;  %v12550_v50 = vmov 0  ;;  %v464_v53 = vor.u32 %v462_v34, %v461_v46 }
  0x73   : > { %322 = vst [vmem:[#allocation2 + $0xc4] sm:$0xf] %v10428_v0  ;;  %323 = vst [vmem:[#allocation2 + $0xc8] sm:$0x1] %v10428_v0  ;;  %9475 = vmatpush3.bf16.msra.mxu1 %v9842_v19  ;;  %v791_v49 = vld [vmem:[#allocation2 + $0x18] sm:$0xf]  ;;  %v472_v55 = vor.u32 %v470_v36, %v469_v47 }
  0x74   : > { %324 = vst [vmem:[#allocation2 + $0xcc] sm:$0xf] %v10428_v0  ;;  %325 = vst [vmem:[#allocation2 + $0xd0] sm:$0xf] %v10428_v0  ;;  %8659 = vmatpush3.bf16.msra.mxu0 %v9844_v21  ;;  %9476 = vmatprep.subr.bf16.mxu1 %v9845_v22  ;;  %v478_v51 = vrot.slane %v476_v40, 7  ;;  %v486_v52 = vrot.slane %v484_v42, 7 }
  0x75   : > { %326 = vst [vmem:[#allocation2 + $0xd4] sm:$0x1] %v10428_v0  ;;  %vm10611_vm5 = vmor %vm455_vm0, %vm456_vm1  ;;  %8660 = vmatprep.subr.bf16.mxu0 %v9846_v25  ;;  %v465_v54 = vrot.slane %v461_v46, 4  ;;  %v474_v56 = vrot.slane %v469_v47, 4  ;;  %v795_v57 = vld [vmem:[#allocation2 + $0x20] sm:$0x1] }
  0x76   : > { %v12546_v37 = vsel %vm10611_vm5, 4294967295, %v12545_v37  ;;  %vm10619_vm6 = vmand %vm779_vm2, %vm780_vm3  ;;  %v331_v58 = vld [vmem:[%s10595_s30 + $0x20] sm:$0xff]  ;;  %v332_v59 = vld [vmem:[%s10595_s30 + $0x28] sm:$0xff]  ;;  %v481_v60 = vor.u32 %v479_v41, %v478_v51  ;;  %v482_v61 = vrot.slane %v478_v51, 4  ;;  %v489_v62 = vor.u32 %v487_v43, %v486_v52  ;;  %s12314_s7 = scalar_lea.vmem [#allocation10], %s8127_s17  ;;  %s8645_s9 = sshll.u32 %s10483_s22, 12 }
  0x77   : > { %12547 = vst [vmem:[#allocation14_spill] sm:$0xff] %v12546_v37  ;;  %vm10625_vm8 = vmand %vm786_vm4, %vm455_vm0  ;;  %9477 = vmatpush3.bf16.msra.mxu1 %v9845_v22  ;;  %v491_v63 = vrot.slane %v486_v52, 4  ;;  %v473_v0 = vsel %vm10611_vm5, %v465_v54, %v472_v55  ;;  %v783_v1 = vsel %vm10619_vm6, %v464_v53, %v782_v38  ;;  %v8585_v3 = vpack.c.bf16 %v331_v58, %v331_v58  ;;  %v333_v4 = vld [vmem:[%s10595_s30 + $0x30] sm:$0xff]  ;;  %v334_v5 = vld [vmem:[%s10595_s30 + $0x38] sm:$0xff]  ;;  %s8026_s13 = sshll.u32 %s12314_s7, 4  ;;  %s12470_s29 = scalar_lea.hbm %s12521_s5, %s8645_s9  ;;  %s12472_s13 = int_to_ptr.vmem [resolvable:$true] %s8026_s13 }
  0x78   : > { %v12551_v50 = vsel %vm10625_vm8, 4294967295, %v12550_v50  ;;  %8661 = vmatpush3.bf16.msra.mxu0 %v9847_v30  ;;  %8782 = vmatprep.subr.bf16.mxu1 %v9854_v45  ;;  %v789_v2 = vsel %vm10625_vm8, %v474_v56, %v788_v39  ;;  %784 = vst [vmem:[#allocation2 + $0xc] sm:$0xf] %v783_v1  ;;  %785 = vst [vmem:[#allocation2 + $0x10] sm:$0xf] %v473_v0  ;;  %v490_v6 = vsel %vm10611_vm5, %v482_v61, %v489_v62  ;;  %vm1638_vm9 = vcmask 1046532  }
  0x79   : > { %12552 = vst [vmem:[#allocation15_spill] sm:$0xff] %v12551_v50  ;;  %9510 = vmatprep.subr.bf16.mxu0 %v10615_v44  ;;  %790 = vst [vmem:[#allocation2 + $0x14] sm:$0x1] %v789_v2  ;;  %v792_v7 = vsel %vm10619_vm6, %v481_v60, %v791_v49  ;;  %v796_v8 = vsel %vm10625_vm8, %v491_v63, %v795_v57  ;;  %v8586_v9 = vpack.c.bf16 %v332_v59, %v332_v59  ;;  %v335_v16 = vld [vmem:[%s10595_s30 + $0x40] sm:$0xff]  ;;  %v798_v22 = vld [vmem:[#allocation2 + $0x24] sm:$0xf] }
  0x7a   : > { %793 = vst [vmem:[#allocation2 + $0x18] sm:$0xf] %v792_v7  ;;  %794 = vst [vmem:[#allocation2 + $0x1c] sm:$0xf] %v490_v6  ;;  %v493_v10 = vshrl.u32 %v8585_v3, 16  ;;  %v496_v11 = vshll.u32 %v8585_v3, 16  ;;  %v8587_v12 = vpack.c.bf16 %v333_v4, %v333_v4  ;;  %v8588_v13 = vpack.c.bf16 %v334_v5, %v334_v5 }
  0x7b   : > { %797 = vst [vmem:[#allocation2 + $0x20] sm:$0x1] %v796_v8  ;;  %v501_v14 = vshrl.u32 %v8586_v9, 16  ;;  %v504_v15 = vshll.u32 %v8586_v9, 16  ;;  %v10647_v24 = vpack.c.bf16 %v335_v16, %v335_v16  ;;  %vm10653_vm10 = vmor %vm1637_vm7, %vm1638_vm9  ;;  %v12553_v29 = vmov 0  ;;  %v10036_v50 = vld [vmem:[#allocation9 + $0x100] sm:$0xff]  }
  0x7c   : > { %v495_v17 = vrot.slane %v493_v10, 7  ;;  %v510_v18 = vshrl.u32 %v8587_v12, 16  ;;  %v513_v19 = vshll.u32 %v8587_v12, 16  ;;  %v518_v20 = vshrl.u32 %v8588_v13, 16  ;;  %v802_v32 = vld [vmem:[#allocation2 + $0x2c] sm:$0x1] }
  0x7d   : > { %v503_v21 = vrot.slane %v501_v14, 7  ;;  %v521_v23 = vshll.u32 %v8588_v13, 16  ;;  %v12554_v29 = vsel %vm10653_vm10, 4294967295, %v12553_v29  ;;  %v805_v33 = vld [vmem:[#allocation2 + $0x30] sm:$0xf]  ;;  %v527_v34 = vshrl.u32 %v10647_v24, 16 }
  0x7e   : > { %v498_v25 = vor.u32 %v496_v11, %v495_v17  ;;  %v499_v26 = vrot.slane %v495_v17, 4  ;;  %v512_v27 = vrot.slane %v510_v18, 7  ;;  %v10649_v28 = vrot.slane %v518_v20, 7  ;;  %12555 = vst [vmem:[#allocation16_spill] sm:$0xff] %v12554_v29  ;;  %v809_v1 = vld [vmem:[#allocation2 + $0x38] sm:$0x1] }
  0x7f   : > { %v506_v30 = vor.u32 %v504_v15, %v503_v21  ;;  %v508_v31 = vrot.slane %v503_v21, 4  ;;  %v1532_v35 = vld [vmem:[#allocation2 + $0xc] sm:$0xe]  ;;  %v1533_v36 = vld [vmem:[#allocation2 + $0x10] sm:$0xf]  ;;  %s10351_s24 = scalar_lea.vmem %s12472_s13, 4096 }
  0x80   : > { %v1534_v38 = vld [vmem:[#allocation2 + $0x14] sm:$0x1]  ;;  %vm1022_vm11 = vsmask.f32 3328  ;;  %vm1023_vm12 = vsmask.f32 7440  ;;  %v799_v39 = vsel %vm10619_vm6, %v498_v25, %v798_v22  ;;  %v515_v40 = vor.u32 %v513_v19, %v512_v27  ;;  %p10352_p11 = scmp.ne.s32.totalorder %s12472_s13, %s10351_s24 }
  0x81   : > { %v523_v41 = vor.u32 %v521_v23, %v10649_v28  ;;  %v8164_v42 = vrot.slane %v1532_v35, 9  ;;  %v1649_v43 = vrot.slane %v1533_v36, 5  ;;  %v1652_v45 = vrot.slane %v1534_v38, 5  ;;  %v1535_v46 = vld [vmem:[#allocation2 + $0x18] sm:$0xe]  ;;  %v336_v22 = vld [vmem:[%s10595_s30 + $0x48] sm:$0xff]  ;;  %vm10687_vm13 = vmor %vm1022_vm11, %vm1023_vm12 }
  0x82   : > { %v507_v47 = vsel %vm10611_vm5, %v499_v26, %v506_v30  ;;  %800 = vst [vmem:[#allocation2 + $0x24] sm:$0xf] %v799_v39  ;;  %v1536_v49 = vld [vmem:[#allocation2 + $0x1c] sm:$0xf]  ;;  %v1537_v51 = vld [vmem:[#allocation2 + $0x20] sm:$0x1]  ;;  %v803_v53 = vsel %vm10625_vm8, %v508_v31, %v802_v32  ;;  %v806_v55 = vsel %vm10619_vm6, %v515_v40, %v805_v33 }
  0x83   : > { %v8165_v52 = vrot.slane %v1535_v46, 9  ;;  %801 = vst [vmem:[#allocation2 + $0x28] sm:$0xf] %v507_v47  ;;  %v516_v54 = vrot.slane %v512_v27, 4  ;;  %v1650_v56 = vsel %vm10653_vm10, %v8164_v42, %v1649_v43  ;;  %v1651_v57 = vrot.slane %v1649_v43, 4  ;;  %v337_v31 = vld [vmem:[%s10595_s30 + $0x50] sm:$0xff] }
  0x84   : > { %v1656_v58 = vrot.slane %v1536_v49, 5  ;;  %v1659_v59 = vrot.slane %v1537_v51, 5  ;;  %v898_v60 = vld [vmem:[#allocation2 + $0xc] sm:$0xf]  ;;  %804 = vst [vmem:[#allocation2 + $0x2c] sm:$0x1] %v803_v53 }
  0x85   : > { %807 = vst [vmem:[#allocation2 + $0x30] sm:$0xf] %v806_v55  ;;  %1804 = vst [vmem:[#allocation3 + $0x20] sm:$0xf] %v1650_v56  ;;  %v899_v61 = vld [vmem:[#allocation2 + $0x10] sm:$0xf]  ;;  %v524_v0 = vsel %vm10611_vm5, %v516_v54, %v523_v41  ;;  %v1653_v2 = vsel %vm10653_vm10, %v1651_v57, %v1652_v45  ;;  %v8590_v57 = vpack.c.bf16 %v336_v22, %v336_v22 }
  0x86   : > { %934 = vst [vmem:[#allocation3 + $0x18] sm:$0xf] %v898_v60  ;;  %v971_v62 = vld [vmem:[#allocation2 + $0xc] sm:$0xf]  ;;  %v972_v63 = vld [vmem:[#allocation2 + $0x10] sm:$0xf]  ;;  %v1657_v3 = vsel %vm10653_vm10, %v8165_v52, %v1656_v58 }
  0x87   : > { %v1658_v4 = vrot.slane %v1656_v58, 4  ;;  %935 = vst [vmem:[#allocation3 + $0x24] sm:$0xf] %v899_v61  ;;  %v973_v5 = vld [vmem:[#allocation2 + $0x14] sm:$0x1]  ;;  %v1050_v6 = vshrl.u32 %v971_v62, 16  ;;  %v10695_v58 = vpack.c.bf16 %v337_v31, %v337_v31 }
  0x88   : > { %808 = vst [vmem:[#allocation2 + $0x34] sm:$0xf] %v524_v0  ;;  %v900_v7 = vld [vmem:[#allocation2 + $0x18] sm:$0xf]  ;;  %1805 = vst [vmem:[#allocation3 + $0x2c] sm:$0xf] %v1653_v2 }
  0x89   : > { %1806 = vst [vmem:[#allocation3 + $0x38] sm:$0xf] %v1657_v3  ;;  %v1053_v8 = vshll.u32 %v971_v62, 16  ;;  %v1059_v9 = vshll.u32 %v972_v63, 16  ;;  %v1063_v10 = vshrl.u32 %v972_v63, 16  ;;  %v1069_v11 = vshll.u32 %v973_v5, 16 }
  0x8a   : > { %v901_v12 = vld [vmem:[#allocation2 + $0x1c] sm:$0xf]  ;;  %936 = vst [vmem:[#allocation3 + $0x30] sm:$0xf] %v900_v7  ;;  %v1660_v13 = vsel %vm10653_vm10, %v1658_v4, %v1659_v59  ;;  %v1052_v14 = vrot.slane %v1050_v6, 4  ;;  %v525_v15 = vrot.slane %v10649_v28, 4 }
  0x8b   : > { %937 = vst [vmem:[#allocation3 + $0x3c] sm:$0xf] %v901_v12  ;;  %v974_v16 = vld [vmem:[#allocation2 + $0x18] sm:$0xf]  ;;  %v10678_v17 = vld [vmem:[#allocation2 + $0x1c] sm:$0xf] }
  0x8c   : > { %1807 = vst [vmem:[#allocation3 + $0x44] sm:$0xf] %v1660_v13  ;;  %v1055_v18 = vrot.slane %v1053_v8, 5  ;;  %v1061_v19 = vrot.slane %v1059_v9, 5  ;;  %v1065_v20 = vrot.slane %v1063_v10, 4  ;;  %v530_v23 = vshll.u32 %v10647_v24, 16 }
  0x8d   : > { %v1538_v21 = vld [vmem:[#allocation2 + $0x24] sm:$0xe]  ;;  %v1071_v25 = vrot.slane %v1069_v11, 5  ;;  %v1539_v26 = vld [vmem:[#allocation2 + $0x28] sm:$0xf]  ;;  %v810_v30 = vsel %vm10625_vm8, %v525_v15, %v809_v1  ;;  %v1074_v28 = vshrl.u32 %v974_v16, 16 }
  0x8e   : > { %v8166_v27 = vrot.slane %v1538_v21, 9  ;;  %v1056_v32 = vor.u32 %v1055_v18, %v1052_v14  ;;  %v1066_v33 = vor.u32 %v1065_v20, %v1061_v19  ;;  %v1540_v35 = vld [vmem:[#allocation2 + $0x2c] sm:$0x1]  ;;  %v1663_v36 = vrot.slane %v1539_v26, 5  ;;  %811 = vst [vmem:[#allocation2 + $0x38] sm:$0x1] %v810_v30 }
  0x8f   : > { %v1541_v38 = vld [vmem:[#allocation2 + $0x30] sm:$0xe]  ;;  %v1077_v39 = vshll.u32 %v974_v16, 16  ;;  %v12556_v40 = vmov 0  ;;  %v1666_v41 = vrot.slane %v1540_v35, 5  ;;  %v1076_v45 = vrot.slane %v1074_v28, 4 }
  0x90   : > { %v12557_v40 = vsel %vm10687_vm13, 4294967295, %v12556_v40  ;;  %v8167_v42 = vrot.slane %v1541_v38, 9  ;;  %v976_v43 = vld [vmem:[#allocation2 + $0x20] sm:$0x1]  ;;  %v1083_v46 = vshll.u32 %v10678_v17, 16  ;;  %v1057_v47 = vrot.slane %v1056_v32, 4 }
  0x91   : > { %12558 = vst [vmem:[#allocation17_spill] sm:$0xff] %v12557_v40  ;;  %v1067_v49 = vrot.slane %v1066_v33, 4  ;;  %v9855_v51 = vld [vmem:[#allocation7 + $0x38] sm:$0xff]   ;;  %v1664_v52 = vsel %vm10653_vm10, %v8166_v27, %v1663_v36  ;;  %v1665_v53 = vrot.slane %v1663_v36, 4  ;;  %v1542_v54 = vld [vmem:[#allocation2 + $0x34] sm:$0xf] }
  0x92   : > { %v338_v55 = vld [vmem:[%s10595_s30 + $0x58] sm:$0xff]  ;;  %1808 = vst [vmem:[#allocation3 + $0x50] sm:$0xf] %v1664_v52  ;;  %v1062_v59 = vsel %vm10687_vm13, %v1057_v47, %v1061_v19  ;;  %v1670_v62 = vrot.slane %v1542_v54, 5  ;;  %v9861_v63 = vld [vmem:[#allocation7 + $0x70] sm:$0xff]   ;;  %v1079_v3 = vrot.slane %v1077_v39, 5 }
  0x93   : > { %v9848_v56 = vld [vmem:[#allocation3 + $0x20] ss:$12 sps:$4 sm:$0xff]   ;;  %v1072_v60 = vsel %vm10687_vm13, %v1067_v49, %v1071_v25  ;;  %v1667_v61 = vsel %vm10653_vm10, %v1665_v53, %v1666_v41  ;;  %v903_v1 = vld [vmem:[#allocation2 + $0x28] sm:$0xf]  ;;  %v9849_v2 = vld [vmem:[#allocation3 + $0x38] ss:$12 sps:$4 sm:$0xff]   ;;  %v10703_v5 = vpack.c.bf16 %v338_v55, %v338_v55 }
  0x94   : > { %v902_v0 = vld [vmem:[#allocation2 + $0x24] sm:$0xf]  ;;  %9478 = vmatprep.mubr.bf16.mxu1 %v9848_v56  ;;  %1495 = vst [vmem:[#allocation3 + $0x1c] sm:$0xf] %v1062_v59  ;;  %1496 = vst [vmem:[#allocation3 + $0x28] sm:$0xf] %v1072_v60  ;;  %v1671_v6 = vsel %vm10653_vm10, %v8167_v42, %v1670_v62  ;;  %v1080_v12 = vor.u32 %v1079_v3, %v1076_v45 }
  0x95   : > { %1809 = vst [vmem:[#allocation3 + $0x5c] sm:$0xf] %v1667_v61  ;;  %v1085_v4 = vrot.slane %v1083_v46, 5  ;;  %938 = vst [vmem:[#allocation3 + $0x48] sm:$0xf] %v902_v0  ;;  %v1672_v7 = vrot.slane %v1670_v62, 4  ;;  %9479 = vmatmul.mubr.bf16.vlgmr.msra.gmra.mxu1 %v9849_v2 }
  0x96   : > { %939 = vst [vmem:[#allocation3 + $0x54] sm:$0xf] %v903_v1  ;;  %v1087_v8 = vshrl.u32 %v10678_v17, 16  ;;  %v1093_v9 = vshll.u32 %v976_v43, 16  ;;  %v812_v10 = vld [vmem:[#allocation2 + $0x3c] sm:$0xf]  ;;  %8783 = vmatpush3.bf16.msra.mxu1 %v9855_v51 }
  0x97   : > { %v1543_v11 = vld [vmem:[#allocation2 + $0x38] sm:$0x1]  ;;  %1810 = vst [vmem:[#allocation3 + $0x68] sm:$0xf] %v1671_v6  ;;  %v529_v14 = vrot.slane %v527_v34, 7  ;;  %v535_v15 = vshrl.u32 %v8590_v57, 16  ;;  %8784 = vmatprep.subr.bf16.mxu1 %v9861_v63 }
  0x98   : > { %v9862_v13 = vld [vmem:[#allocation7 + $0x30] sm:$0xff]   ;;  %v538_v16 = vshll.u32 %v8590_v57, 16  ;;  %v1673_v18 = vrot.slane %v1543_v11, 5  ;;  %v1089_v19 = vrot.slane %v1087_v8, 4  ;;  %v1095_v20 = vrot.slane %v1093_v9, 5  ;;  %v9869_v34 = vld [vmem:[#allocation7 + $0x68] sm:$0xff]  }
  0x99   : > { %v816_v21 = vld [vmem:[#allocation2 + $0x44] sm:$0x1]  ;;  %v544_v17 = vshrl.u32 %v10695_v58, 16  ;;  %v1081_v22 = vrot.slane %v1080_v12, 4  ;;  %v532_v25 = vor.u32 %v530_v23, %v529_v14  ;;  %v533_v26 = vrot.slane %v529_v14, 4  ;;  %v339_v28 = vld [vmem:[%s10595_s30 + $0x60] sm:$0xff] }
  0x9a   : > { %v537_v27 = vrot.slane %v535_v15, 7  ;;  %v819_v30 = vld [vmem:[#allocation2 + $0x48] sm:$0xf]  ;;  %v340_v31 = vld [vmem:[%s10595_s30 + $0x68] sm:$0xff]  ;;  %v1674_v32 = vsel %vm10653_vm10, %v1672_v7, %v1673_v18  ;;  %v1090_v33 = vor.u32 %v1089_v19, %v1085_v4  ;;  %v547_v36 = vshll.u32 %v10695_v58, 16  ;;  %v10724_v46 = vld [vmem:[#allocation7 + $0xb0] sm:$0xff]   ;;  %8785 = vmatpush3.bf16.msra.mxu1 %v9862_v13 }
  0x9b   : > { %v10717_v35 = vrot.slane %v544_v17, 7  ;;  %v977_v38 = vld [vmem:[#allocation2 + $0x24] sm:$0xf]  ;;  %v978_v39 = vld [vmem:[#allocation2 + $0x28] sm:$0xf]  ;;  %v9870_v41 = vld [vmem:[#allocation7 + $0x28] sm:$0xff]   ;;  %v1086_v24 = vsel %vm10687_vm13, %v1081_v22, %v1085_v4  ;;  %v813_v43 = vsel %vm10619_vm6, %v532_v25, %v812_v10  ;;  %v10728_v54 = vpack.c.bf16 %v339_v28, %v339_v28  ;;  %8786 = vmatprep.subr.bf16.mxu1 %v9869_v34 }
  0x9c   : > { %1811 = vst [vmem:[#allocation3 + $0x74] sm:$0xf] %v1674_v32  ;;  %v540_v23 = vor.u32 %v538_v16, %v537_v27  ;;  %v542_v42 = vrot.slane %v537_v27, 4  ;;  %v979_v45 = vld [vmem:[#allocation2 + $0x2c] sm:$0x1]  ;;  %v1091_v51 = vrot.slane %v1090_v33, 4  ;;  %v10734_v59 = vpack.c.bf16 %v340_v31, %v340_v31 }
  0x9d   : > { %v9876_v47 = vld [vmem:[#allocation7 + $0x60] sm:$0xff]   ;;  %v9850_v49 = vld [vmem:[#allocation3 + $0x1c] ss:$12 sps:$4 sm:$0xff]   ;;  %1497 = vst [vmem:[#allocation3 + $0x34] sm:$0xf] %v1086_v24  ;;  %v549_v52 = vor.u32 %v547_v36, %v10717_v35  ;;  %v550_v53 = vrot.slane %v10717_v35, 4 }
  0x9e   : > { %814 = vst [vmem:[#allocation2 + $0x3c] sm:$0xf] %v813_v43  ;;  %v9853_v55 = vld [vmem:[#allocation3 + $0x18] ss:$12 sps:$4 sm:$0xff]   ;;  %v9856_v56 = vld [vmem:[#allocation3 + $0x50] ss:$12 sps:$4 sm:$0xff]   ;;  %v541_v57 = vsel %vm10611_vm5, %v533_v26, %v540_v23  ;;  %v817_v58 = vsel %vm10625_vm8, %v542_v42, %v816_v21  ;;  %2435 = vmatprep.mubr.bf16.mxu0 %v9850_v49  ;;  %v1096_v61 = vsel %vm10687_vm13, %v1091_v51, %v1095_v20 }
  0x9f   : > { %v341_v60 = vld [vmem:[%s10595_s30 + $0x70] sm:$0xff]  ;;  %815 = vst [vmem:[#allocation2 + $0x40] sm:$0xf] %v541_v57  ;;  %818 = vst [vmem:[#allocation2 + $0x44] sm:$0x1] %v817_v58  ;;  %v552_v62 = vshrl.u32 %v10703_v5, 16  ;;  %v820_v0 = vsel %vm10619_vm6, %v549_v52, %v819_v30  ;;  %2436 = vmatmul.mubr.bf16.vlgmr.msra.gmra.mxu0 %v9853_v55  ;;  %9482 = vmatprep.mubr.bf16.mxu1 %v9856_v56 }
  0xa0   : > { %v555_v63 = vshll.u32 %v10703_v5, 16  ;;  %1498 = vst [vmem:[#allocation3 + $0x40] sm:$0xf] %v1096_v61  ;;  %821 = vst [vmem:[#allocation2 + $0x48] sm:$0xf] %v820_v0  ;;  %v1098_v2 = vshrl.u32 %v977_v38, 16  ;;  %9511 = vmatpush3.bf16.msra.mxu0 %v10615_v44  ;;  %8787 = vmatpush3.bf16.msra.mxu1 %v9870_v41  ;;  %v10749_v21 = vpack.c.bf16 %v341_v60, %v341_v60 }
  0xa1   : > { %v823_v1 = vld [vmem:[#allocation2 + $0x50] sm:$0x1]  ;;  %v1101_v3 = vshll.u32 %v977_v38, 16  ;;  %v1107_v4 = vshll.u32 %v978_v39, 16  ;;  %v1111_v6 = vshrl.u32 %v978_v39, 16  ;;  %v554_v7 = vrot.slane %v552_v62, 7  ;;  %9512 = vmatprep.subr.bf16.mxu0 %v10724_v46  ;;  %8788 = vmatprep.subr.bf16.mxu1 %v9876_v47 }
  0xa2   : > { %v1117_v8 = vshll.u32 %v979_v45, 16  ;;  %v561_v5 = vshrl.u32 %v10728_v54, 16  ;;  %v564_v9 = vshll.u32 %v10728_v54, 16  ;;  %v342_v10 = vld [vmem:[%s10595_s30 + $0x78] sm:$0xff]  ;;  %v1100_v11 = vrot.slane %v1098_v2, 4  ;;  %v9877_v15 = vld [vmem:[#allocation7 + $0x20] sm:$0xff]  }
  0xa3   : > { %v1103_v12 = vrot.slane %v1101_v3, 5  ;;  %v1109_v13 = vrot.slane %v1107_v4, 5  ;;  %v1113_v14 = vrot.slane %v1111_v6, 4  ;;  %v343_v16 = vld [vmem:[%s10595_s30 + $0x80] sm:$0xff]  ;;  %v557_v44 = vor.u32 %v555_v63, %v554_v7  ;;  %v344_v30 = vld [vmem:[%s10595_s30 + $0x88] sm:$0xff]  ;;  %p12577_p10 = scmp.ne.s32.totalorder %s12539_s23, 0 }
  0xa4   : > { %v9857_v18 = vld [vmem:[#allocation3 + $0x68] ss:$12 sps:$4 sm:$0xff]   ;;  %v559_v19 = vrot.slane %v554_v7, 4  ;;  %v1119_v20 = vrot.slane %v1117_v8, 5  ;;  %v10751_v26 = vrot.slane %v561_v5, 7  ;;  %v569_v27 = vshrl.u32 %v10734_v59, 16  ;;  %9513 = vmatpush3.bf16.msra.mxu0 %v10724_v46  ;;  %8789 = vmatpush3.bf16.msra.mxu1 %v9877_v15 }
  0xa5   : > { %v1544_v17 = vld [vmem:[#allocation2 + $0x3c] sm:$0xe]  ;;  %v1104_v22 = vor.u32 %v1103_v12, %v1100_v11  ;;  %v1114_v25 = vor.u32 %v1113_v14, %v1109_v13  ;;  %9483 = vmatmul.mubr.bf16.gmra.mxu1 %v9857_v18  ;;  %v558_v28 = vsel %vm10611_vm5, %v550_v53, %v557_v44  ;;  %v572_v32 = vshll.u32 %v10734_v59, 16  ;;  %v826_v33 = vld [vmem:[#allocation2 + $0x54] sm:$0xf]  ;;  %v10038_v37 = vld [vmem:[#allocation9 + $0xc0] sm:$0xff]   ;;  %p10353_p1 = pnand %p10352_p11, %p12577_p10 }
  0xa6   : > { %v8168_v34 = vrot.slane %v1544_v17, 9  ;;  %v824_v31 = vsel %vm10625_vm8, %v559_v19, %v823_v1  ;;  %v1545_v35 = vld [vmem:[#allocation2 + $0x40] sm:$0xf]  ;;  %v1546_v36 = vld [vmem:[#allocation2 + $0x44] sm:$0x1]  ;;  %v566_v41 = vor.u32 %v564_v9, %v10751_v26  ;;  %v8596_v24 = vpack.c.bf16 %v342_v10, %v342_v10  ;;  %s10429_s22 = smov [#allocation10]  }
  0xa7   : > { %822 = vst [vmem:[#allocation2 + $0x4c] sm:$0xf] %v558_v28  ;;  %825 = vst [vmem:[#allocation2 + $0x50] sm:$0x1] %v824_v31  ;;  %v1105_v38 = vrot.slane %v1104_v22, 4  ;;  %v1115_v39 = vrot.slane %v1114_v25, 4  ;;  %v10762_v45 = vpack.c.bf16 %v343_v16, %v343_v16  ;;  %v10764_v47 = vpack.c.bf16 %v344_v30, %v344_v30  ;;  %p10354_p2 = pneg %p10353_p1 }
  0xa8   : > { %v9858_v23 = vld [vmem:[#allocation3 + $0x34] ss:$12 sps:$4 sm:$0xff]   ;;  %v9860_v42 = vld [vmem:[#allocation3 + $0x30] ss:$12 sps:$4 sm:$0xff]   ;;  %v1677_v43 = vrot.slane %v1545_v35, 5  ;;  %v1680_v46 = vrot.slane %v1546_v36, 5  ;;  %v827_v60 = vsel %vm10619_vm6, %v566_v41, %v826_v33 }
  0xa9   : > { %v1547_v49 = vld [vmem:[#allocation2 + $0x48] sm:$0xe]  ;;  %v1110_v51 = vsel %vm10687_vm13, %v1105_v38, %v1109_v13  ;;  %v1120_v52 = vsel %vm10687_vm13, %v1115_v39, %v1119_v20  ;;  %v567_v53 = vrot.slane %v10751_v26, 4  ;;  %v830_v54 = vld [vmem:[#allocation2 + $0x5c] sm:$0x1]  ;;  %2443 = vmatprep.mubr.bf16.mxu0 %v9858_v23  ;;  %v571_v58 = vrot.slane %v569_v27, 7 }
  0xaa   : > { %v1678_v55 = vsel %vm10653_vm10, %v8168_v34, %v1677_v43  ;;  %v1679_v56 = vrot.slane %v1677_v43, 4  ;;  %v8169_v57 = vrot.slane %v1547_v49, 9  ;;  %1499 = vst [vmem:[#allocation3 + $0x4c] sm:$0xf] %v1110_v51  ;;  %1500 = vst [vmem:[#allocation3 + $0x58] sm:$0xf] %v1120_v52  ;;  %2444 = vmatmul.mubr.bf16.gmra.mxu0 %v9860_v42 }
  0xab   : > { %v904_v59 = vld [vmem:[#allocation2 + $0x30] sm:$0xf]  ;;  %1812 = vst [vmem:[#allocation3 + $0x80] sm:$0xf] %v1678_v55  ;;  %v578_v61 = vshrl.u32 %v10749_v21, 16  ;;  %v581_v62 = vshll.u32 %v10749_v21, 16  ;;  %v574_v2 = vor.u32 %v572_v32, %v571_v58 }
  0xac   : > { %v586_v63 = vshrl.u32 %v8596_v24, 16  ;;  %v905_v0 = vld [vmem:[#allocation2 + $0x34] sm:$0xf]  ;;  %940 = vst [vmem:[#allocation3 + $0x60] sm:$0xf] %v904_v59  ;;  %v1681_v1 = vsel %vm10653_vm10, %v1679_v56, %v1680_v46  ;;  %v576_v3 = vrot.slane %v571_v58, 4 }
  0xad   : > { %828 = vst [vmem:[#allocation2 + $0x54] sm:$0xf] %v827_v60  ;;  %v589_v4 = vshll.u32 %v8596_v24, 16  ;;  %v833_v6 = vld [vmem:[#allocation2 + $0x60] sm:$0xf]  ;;  %v580_v5 = vrot.slane %v578_v61, 7  ;;  %v575_v15 = vsel %vm10611_vm5, %v567_v53, %v574_v2 }
  0xae   : > { %941 = vst [vmem:[#allocation3 + $0x6c] sm:$0xf] %v905_v0  ;;  %v980_v7 = vld [vmem:[#allocation2 + $0x30] sm:$0xf]  ;;  %v981_v8 = vld [vmem:[#allocation2 + $0x34] sm:$0xf]  ;;  %v831_v16 = vsel %vm10625_vm8, %v576_v3, %v830_v54 }
  0xaf   : > { %1813 = vst [vmem:[#allocation3 + $0x8c] sm:$0xf] %v1681_v1  ;;  %v588_v9 = vrot.slane %v586_v63, 7  ;;  %v837_v10 = vld [vmem:[#allocation2 + $0x68] sm:$0x1]  ;;  %v1122_v11 = vshrl.u32 %v980_v7, 16  ;;  %v583_v22 = vor.u32 %v581_v62, %v580_v5 }
  0xb0   : > { %v1125_v12 = vshll.u32 %v980_v7, 16  ;;  %v1548_v13 = vld [vmem:[#allocation2 + $0x4c] sm:$0xf]  ;;  %v1549_v14 = vld [vmem:[#allocation2 + $0x50] sm:$0x1]  ;;  %v1131_v44 = vshll.u32 %v981_v8, 16 }
  0xb1   : > { %v982_v18 = vld [vmem:[#allocation2 + $0x38] sm:$0x1]  ;;  %v1135_v19 = vshrl.u32 %v981_v8, 16  ;;  %v1684_v21 = vrot.slane %v1548_v13, 5  ;;  %v1687_v17 = vrot.slane %v1549_v14, 5  ;;  %v584_v25 = vrot.slane %v580_v5, 4 }
  0xb2   : > { %v345_v20 = vld [vmem:[%s10595_s30 + $0x90] sm:$0xff]  ;;  %829 = vst [vmem:[#allocation2 + $0x58] sm:$0xf] %v575_v15  ;;  %832 = vst [vmem:[#allocation2 + $0x5c] sm:$0x1] %v831_v16  ;;  %v346_v26 = vld [vmem:[%s10595_s30 + $0x98] sm:$0xff]  ;;  %v591_v30 = vor.u32 %v589_v4, %v588_v9  ;;  %v834_v38 = vsel %vm10619_vm6, %v583_v22, %v833_v6 }
  0xb3   : > { %v9882_v27 = vld [vmem:[#allocation7 + $0xa8] sm:$0xff]   ;;  %v593_v34 = vrot.slane %v588_v9, 4  ;;  %v1124_v28 = vrot.slane %v1122_v11, 4  ;;  %v1127_v31 = vrot.slane %v1125_v12, 5  ;;  %v9884_v32 = vld [vmem:[#allocation7 + $0x58] sm:$0xff]   ;;  %v1685_v33 = vsel %vm10653_vm10, %v8169_v57, %v1684_v21  ;;  %s10355_s26 = sshll.u32 %s10429_s22, 4  ;;  %s10356_s26 = int_to_ptr.vmem [resolvable:$false] %s10355_s26 }
  0xb4   : > { %v1686_v35 = vrot.slane %v1684_v21, 4  ;;  %v9865_v36 = vld [vmem:[#allocation3 + $0x4c] ss:$12 sps:$4 sm:$0xff]   ;;  %v1133_v39 = vrot.slane %v1131_v44, 5  ;;  %9514 = vmatprep.subr.bf16.mxu0 %v9882_v27  ;;  %1814 = vst [vmem:[#allocation3 + $0x98] sm:$0xf] %v1685_v33  ;;  %v592_v24 = vsel %vm10611_vm5, %v584_v25, %v591_v30  ;;  %8790 = vmatprep.subr.bf16.mxu1 %v9884_v32  ;;  %v10796_v54 = vpack.c.bf16 %v345_v20, %v345_v20  ;;  %p10358_p6 = scmp.lt.s32.totalorder %s12472_s13, %s10356_s26 }
  0xb5   : > { %v9868_v41 = vld [vmem:[#allocation3 + $0x48] ss:$12 sps:$4 sm:$0xff]   ;;  %835 = vst [vmem:[#allocation2 + $0x60] sm:$0xf] %v834_v38  ;;  %v838_v23 = vsel %vm10625_vm8, %v593_v34, %v837_v10  ;;  %v1128_v42 = vor.u32 %v1127_v31, %v1124_v28  ;;  %v1137_v43 = vrot.slane %v1135_v19, 4  ;;  %9515 = vmatpush3.bf16.msra.mxu0 %v9882_v27  ;;  %2451 = vmatprep.mubr.bf16.mxu0 %v9865_v36  ;;  %v1141_v52 = vshll.u32 %v982_v18, 16 }
  0xb6   : > { %v9885_v46 = vld [vmem:[#allocation7 + $0x18] sm:$0xff]   ;;  %v1688_v49 = vsel %vm10653_vm10, %v1686_v35, %v1687_v17  ;;  %v1550_v51 = vld [vmem:[#allocation2 + $0x54] sm:$0xe]  ;;  %836 = vst [vmem:[#allocation2 + $0x64] sm:$0xf] %v592_v24  ;;  %v595_v53 = vshrl.u32 %v10762_v45, 16  ;;  %2452 = vmatmul.mubr.bf16.gmra.mxu0 %v9868_v41  ;;  %v10798_v59 = vpack.c.bf16 %v346_v26, %v346_v26 }
  0xb7   : > { %839 = vst [vmem:[#allocation2 + $0x68] sm:$0x1] %v838_v23  ;;  %v9863_v55 = vld [vmem:[#allocation3 + $0x80] ss:$12 sps:$4 sm:$0xff]   ;;  %1815 = vst [vmem:[#allocation3 + $0xa4] sm:$0xf] %v1688_v49  ;;  %v1138_v58 = vor.u32 %v1137_v43, %v1133_v39  ;;  %8791 = vmatpush3.bf16.msra.mxu1 %v9885_v46 }
  0xb8   : > { %v8170_v56 = vrot.slane %v1550_v51, 9  ;;  %v1129_v57 = vrot.slane %v1128_v42, 4  ;;  %v1143_v60 = vrot.slane %v1141_v52, 5  ;;  %v597_v61 = vrot.slane %v595_v53, 7  ;;  %9486 = vmatprep.mubr.bf16.mxu1 %v9863_v55  ;;  %v840_v9 = vld [vmem:[#allocation2 + $0x6c] sm:$0xf] }
  0xb9   : > { %v598_v62 = vshll.u32 %v10762_v45, 16  ;;  %v603_v63 = vshrl.u32 %v10764_v47, 16  ;;  %v1551_v0 = vld [vmem:[#allocation2 + $0x58] sm:$0xf]  ;;  %v1552_v1 = vld [vmem:[#allocation2 + $0x5c] sm:$0x1] }
  0xba   : > { %v1134_v2 = vsel %vm10687_vm13, %v1129_v57, %v1133_v39  ;;  %v1139_v3 = vrot.slane %v1138_v58, 4  ;;  %v606_v4 = vshll.u32 %v10764_v47, 16  ;;  %v1691_v6 = vrot.slane %v1551_v0, 5  ;;  %v347_v10 = vld [vmem:[%s10595_s30 + $0xa0] sm:$0xff]  ;;  %v844_v12 = vld [vmem:[#allocation2 + $0x74] sm:$0x1] }
  0xbb   : > { %v1694_v7 = vrot.slane %v1552_v1, 5  ;;  %1501 = vst [vmem:[#allocation3 + $0x64] sm:$0xf] %v1134_v2  ;;  %v600_v8 = vor.u32 %v598_v62, %v597_v61  ;;  %v601_v5 = vrot.slane %v597_v61, 4  ;;  %v605_v11 = vrot.slane %v603_v63, 7  ;;  %s10357_s8 = scalar_lea.vmem %s10356_s26, 8192 }
  0xbc   : > { %v1144_v45 = vsel %vm10687_vm13, %v1139_v3, %v1143_v60  ;;  %v612_v13 = vshrl.u32 %v10796_v54, 16  ;;  %v615_v14 = vshll.u32 %v10796_v54, 16  ;;  %v1692_v15 = vsel %vm10653_vm10, %v8170_v56, %v1691_v6  ;;  %v1553_v16 = vld [vmem:[#allocation2 + $0x60] sm:$0xe]  ;;  %v847_v35 = vld [vmem:[#allocation2 + $0x78] sm:$0xf]  ;;  %p10359_p12 = scmp.lt.s32.totalorder %s10357_s8, %s10351_s24 }
  0xbd   : > { %v1693_v47 = vrot.slane %v1691_v6, 4  ;;  %1502 = vst [vmem:[#allocation3 + $0x70] sm:$0xf] %v1144_v45  ;;  %v841_v18 = vsel %vm10619_vm6, %v600_v8, %v840_v9  ;;  %v620_v44 = vshrl.u32 %v10798_v59, 16  ;;  %1816 = vst [vmem:[#allocation3 + $0xb0] sm:$0xf] %v1692_v15  ;;  %v608_v17 = vor.u32 %v606_v4, %v605_v11 }
  0xbe   : > { %v1554_v19 = vld [vmem:[#allocation2 + $0x64] sm:$0xf]  ;;  %v1555_v20 = vld [vmem:[#allocation2 + $0x68] sm:$0x1]  ;;  %v8171_v21 = vrot.slane %v1553_v16, 9  ;;  %v610_v22 = vrot.slane %v605_v11, 4  ;;  %v10815_v25 = vpack.c.bf16 %v347_v10, %v347_v10  ;;  %p10360_p7 = por %p10359_p12, %p10358_p6 }
  0xbf   : > { %842 = vst [vmem:[#allocation2 + $0x6c] sm:$0xf] %v841_v18  ;;  %v9864_v26 = vld [vmem:[#allocation3 + $0x98] ss:$12 sps:$4 sm:$0xff]   ;;  %v1695_v27 = vsel %vm10653_vm10, %v1693_v47, %v1694_v7  ;;  %v1698_v30 = vrot.slane %v1554_v19, 5  ;;  %v1701_v34 = vrot.slane %v1555_v20, 5  ;;  %v609_v28 = vsel %vm10611_vm5, %v601_v5, %v608_v17 }
  0xc0   : > { %1817 = vst [vmem:[#allocation3 + $0xbc] sm:$0xf] %v1695_v27  ;;  %v845_v31 = vsel %vm10625_vm8, %v610_v22, %v844_v12  ;;  %v614_v32 = vrot.slane %v612_v13, 7  ;;  %v622_v33 = vrot.slane %v620_v44, 7  ;;  %v851_v36 = vld [vmem:[#allocation2 + $0x80] sm:$0x1]  ;;  %9487 = vmatmul.mubr.bf16.gmra.mxu1 %v9864_v26  ;;  %p10361_p9 = pnand %p10360_p7, %p10354_p2 }
  0xc1   : > { %v1699_v38 = vsel %vm10653_vm10, %v8171_v21, %v1698_v30  ;;  %v1700_v39 = vrot.slane %v1698_v30, 4  ;;  %843 = vst [vmem:[#allocation2 + $0x70] sm:$0xf] %v609_v28  ;;  %846 = vst [vmem:[#allocation2 + $0x74] sm:$0x1] %v845_v31  ;;  %v623_v41 = vshll.u32 %v10798_v59, 16 }
  0xc2   : > { %v906_v24 = vld [vmem:[#allocation2 + $0x3c] sm:$0xf]  ;;  %v907_v23 = vld [vmem:[#allocation2 + $0x40] sm:$0xf]  ;;  %1818 = vst [vmem:[#allocation3 + $0xc8] sm:$0xf] %v1699_v38  ;;  %v617_v42 = vor.u32 %v615_v14, %v614_v32 }
  0xc3   : > { %v618_v43 = vrot.slane %v614_v32, 4  ;;  %v627_v46 = vrot.slane %v622_v33, 4  ;;  %942 = vst [vmem:[#allocation3 + $0x78] sm:$0xf] %v906_v24  ;;  %943 = vst [vmem:[#allocation3 + $0x84] sm:$0xf] %v907_v23  ;;  %v1702_v52 = vsel %vm10653_vm10, %v1700_v39, %v1701_v34  ;;  %v625_v53 = vor.u32 %v623_v41, %v622_v33 }
  0xc4   : > { %v983_v49 = vld [vmem:[#allocation2 + $0x3c] sm:$0xf]  ;;  %v629_v51 = vshrl.u32 %v10815_v25, 16  ;;  %v984_v54 = vld [vmem:[#allocation2 + $0x40] sm:$0xf]  ;;  %v848_v60 = vsel %vm10619_vm6, %v617_v42, %v847_v35  ;;  %v348_v3 = vld [vmem:[%s10595_s30 + $0xa8] sm:$0xff] }
  0xc5   : > { %v985_v55 = vld [vmem:[#allocation2 + $0x44] sm:$0x1]  ;;  %v1146_v56 = vshrl.u32 %v983_v49, 16  ;;  %v1149_v57 = vshll.u32 %v983_v49, 16  ;;  %1819 = vst [vmem:[#allocation3 + $0xd4] sm:$0xf] %v1702_v52  ;;  %v852_v61 = vsel %vm10625_vm8, %v627_v46, %v851_v36  ;;  %v626_v0 = vsel %vm10611_vm5, %v618_v43, %v625_v53 }
  0xc6   : > { %v9873_v58 = vld [vmem:[#allocation3 + $0x64] ss:$12 sps:$4 sm:$0xff]   ;;  %v9875_v59 = vld [vmem:[#allocation3 + $0x60] ss:$12 sps:$4 sm:$0xff]   ;;  %v1155_v62 = vshll.u32 %v984_v54, 16  ;;  %v1159_v7 = vshrl.u32 %v984_v54, 16  ;;  %v8602_v18 = vpack.c.bf16 %v348_v3, %v348_v3 }
  0xc7   : > { %v1556_v63 = vld [vmem:[#allocation2 + $0x6c] sm:$0xe]  ;;  %849 = vst [vmem:[#allocation2 + $0x78] sm:$0xf] %v848_v60  ;;  %853 = vst [vmem:[#allocation2 + $0x80] sm:$0x1] %v852_v61  ;;  %2459 = vmatprep.mubr.bf16.mxu0 %v9873_v58 }
  0xc8   : > { %v1148_v1 = vrot.slane %v1146_v56, 4  ;;  %v1151_v2 = vrot.slane %v1149_v57, 5  ;;  %v8172_v4 = vrot.slane %v1556_v63, 9  ;;  %850 = vst [vmem:[#allocation2 + $0x7c] sm:$0xf] %v626_v0  ;;  %v1157_v6 = vrot.slane %v1155_v62, 5  ;;  %2460 = vmatmul.mubr.bf16.gmra.mxu0 %v9875_v59 }
  0xc9   : > { %v1165_v8 = vshll.u32 %v985_v55, 16  ;;  %v9871_v5 = vld [vmem:[#allocation3 + $0xb0] ss:$12 sps:$4 sm:$0xff]   ;;  %v1557_v10 = vld [vmem:[#allocation2 + $0x70] sm:$0xf]  ;;  %v1161_v11 = vrot.slane %v1159_v7, 4 }
  0xca   : > { %v1152_v9 = vor.u32 %v1151_v2, %v1148_v1  ;;  %v1558_v45 = vld [vmem:[#allocation2 + $0x74] sm:$0x1]  ;;  %9490 = vmatprep.mubr.bf16.mxu1 %v9871_v5  ;;  %v1705_v13 = vrot.slane %v1557_v10, 5  ;;  %v631_v47 = vrot.slane %v629_v51, 7  ;;  %v632_v17 = vshll.u32 %v10815_v25, 16  ;;  %v349_v39 = vld [vmem:[%s10595_s30 + $0xb0] sm:$0xff] }
  0xcb   : > { %v1167_v12 = vrot.slane %v1165_v8, 5  ;;  %v1708_v14 = vrot.slane %v1558_v45, 5  ;;  %v1162_v16 = vor.u32 %v1161_v11, %v1157_v6  ;;  %v637_v35 = vshrl.u32 %v8602_v18, 16  ;;  %v854_v38 = vld [vmem:[#allocation2 + $0x84] sm:$0xf] }
  0xcc   : > { %v1153_v15 = vrot.slane %v1152_v9, 4  ;;  %v9872_v44 = vld [vmem:[#allocation3 + $0xc8] ss:$12 sps:$4 sm:$0xff]   ;;  %v1706_v19 = vsel %vm10653_vm10, %v8172_v4, %v1705_v13  ;;  %v1707_v20 = vrot.slane %v1705_v13, 4  ;;  %v634_v32 = vor.u32 %v632_v17, %v631_v47  ;;  %v908_v53 = vld [vmem:[#allocation2 + $0x48] sm:$0xf] }
  0xcd   : > { %1820 = vst [vmem:[#allocation3 + $0xe0] sm:$0xf] %v1706_v19  ;;  %v1163_v27 = vrot.slane %v1162_v16, 4  ;;  %9491 = vmatmul.mubr.bf16.gmra.mxu1 %v9872_v44  ;;  %v640_v36 = vshll.u32 %v8602_v18, 16  ;;  %v635_v41 = vrot.slane %v631_v47, 4  ;;  %v350_v23 = vld [vmem:[%s10595_s30 + $0xb8] sm:$0xff]  ;;  %v8603_v42 = vpack.c.bf16 %v349_v39, %v349_v39 }
  0xce   : > { %v1158_v21 = vsel %vm10687_vm13, %v1153_v15, %v1157_v6  ;;  %v1559_v22 = vld [vmem:[#allocation2 + $0x78] sm:$0xe]  ;;  %v1561_v26 = vld [vmem:[#allocation2 + $0x80] sm:$0x1]  ;;  %v1709_v30 = vsel %vm10653_vm10, %v1707_v20, %v1708_v14  ;;  %v855_v24 = vsel %vm10619_vm6, %v634_v32, %v854_v38  ;;  %v639_v49 = vrot.slane %v637_v35, 7 }
  0xcf   : > { %1503 = vst [vmem:[#allocation3 + $0x7c] sm:$0xf] %v1158_v21  ;;  %v1560_v34 = vld [vmem:[#allocation2 + $0x7c] sm:$0xf]  ;;  %v8173_v28 = vrot.slane %v1559_v22, 9  ;;  %v1715_v31 = vrot.slane %v1561_v26, 5  ;;  %v1168_v25 = vsel %vm10687_vm13, %v1163_v27, %v1167_v12  ;;  %v8604_v52 = vpack.c.bf16 %v350_v23, %v350_v23 }
  0xd0   : > { %1821 = vst [vmem:[#allocation3 + $0xec] sm:$0xf] %v1709_v30  ;;  %v1712_v33 = vrot.slane %v1560_v34, 5  ;;  %1504 = vst [vmem:[#allocation3 + $0x88] sm:$0xf] %v1168_v25  ;;  %v646_v54 = vshrl.u32 %v8603_v42, 16  ;;  %v642_v59 = vor.u32 %v640_v36, %v639_v49 }
  0xd1   : > { %856 = vst [vmem:[#allocation2 + $0x84] sm:$0xf] %v855_v24  ;;  %v858_v51 = vld [vmem:[#allocation2 + $0x8c] sm:$0x1]  ;;  %v649_v55 = vshll.u32 %v8603_v42, 16  ;;  %v644_v60 = vrot.slane %v639_v49, 4 }
  0xd2   : > { %v1713_v43 = vsel %vm10653_vm10, %v8173_v28, %v1712_v33  ;;  %v1714_v46 = vrot.slane %v1712_v33, 4  ;;  %v909_v56 = vld [vmem:[#allocation2 + $0x4c] sm:$0xf]  ;;  %944 = vst [vmem:[#allocation3 + $0x90] sm:$0xf] %v908_v53  ;;  %v654_v61 = vshrl.u32 %v8604_v52, 16  ;;  %v643_v6 = vsel %vm10611_vm5, %v635_v41, %v642_v59 }
  0xd3   : > { %1822 = vst [vmem:[#allocation3 + $0xf8] sm:$0xf] %v1713_v43  ;;  %v986_v57 = vld [vmem:[#allocation2 + $0x48] sm:$0xf]  ;;  %v861_v62 = vld [vmem:[#allocation2 + $0x90] sm:$0xf]  ;;  %v859_v7 = vsel %vm10625_vm8, %v644_v60, %v858_v51 }
  0xd4   : > { %v1716_v58 = vsel %vm10653_vm10, %v1714_v46, %v1715_v31  ;;  %945 = vst [vmem:[#allocation3 + $0x9c] sm:$0xf] %v909_v56  ;;  %v987_v63 = vld [vmem:[#allocation2 + $0x4c] sm:$0xf]  ;;  %v648_v0 = vrot.slane %v646_v54, 7  ;;  %v657_v1 = vshll.u32 %v8604_v52, 16 }
  0xd5   : > { %1823 = vst [vmem:[#allocation3 + $0x104] sm:$0xf] %v1716_v58  ;;  %v865_v2 = vld [vmem:[#allocation2 + $0x98] sm:$0x1]  ;;  %v988_v3 = vld [vmem:[#allocation2 + $0x50] sm:$0x1] }
  0xd6   : > { %v1170_v4 = vshrl.u32 %v986_v57, 16  ;;  %v656_v8 = vrot.slane %v654_v61, 7  ;;  %v1173_v5 = vshll.u32 %v986_v57, 16  ;;  %857 = vst [vmem:[#allocation2 + $0x88] sm:$0xf] %v643_v6  ;;  %v651_v10 = vor.u32 %v649_v55, %v648_v0  ;;  %v9891_v20 = vld [vmem:[#allocation7 + $0x50] sm:$0xff]  }
  0xd7   : > { %v9878_v9 = vld [vmem:[#allocation3 + $0xe0] ss:$12 sps:$4 sm:$0xff]   ;;  %860 = vst [vmem:[#allocation2 + $0x8c] sm:$0x1] %v859_v7  ;;  %v652_v45 = vrot.slane %v648_v0, 4  ;;  %v1179_v44 = vshll.u32 %v987_v63, 16  ;;  %8792 = vmatprep.subr.bf16.mxu1 %v9891_v20 }
  0xd8   : > { %v1172_v11 = vrot.slane %v1170_v4, 4  ;;  %v9880_v12 = vld [vmem:[#allocation3 + $0x7c] ss:$12 sps:$4 sm:$0xff]   ;;  %v9883_v13 = vld [vmem:[#allocation3 + $0x78] ss:$12 sps:$4 sm:$0xff]   ;;  %v659_v14 = vor.u32 %v657_v1, %v656_v8  ;;  %v661_v15 = vrot.slane %v656_v8, 4  ;;  %9494 = vmatprep.mubr.bf16.mxu1 %v9878_v9  ;;  %v862_v16 = vsel %vm10619_vm6, %v651_v10, %v861_v62 }
  0xd9   : > { %v1562_v47 = vld [vmem:[#allocation2 + $0x84] sm:$0xe]  ;;  %v1175_v18 = vrot.slane %v1173_v5, 5  ;;  %v1183_v19 = vshrl.u32 %v987_v63, 16  ;;  %2467 = vmatprep.mubr.bf16.mxu0 %v9880_v12  ;;  %863 = vst [vmem:[#allocation2 + $0x90] sm:$0xf] %v862_v16 }
  0xda   : > { %v660_v21 = vsel %vm10611_vm5, %v652_v45, %v659_v14  ;;  %v866_v17 = vsel %vm10625_vm8, %v661_v15, %v865_v2  ;;  %v1189_v22 = vshll.u32 %v988_v3, 16  ;;  %2468 = vmatmul.mubr.bf16.gmra.mxu0 %v9883_v13  ;;  %v1181_v27 = vrot.slane %v1179_v44, 5  ;;  %v9892_v34 = vld [vmem:[#allocation7 + $0x10] sm:$0xff]   ;;  %v351_v28 = vld [vmem:[%s10595_s30 + $0xc0] sm:$0xff]  ;;  %v352_v33 = vld [vmem:[%s10595_s30 + $0xc8] sm:$0xff] }
  0xdb   : > { %864 = vst [vmem:[#allocation2 + $0x94] sm:$0xf] %v660_v21  ;;  %867 = vst [vmem:[#allocation2 + $0x98] sm:$0x1] %v866_v17  ;;  %v1176_v26 = vor.u32 %v1175_v18, %v1172_v11  ;;  %v1185_v30 = vrot.slane %v1183_v19, 4  ;;  %v8174_v32 = vrot.slane %v1562_v47, 9  ;;  %v8605_v25 = vpack.c.bf16 %v351_v28, %v351_v28  ;;  %8793 = vmatpush3.bf16.msra.mxu1 %v9892_v34 }
  0xdc   : > { %v9879_v31 = vld [vmem:[#allocation3 + $0xf8] ss:$12 sps:$4 sm:$0xff]   ;;  %v1191_v38 = vrot.slane %v1189_v22, 5  ;;  %v8606_v39 = vpack.c.bf16 %v352_v33, %v352_v33  ;;  %v354_v54 = vld [vmem:[%s10595_s30 + $0xd8] sm:$0xff]  ;;  %v9897_v60 = vld [vmem:[#allocation7 + $0xa0] sm:$0xff]  }
  0xdd   : > { %v1177_v35 = vrot.slane %v1176_v26, 4  ;;  %v1186_v36 = vor.u32 %v1185_v30, %v1181_v27  ;;  %v353_v41 = vld [vmem:[%s10595_s30 + $0xd0] sm:$0xff]  ;;  %9495 = vmatmul.mubr.bf16.gmra.mxu1 %v9879_v31  ;;  %v1563_v24 = vld [vmem:[#allocation2 + $0x88] sm:$0xf]  ;;  %v663_v42 = vshrl.u32 %v8605_v25, 16  ;;  %v666_v43 = vshll.u32 %v8605_v25, 16  ;;  %9516 = vmatprep.subr.bf16.mxu0 %v9897_v60 }
  0xde   : > { %v1564_v23 = vld [vmem:[#allocation2 + $0x8c] sm:$0x1]  ;;  %v8607_v46 = vpack.c.bf16 %v353_v41, %v353_v41  ;;  %v1719_v49 = vrot.slane %v1563_v24, 5  ;;  %v671_v56 = vshrl.u32 %v8606_v39, 16  ;;  %v674_v57 = vshll.u32 %v8606_v39, 16  ;;  %9517 = vmatpush3.bf16.msra.mxu0 %v9897_v60  ;;  %v9899_v14 = vld [vmem:[#allocation7 + $0x48] sm:$0xff]  }
  0xdf   : > { %v1722_v51 = vrot.slane %v1564_v23, 5  ;;  %v1182_v52 = vsel %vm10687_vm13, %v1177_v35, %v1181_v27  ;;  %v1187_v53 = vrot.slane %v1186_v36, 4  ;;  %v665_v55 = vrot.slane %v663_v42, 7  ;;  %v868_v58 = vld [vmem:[#allocation2 + $0x9c] sm:$0xf]  ;;  %v9900_v19 = vld [vmem:[#allocation7 + $0x8] sm:$0xff]   ;;  %8794 = vmatprep.subr.bf16.mxu1 %v9899_v14 }
  0xe0   : > { %1505 = vst [vmem:[#allocation3 + $0x94] sm:$0xf] %v1182_v52  ;;  %v8608_v59 = vpack.c.bf16 %v354_v54, %v354_v54  ;;  %v1720_v61 = vsel %vm10653_vm10, %v8174_v32, %v1719_v49  ;;  %v1721_v62 = vrot.slane %v1719_v49, 4  ;;  %v1565_v63 = vld [vmem:[#allocation2 + $0x90] sm:$0xe]  ;;  %v680_v1 = vshrl.u32 %v8607_v46, 16  ;;  %8795 = vmatpush3.bf16.msra.mxu1 %v9900_v19 }
  0xe1   : > { %v1192_v0 = vsel %vm10687_vm13, %v1187_v53, %v1191_v38  ;;  %v910_v2 = vld [vmem:[#allocation2 + $0x54] sm:$0xf]  ;;  %1824 = vst [vmem:[#allocation3 + $0x110] sm:$0xf] %v1720_v61  ;;  %v8175_v6 = vrot.slane %v1565_v63, 9  ;;  %v668_v7 = vor.u32 %v666_v43, %v665_v55  ;;  %v669_v8 = vrot.slane %v665_v55, 4 }
  0xe2   : > { %v1566_v3 = vld [vmem:[#allocation2 + $0x94] sm:$0xf]  ;;  %v1567_v4 = vld [vmem:[#allocation2 + $0x98] sm:$0x1]  ;;  %1506 = vst [vmem:[#allocation3 + $0xa0] sm:$0xf] %v1192_v0  ;;  %v1723_v9 = vsel %vm10653_vm10, %v1721_v62, %v1722_v51 }
  0xe3   : > { %v872_v5 = vld [vmem:[#allocation2 + $0xa4] sm:$0x1]  ;;  %946 = vst [vmem:[#allocation3 + $0xa8] sm:$0xf] %v910_v2  ;;  %v1726_v10 = vrot.slane %v1566_v3, 5  ;;  %v1729_v45 = vrot.slane %v1567_v4, 5  ;;  %v869_v15 = vsel %vm10619_vm6, %v668_v7, %v868_v58 }
  0xe4   : > { %v673_v11 = vrot.slane %v671_v56, 7  ;;  %v875_v12 = vld [vmem:[#allocation2 + $0xa8] sm:$0xf]  ;;  %v911_v13 = vld [vmem:[#allocation2 + $0x58] sm:$0xf]  ;;  %v682_v47 = vrot.slane %v680_v1, 7 }
  0xe5   : > { %1825 = vst [vmem:[#allocation3 + $0x11c] sm:$0xf] %v1723_v9  ;;  %v683_v16 = vshll.u32 %v8607_v46, 16  ;;  %v688_v18 = vshrl.u32 %v8608_v59, 16  ;;  %947 = vst [vmem:[#allocation3 + $0xb4] sm:$0xf] %v911_v13  ;;  %v1727_v20 = vsel %vm10653_vm10, %v8175_v6, %v1726_v10 }
  0xe6   : > { %v989_v44 = vld [vmem:[#allocation2 + $0x54] sm:$0xf]  ;;  %v1728_v21 = vrot.slane %v1726_v10, 4  ;;  %v676_v17 = vor.u32 %v674_v57, %v673_v11  ;;  %v678_v22 = vrot.slane %v673_v11, 4  ;;  %870 = vst [vmem:[#allocation2 + $0x9c] sm:$0xf] %v869_v15 }
  0xe7   : > { %v879_v26 = vld [vmem:[#allocation2 + $0xb0] sm:$0x1]  ;;  %v990_v27 = vld [vmem:[#allocation2 + $0x58] sm:$0xf]  ;;  %1826 = vst [vmem:[#allocation3 + $0x128] sm:$0xf] %v1727_v20  ;;  %v685_v30 = vor.u32 %v683_v16, %v682_v47 }
  0xe8   : > { %v686_v34 = vrot.slane %v682_v47, 4  ;;  %v690_v28 = vrot.slane %v688_v18, 7  ;;  %v691_v31 = vshll.u32 %v8608_v59, 16  ;;  %v991_v32 = vld [vmem:[#allocation2 + $0x5c] sm:$0x1]  ;;  %v355_v33 = vld [vmem:[%s10595_s30 + $0xe0] sm:$0xff]  ;;  %v1730_v25 = vsel %vm10653_vm10, %v1728_v21, %v1729_v45 }
  0xe9   : > { %v677_v35 = vsel %vm10611_vm5, %v669_v8, %v676_v17  ;;  %v873_v36 = vsel %vm10625_vm8, %v678_v22, %v872_v5  ;;  %v1194_v38 = vshrl.u32 %v989_v44, 16  ;;  %1827 = vst [vmem:[#allocation3 + $0x134] sm:$0xf] %v1730_v25  ;;  %v876_v24 = vsel %vm10619_vm6, %v685_v30, %v875_v12  ;;  %v9888_v42 = vld [vmem:[#allocation3 + $0x94] ss:$12 sps:$4 sm:$0xff]   ;;  %v356_v61 = vld [vmem:[%s10595_s30 + $0xe8] sm:$0xff] }
  0xea   : > { %871 = vst [vmem:[#allocation2 + $0xa0] sm:$0xf] %v677_v35  ;;  %874 = vst [vmem:[#allocation2 + $0xa4] sm:$0x1] %v873_v36  ;;  %v693_v39 = vor.u32 %v691_v31, %v690_v28  ;;  %v695_v41 = vrot.slane %v690_v28, 4  ;;  %v1197_v23 = vshll.u32 %v989_v44, 16  ;;  %v8609_v46 = vpack.c.bf16 %v355_v33, %v355_v33  ;;  %2475 = vmatprep.mubr.bf16.mxu0 %v9888_v42 }
  0xeb   : > { %877 = vst [vmem:[#allocation2 + $0xa8] sm:$0xf] %v876_v24  ;;  %v1196_v43 = vrot.slane %v1194_v38, 4  ;;  %v9890_v49 = vld [vmem:[#allocation3 + $0x90] ss:$12 sps:$4 sm:$0xff]   ;;  %v1203_v54 = vshll.u32 %v990_v27, 16  ;;  %v8610_v1 = vpack.c.bf16 %v356_v61, %v356_v61 }
  0xec   : > { %v694_v51 = vsel %vm10611_vm5, %v686_v34, %v693_v39  ;;  %v880_v52 = vsel %vm10625_vm8, %v695_v41, %v879_v26  ;;  %v1199_v53 = vrot.slane %v1197_v23, 5  ;;  %v9886_v55 = vld [vmem:[#allocation3 + $0x110] ss:$12 sps:$4 sm:$0xff]   ;;  %v1207_v56 = vshrl.u32 %v990_v27, 16  ;;  %2476 = vmatmul.mubr.bf16.gmra.mxu0 %v9890_v49  ;;  %v357_v2 = vld [vmem:[%s10595_s30 + $0xf0] sm:$0xff]  ;;  %v358_v20 = vld [vmem:[%s10595_s30 + $0xf8] sm:$0xff] }
  0xed   : > { %878 = vst [vmem:[#allocation2 + $0xac] sm:$0xf] %v694_v51  ;;  %881 = vst [vmem:[#allocation2 + $0xb0] sm:$0x1] %v880_v52  ;;  %v1213_v57 = vshll.u32 %v991_v32, 16  ;;  %v1205_v60 = vrot.slane %v1203_v54, 5  ;;  %9498 = vmatprep.mubr.bf16.mxu1 %v9886_v55  ;;  %v10894_v45 = vpack.c.bf16 %v357_v2, %v357_v2  ;;  %v8612_v38 = vpack.c.bf16 %v358_v20, %v358_v20 }
  0xee   : > { %v1568_v58 = vld [vmem:[#allocation2 + $0x9c] sm:$0xe]  ;;  %v1200_v59 = vor.u32 %v1199_v53, %v1196_v43  ;;  %v697_v62 = vshrl.u32 %v8609_v46, 16  ;;  %v700_v63 = vshll.u32 %v8609_v46, 16  ;;  %v1209_v0 = vrot.slane %v1207_v56, 4  ;;  %v9906_v21 = vld [vmem:[#allocation7 + $0x40] sm:$0xff]  }
  0xef   : > { %v8176_v3 = vrot.slane %v1568_v58, 9  ;;  %v1215_v6 = vrot.slane %v1213_v57, 5  ;;  %v882_v8 = vld [vmem:[#allocation2 + $0xb4] sm:$0xf]  ;;  %v705_v19 = vshrl.u32 %v8610_v1, 16  ;;  %v708_v30 = vshll.u32 %v8610_v1, 16  ;;  %8796 = vmatprep.subr.bf16.mxu1 %v9906_v21 }
  0xf0   : > { %v1201_v4 = vrot.slane %v1200_v59, 4  ;;  %v699_v7 = vrot.slane %v697_v62, 7  ;;  %v9887_v5 = vld [vmem:[#allocation3 + $0x128] ss:$12 sps:$4 sm:$0xff]   ;;  %v1210_v10 = vor.u32 %v1209_v0, %v1205_v60  ;;  %v886_v36 = vld [vmem:[#allocation2 + $0xbc] sm:$0x1] }
  0xf1   : > { %v1569_v9 = vld [vmem:[#allocation2 + $0xa0] sm:$0xf]  ;;  %v1570_v11 = vld [vmem:[#allocation2 + $0xa4] sm:$0x1]  ;;  %9499 = vmatmul.mubr.bf16.gmra.mxu1 %v9887_v5  ;;  %v707_v33 = vrot.slane %v705_v19, 7  ;;  %v9907_v25 = vld [vmem:[#allocation7] sm:$0xff]  }
  0xf2   : > { %v1733_v12 = vrot.slane %v1569_v9, 5  ;;  %v1571_v13 = vld [vmem:[#allocation2 + $0xa8] sm:$0xe]  ;;  %v1206_v14 = vsel %vm10687_vm13, %v1201_v4, %v1205_v60  ;;  %v702_v15 = vor.u32 %v700_v63, %v699_v7  ;;  %v703_v47 = vrot.slane %v699_v7, 4  ;;  %v912_v24 = vld [vmem:[#allocation2 + $0x60] sm:$0xf]  ;;  %8797 = vmatpush3.bf16.msra.mxu1 %v9907_v25 }
  0xf3   : > { %v1736_v16 = vrot.slane %v1570_v11, 5  ;;  %v8177_v18 = vrot.slane %v1571_v13, 9  ;;  %v1211_v44 = vrot.slane %v1210_v10, 4  ;;  %1507 = vst [vmem:[#allocation3 + $0xac] sm:$0xf] %v1206_v14  ;;  %v714_v39 = vshrl.u32 %v10894_v45, 16 }
  0xf4   : > { %v1734_v17 = vsel %vm10653_vm10, %v8176_v3, %v1733_v12  ;;  %v1735_v22 = vrot.slane %v1733_v12, 4  ;;  %v1572_v26 = vld [vmem:[#allocation2 + $0xac] sm:$0xf]  ;;  %v1573_v27 = vld [vmem:[#allocation2 + $0xb0] sm:$0x1]  ;;  %v883_v34 = vsel %vm10619_vm6, %v702_v15, %v882_v8  ;;  %v717_v41 = vshll.u32 %v10894_v45, 16 }
  0xf5   : > { %1828 = vst [vmem:[#allocation3 + $0x140] sm:$0xf] %v1734_v17  ;;  %v1740_v28 = vrot.slane %v1572_v26, 5  ;;  %v1743_v31 = vrot.slane %v1573_v27, 5  ;;  %v1216_v32 = vsel %vm10687_vm13, %v1211_v44, %v1215_v6  ;;  %884 = vst [vmem:[#allocation2 + $0xb4] sm:$0xf] %v883_v34  ;;  %v710_v43 = vor.u32 %v708_v30, %v707_v33 }
  0xf6   : > { %v1737_v35 = vsel %vm10653_vm10, %v1735_v22, %v1736_v16  ;;  %1508 = vst [vmem:[#allocation3 + $0xb8] sm:$0xf] %v1216_v32  ;;  %v712_v46 = vrot.slane %v707_v33, 4  ;;  %v889_v49 = vld [vmem:[#allocation2 + $0xc0] sm:$0xf]  ;;  %v716_v53 = vrot.slane %v714_v39, 7 }
  0xf7   : > { %1829 = vst [vmem:[#allocation3 + $0x14c] sm:$0xf] %v1737_v35  ;;  %v1741_v23 = vsel %vm10653_vm10, %v8177_v18, %v1740_v28  ;;  %v1742_v42 = vrot.slane %v1740_v28, 4  ;;  %v913_v51 = vld [vmem:[#allocation2 + $0x64] sm:$0xf]  ;;  %v722_v54 = vshrl.u32 %v8612_v38, 16  ;;  %v711_v59 = vsel %vm10611_vm5, %v703_v47, %v710_v43 }
  0xf8   : > { %948 = vst [vmem:[#allocation3 + $0xc0] sm:$0xf] %v912_v24  ;;  %v992_v52 = vld [vmem:[#allocation2 + $0x60] sm:$0xf]  ;;  %1830 = vst [vmem:[#allocation3 + $0x158] sm:$0xf] %v1741_v23  ;;  %v887_v60 = vsel %vm10625_vm8, %v712_v46, %v886_v36  ;;  %v719_v1 = vor.u32 %v717_v41, %v716_v53 }
  0xf9   : > { %v725_v55 = vshll.u32 %v8612_v38, 16  ;;  %949 = vst [vmem:[#allocation3 + $0xcc] sm:$0xf] %v913_v51  ;;  %v993_v56 = vld [vmem:[#allocation2 + $0x64] sm:$0xf]  ;;  %v1218_v57 = vshrl.u32 %v992_v52, 16  ;;  %v1744_v58 = vsel %vm10653_vm10, %v1742_v42, %v1743_v31 }
  0xfa   : > { %v893_v61 = vld [vmem:[#allocation2 + $0xc8] sm:$0x1]  ;;  %v1221_v63 = vshll.u32 %v992_v52, 16  ;;  %v9912_v0 = vld [vmem:[#allocation7 + $0x98] sm:$0xff]   ;;  %1831 = vst [vmem:[#allocation3 + $0x164] sm:$0xf] %v1744_v58  ;;  %v890_v11 = vsel %vm10619_vm6, %v719_v1, %v889_v49 }
  0xfb   : > { %v994_v62 = vld [vmem:[#allocation2 + $0x68] sm:$0x1]  ;;  %885 = vst [vmem:[#allocation2 + $0xb8] sm:$0xf] %v711_v59  ;;  %888 = vst [vmem:[#allocation2 + $0xbc] sm:$0x1] %v887_v60  ;;  %9518 = vmatprep.subr.bf16.mxu0 %v9912_v0 }
  0xfc   : > { %v720_v2 = vrot.slane %v716_v53, 4  ;;  %v724_v3 = vrot.slane %v722_v54, 7  ;;  %v1220_v4 = vrot.slane %v1218_v57, 4  ;;  %v1223_v6 = vrot.slane %v1221_v63, 5  ;;  %v1574_v9 = vld [vmem:[#allocation2 + $0xb4] sm:$0xe]  ;;  %9519 = vmatpush3.bf16.msra.mxu0 %v9912_v0 }
  0xfd   : > { %v1227_v7 = vshll.u32 %v993_v56, 16  ;;  %v1231_v8 = vshrl.u32 %v993_v56, 16  ;;  %v1237_v5 = vshll.u32 %v994_v62, 16  ;;  %v10919_v12 = vld [vmem:[#allocation7 + $0x238] sm:$0xff]   ;;  %v8178_v15 = vrot.slane %v1574_v9, 9 }
  0xfe   : > { %v727_v10 = vor.u32 %v725_v55, %v724_v3  ;;  %v729_v45 = vrot.slane %v724_v3, 4  ;;  %v10921_v13 = vld [vmem:[#allocation3 + $0xac] ss:$12 sps:$4 sm:$0xff]   ;;  %v10923_v14 = vld [vmem:[#allocation3 + $0xa8] ss:$12 sps:$4 sm:$0xff]   ;;  %v1224_v47 = vor.u32 %v1223_v6, %v1220_v4  ;;  %9558 = vmatprep.subr.bf16.mxu1 %v10919_v12 }
  0xff   : > { %891 = vst [vmem:[#allocation2 + $0xc0] sm:$0xf] %v890_v11  ;;  %v9893_v16 = vld [vmem:[#allocation3 + $0x140] ss:$12 sps:$4 sm:$0xff]   ;;  %v1229_v19 = vrot.slane %v1227_v7, 5  ;;  %v1233_v20 = vrot.slane %v1231_v8, 4  ;;  %2483 = vmatprep.mubr.bf16.mxu0 %v10921_v13 }
 0x100   : > { %v728_v18 = vsel %vm10611_vm5, %v720_v2, %v727_v10  ;;  %v894_v44 = vsel %vm10625_vm8, %v729_v45, %v893_v61  ;;  %v1225_v21 = vrot.slane %v1224_v47, 4  ;;  %v1239_v17 = vrot.slane %v1237_v5, 5  ;;  %9502 = vmatprep.mubr.bf16.mxu1 %v9893_v16  ;;  %2484 = vmatmul.mubr.bf16.gmra.mxu0 %v10923_v14  ;;  %v896_v26 = vld [vmem:[#allocation2] sm:$0xf]  ;;  %v897_v27 = vld [vmem:[#allocation2 + $0x4] sm:$0xf] }
 0x101   : > { %892 = vst [vmem:[#allocation2 + $0xc4] sm:$0xf] %v728_v18  ;;  %895 = vst [vmem:[#allocation2 + $0xc8] sm:$0x1] %v894_v44  ;;  %v1234_v22 = vor.u32 %v1233_v20, %v1229_v19  ;;  %v968_v30 = vld [vmem:[#allocation2] sm:$0xf] }
 0x102   : > { %v9894_v34 = vld [vmem:[#allocation3 + $0x158] ss:$12 sps:$4 sm:$0xff]   ;;  %v1575_v28 = vld [vmem:[#allocation2 + $0xb8] sm:$0xf]  ;;  %v1230_v31 = vsel %vm10687_vm13, %v1225_v21, %v1229_v19  ;;  %932 = vst [vmem:[#allocation3] sm:$0xf] %v896_v26 }
 0x103   : > { %933 = vst [vmem:[#allocation3 + $0xc] sm:$0xf] %v897_v27  ;;  %v1576_v32 = vld [vmem:[#allocation2 + $0xbc] sm:$0x1]  ;;  %v1747_v33 = vrot.slane %v1575_v28, 5  ;;  %v1235_v25 = vrot.slane %v1234_v22, 4  ;;  %9503 = vmatmul.mubr.bf16.gmra.mxu1 %v9894_v34 }
 0x104   : > { %1509 = vst [vmem:[#allocation3 + $0xc4] sm:$0xf] %v1230_v31  ;;  %v969_v35 = vld [vmem:[#allocation2 + $0x4] sm:$0xf]  ;;  %v1750_v36 = vrot.slane %v1576_v32, 5  ;;  %v1026_v39 = vshrl.u32 %v968_v30, 16 }
 0x105   : > { %v970_v38 = vld [vmem:[#allocation2 + $0x8] sm:$0x1]  ;;  %v1029_v41 = vshll.u32 %v968_v30, 16  ;;  %v1035_v24 = vshll.u32 %v969_v35, 16  ;;  %v1748_v23 = vsel %vm10653_vm10, %v8178_v15, %v1747_v33  ;;  %v1749_v42 = vrot.slane %v1747_v33, 4  ;;  %v9920_v7 = vld [vmem:[#allocation7 + $0x90] sm:$0xff]  }
 0x106   : > { %v1577_v43 = vld [vmem:[#allocation2 + $0xc0] sm:$0xe]  ;;  %v1240_v46 = vsel %vm10687_vm13, %v1235_v25, %v1239_v17  ;;  %v1039_v49 = vshrl.u32 %v969_v35, 16  ;;  %1832 = vst [vmem:[#allocation3 + $0x170] sm:$0xf] %v1748_v23  ;;  %v1028_v52 = vrot.slane %v1026_v39, 4  ;;  %9520 = vmatprep.subr.bf16.mxu0 %v9920_v7 }
 0x107   : > { %v8179_v51 = vrot.slane %v1577_v43, 9  ;;  %1510 = vst [vmem:[#allocation3 + $0xd0] sm:$0xf] %v1240_v46  ;;  %v1031_v53 = vrot.slane %v1029_v41, 5  ;;  %v1037_v54 = vrot.slane %v1035_v24, 5  ;;  %v1751_v55 = vsel %vm10653_vm10, %v1749_v42, %v1750_v36  ;;  %9521 = vmatpush3.bf16.msra.mxu0 %v9920_v7 }
 0x108   : > { %v1578_v56 = vld [vmem:[#allocation2 + $0xc4] sm:$0xf]  ;;  %v1579_v57 = vld [vmem:[#allocation2 + $0xc8] sm:$0x1]  ;;  %v1041_v58 = vrot.slane %v1039_v49, 4  ;;  %v1045_v59 = vshll.u32 %v970_v38, 16 }
 0x109   : > { %1833 = vst [vmem:[#allocation3 + $0x17c] sm:$0xf] %v1751_v55  ;;  %v1754_v60 = vrot.slane %v1578_v56, 5  ;;  %v1757_v61 = vrot.slane %v1579_v57, 5  ;;  %v1032_v62 = vor.u32 %v1031_v53, %v1028_v52  ;;  %v4777_v63 = vld [vmem:[#allocation2] sm:$0xf] }
 0x10a   : > { %v4778_v0 = vld [vmem:[#allocation2 + $0x4] sm:$0xf]  ;;  %v1042_v1 = vor.u32 %v1041_v58, %v1037_v54  ;;  %v1047_v2 = vrot.slane %v1045_v59, 5  ;;  %v4779_v3 = vld [vmem:[#allocation2 + $0x8] sm:$0x1]  ;;  %v4832_v4 = vshrl.u32 %v4777_v63, 16 }
 0x10b   : > { %v4835_v6 = vshll.u32 %v4777_v63, 16  ;;  %v1755_v8 = vsel %vm10653_vm10, %v8179_v51, %v1754_v60  ;;  %v1756_v5 = vrot.slane %v1754_v60, 4  ;;  %v1033_v9 = vrot.slane %v1032_v62, 4  ;;  %v914_v45 = vld [vmem:[#allocation2 + $0x6c] sm:$0xf] }
 0x10c   : > { %v4841_v10 = vshll.u32 %v4778_v0, 16  ;;  %1834 = vst [vmem:[#allocation3 + $0x188] sm:$0xf] %v1755_v8  ;;  %v1043_v11 = vrot.slane %v1042_v1, 4  ;;  %v4834_v15 = vrot.slane %v4832_v4, 4  ;;  %v4845_v16 = vshrl.u32 %v4778_v0, 16 }
 0x10d   : > { %v4837_v47 = vrot.slane %v4835_v6, 5  ;;  %v915_v18 = vld [vmem:[#allocation2 + $0x70] sm:$0xf]  ;;  %950 = vst [vmem:[#allocation3 + $0xd8] sm:$0xf] %v914_v45  ;;  %v1758_v44 = vsel %vm10653_vm10, %v1756_v5, %v1757_v61  ;;  %v1038_v19 = vsel %vm10687_vm13, %v1033_v9, %v1037_v54  ;;  %v4851_v21 = vshll.u32 %v4779_v3, 16 }
 0x10e   : > { %v4843_v20 = vrot.slane %v4841_v10, 5  ;;  %951 = vst [vmem:[#allocation3 + $0xe4] sm:$0xf] %v915_v18  ;;  %v995_v17 = vld [vmem:[#allocation2 + $0x6c] sm:$0xf]  ;;  %v1048_v27 = vsel %vm10687_vm13, %v1043_v11, %v1047_v2  ;;  %v4847_v34 = vrot.slane %v4845_v16, 4 }
 0x10f   : > { %v996_v22 = vld [vmem:[#allocation2 + $0x70] sm:$0xf]  ;;  %1835 = vst [vmem:[#allocation3 + $0x194] sm:$0xf] %v1758_v44  ;;  %v10946_v26 = vld [vmem:[#allocation3 + $0xc4] ss:$12 sps:$4 sm:$0xff]   ;;  %v4838_v30 = vor.u32 %v4837_v47, %v4834_v15 }
 0x110   : > { %1493 = vst [vmem:[#allocation3 + $0x4] sm:$0xf] %v1038_v19  ;;  %v10950_v28 = vld [vmem:[#allocation3 + $0xc0] ss:$12 sps:$4 sm:$0xff]   ;;  %1494 = vst [vmem:[#allocation3 + $0x10] sm:$0xf] %v1048_v27  ;;  %2491 = vmatprep.mubr.bf16.mxu0 %v10946_v26  ;;  %v4848_v36 = vor.u32 %v4847_v34, %v4843_v20 }
 0x111   : > { %v4853_v31 = vrot.slane %v4851_v21, 5  ;;  %v997_v32 = vld [vmem:[#allocation2 + $0x74] sm:$0x1]  ;;  %v1242_v33 = vshrl.u32 %v995_v17, 16  ;;  %v4839_v35 = vrot.slane %v4838_v30, 4  ;;  %v1245_v38 = vshll.u32 %v995_v17, 16  ;;  %2492 = vmatmul.mubr.bf16.gmra.mxu0 %v10950_v28 }
 0x112   : > { %v9901_v25 = vld [vmem:[#allocation3 + $0x170] ss:$12 sps:$4 sm:$0xff]   ;;  %v1251_v41 = vshll.u32 %v996_v22, 16  ;;  %v1255_v24 = vshrl.u32 %v996_v22, 16  ;;  %v1261_v23 = vshll.u32 %v997_v32, 16  ;;  %v4849_v43 = vrot.slane %v4848_v36, 4 }
 0x113   : > { %v1244_v39 = vrot.slane %v1242_v33, 4  ;;  %9506 = vmatprep.mubr.bf16.mxu1 %v9901_v25  ;;  %v4705_v42 = vld [vmem:[#allocation2] sm:$0xf]  ;;  %v1247_v46 = vrot.slane %v1245_v38, 5  ;;  %v4706_v49 = vld [vmem:[#allocation2 + $0x4] sm:$0xf]  ;;  %v4844_v53 = vsel %vm10687_vm13, %v4839_v35, %v4843_v20 }
 0x114   : > { %v1253_v51 = vrot.slane %v1251_v41, 5  ;;  %v1257_v52 = vrot.slane %v1255_v24, 4  ;;  %v4854_v54 = vsel %vm10687_vm13, %v4849_v43, %v4853_v31  ;;  %v916_v56 = vld [vmem:[#allocation2 + $0x78] sm:$0xf]  ;;  %v917_v57 = vld [vmem:[#allocation2 + $0x7c] sm:$0xf] }
 0x115   : > { %v1248_v55 = vor.u32 %v1247_v46, %v1244_v39  ;;  %v1263_v61 = vrot.slane %v1261_v23, 5  ;;  %952 = vst [vmem:[#allocation3 + $0xf0] sm:$0xf] %v916_v56  ;;  %953 = vst [vmem:[#allocation3 + $0xfc] sm:$0xf] %v917_v57  ;;  %v9928_v45 = vld [vmem:[#allocation7 + $0x88] sm:$0xff]  }
 0x116   : > { %v9902_v58 = vld [vmem:[#allocation3 + $0x188] ss:$12 sps:$4 sm:$0xff]   ;;  %v1258_v60 = vor.u32 %v1257_v52, %v1253_v51  ;;  %v998_v1 = vld [vmem:[#allocation2 + $0x78] sm:$0xf]  ;;  %v999_v3 = vld [vmem:[#allocation2 + $0x7c] sm:$0xf]  ;;  %9522 = vmatprep.subr.bf16.mxu0 %v9928_v45 }
 0x117   : > { %v1838_v59 = vld [vmem:[#allocation3] sm:$0xff]  ;;  %v1840_v62 = vld [vmem:[#allocation3 + $0xc] sm:$0xff]  ;;  %v1249_v0 = vrot.slane %v1248_v55, 4  ;;  %9507 = vmatmul.mubr.bf16.gmra.mxu1 %v9902_v58  ;;  %v1000_v4 = vld [vmem:[#allocation2 + $0x80] sm:$0x1]  ;;  %v1266_v6 = vshrl.u32 %v998_v1, 16  ;;  %9523 = vmatpush3.bf16.msra.mxu0 %v9928_v45 }
 0x118   : > { %v9908_v63 = vld [vmem:[#allocation3 + $0x4] ss:$12 sps:$4 sm:$0xff]   ;;  %4741 = vst [vmem:[#allocation3] sm:$0xf] %v4705_v42  ;;  %4742 = vst [vmem:[#allocation3 + $0xc] sm:$0xf] %v4706_v49  ;;  %v8253_v11 = vcombine.low %v1838_v59, %v1840_v62 }
 0x119   : > { %5299 = vst [vmem:[#allocation3 + $0x4] sm:$0xf] %v4844_v53  ;;  %5300 = vst [vmem:[#allocation3 + $0x10] sm:$0xf] %v4854_v54  ;;  %v1259_v2 = vrot.slane %v1258_v60, 4  ;;  %2917 = vmatprep.mubr.bf16.mxu1 %v9908_v63  ;;  %v1254_v7 = vsel %vm10687_vm13, %v1249_v0, %v1253_v51  ;;  %v1269_v8 = vshll.u32 %v998_v1, 16 }
 0x11a   : > { %v1275_v5 = vshll.u32 %v999_v3, 16  ;;  %v1279_v9 = vshrl.u32 %v999_v3, 16  ;;  %v918_v10 = vld [vmem:[#allocation2 + $0x84] sm:$0xf]  ;;  %1511 = vst [vmem:[#allocation3 + $0xdc] sm:$0xf] %v1254_v7 }
 0x11b   : > { %v1264_v15 = vsel %vm10687_vm13, %v1259_v2, %v1263_v61  ;;  %v1268_v47 = vrot.slane %v1266_v6, 4  ;;  %v1285_v16 = vshll.u32 %v1000_v4, 16  ;;  %v919_v18 = vld [vmem:[#allocation2 + $0x88] sm:$0xf]  ;;  %954 = vst [vmem:[#allocation3 + $0x108] sm:$0xf] %v918_v10 }
 0x11c   : > { %v1001_v44 = vld [vmem:[#allocation2 + $0x84] sm:$0xf]  ;;  %1512 = vst [vmem:[#allocation3 + $0xe8] sm:$0xf] %v1264_v15  ;;  %v1271_v19 = vrot.slane %v1269_v8, 5  ;;  %v1277_v20 = vrot.slane %v1275_v5, 5 }
 0x11d   : > { %v1281_v21 = vrot.slane %v1279_v9, 4  ;;  %955 = vst [vmem:[#allocation3 + $0x114] sm:$0xf] %v919_v18  ;;  %v1002_v17 = vld [vmem:[#allocation2 + $0x88] sm:$0xf]  ;;  %v1290_v22 = vshrl.u32 %v1001_v44, 16 }
 0x11e   : > { %v1287_v27 = vrot.slane %v1285_v16, 5  ;;  %v1003_v30 = vld [vmem:[#allocation2 + $0x8c] sm:$0x1]  ;;  %v1293_v34 = vshll.u32 %v1001_v44, 16  ;;  %v1299_v31 = vshll.u32 %v1002_v17, 16  ;;  %v1303_v32 = vshrl.u32 %v1002_v17, 16 }
 0x11f   : > { %v1272_v33 = vor.u32 %v1271_v19, %v1268_v47  ;;  %v1282_v25 = vor.u32 %v1281_v21, %v1277_v20  ;;  %v1292_v35 = vrot.slane %v1290_v22, 4  ;;  %v1309_v36 = vshll.u32 %v1003_v30, 16  ;;  %v9922_v24 = vld [vmem:[#allocation7 + $0x230] sm:$0xff]   ;;  %v9936_v46 = vld [vmem:[#allocation7 + $0x80] sm:$0xff]   ;;  %2918 = vmatmul.mubr.bf16.vlgmr.msra.gmra.mxu1 %v8253_v11  ;;  %v920_v52 = vld [vmem:[#allocation2 + $0x90] sm:$0xf] }
 0x120   : > { %v1295_v38 = vrot.slane %v1293_v34, 5  ;;  %v1301_v39 = vrot.slane %v1299_v31, 5  ;;  %v1305_v41 = vrot.slane %v1303_v32, 4  ;;  %v921_v53 = vld [vmem:[#allocation2 + $0x94] sm:$0xf]  ;;  %9559 = vmatpush3.bf16.msra.mxu1 %v10919_v12  ;;  %9524 = vmatprep.subr.bf16.mxu0 %v9936_v46 }
 0x121   : > { %v1273_v23 = vrot.slane %v1272_v33, 4  ;;  %v1283_v42 = vrot.slane %v1282_v25, 4  ;;  %v1311_v43 = vrot.slane %v1309_v36, 5  ;;  %v1004_v54 = vld [vmem:[#allocation2 + $0x90] sm:$0xf]  ;;  %9560 = vmatprep.subr.bf16.mxu1 %v9922_v24  ;;  %9525 = vmatpush3.bf16.msra.mxu0 %v9936_v46 }
 0x122   : > { %v1296_v49 = vor.u32 %v1295_v38, %v1292_v35  ;;  %v1306_v51 = vor.u32 %v1305_v41, %v1301_v39  ;;  %v9930_v55 = vld [vmem:[#allocation7 + $0x228] sm:$0xff]   ;;  %956 = vst [vmem:[#allocation3 + $0x120] sm:$0xf] %v920_v52  ;;  %957 = vst [vmem:[#allocation3 + $0x12c] sm:$0xf] %v921_v53  ;;  %v1314_v61 = vshrl.u32 %v1004_v54, 16 }
 0x123   : > { %v10212_v56 = vld [vmem:[#allocation3 + $0x1c] ss:$12 sps:$4 sm:$0xff]   ;;  %v1278_v57 = vsel %vm10687_vm13, %v1273_v23, %v1277_v20  ;;  %v1288_v58 = vsel %vm10687_vm13, %v1283_v42, %v1287_v27  ;;  %v1006_v60 = vld [vmem:[#allocation2 + $0x98] sm:$0x1]  ;;  %v10969_v63 = vld [vmem:[#allocation3 + $0xd8] ss:$12 sps:$4 sm:$0xff]  }
 0x124   : > { %2925 = vmatprep.mubr.bf16.mxu1 %v10212_v56  ;;  %v1005_v59 = vld [vmem:[#allocation2 + $0x94] sm:$0xf]  ;;  %1513 = vst [vmem:[#allocation3 + $0xf4] sm:$0xf] %v1278_v57  ;;  %1514 = vst [vmem:[#allocation3 + $0x100] sm:$0xf] %v1288_v58  ;;  %9561 = vmatpush3.bf16.msra.mxu1 %v9922_v24 }
 0x125   : > { %v10967_v62 = vld [vmem:[#allocation3 + $0xdc] ss:$12 sps:$4 sm:$0xff]   ;;  %v1297_v12 = vrot.slane %v1296_v49, 4  ;;  %v1307_v0 = vrot.slane %v1306_v51, 4  ;;  %v1316_v1 = vrot.slane %v1314_v61, 4  ;;  %v1317_v2 = vshll.u32 %v1004_v54, 16  ;;  %9562 = vmatprep.subr.bf16.mxu1 %v9930_v55 }
 0x126   : > { %v1323_v3 = vshll.u32 %v1005_v59, 16  ;;  %v922_v4 = vld [vmem:[#allocation2 + $0x9c] sm:$0xf]  ;;  %2499 = vmatprep.mubr.bf16.mxu0 %v10967_v62  ;;  %v1327_v7 = vshrl.u32 %v1005_v59, 16  ;;  %v1333_v8 = vshll.u32 %v1006_v60, 16  ;;  %v9938_v27 = vld [vmem:[#allocation7 + $0x220] sm:$0xff]  }
 0x127   : > { %v1302_v6 = vsel %vm10687_vm13, %v1297_v12, %v1301_v39  ;;  %v923_v5 = vld [vmem:[#allocation2 + $0xa0] sm:$0xf]  ;;  %958 = vst [vmem:[#allocation3 + $0x138] sm:$0xf] %v922_v4  ;;  %v1007_v9 = vld [vmem:[#allocation2 + $0x9c] sm:$0xf]  ;;  %2500 = vmatmul.mubr.bf16.gmra.mxu0 %v10969_v63  ;;  %v1312_v10 = vsel %vm10687_vm13, %v1307_v0, %v1311_v43 }
 0x128   : > { %1515 = vst [vmem:[#allocation3 + $0x10c] sm:$0xf] %v1302_v6  ;;  %v1319_v45 = vrot.slane %v1317_v2, 5  ;;  %v1325_v11 = vrot.slane %v1323_v3, 5  ;;  %959 = vst [vmem:[#allocation3 + $0x144] sm:$0xf] %v923_v5  ;;  %9563 = vmatpush3.bf16.msra.mxu1 %v9930_v55 }
 0x129   : > { %v1008_v15 = vld [vmem:[#allocation2 + $0xa0] sm:$0xf]  ;;  %v1009_v47 = vld [vmem:[#allocation2 + $0xa4] sm:$0x1]  ;;  %1516 = vst [vmem:[#allocation3 + $0x118] sm:$0xf] %v1312_v10  ;;  %9564 = vmatprep.subr.bf16.mxu1 %v9938_v27 }
 0x12a   : > { %v1329_v16 = vrot.slane %v1327_v7, 4  ;;  %v1335_v18 = vrot.slane %v1333_v8, 5  ;;  %v1338_v44 = vshrl.u32 %v1007_v9, 16  ;;  %v1341_v19 = vshll.u32 %v1007_v9, 16  ;;  %v10213_v30 = vld [vmem:[#allocation3 + $0x18] ss:$12 sps:$4 sm:$0xff]  }
 0x12b   : > { %v1320_v20 = vor.u32 %v1319_v45, %v1316_v1  ;;  %v1347_v21 = vshll.u32 %v1008_v15, 16  ;;  %v1351_v17 = vshrl.u32 %v1008_v15, 16  ;;  %v1357_v22 = vshll.u32 %v1009_v47, 16  ;;  %2926 = vmatmul.mubr.bf16.gmra.mxu1 %v10213_v30  ;;  %v10977_v33 = vld [vmem:[#allocation3 + $0xf4] ss:$12 sps:$4 sm:$0xff]   ;;  %v9943_v42 = vld [vmem:[#allocation7 + $0x1f8] sm:$0xff]  }
 0x12c   : > { %v1330_v34 = vor.u32 %v1329_v16, %v1325_v11  ;;  %v1340_v31 = vrot.slane %v1338_v44, 4  ;;  %v1343_v32 = vrot.slane %v1341_v19, 5  ;;  %v10214_v25 = vld [vmem:[#allocation3 + $0x34] ss:$12 sps:$4 sm:$0xff]   ;;  %v10979_v38 = vld [vmem:[#allocation3 + $0xf0] ss:$12 sps:$4 sm:$0xff]   ;;  %2507 = vmatprep.mubr.bf16.mxu0 %v10977_v33  ;;  %8918 = vmatprep.subr.bf16.mxu0 %v9943_v42 }
 0x12d   : > { %2933 = vmatprep.mubr.bf16.mxu1 %v10214_v25  ;;  %v1321_v35 = vrot.slane %v1320_v20, 4  ;;  %v1349_v36 = vrot.slane %v1347_v21, 5  ;;  %v1353_v24 = vrot.slane %v1351_v17, 4  ;;  %v1359_v23 = vrot.slane %v1357_v22, 5  ;;  %v924_v46 = vld [vmem:[#allocation2 + $0xa8] sm:$0xf]  ;;  %9565 = vmatpush3.bf16.msra.mxu1 %v9938_v27 }
 0x12e   : > { %v1331_v39 = vrot.slane %v1330_v34, 4  ;;  %v1344_v41 = vor.u32 %v1343_v32, %v1340_v31  ;;  %v925_v49 = vld [vmem:[#allocation2 + $0xac] sm:$0xf]  ;;  %v1010_v51 = vld [vmem:[#allocation2 + $0xa8] sm:$0xf]  ;;  %v9945_v7 = vld [vmem:[#allocation7 + $0x218] sm:$0xff]  }
 0x12f   : > { %v1326_v43 = vsel %vm10687_vm13, %v1321_v35, %v1325_v11  ;;  %v1354_v54 = vor.u32 %v1353_v24, %v1349_v36  ;;  %960 = vst [vmem:[#allocation3 + $0x150] sm:$0xf] %v924_v46  ;;  %961 = vst [vmem:[#allocation3 + $0x15c] sm:$0xf] %v925_v49  ;;  %v1011_v55 = vld [vmem:[#allocation2 + $0xac] sm:$0xf]  ;;  %2508 = vmatmul.mubr.bf16.gmra.mxu0 %v10979_v38  ;;  %9566 = vmatprep.subr.bf16.mxu1 %v9945_v7 }
 0x130   : > { %v1336_v52 = vsel %vm10687_vm13, %v1331_v39, %v1335_v18  ;;  %1517 = vst [vmem:[#allocation3 + $0x124] sm:$0xf] %v1326_v43  ;;  %v1345_v53 = vrot.slane %v1344_v41, 4  ;;  %v1012_v56 = vld [vmem:[#allocation2 + $0xb0] sm:$0x1]  ;;  %v1362_v58 = vshrl.u32 %v1010_v51, 16 }
 0x131   : > { %v10987_v57 = vld [vmem:[#allocation3 + $0x10c] ss:$12 sps:$4 sm:$0xff]   ;;  %1518 = vst [vmem:[#allocation3 + $0x130] sm:$0xf] %v1336_v52  ;;  %v1355_v60 = vrot.slane %v1354_v54, 4  ;;  %v1365_v61 = vshll.u32 %v1010_v51, 16  ;;  %9567 = vmatpush3.bf16.msra.mxu1 %v9945_v7 }
 0x132   : > { %v1350_v59 = vsel %vm10687_vm13, %v1345_v53, %v1349_v36  ;;  %v1371_v12 = vshll.u32 %v1011_v55, 16  ;;  %v926_v0 = vld [vmem:[#allocation2 + $0xb4] sm:$0xf]  ;;  %2515 = vmatprep.mubr.bf16.mxu0 %v10987_v57  ;;  %v10992_v1 = vld [vmem:[#allocation3 + $0x108] ss:$12 sps:$4 sm:$0xff]   ;;  %v1364_v2 = vrot.slane %v1362_v58, 4 }
 0x133   : > { %1519 = vst [vmem:[#allocation3 + $0x13c] sm:$0xf] %v1350_v59  ;;  %v1375_v3 = vshrl.u32 %v1011_v55, 16  ;;  %v1381_v4 = vshll.u32 %v1012_v56, 16  ;;  %v927_v6 = vld [vmem:[#allocation2 + $0xb8] sm:$0xf]  ;;  %v1360_v5 = vsel %vm10687_vm13, %v1355_v60, %v1359_v23 }
 0x134   : > { %962 = vst [vmem:[#allocation3 + $0x168] sm:$0xf] %v926_v0  ;;  %v10215_v8 = vld [vmem:[#allocation3 + $0x30] ss:$12 sps:$4 sm:$0xff]   ;;  %v1367_v9 = vrot.slane %v1365_v61, 5  ;;  %v1373_v10 = vrot.slane %v1371_v12, 5 }
 0x135   : > { %2934 = vmatmul.mubr.bf16.gmra.mxu1 %v10215_v8  ;;  %963 = vst [vmem:[#allocation3 + $0x174] sm:$0xf] %v927_v6  ;;  %v1013_v45 = vld [vmem:[#allocation2 + $0xb4] sm:$0xf]  ;;  %v1014_v11 = vld [vmem:[#allocation2 + $0xb8] sm:$0xf] }
 0x136   : > { %v10216_v15 = vld [vmem:[#allocation3 + $0x4c] ss:$12 sps:$4 sm:$0xff]   ;;  %1520 = vst [vmem:[#allocation3 + $0x148] sm:$0xf] %v1360_v5  ;;  %v1377_v47 = vrot.slane %v1375_v3, 4  ;;  %v1386_v18 = vshrl.u32 %v1013_v45, 16  ;;  %v1368_v19 = vor.u32 %v1367_v9, %v1364_v2 }
 0x137   : > { %2941 = vmatprep.mubr.bf16.mxu1 %v10216_v15  ;;  %v1015_v16 = vld [vmem:[#allocation2 + $0xbc] sm:$0x1]  ;;  %v1389_v44 = vshll.u32 %v1013_v45, 16  ;;  %v1383_v20 = vrot.slane %v1381_v4, 5  ;;  %v1395_v21 = vshll.u32 %v1014_v11, 16  ;;  %v1399_v17 = vshrl.u32 %v1014_v11, 16  ;;  %2516 = vmatmul.mubr.bf16.gmra.mxu0 %v10992_v1 }
 0x138   : > { %v1378_v22 = vor.u32 %v1377_v47, %v1373_v10  ;;  %v1388_v27 = vrot.slane %v1386_v18, 4  ;;  %v1405_v34 = vshll.u32 %v1015_v16, 16  ;;  %v10996_v31 = vld [vmem:[#allocation3 + $0x124] ss:$12 sps:$4 sm:$0xff]   ;;  %v1369_v32 = vrot.slane %v1368_v19, 4 }
 0x139   : > { %v1391_v30 = vrot.slane %v1389_v44, 5  ;;  %v1397_v36 = vrot.slane %v1395_v21, 5  ;;  %v1401_v39 = vrot.slane %v1399_v17, 4  ;;  %2523 = vmatprep.mubr.bf16.mxu0 %v10996_v31  ;;  %v928_v24 = vld [vmem:[#allocation2 + $0xc0] sm:$0xf] }
 0x13a   : > { %v1379_v25 = vrot.slane %v1378_v22, 4  ;;  %v1374_v41 = vsel %vm10687_vm13, %v1369_v32, %v1373_v10  ;;  %v1407_v46 = vrot.slane %v1405_v34, 5  ;;  %v929_v49 = vld [vmem:[#allocation2 + $0xc4] sm:$0xf]  ;;  %964 = vst [vmem:[#allocation3 + $0x180] sm:$0xf] %v928_v24 }
 0x13b   : > { %v1392_v35 = vor.u32 %v1391_v30, %v1388_v27  ;;  %1521 = vst [vmem:[#allocation3 + $0x154] sm:$0xf] %v1374_v41  ;;  %v1402_v43 = vor.u32 %v1401_v39, %v1397_v36  ;;  %v1016_v51 = vld [vmem:[#allocation2 + $0xc0] sm:$0xf]  ;;  %v11004_v53 = vld [vmem:[#allocation3 + $0x120] ss:$12 sps:$4 sm:$0xff]  }
 0x13c   : > { %v1384_v23 = vsel %vm10687_vm13, %v1379_v25, %v1383_v20  ;;  %v10217_v52 = vld [vmem:[#allocation3 + $0x48] ss:$12 sps:$4 sm:$0xff]   ;;  %965 = vst [vmem:[#allocation3 + $0x18c] sm:$0xf] %v929_v49  ;;  %v1410_v55 = vshrl.u32 %v1016_v51, 16  ;;  %v1413_v12 = vshll.u32 %v1016_v51, 16 }
 0x13d   : > { %v1393_v42 = vrot.slane %v1392_v35, 4  ;;  %2942 = vmatmul.mubr.bf16.gmra.mxu1 %v10217_v52  ;;  %v11006_v54 = vld [vmem:[#allocation3 + $0x13c] ss:$12 sps:$4 sm:$0xff]   ;;  %1522 = vst [vmem:[#allocation3 + $0x160] sm:$0xf] %v1384_v23  ;;  %v1403_v59 = vrot.slane %v1402_v43, 4 }
 0x13e   : > { %v10218_v56 = vld [vmem:[#allocation3 + $0x64] ss:$12 sps:$4 sm:$0xff]   ;;  %v1017_v60 = vld [vmem:[#allocation2 + $0xc4] sm:$0xf]  ;;  %v1412_v0 = vrot.slane %v1410_v55, 4  ;;  %v1415_v8 = vrot.slane %v1413_v12, 5 }
 0x13f   : > { %2949 = vmatprep.mubr.bf16.mxu1 %v10218_v56  ;;  %v1398_v58 = vsel %vm10687_vm13, %v1393_v42, %v1397_v36  ;;  %v1018_v61 = vld [vmem:[#allocation2 + $0xc8] sm:$0x1]  ;;  %v1419_v2 = vshll.u32 %v1017_v60, 16  ;;  %v1423_v3 = vshrl.u32 %v1017_v60, 16  ;;  %v1529_v6 = vld [vmem:[#allocation2] sm:$0xe]  ;;  %v1408_v7 = vsel %vm10687_vm13, %v1403_v59, %v1407_v46  ;;  %2524 = vmatmul.mubr.bf16.gmra.mxu0 %v11004_v53 }
 0x140   : > { %1523 = vst [vmem:[#allocation3 + $0x16c] sm:$0xf] %v1398_v58  ;;  %v1429_v4 = vshll.u32 %v1018_v61, 16  ;;  %v1530_v5 = vld [vmem:[#allocation2 + $0x4] sm:$0xf]  ;;  %v8163_v10 = vrot.slane %v1529_v6, 9  ;;  %v1416_v16 = vor.u32 %v1415_v8, %v1412_v0  ;;  %2531 = vmatprep.mubr.bf16.mxu0 %v11006_v54 }
 0x141   : > { %v1531_v9 = vld [vmem:[#allocation2 + $0x8] sm:$0x1]  ;;  %1524 = vst [vmem:[#allocation3 + $0x178] sm:$0xf] %v1408_v7  ;;  %v1421_v45 = vrot.slane %v1419_v2, 5  ;;  %v1425_v11 = vrot.slane %v1423_v3, 4 }
 0x142   : > { %v1642_v15 = vrot.slane %v1530_v5, 5  ;;  %v5335_v47 = vld [vmem:[#allocation2] sm:$0xe]  ;;  %v1431_v18 = vrot.slane %v1429_v4, 5  ;;  %v1645_v44 = vrot.slane %v1531_v9, 5  ;;  %v9950_v30 = vld [vmem:[#allocation7 + $0x210] sm:$0xff]  }
 0x143   : > { %v5336_v19 = vld [vmem:[#allocation2 + $0x4] sm:$0xf]  ;;  %v5337_v20 = vld [vmem:[#allocation2 + $0x8] sm:$0x1]  ;;  %v1426_v21 = vor.u32 %v1425_v11, %v1421_v45  ;;  %v11016_v34 = vld [vmem:[#allocation3 + $0x138] ss:$12 sps:$4 sm:$0xff]   ;;  %9568 = vmatprep.subr.bf16.mxu1 %v9950_v30 }
 0x144   : > { %v1643_v17 = vsel %vm10653_vm10, %v8163_v10, %v1642_v15  ;;  %v1644_v22 = vrot.slane %v1642_v15, 4  ;;  %v5445_v27 = vrot.slane %v5336_v19, 5  ;;  %v1417_v32 = vrot.slane %v1416_v16, 4  ;;  %v10219_v35 = vld [vmem:[#allocation3 + $0x60] ss:$12 sps:$4 sm:$0xff]   ;;  %9569 = vmatpush3.bf16.msra.mxu1 %v9950_v30  ;;  %v9955_v60 = vld [vmem:[#allocation7 + $0x208] sm:$0xff]  }
 0x145   : > { %1802 = vst [vmem:[#allocation3 + $0x8] sm:$0xf] %v1643_v17  ;;  %v8385_v25 = vrot.slane %v5335_v47, 9  ;;  %2950 = vmatmul.mubr.bf16.gmra.mxu1 %v10219_v35  ;;  %v11018_v36 = vld [vmem:[#allocation3 + $0x154] ss:$12 sps:$4 sm:$0xff]   ;;  %v1427_v39 = vrot.slane %v1426_v21, 4  ;;  %9570 = vmatprep.subr.bf16.mxu1 %v9955_v60 }
 0x146   : > { %v1646_v41 = vsel %vm10653_vm10, %v1644_v22, %v1645_v44  ;;  %v5447_v24 = vrot.slane %v5445_v27, 4  ;;  %v10220_v23 = vld [vmem:[#allocation3 + $0x7c] ss:$12 sps:$4 sm:$0xff]   ;;  %v1422_v42 = vsel %vm10687_vm13, %v1417_v32, %v1421_v45  ;;  %v5448_v43 = vrot.slane %v5337_v20, 5  ;;  %v10221_v52 = vld [vmem:[#allocation3 + $0x78] ss:$12 sps:$4 sm:$0xff]  }
 0x147   : > { %2957 = vmatprep.mubr.bf16.mxu1 %v10220_v23  ;;  %1803 = vst [vmem:[#allocation3 + $0x14] sm:$0xf] %v1646_v41  ;;  %v1432_v46 = vsel %vm10687_vm13, %v1427_v39, %v1431_v18  ;;  %1525 = vst [vmem:[#allocation3 + $0x184] sm:$0xf] %v1422_v42  ;;  %2532 = vmatmul.mubr.bf16.gmra.mxu0 %v11016_v34  ;;  %v5446_v49 = vsel %vm10653_vm10, %v8385_v25, %v5445_v27  ;;  %v11032_v56 = vld [vmem:[#allocation3 + $0x150] ss:$12 sps:$4 sm:$0xff]  }
 0x148   : > { %1526 = vst [vmem:[#allocation3 + $0x190] sm:$0xf] %v1432_v46  ;;  %2539 = vmatprep.mubr.bf16.mxu0 %v11018_v36  ;;  %v5449_v51 = vsel %vm10653_vm10, %v5447_v24, %v5448_v43  ;;  %v10222_v58 = vld [vmem:[#allocation3 + $0x94] ss:$12 sps:$4 sm:$0xff]   ;;  %v11034_v59 = vld [vmem:[#allocation3 + $0x16c] ss:$12 sps:$4 sm:$0xff]   ;;  %9571 = vmatpush3.bf16.msra.mxu1 %v9955_v60 }
 0x149   : > { %v10223_v61 = vld [vmem:[#allocation3 + $0x90] ss:$12 sps:$4 sm:$0xff]   ;;  %v11038_v12 = vld [vmem:[#allocation3 + $0x168] ss:$12 sps:$4 sm:$0xff]   ;;  %v9941_v3 = vld [vmem:[#allocation3 + $0x180] ss:$12 sps:$4 sm:$0xff]  }
 0x14a   : > { %v9960_v2 = vld [vmem:[#allocation7 + $0x200] sm:$0xff]   ;;  %v9946_v4 = vld [vmem:[#allocation7 + $0x1f0] sm:$0xff]   ;;  %v9948_v5 = vld [vmem:[#allocation7 + $0x1e8] sm:$0xff]  }
 0x14b   : > { %9572 = vmatprep.subr.bf16.mxu1 %v9960_v2  ;;  %v10224_v6 = vld [vmem:[#allocation3 + $0x20] ss:$12 sps:$4 sm:$0xff]   ;;  %v10225_v7 = vld [vmem:[#allocation3 + $0x38] ss:$12 sps:$4 sm:$0xff]   ;;  %v10226_v10 = vld [vmem:[#allocation3 + $0x50] ss:$12 sps:$4 sm:$0xff]  }
 0x14c   : > { %9573 = vmatpush3.bf16.msra.mxu1 %v9960_v2  ;;  %v9947_v8 = vld [vmem:[#allocation7 + $0x1b0] sm:$0xff]   ;;  %v10227_v45 = vld [vmem:[#allocation3 + $0x68] ss:$12 sps:$4 sm:$0xff]   ;;  %v9958_v27 = vld [vmem:[#allocation7 + $0x1c8] sm:$0xff]  }
 0x14d   : > { %2958 = vmatmul.mubr.bf16.gmra.mxu1 %v10221_v52  ;;  %v9952_v11 = vld [vmem:[#allocation7 + $0x1a0] sm:$0xff]   ;;  %v9953_v47 = vld [vmem:[#allocation7 + $0x1d8] sm:$0xff]   ;;  %v9956_v20 = vld [vmem:[#allocation7 + $0x1d0] sm:$0xff]  }
 0x14e   : > { %v9942_v55 = vld [vmem:[#allocation3 + $0x8] ss:$12 sps:$4 sm:$0xff]   ;;  %2965 = vmatprep.mubr.bf16.mxu1 %v10222_v58  ;;  %v9957_v21 = vld [vmem:[#allocation7 + $0x190] sm:$0xff]   ;;  %v9959_v35 = vld [vmem:[#allocation7 + $0x188] sm:$0xff]  }
 0x14f   : > { %5605 = vst [vmem:[#allocation3 + $0x8] sm:$0xf] %v5446_v49  ;;  %5606 = vst [vmem:[#allocation3 + $0x14] sm:$0xf] %v5449_v51  ;;  %2540 = vmatmul.mubr.bf16.gmra.mxu0 %v11032_v56  ;;  %v9939_v0 = vld [vmem:[#allocation3 + $0x184] ss:$12 sps:$4 sm:$0xff]  }
 0x150   : > { %2547 = vmatprep.mubr.bf16.mxu0 %v11034_v59  ;;  %v9954_v44 = vld [vmem:[#allocation7 + $0x198] sm:$0xff]   ;;  %v9961_v41 = vld [vmem:[#allocation7 + $0x1c0] sm:$0xff]   ;;  %v1581_v60 = vld [vmem:[#allocation2 + $0xd0] sm:$0xf] }
 0x151   : > { %v10228_v22 = vld [vmem:[#allocation3 + $0x80] ss:$12 sps:$4 sm:$0xff]   ;;  %v10230_v43 = vld [vmem:[#allocation3 + $0xb0] ss:$12 sps:$4 sm:$0xff]   ;;  %v10231_v49 = vld [vmem:[#allocation3 + $0xc8] ss:$12 sps:$4 sm:$0xff]  }
 0x155   : > { %2966 = vmatmul.mubr.bf16.gmra.mxu1 %v10223_v61 }
 0x156   : > { %2973 = vmatprep.mubr.bf16.mxu1 %v10921_v13  ;;  %v9944_v13 = vld [vmem:[#allocation7 + $0x1b8] sm:$0xff]  }
 0x157   : > { %2548 = vmatmul.mubr.bf16.gmra.mxu0 %v11038_v12 }
 0x158   : > { %2555 = vmatprep.mubr.bf16.mxu0 %v9939_v0  ;;  %v1761_v0 = vrot.slane %v1581_v60, 5 }
 0x15d   : > { %2974 = vmatmul.mubr.bf16.gmra.mxu1 %v10923_v14  ;;  %v9480_v14 = vpop.f32.mrf.mxu1 }
 0x15e   : > { %2981 = vmatprep.mubr.bf16.mxu1 %v10946_v26  ;;  %v9949_v26 = vld [vmem:[#allocation7 + $0x1a8] sm:$0xff]  }
 0x15f   : > { %2556 = vmatmul.mubr.bf16.gmra.mxu0 %v9941_v3  ;;  %v8662_v9 = vpop.f32.mrf.mxu0 }
 0x160   : > { %9526 = vmatprep.mubr.bf16.mxu0 %v9942_v55 }
 0x161   : > { %v8663_v15 = vpop.f32.mrf.mxu0 }
 0x162   : > { %v8664_v16 = vadd.f32 %v8663_v15, %v8662_v9 }
 0x165   : > { %2982 = vmatmul.mubr.bf16.gmra.mxu1 %v10950_v28  ;;  %v9951_v28 = vld [vmem:[#allocation7 + $0x1e0] sm:$0xff]  }
 0x166   : > { %2989 = vmatprep.mubr.bf16.mxu1 %v10967_v62  ;;  %v2598_v62 = vpop.f32.mrf.mxu1 }
 0x167   : > { %9527 = vmatmul.mubr.bf16.vlgmr.msra.gmra.mxu0 %v10224_v6  ;;  %v11052_v18 = vadd.f32 %v8664_v16, %v2598_v62  ;;  %v10232_v6 = vld [vmem:[#allocation3 + $0xe0] ss:$12 sps:$4 sm:$0xff]  }
 0x168   : > { %8919 = vmatpush3.bf16.msra.mxu0 %v9944_v13  ;;  %9530 = vmatprep.mubr.bf16.mxu0 %v10225_v7  ;;  %v1580_v13 = vld [vmem:[#allocation2 + $0xcc] sm:$0xe] }
 0x169   : > { %8920 = vmatprep.subr.bf16.mxu0 %v9946_v4  ;;  %v1582_v4 = vld [vmem:[#allocation2 + $0xd4] sm:$0x1] }
 0x16c   : > { %8921 = vmatpush3.bf16.msra.mxu0 %v9947_v8  ;;  %v8180_v8 = vrot.slane %v1580_v13, 9  ;;  %v930_v13 = vld [vmem:[#allocation2 + $0xcc] sm:$0xf] }
 0x16d   : > { %2990 = vmatmul.mubr.bf16.gmra.mxu1 %v10969_v63  ;;  %8922 = vmatprep.subr.bf16.mxu0 %v9948_v5  ;;  %v9481_v63 = vpop.f32.mrf.mxu1  ;;  %v1764_v5 = vrot.slane %v1582_v4, 5  ;;  %966 = vst [vmem:[#allocation3 + $0x198] sm:$0xf] %v930_v13 }
 0x16e   : > { %2997 = vmatprep.mubr.bf16.mxu1 %v10977_v33  ;;  %v11049_v33 = vpop.f32.mrf.mxu0 }
 0x16f   : > { %9531 = vmatmul.mubr.bf16.gmra.mxu0 %v10226_v10  ;;  %v11056_v17 = vpop.f32.mrf.mxu1  ;;  %v1019_v10 = vld [vmem:[#allocation2 + $0xcc] sm:$0xf] }
 0x170   : > { %9534 = vmatprep.mubr.bf16.mxu0 %v10227_v45  ;;  %8923 = vmatpush3.bf16.msra.mxu0 %v9949_v26  ;;  %v11054_v19 = vpop.f32.mrf.mxu0  ;;  %v1762_v26 = vsel %vm10653_vm10, %v8180_v8, %v1761_v0  ;;  %v1020_v45 = vld [vmem:[#allocation2 + $0xd0] sm:$0xf]  ;;  %v1437_v15 = vshll.u32 %v1019_v10, 16  ;;  %v10236_v8 = vld [vmem:[#allocation3 + $0x140] ss:$12 sps:$4 sm:$0xff]  }
 0x171   : > { %8924 = vmatprep.subr.bf16.mxu0 %v9951_v28  ;;  %1836 = vst [vmem:[#allocation3 + $0x1a0] sm:$0xf] %v1762_v26  ;;  %v1447_v16 = vshrl.u32 %v1020_v45, 16 }
 0x172   : > { %v8668_v30 = vpop.f32.mrf.mxu0 }
 0x174   : > { %8925 = vmatpush3.bf16.msra.mxu0 %v9952_v11  ;;  %v8669_v32 = vpop.f32.mrf.mxu0  ;;  %v1434_v11 = vshrl.u32 %v1019_v10, 16 }
 0x175   : > { %2998 = vmatmul.mubr.bf16.gmra.mxu1 %v10979_v38  ;;  %8926 = vmatprep.subr.bf16.mxu0 %v9953_v47  ;;  %v10229_v38 = vld [vmem:[#allocation3 + $0x98] ss:$12 sps:$4 sm:$0xff]   ;;  %v8670_v25 = vadd.f32 %v8669_v32, %v8668_v30  ;;  %v1443_v47 = vshll.u32 %v1020_v45, 16  ;;  %v9964_v45 = vld [vmem:[#allocation3 + $0x50] ss:$12 sps:$4 sm:$0xff]  }
 0x176   : > { %3005 = vmatprep.mubr.bf16.mxu1 %v10987_v57  ;;  %v11059_v57 = vpop.f32.mrf.mxu1  ;;  %v8671_v39 = vpop.f32.mrf.mxu0 }
 0x177   : > { %9535 = vmatmul.mubr.bf16.gmra.mxu0 %v10228_v22  ;;  %v11062_v24 = vadd.f32 %v9480_v14, %v8670_v25  ;;  %v10233_v14 = vld [vmem:[#allocation3 + $0xf8] ss:$12 sps:$4 sm:$0xff]   ;;  %v10234_v22 = vld [vmem:[#allocation3 + $0x110] ss:$12 sps:$4 sm:$0xff]  }
 0x178   : > { %9538 = vmatprep.mubr.bf16.mxu0 %v10229_v38  ;;  %8927 = vmatpush3.bf16.msra.mxu0 %v9954_v44  ;;  %v2614_v23 = vpop.f32.mrf.mxu1  ;;  %v8672_v42 = vpop.f32.mrf.mxu0  ;;  %v1436_v44 = vrot.slane %v1434_v11, 4  ;;  %v10235_v38 = vld [vmem:[#allocation3 + $0x128] ss:$12 sps:$4 sm:$0xff]  }
 0x179   : > { %8928 = vmatprep.subr.bf16.mxu0 %v9956_v20  ;;  %v8673_v46 = vadd.f32 %v8672_v42, %v8671_v39  ;;  %v1439_v20 = vrot.slane %v1437_v15, 5  ;;  %v9971_v11 = vld [vmem:[#allocation3 + $0x68] ss:$12 sps:$4 sm:$0xff]  }
 0x17a   : > { %v11067_v52 = vpop.f32.mrf.mxu1 }
 0x17b   : > { %v11064_v51 = vadd.f32 %v9481_v63, %v8673_v46  ;;  %v1440_v32 = vor.u32 %v1439_v20, %v1436_v44  ;;  %v4740_v44 = vld [vmem:[#allocation2 + $0xd0] sm:$0xf]  ;;  %v4828_v20 = vld [vmem:[#allocation2 + $0xcc] sm:$0xf] }
 0x17c   : > { %8929 = vmatpush3.bf16.msra.mxu0 %v9957_v21  ;;  %v2617_v2 = vpop.f32.mrf.mxu1  ;;  %v1445_v21 = vrot.slane %v1443_v47, 5 }
 0x17d   : > { %3006 = vmatmul.mubr.bf16.gmra.mxu1 %v10992_v1  ;;  %8930 = vmatprep.subr.bf16.mxu0 %v9958_v27  ;;  %v9962_v1 = vld [vmem:[#allocation7 + $0x180] sm:$0xff]   ;;  %v1021_v27 = vld [vmem:[#allocation2 + $0xd4] sm:$0x1] }
 0x17e   : > { %3013 = vmatprep.mubr.bf16.mxu1 %v10996_v31  ;;  %v8674_v31 = vpop.f32.mrf.mxu0  ;;  %v1453_v25 = vshll.u32 %v1021_v27, 16  ;;  %v5243_v27 = vshll.u32 %v4828_v20, 16 }
 0x17f   : > { %9539 = vmatmul.mubr.bf16.gmra.mxu0 %v10230_v43 }
 0x180   : > { %9542 = vmatprep.mubr.bf16.mxu0 %v10231_v49  ;;  %8931 = vmatpush3.bf16.msra.mxu0 %v9959_v35  ;;  %v8675_v55 = vpop.f32.mrf.mxu0  ;;  %v11077_v62 = vpop.f32.mrf.mxu1  ;;  %v1455_v42 = vrot.slane %v1453_v25, 5  ;;  %v5386_v49 = vld [vmem:[#allocation2 + $0xcc] sm:$0xe] }
 0x181   : > { %8932 = vmatprep.subr.bf16.mxu0 %v9961_v41  ;;  %v8676_v58 = vadd.f32 %v8675_v55, %v8674_v31  ;;  %v1441_v41 = vrot.slane %v1440_v32, 4  ;;  %v5388_v31 = vld [vmem:[#allocation2 + $0xd4] sm:$0x1] }
 0x182   : > { %v8677_v61 = vpop.f32.mrf.mxu0  ;;  %v11082_v63 = vpop.f32.mrf.mxu1 }
 0x183   : > { %v11070_v3 = vadd.f32 %v8676_v58, %v2614_v23  ;;  %v1446_v55 = vsel %vm10687_vm13, %v1441_v41, %v1445_v21 }
 0x184   : > { %8933 = vmatpush3.bf16.msra.mxu0 %v9962_v1  ;;  %v8678_v7 = vpop.f32.mrf.mxu0  ;;  %v11085_v35 = vpop.f32.mrf.mxu1  ;;  %v5387_v1 = vld [vmem:[#allocation2 + $0xd0] sm:$0xf]  ;;  %1527 = vst [vmem:[#allocation3 + $0x19c] sm:$0xf] %v1446_v55 }
 0x185   : > { %3014 = vmatmul.mubr.bf16.gmra.mxu1 %v11004_v53  ;;  %v1763_v53 = vrot.slane %v1761_v0, 4  ;;  %v8402_v0 = vrot.slane %v5386_v49, 9 }
 0x186   : > { %3021 = vmatprep.mubr.bf16.mxu1 %v11006_v54  ;;  %v8679_v54 = vadd.f32 %v8678_v7, %v8677_v61  ;;  %v11097_v4 = vpop.f32.mrf.mxu1  ;;  %v931_v7 = vld [vmem:[#allocation2 + $0xd0] sm:$0xf] }
 0x187   : > { %9543 = vmatmul.mubr.bf16.gmra.mxu0 %v10232_v6  ;;  %v1765_v28 = vsel %vm10653_vm10, %v1763_v53, %v1764_v5  ;;  %967 = vst [vmem:[#allocation3 + $0x1a4] sm:$0xf] %v931_v7 }
 0x188   : > { %9546 = vmatprep.mubr.bf16.mxu0 %v10233_v14  ;;  %v11079_v9 = vadd.f32 %v8679_v54, %v2617_v2  ;;  %1837 = vst [vmem:[#allocation3 + $0x1ac] sm:$0xf] %v1765_v28  ;;  %v8680_v30 = vpop.f32.mrf.mxu0  ;;  %v5564_v2 = vrot.slane %v5387_v1, 5  ;;  %v10237_v14 = vld [vmem:[#allocation3 + $0x158] ss:$12 sps:$4 sm:$0xff]  }
 0x189   : > { %v9965_v28 = vld [vmem:[#allocation3 + $0x34] ss:$12 sps:$4 sm:$0xff]   ;;  %4776 = vst [vmem:[#allocation3 + $0x1a4] sm:$0xf] %v4740_v44 }
 0x18a   : > { %v8681_v39 = vpop.f32.mrf.mxu0  ;;  %v5566_v5 = vrot.slane %v5564_v2, 4 }
 0x18b   : > { %v8682_v43 = vadd.f32 %v8681_v39, %v8680_v30 }
 0x18c   : > { %v8683_v46 = vpop.f32.mrf.mxu0 }
 0x18d   : > { %3022 = vmatmul.mubr.bf16.gmra.mxu1 %v11016_v34  ;;  %v1449_v34 = vrot.slane %v1447_v16, 4  ;;  %v11093_v60 = vadd.f32 %v11059_v57, %v8682_v43  ;;  %v5565_v57 = vsel %vm10653_vm10, %v8402_v0, %v5564_v2  ;;  %v11107_v10 = vpop.f32.mrf.mxu1  ;;  %v10238_v16 = vld [vmem:[#allocation3 + $0x170] ss:$12 sps:$4 sm:$0xff]  }
 0x18e   : > { %3029 = vmatprep.mubr.bf16.mxu1 %v11018_v36  ;;  %v8684_v6 = vpop.f32.mrf.mxu0 }
 0x18f   : > { %9547 = vmatmul.mubr.bf16.gmra.mxu0 %v10234_v22  ;;  %v1450_v36 = vor.u32 %v1449_v34, %v1445_v21  ;;  %v11095_v61 = vld [vmem:[#allocation3 + $0x1a0] ss:$12 sps:$4 sm:$0xff]   ;;  %v8685_v53 = vadd.f32 %v8684_v6, %v8683_v46  ;;  %v11109_v15 = vpop.f32.mrf.mxu1  ;;  %v9967_v21 = vld [vmem:[#allocation3 + $0x30] ss:$12 sps:$4 sm:$0xff]   ;;  %v5240_v22 = vshrl.u32 %v4828_v20, 16 }
 0x190   : > { %9550 = vmatprep.mubr.bf16.mxu0 %v10235_v38  ;;  %5639 = vst [vmem:[#allocation3 + $0x1a0] sm:$0xf] %v5565_v57  ;;  %v4830_v34 = vld [vmem:[#allocation2 + $0xd4] sm:$0x1]  ;;  %v9968_v38 = vld [vmem:[#allocation3 + $0x4c] ss:$12 sps:$4 sm:$0xff]  }
 0x191   : > { %v1451_v23 = vrot.slane %v1450_v36, 4  ;;  %v11102_v54 = vadd.f32 %v11067_v52, %v8685_v53  ;;  %v4739_v52 = vld [vmem:[#allocation2 + $0xcc] sm:$0xf]  ;;  %v11113_v30 = vpop.f32.mrf.mxu1  ;;  %v5259_v39 = vshll.u32 %v4830_v34, 16  ;;  %v5242_v41 = vrot.slane %v5240_v22, 4 }
 0x192   : > { %4775 = vst [vmem:[#allocation3 + $0x198] sm:$0xf] %v4739_v52  ;;  %v9976_v52 = vld [vmem:[#allocation3 + $0x7c] ss:$12 sps:$4 sm:$0xff]  }
 0x193   : > { %v1456_v58 = vsel %vm10687_vm13, %v1451_v23, %v1455_v42  ;;  %v5245_v23 = vrot.slane %v5243_v27, 5  ;;  %v9972_v42 = vld [vmem:[#allocation3 + $0x80] ss:$12 sps:$4 sm:$0xff]   ;;  %v5261_v1 = vrot.slane %v5259_v39, 5  ;;  %v9995_v27 = vld [vmem:[#allocation3 + $0xf8] ss:$12 sps:$4 sm:$0xff]  }
 0x194   : > { %1528 = vst [vmem:[#allocation3 + $0x1a8] sm:$0xf] %v1456_v58  ;;  %v9978_v39 = vld [vmem:[#allocation3 + $0x78] ss:$12 sps:$4 sm:$0xff]  }
 0x195   : > { %3030 = vmatmul.mubr.bf16.gmra.mxu1 %v11032_v56  ;;  %v9963_v56 = vld [vmem:[#allocation3 + $0x38] ss:$12 sps:$4 sm:$0xff]   ;;  %v5246_v58 = vor.u32 %v5245_v23, %v5242_v41  ;;  %v9981_v41 = vld [vmem:[#allocation3 + $0x94] ss:$12 sps:$4 sm:$0xff]  }
 0x196   : > { %3037 = vmatprep.mubr.bf16.mxu1 %v11034_v59  ;;  %v5567_v59 = vrot.slane %v5388_v31, 5  ;;  %v9979_v31 = vld [vmem:[#allocation3 + $0x98] ss:$12 sps:$4 sm:$0xff]  }
 0x197   : > { %9551 = vmatmul.mubr.bf16.gmra.mxu0 %v10236_v8  ;;  %v5247_v13 = vrot.slane %v5246_v58, 4  ;;  %v9970_v8 = vld [vmem:[#allocation3 + $0x48] ss:$12 sps:$4 sm:$0xff]   ;;  %v10004_v58 = vld [vmem:[#allocation3 + $0x140] ss:$12 sps:$4 sm:$0xff]  }
 0x198   : > { %9554 = vmatprep.mubr.bf16.mxu0 %v10237_v14  ;;  %v5568_v26 = vsel %vm10653_vm10, %v5566_v5, %v5567_v59  ;;  %v9973_v5 = vld [vmem:[#allocation3 + $0x64] ss:$12 sps:$4 sm:$0xff]  }
 0x199   : > { %5640 = vst [vmem:[#allocation3 + $0x1ac] sm:$0xf] %v5568_v26 }
 0x19a   : > { %v8686_v32 = vpop.f32.mrf.mxu0 }
 0x19b   : > { %v11111_v47 = vld [vmem:[#allocation3 + $0x19c] ss:$12 sps:$4 sm:$0xff]  }
 0x19c   : > { %v8687_v43 = vpop.f32.mrf.mxu0 }
 0x19d   : > { %3038 = vmatmul.mubr.bf16.gmra.mxu1 %v11038_v12  ;;  %v4829_v12 = vld [vmem:[#allocation2 + $0xd0] sm:$0xf]  ;;  %v8688_v55 = vadd.f32 %v8687_v43, %v8686_v32  ;;  %v9996_v43 = vld [vmem:[#allocation3 + $0x110] ss:$12 sps:$4 sm:$0xff]  }
 0x19e   : > { %9574 = vmatprep.mubr.bf16.mxu1 %v9963_v56  ;;  %v5249_v36 = vshll.u32 %v4829_v12, 16  ;;  %v5253_v25 = vshrl.u32 %v4829_v12, 16  ;;  %v11115_v56 = vpop.f32.mrf.mxu1  ;;  %v8689_v0 = vpop.f32.mrf.mxu0 }
 0x19f   : > { %9555 = vmatmul.mubr.bf16.gmra.mxu0 %v10238_v16  ;;  %v11118_v59 = vadd.f32 %v8688_v55, %v11082_v63  ;;  %v9975_v16 = vld [vmem:[#allocation3 + $0x60] ss:$12 sps:$4 sm:$0xff]  }
 0x1a0   : > { %3752 = vmatprep.mubr.bf16.mxu0 %v9965_v28  ;;  %v5251_v46 = vrot.slane %v5249_v36, 5  ;;  %v5255_v49 = vrot.slane %v5253_v25, 4  ;;  %v8690_v6 = vpop.f32.mrf.mxu0  ;;  %v11122_v14 = vpop.f32.mrf.mxu1  ;;  %v9980_v28 = vld [vmem:[#allocation3 + $0xb0] ss:$12 sps:$4 sm:$0xff]  }
 0x1a1   : > { %v8691_v53 = vadd.f32 %v8690_v6, %v8689_v0 }
 0x1a2   : > { %v5256_v2 = vor.u32 %v5255_v49, %v5251_v46  ;;  %v5252_v57 = vsel %vm10687_vm13, %v5247_v13, %v5251_v46  ;;  %v10003_v46 = vld [vmem:[#allocation3 + $0x128] ss:$12 sps:$4 sm:$0xff]  }
 0x1a3   : > { %5333 = vst [vmem:[#allocation3 + $0x19c] sm:$0xf] %v5252_v57  ;;  %v11127_v63 = vadd.f32 %v8691_v53, %v11097_v4  ;;  %v9988_v4 = vld [vmem:[#allocation3 + $0xe0] ss:$12 sps:$4 sm:$0xff]   ;;  %v9989_v57 = vld [vmem:[#allocation3 + $0xc4] ss:$12 sps:$4 sm:$0xff]  }
 0x1a4   : > { %v5257_v7 = vrot.slane %v5256_v2, 4 }
 0x1a5   : > { %9575 = vmatmul.mubr.bf16.vlgmr.msra.gmra.mxu1 %v9964_v45  ;;  %v9987_v45 = vld [vmem:[#allocation3 + $0xc8] ss:$12 sps:$4 sm:$0xff]  }
 0x1a6   : > { %9578 = vmatprep.mubr.bf16.mxu1 %v9971_v11  ;;  %v5262_v26 = vsel %vm10687_vm13, %v5257_v7, %v5261_v1  ;;  %v11129_v11 = vpop.f32.mrf.mxu1  ;;  %v9984_v1 = vld [vmem:[#allocation3 + $0xac] ss:$12 sps:$4 sm:$0xff]  }
 0x1a7   : > { %3753 = vmatmul.mubr.bf16.vlgmr.msra.gmra.mxu0 %v9967_v21  ;;  %5334 = vst [vmem:[#allocation3 + $0x1a8] sm:$0xf] %v5262_v26 }
 0x1a8   : > { %3760 = vmatprep.mubr.bf16.mxu0 %v9968_v38  ;;  %v11131_v44 = vpop.f32.mrf.mxu1 }
 0x1aa   : > { %v11133_v12 = vpop.f32.mrf.mxu1 }
 0x1ac   : > { %v8692_v20 = vpop.f32.mrf.mxu0 }
 0x1ad   : > { %9579 = vmatmul.mubr.bf16.gmra.mxu1 %v9972_v42 }
 0x1ae   : > { %9582 = vmatprep.mubr.bf16.mxu1 %v9979_v31  ;;  %v8693_v21 = vpop.f32.mrf.mxu0 }
 0x1af   : > { %3761 = vmatmul.mubr.bf16.gmra.mxu0 %v9970_v8  ;;  %v8694_v34 = vadd.f32 %v8693_v21, %v8692_v20  ;;  %v9986_v8 = vld [vmem:[#allocation3 + $0xa8] ss:$12 sps:$4 sm:$0xff]  }
 0x1b0   : > { %3768 = vmatprep.mubr.bf16.mxu0 %v9973_v5  ;;  %v8695_v22 = vpop.f32.mrf.mxu0  ;;  %v9992_v20 = vld [vmem:[#allocation3 + $0xdc] ss:$12 sps:$4 sm:$0xff]  }
 0x1b1   : > { %v11136_v38 = vadd.f32 %v11077_v62, %v8694_v34  ;;  %v11138_v36 = vpop.f32.mrf.mxu1  ;;  %v9983_v62 = vld [vmem:[#allocation3 + $0x90] ss:$12 sps:$4 sm:$0xff]  }
 0x1b2   : > { %v8696_v32 = vpop.f32.mrf.mxu0 }
 0x1b3   : > { %v8697_v25 = vadd.f32 %v8696_v32, %v8695_v22  ;;  %v11143_v42 = vpop.f32.mrf.mxu1 }
 0x1b5   : > { %9583 = vmatmul.mubr.bf16.gmra.mxu1 %v9980_v28  ;;  %v11141_v23 = vadd.f32 %v11085_v35, %v8697_v25  ;;  %v11145_v49 = vpop.f32.mrf.mxu1  ;;  %v10011_v35 = vld [vmem:[#allocation3 + $0x158] ss:$12 sps:$4 sm:$0xff]  }
 0x1b6   : > { %9586 = vmatprep.mubr.bf16.mxu1 %v9987_v45  ;;  %v10012_v45 = vld [vmem:[#allocation3 + $0x170] ss:$12 sps:$4 sm:$0xff]   ;;  %v9994_v25 = vld [vmem:[#allocation3 + $0xd8] ss:$12 sps:$4 sm:$0xff]  }
 0x1b7   : > { %3769 = vmatmul.mubr.bf16.gmra.mxu0 %v9975_v16  ;;  %v11147_v55 = vpop.f32.mrf.mxu1  ;;  %v10013_v16 = vld [vmem:[#allocation3 + $0x188] ss:$12 sps:$4 sm:$0xff]  }
 0x1b8   : > { %3776 = vmatprep.mubr.bf16.mxu0 %v9976_v52 }
 0x1bd   : > { %9587 = vmatmul.mubr.bf16.gmra.mxu1 %v9988_v4 }
 0x1be   : > { %9590 = vmatprep.mubr.bf16.mxu1 %v9995_v27 }
 0x1bf   : > { %3777 = vmatmul.mubr.bf16.gmra.mxu0 %v9978_v39 }
 0x1c0   : > { %3784 = vmatprep.mubr.bf16.mxu0 %v9981_v41  ;;  %v8698_v31 = vpop.f32.mrf.mxu0 }
 0x1c2   : > { %v8699_v0 = vpop.f32.mrf.mxu0 }
 0x1c3   : > { %v8700_v2 = vadd.f32 %v8699_v0, %v8698_v31  ;;  %v11149_v6 = vpop.f32.mrf.mxu1  ;;  %v10019_v31 = vld [vmem:[#allocation9 + $0x178] sm:$0xff]  }
 0x1c4   : > { %v8701_v13 = vpop.f32.mrf.mxu0  ;;  %9606 = vmatprep.subr.bf16.mxu0 %v10019_v31 }
 0x1c5   : > { %9591 = vmatmul.mubr.bf16.gmra.mxu1 %v9996_v43  ;;  %v11152_v7 = vadd.f32 %v8700_v2, %v11109_v15  ;;  %v11154_v26 = vpop.f32.mrf.mxu1  ;;  %v9991_v15 = vld [vmem:[#allocation3 + $0xc0] ss:$12 sps:$4 sm:$0xff]   ;;  %9607 = vmatpush3.bf16.msra.mxu0 %v10019_v31 }
 0x1c6   : > { %9594 = vmatprep.mubr.bf16.mxu1 %v10003_v46  ;;  %v8702_v53 = vpop.f32.mrf.mxu0  ;;  %v9997_v43 = vld [vmem:[#allocation3 + $0xf4] ss:$12 sps:$4 sm:$0xff]   ;;  %v10017_v46 = vld [vmem:[#allocation9 + $0x138] sm:$0xff]  }
 0x1c7   : > { %3785 = vmatmul.mubr.bf16.gmra.mxu0 %v9983_v62  ;;  %v8703_v5 = vadd.f32 %v8702_v53, %v8701_v13  ;;  %v11159_v52 = vpop.f32.mrf.mxu1  ;;  %9054 = vmatprep.subr.bf16.mxu1 %v10017_v46  ;;  %v10000_v2 = vld [vmem:[#allocation3 + $0x10c] ss:$12 sps:$4 sm:$0xff]   ;;  %v8667_v13 = vadd.f32 %v11054_v19, %v11049_v33  ;;  %v10020_v53 = vld [vmem:[#allocation9 + $0x130] sm:$0xff]  }
 0x1c8   : > { %3792 = vmatprep.mubr.bf16.mxu0 %v9984_v1  ;;  %v10018_v1 = vld [vmem:[#allocation9 + $0xf8] sm:$0xff]   ;;  %v10005_v46 = vld [vmem:[#allocation3 + $0x124] ss:$12 sps:$4 sm:$0xff]  }
 0x1c9   : > { %v11157_v28 = vadd.f32 %v8703_v5, %v11115_v56  ;;  %v11161_v34 = vpop.f32.mrf.mxu1  ;;  %9055 = vmatpush3.bf16.msra.mxu1 %v10018_v1  ;;  %v10021_v5 = vld [vmem:[#allocation9 + $0xf0] sm:$0xff]  }
 0x1ca   : > { %9056 = vmatprep.subr.bf16.mxu1 %v10020_v53 }
 0x1cd   : > { %9595 = vmatmul.mubr.bf16.gmra.mxu1 %v10004_v58 }
 0x1ce   : > { %9598 = vmatprep.mubr.bf16.mxu1 %v10011_v35  ;;  %9057 = vmatpush3.bf16.msra.mxu1 %v10021_v5  ;;  %v10007_v5 = vld [vmem:[#allocation3 + $0x120] ss:$12 sps:$4 sm:$0xff]  }
 0x1cf   : > { %3793 = vmatmul.mubr.bf16.gmra.mxu0 %v9986_v8 }
 0x1d0   : > { %3800 = vmatprep.mubr.bf16.mxu0 %v9989_v57 }
 0x1d1   : > { %v8704_v21 = vpop.f32.mrf.mxu0 }
 0x1d3   : > { %v8705_v4 = vpop.f32.mrf.mxu0 }
 0x1d4   : > { %v11163_v22 = vadd.f32 %v8705_v4, %v8704_v21 }
 0x1d5   : > { %9599 = vmatmul.mubr.bf16.gmra.mxu1 %v10012_v45  ;;  %v8707_v56 = vpop.f32.mrf.mxu0 }
 0x1d6   : > { %9602 = vmatprep.mubr.bf16.mxu1 %v10013_v16 }
 0x1d7   : > { %3801 = vmatmul.mubr.bf16.gmra.mxu0 %v9991_v15  ;;  %v11165_v27 = vpop.f32.mrf.mxu1  ;;  %v8708_v32 = vpop.f32.mrf.mxu0 }
 0x1d8   : > { %3808 = vmatprep.mubr.bf16.mxu0 %v9992_v20  ;;  %v11168_v39 = vadd.f32 %v8708_v32, %v8707_v56  ;;  %v2602_v20 = vadd.f32 %v8667_v13, %v11056_v17  ;;  %v10002_v32 = vld [vmem:[#allocation3 + $0x108] ss:$12 sps:$4 sm:$0xff]  }
 0x1d9   : > { %v11170_v41 = vpop.f32.mrf.mxu1 }
 0x1db   : > { %v11172_v62 = vpop.f32.mrf.mxu1 }
 0x1dd   : > { %9603 = vmatmul.mubr.bf16.gmra.mxu1 %v11095_v61  ;;  %v11174_v58 = vpop.f32.mrf.mxu1  ;;  %v9999_v61 = vld [vmem:[#allocation3 + $0xf0] ss:$12 sps:$4 sm:$0xff]  }
 0x1df   : > { %3809 = vmatmul.mubr.bf16.gmra.mxu0 %v9994_v25  ;;  %v8798_v0 = vpop.f32.mrf.mxu1 }
 0x1e0   : > { %3816 = vmatprep.mubr.bf16.mxu0 %v9997_v43 }
 0x1e1   : > { %v8799_v35 = vpop.f32.mrf.mxu1 }
 0x1e2   : > { %v8800_v8 = vadd.f32 %v8799_v35, %v8798_v0 }
 0x1e3   : > { %v8801_v57 = vpop.f32.mrf.mxu1 }
 0x1e4   : > { %v11179_v16 = vadd.f32 %v8800_v8, %v11052_v18 }
 0x1e5   : > { %v8802_v15 = vpop.f32.mrf.mxu1 }
 0x1e6   : > { %v8803_v4 = vadd.f32 %v8802_v15, %v8801_v57 }
 0x1e7   : > { %v8710_v45 = vpop.f32.mrf.mxu0  ;;  %3817 = vmatmul.mubr.bf16.gmra.mxu0 %v9999_v61 }
 0x1e8   : > { %3824 = vmatprep.mubr.bf16.mxu0 %v10000_v2  ;;  %v11184_v25 = vadd.f32 %v8803_v4, %v2602_v20  ;;  %v10008_v20 = vld [vmem:[#allocation3 + $0x13c] ss:$12 sps:$4 sm:$0xff]  }
 0x1e9   : > { %v8711_v21 = vpop.f32.mrf.mxu0 }
 0x1ea   : > { %v11182_v56 = vadd.f32 %v8711_v21, %v8710_v45 }
 0x1eb   : > { %v8804_v33 = vpop.f32.mrf.mxu1  ;;  %v8713_v19 = vpop.f32.mrf.mxu0 }
 0x1ed   : > { %v8805_v43 = vpop.f32.mrf.mxu1  ;;  %v8714_v1 = vpop.f32.mrf.mxu0 }
 0x1ee   : > { %v8806_v18 = vadd.f32 %v8805_v43, %v8804_v33  ;;  %v11186_v31 = vadd.f32 %v8714_v1, %v8713_v19 }
 0x1ef   : > { %v8807_v0 = vpop.f32.mrf.mxu1  ;;  %v8716_v61 = vpop.f32.mrf.mxu0  ;;  %3825 = vmatmul.mubr.bf16.gmra.mxu0 %v10002_v32 }
 0x1f0   : > { %v11189_v17 = vadd.f32 %v8806_v18, %v11062_v24  ;;  %3832 = vmatprep.mubr.bf16.mxu0 %v10005_v46 }
 0x1f1   : > { %v8808_v35 = vpop.f32.mrf.mxu1  ;;  %v8717_v2 = vpop.f32.mrf.mxu0 }
 0x1f2   : > { %v8809_v13 = vadd.f32 %v8808_v35, %v8807_v0  ;;  %v11191_v8 = vadd.f32 %v8717_v2, %v8716_v61  ;;  %v10010_v61 = vld [vmem:[#allocation3 + $0x138] ss:$12 sps:$4 sm:$0xff]  }
 0x1f3   : > { %v8719_v57 = vpop.f32.mrf.mxu0 }
 0x1f4   : > { %v11194_v45 = vadd.f32 %v8809_v13, %v11064_v51 }
 0x1f5   : > { %v8810_v53 = vpop.f32.mrf.mxu1  ;;  %v8720_v21 = vpop.f32.mrf.mxu0 }
 0x1f6   : > { %v11196_v33 = vadd.f32 %v8720_v21, %v8719_v57 }
 0x1f7   : > { %v8811_v15 = vpop.f32.mrf.mxu1  ;;  %v8722_v19 = vpop.f32.mrf.mxu0  ;;  %3833 = vmatmul.mubr.bf16.gmra.mxu0 %v10007_v5  ;;  %v10022_v5 = vld [vmem:[#allocation9 + $0x128] sm:$0xff]  }
 0x1f8   : > { %v8812_v4 = vadd.f32 %v8811_v15, %v8810_v53  ;;  %3840 = vmatprep.mubr.bf16.mxu0 %v10008_v20  ;;  %9058 = vmatprep.subr.bf16.mxu1 %v10022_v5 }
 0x1f9   : > { %v8813_v24 = vpop.f32.mrf.mxu1  ;;  %v8723_v46 = vpop.f32.mrf.mxu0 }
 0x1fa   : > { %v11199_v32 = vadd.f32 %v8812_v4, %v11070_v3  ;;  %v8724_v18 = vadd.f32 %v8723_v46, %v8722_v19 }
 0x1fb   : > { %v8814_v43 = vpop.f32.mrf.mxu1  ;;  %v8725_v51 = vpop.f32.mrf.mxu0 }
 0x1fc   : > { %v8815_v1 = vadd.f32 %v8814_v43, %v8813_v24  ;;  %v11205_v2 = vadd.f32 %v8724_v18, %v11143_v42  ;;  %v10239_v24 = vld [vmem:[#allocation3 + $0x154] ss:$12 sps:$4 sm:$0xff]   ;;  %v10023_v42 = vld [vmem:[#allocation9 + $0xe8] sm:$0xff]  }
 0x1fd   : > { %v8816_v0 = vpop.f32.mrf.mxu1  ;;  %v8726_v53 = vpop.f32.mrf.mxu0  ;;  %v10024_v43 = vld [vmem:[#allocation9 + $0x170] sm:$0xff]   ;;  %9059 = vmatpush3.bf16.msra.mxu1 %v10023_v42 }
 0x1fe   : > { %v11202_v35 = vadd.f32 %v8815_v1, %v11079_v9  ;;  %v11207_v3 = vadd.f32 %v8726_v53, %v8725_v51  ;;  %9608 = vmatprep.subr.bf16.mxu0 %v10024_v43 }
 0x1ff   : > { %v8817_v13 = vpop.f32.mrf.mxu1  ;;  %v8728_v20 = vpop.f32.mrf.mxu0  ;;  %3841 = vmatmul.mubr.bf16.gmra.mxu0 %v10010_v61 }
 0x200   : > { %v8818_v57 = vadd.f32 %v8817_v13, %v8816_v0  ;;  %3848 = vmatprep.mubr.bf16.mxu0 %v10239_v24  ;;  %9609 = vmatpush3.bf16.msra.mxu0 %v10024_v43 }
 0x201   : > { %v8819_v15 = vpop.f32.mrf.mxu1  ;;  %v8729_v9 = vpop.f32.mrf.mxu0 }
 0x202   : > { %v11210_v21 = vadd.f32 %v8818_v57, %v11093_v60  ;;  %v11212_v46 = vadd.f32 %v8729_v9, %v8728_v20  ;;  %v10025_v57 = vld [vmem:[#allocation9 + $0x120] sm:$0xff]  }
 0x203   : > { %v8820_v4 = vpop.f32.mrf.mxu1  ;;  %v8731_v18 = vpop.f32.mrf.mxu0  ;;  %9060 = vmatprep.subr.bf16.mxu1 %v10025_v57  ;;  %v10026_v9 = vld [vmem:[#allocation9 + $0xe0] sm:$0xff]  }
 0x204   : > { %v8821_v19 = vadd.f32 %v8820_v4, %v8819_v15  ;;  %v10240_v15 = vld [vmem:[#allocation3 + $0x150] ss:$12 sps:$4 sm:$0xff]   ;;  %9061 = vmatpush3.bf16.msra.mxu1 %v10026_v9  ;;  %v10035_v9 = vld [vmem:[#allocation9 + $0x158] sm:$0xff]  }
 0x205   : > { %v8822_v1 = vpop.f32.mrf.mxu1  ;;  %v8732_v60 = vpop.f32.mrf.mxu0  ;;  %v10029_v4 = vld [vmem:[#allocation9 + $0x168] sm:$0xff]  }
 0x206   : > { %v11215_v0 = vadd.f32 %v8821_v19, %v11102_v54  ;;  %v11217_v13 = vadd.f32 %v8732_v60, %v8731_v18  ;;  %v10241_v54 = vld [vmem:[#allocation3 + $0x16c] ss:$12 sps:$4 sm:$0xff]   ;;  %9610 = vmatprep.subr.bf16.mxu0 %v10029_v4 }
 0x207   : > { %v8823_v51 = vpop.f32.mrf.mxu1  ;;  %v8734_v5 = vpop.f32.mrf.mxu0  ;;  %3849 = vmatmul.mubr.bf16.gmra.mxu0 %v10240_v15  ;;  %v10027_v15 = vld [vmem:[#allocation9 + $0x118] sm:$0xff]  }
 0x208   : > { %v8824_v61 = vadd.f32 %v8823_v51, %v8822_v1  ;;  %3856 = vmatprep.mubr.bf16.mxu0 %v10241_v54  ;;  %9611 = vmatpush3.bf16.msra.mxu0 %v10029_v4 }
 0x209   : > { %v8825_v53 = vpop.f32.mrf.mxu1  ;;  %v8735_v19 = vpop.f32.mrf.mxu0  ;;  %9062 = vmatprep.subr.bf16.mxu1 %v10027_v15 }
 0x20a   : > { %v11220_v20 = vadd.f32 %v8824_v61, %v11118_v59  ;;  %v8736_v43 = vadd.f32 %v8735_v19, %v8734_v5  ;;  %v10033_v59 = vld [vmem:[#allocation9 + $0x160] sm:$0xff]  }
 0x20b   : > { %v8826_v24 = vpop.f32.mrf.mxu1  ;;  %v11222_v18 = vpop.f32.mrf.mxu0  ;;  %9612 = vmatprep.subr.bf16.mxu0 %v10033_v59  ;;  %v10243_v19 = vld [vmem:[#allocation3 + $0x184] ss:$12 sps:$4 sm:$0xff]  }
 0x20c   : > { %v8827_v42 = vadd.f32 %v8826_v24, %v8825_v53  ;;  %v11228_v60 = vadd.f32 %v8736_v43, %v11154_v26  ;;  %v10028_v53 = vld [vmem:[#allocation9 + $0xd8] sm:$0xff]   ;;  %9613 = vmatpush3.bf16.msra.mxu0 %v10033_v59 }
 0x20d   : > { %v8828_v1 = vpop.f32.mrf.mxu1  ;;  %v11230_v57 = vpop.f32.mrf.mxu0  ;;  %v10242_v24 = vld [vmem:[#allocation3 + $0x168] ss:$12 sps:$4 sm:$0xff]   ;;  %9063 = vmatpush3.bf16.msra.mxu1 %v10028_v53  ;;  %9614 = vmatprep.subr.bf16.mxu0 %v10035_v9 }
 0x20e   : > { %v11225_v51 = vadd.f32 %v8827_v42, %v11127_v63  ;;  %v10030_v42 = vld [vmem:[#allocation9 + $0x110] sm:$0xff]  }
 0x20f   : > { %v8829_v61 = vpop.f32.mrf.mxu1  ;;  %v8740_v4 = vpop.f32.mrf.mxu0  ;;  %3857 = vmatmul.mubr.bf16.gmra.mxu0 %v10242_v24  ;;  %9064 = vmatprep.subr.bf16.mxu1 %v10030_v42  ;;  %v10032_v24 = vld [vmem:[#allocation9 + $0x108] sm:$0xff]   ;;  %v10244_v42 = vld [vmem:[#allocation3 + $0x180] ss:$12 sps:$4 sm:$0xff]  }
 0x210   : > { %v8830_v54 = vadd.f32 %v8829_v61, %v8828_v1  ;;  %3864 = vmatprep.mubr.bf16.mxu0 %v10243_v19  ;;  %v10031_v1 = vld [vmem:[#allocation9 + $0xd0] sm:$0xff]   ;;  %9615 = vmatpush3.bf16.msra.mxu0 %v10035_v9 }
 0x211   : > { %v8831_v5 = vpop.f32.mrf.mxu1  ;;  %v8741_v43 = vpop.f32.mrf.mxu0  ;;  %9065 = vmatpush3.bf16.msra.mxu1 %v10031_v1  ;;  %v3269_v1 = vld [vmem:[#allocation3 + $0x1a4] sm:$0xff] }
 0x212   : > { %v11233_v63 = vadd.f32 %v8830_v54, %v11136_v38  ;;  %v11235_v61 = vadd.f32 %v8741_v43, %v8740_v4  ;;  %v10037_v54 = vld [vmem:[#allocation9 + $0x150] sm:$0xff]   ;;  %9066 = vmatprep.subr.bf16.mxu1 %v10032_v24  ;;  %v3267_v43 = vld [vmem:[#allocation3 + $0x198] sm:$0xff] }
 0x213   : > { %v8832_v26 = vpop.f32.mrf.mxu1  ;;  %v11237_v59 = vpop.f32.mrf.mxu0  ;;  %9616 = vmatprep.subr.bf16.mxu0 %v10037_v54 }
 0x214   : > { %v8833_v40 = vadd.f32 %v8832_v26, %v8831_v5  ;;  %v10034_v5 = vld [vmem:[#allocation9 + $0xc8] sm:$0xff]   ;;  %9617 = vmatpush3.bf16.msra.mxu0 %v10037_v54 }
 0x215   : > { %v8834_v15 = vpop.f32.mrf.mxu1  ;;  %v11242_v19 = vpop.f32.mrf.mxu0  ;;  %9067 = vmatpush3.bf16.msra.mxu1 %v10034_v5 }
 0x216   : > { %v11240_v38 = vadd.f32 %v8833_v40, %v11141_v23  ;;  %v10039_v40 = vld [vmem:[#allocation9 + $0x148] sm:$0xff]   ;;  %9068 = vmatprep.subr.bf16.mxu1 %v10036_v50 }
 0x217   : > { %v8835_v53 = vpop.f32.mrf.mxu1  ;;  %v8746_v4 = vpop.f32.mrf.mxu0  ;;  %3865 = vmatmul.mubr.bf16.gmra.mxu0 %v10244_v42  ;;  %9618 = vmatprep.subr.bf16.mxu0 %v10039_v40 }
 0x218   : > { %v8836_v29 = vadd.f32 %v8835_v53, %v8834_v15  ;;  %3872 = vmatprep.mubr.bf16.mxu0 %v11111_v47  ;;  %9619 = vmatpush3.bf16.msra.mxu0 %v10039_v40 }
 0x219   : > { %v8837_v26 = vpop.f32.mrf.mxu1  ;;  %v8747_v15 = vpop.f32.mrf.mxu0  ;;  %9069 = vmatpush3.bf16.msra.mxu1 %v10038_v37 }
 0x21a   : > { %v11245_v9 = vadd.f32 %v8836_v29, %v11152_v7  ;;  %v8748_v24 = vadd.f32 %v8747_v15, %v8746_v4  ;;  %v8325_v29 = vcombine.low %v3267_v43, %v3269_v1 }
 0x21b   : > { %v8838_v23 = vpop.f32.mrf.mxu1  ;;  %v11248_v42 = vpop.f32.mrf.mxu0 }
 0x21c   : > { %v8839_v53 = vadd.f32 %v8838_v23, %v8837_v26  ;;  %v11254_v5 = vadd.f32 %v8748_v24, %v11170_v41  ;;  %v2655_v26 = vadd.f32 %v11107_v10, %v11163_v22 }
 0x21d   : > { %v8840_v54 = vpop.f32.mrf.mxu1  ;;  %v11258_v23 = vpop.f32.mrf.mxu0 }
 0x21e   : > { %v11251_v7 = vadd.f32 %v8839_v53, %v11157_v28  ;;  %v2658_v28 = vadd.f32 %v11113_v30, %v11168_v39 }
 0x21f   : > { %v8841_v47 = vpop.f32.mrf.mxu1  ;;  %v8752_v50 = vpop.f32.mrf.mxu0  ;;  %3873 = vmatmul.mubr.bf16.gmra.mxu0 %v8325_v29 }
 0x220   : > { %12559 = vst [vmem:[#allocation18_spill] sm:$0xff] %v11251_v7  ;;  %v8842_v4 = vadd.f32 %v8841_v47, %v8840_v54  ;;  %v2663_v54 = vadd.f32 %v11182_v56, %v11129_v11 }
 0x221   : > { %v8843_v15 = vpop.f32.mrf.mxu1  ;;  %v8753_v37 = vpop.f32.mrf.mxu0 }
 0x222   : > { %v11260_v40 = vadd.f32 %v8842_v4, %v2655_v26  ;;  %v11264_v41 = vadd.f32 %v8753_v37, %v8752_v50 }
 0x223   : > { %v8844_v43 = vpop.f32.mrf.mxu1  ;;  %v11266_v24 = vpop.f32.mrf.mxu0 }
 0x224   : > { %v8845_v1 = vadd.f32 %v8844_v43, %v8843_v15  ;;  %v2666_v15 = vadd.f32 %v11186_v31, %v11133_v12  ;;  %v10044_v12 = vld [vmem:[#allocation9 + $0x140] sm:$0xff]  }
 0x225   : > { %v8846_v53 = vpop.f32.mrf.mxu1  ;;  %v11272_v29 = vpop.f32.mrf.mxu0  ;;  %9620 = vmatprep.subr.bf16.mxu0 %v10044_v12 }
 0x226   : > { %v11268_v10 = vadd.f32 %v8845_v1, %v2658_v28  ;;  %9621 = vmatpush3.bf16.msra.mxu0 %v10044_v12 }
 0x227   : > { %v8847_v22 = vpop.f32.mrf.mxu1  ;;  %v9528_v4 = vpop.f32.mrf.mxu0 }
 0x228   : > { %v8848_v47 = vadd.f32 %v8847_v22, %v8846_v53  ;;  %v11277_v30 = vadd.f32 %v9528_v4, %v11189_v17  ;;  %v2671_v17 = vadd.f32 %v11122_v14, %v11191_v8  ;;  %v2674_v14 = vadd.f32 %v11131_v44, %v11196_v33 }
 0x229   : > { %v8849_v26 = vpop.f32.mrf.mxu1  ;;  %v3080_v50 = vpop.f32.mrf.mxu0 }
 0x22a   : > { %v11274_v7 = vadd.f32 %v8848_v47, %v2663_v54  ;;  %v11282_v28 = vadd.f32 %v3080_v50, %v11179_v16  ;;  %v11293_v47 = vld [vmem:[#allocation9 + $0xb8] sm:$0xff]  }
 0x22b   : > { %v8850_v39 = vpop.f32.mrf.mxu1  ;;  %v9529_v56 = vpop.f32.mrf.mxu0  ;;  %9654 = vmatprep.subr.bf16.mxu1 %v11293_v47 }
 0x22c   : > { %v8851_v43 = vadd.f32 %v8850_v39, %v8849_v26  ;;  %v11287_v1 = vadd.f32 %v9529_v56, %v11194_v45 }
 0x22d   : > { %v8852_v11 = vpop.f32.mrf.mxu1  ;;  %v11291_v22 = vpop.f32.mrf.mxu0 }
 0x22e   : > { %v11284_v37 = vadd.f32 %v8851_v43, %v2666_v15 }
 0x22f   : > { %v8853_v53 = vpop.f32.mrf.mxu1  ;;  %v9532_v16 = vpop.f32.mrf.mxu0 }
 0x230   : > { %v8854_v54 = vadd.f32 %v8853_v53, %v8852_v11  ;;  %v11296_v4 = vadd.f32 %v9532_v16, %v11210_v21 }
 0x231   : > { %v8855_v31 = vpop.f32.mrf.mxu1  ;;  %v3096_v8 = vpop.f32.mrf.mxu0 }
 0x232   : > { %v2992_v26 = vadd.f32 %v8854_v54, %v2671_v17  ;;  %v11302_v15 = vadd.f32 %v3096_v8, %v11199_v32  ;;  %v2682_v32 = vadd.f32 %v11207_v3, %v11147_v55 }
 0x233   : > { %v8856_v39 = vpop.f32.mrf.mxu1  ;;  %v9533_v43 = vpop.f32.mrf.mxu0 }
 0x234   : > { %v8857_v45 = vadd.f32 %v8856_v39, %v8855_v31  ;;  %v11305_v56 = vadd.f32 %v9533_v43, %v11215_v0 }
 0x235   : > { %v8858_v50 = vpop.f32.mrf.mxu1  ;;  %v11307_v53 = vpop.f32.mrf.mxu0 }
 0x236   : > { %v2995_v11 = vadd.f32 %v8857_v45, %v2674_v14 }
 0x237   : > { %v8859_v21 = vpop.f32.mrf.mxu1  ;;  %v9536_v12 = vpop.f32.mrf.mxu0 }
 0x238   : > { %v8860_v17 = vadd.f32 %v8859_v21, %v8858_v50  ;;  %v11311_v44 = vadd.f32 %v9536_v12, %v11233_v63  ;;  %v2687_v63 = vadd.f32 %v11138_v36, %v11212_v46  ;;  %v2690_v12 = vadd.f32 %v11145_v49, %v11217_v13 }
 0x239   : > { %v8861_v54 = vpop.f32.mrf.mxu1  ;;  %v3112_v31 = vpop.f32.mrf.mxu0 }
 0x23a   : > { %v3000_v16 = vadd.f32 %v8860_v17, %v11205_v2  ;;  %v11316_v0 = vadd.f32 %v3112_v31, %v11220_v20 }
 0x23b   : > { %v8862_v33 = vpop.f32.mrf.mxu1  ;;  %v9537_v8 = vpop.f32.mrf.mxu0 }
 0x23c   : > { %v8863_v39 = vadd.f32 %v8862_v33, %v8861_v54  ;;  %v11321_v50 = vadd.f32 %v9537_v8, %v11240_v38 }
 0x23d   : > { %v8864_v14 = vpop.f32.mrf.mxu1  ;;  %v11325_v43 = vpop.f32.mrf.mxu0 }
 0x23e   : > { %v11318_v45 = vadd.f32 %v8863_v39, %v2682_v32 }
 0x23f   : > { %v8865_v2 = vpop.f32.mrf.mxu1  ;;  %v9540_v3 = vpop.f32.mrf.mxu0 }
 0x240   : > { %v8866_v21 = vadd.f32 %v8865_v2, %v8864_v14  ;;  %v11328_v20 = vadd.f32 %v9540_v3, %v11260_v40  ;;  %v8739_v40 = vadd.f32 %v11230_v57, %v11222_v18 }
 0x241   : > { %v8867_v55 = vpop.f32.mrf.mxu1  ;;  %v3128_v33 = vpop.f32.mrf.mxu0 }
 0x242   : > { %v3008_v17 = vadd.f32 %v8866_v21, %v2687_v63  ;;  %v11333_v32 = vadd.f32 %v3128_v33, %v11245_v9 }
 0x243   : > { %v8868_v54 = vpop.f32.mrf.mxu1  ;;  %v9541_v36 = vpop.f32.mrf.mxu0 }
 0x244   : > { %v8869_v38 = vadd.f32 %v8868_v54, %v8867_v55  ;;  %v11336_v39 = vadd.f32 %v9541_v36, %v11268_v10  ;;  %v2698_v55 = vadd.f32 %v8739_v40, %v11161_v34 }
 0x245   : > { %v8870_v31 = vpop.f32.mrf.mxu1  ;;  %v11340_v8 = vpop.f32.mrf.mxu0 }
 0x246   : > { %v3011_v46 = vadd.f32 %v8869_v38, %v2690_v12 }
 0x247   : > { %v8871_v14 = vpop.f32.mrf.mxu1  ;;  %v9544_v49 = vpop.f32.mrf.mxu0 }
 0x248   : > { %v8872_v2 = vadd.f32 %v8871_v14, %v8870_v31  ;;  %v11343_v21 = vadd.f32 %v9544_v49, %v2992_v26  ;;  %v8745_v26 = vadd.f32 %v11242_v19, %v11237_v59  ;;  %v8751_v19 = vadd.f32 %v11258_v23, %v11248_v42 }
 0x249   : > { %v8873_v63 = vpop.f32.mrf.mxu1  ;;  %v3144_v3 = vpop.f32.mrf.mxu0 }
 0x24a   : > { %v3016_v13 = vadd.f32 %v8872_v2, %v11228_v60  ;;  %v11347_v10 = vadd.f32 %v3144_v3, %v11274_v7  ;;  %v2703_v60 = vadd.f32 %v11149_v6, %v11235_v61 }
 0x24b   : > { %v8874_v9 = vpop.f32.mrf.mxu1  ;;  %v9545_v33 = vpop.f32.mrf.mxu0 }
 0x24c   : > { %v8875_v54 = vadd.f32 %v8874_v9, %v8873_v63  ;;  %v11351_v57 = vadd.f32 %v9545_v33, %v2995_v11  ;;  %v2706_v63 = vadd.f32 %v11159_v52, %v8745_v26 }
 0x24d   : > { %v8876_v12 = vpop.f32.mrf.mxu1  ;;  %v11357_v31 = vpop.f32.mrf.mxu0 }
 0x24e   : > { %v11349_v18 = vadd.f32 %v8875_v54, %v2698_v55 }
 0x24f   : > { %v8877_v38 = vpop.f32.mrf.mxu1  ;;  %v9548_v14 = vpop.f32.mrf.mxu0 }
 0x250   : > { %v8878_v34 = vadd.f32 %v8877_v38, %v8876_v12  ;;  %v11359_v40 = vadd.f32 %v9548_v14, %v3008_v17 }
 0x251   : > { %v8879_v36 = vpop.f32.mrf.mxu1  ;;  %v3160_v11 = vpop.f32.mrf.mxu0 }
 0x252   : > { %v3024_v7 = vadd.f32 %v8878_v34, %v2703_v60  ;;  %v11362_v9 = vadd.f32 %v3160_v11, %v3000_v16  ;;  %v2714_v60 = vadd.f32 %v8751_v19, %v11174_v58 }
 0x253   : > { %v8880_v2 = vpop.f32.mrf.mxu1  ;;  %v9549_v6 = vpop.f32.mrf.mxu0 }
 0x254   : > { %v8881_v49 = vadd.f32 %v8880_v2, %v8879_v36  ;;  %v11364_v3 = vadd.f32 %v9549_v6, %v3011_v46 }
 0x255   : > { %v8882_v55 = vpop.f32.mrf.mxu1  ;;  %v11368_v54 = vpop.f32.mrf.mxu0 }
 0x256   : > { %v3027_v61 = vadd.f32 %v8881_v49, %v2706_v63  ;;  %v2719_v63 = vadd.f32 %v11165_v27, %v11264_v41 }
 0x257   : > { %v8883_v59 = vpop.f32.mrf.mxu1  ;;  %v9552_v33 = vpop.f32.mrf.mxu0 }
 0x258   : > { %v8884_v17 = vadd.f32 %v8883_v59, %v8882_v55  ;;  %v11371_v38 = vadd.f32 %v9552_v33, %v3024_v7 }
 0x259   : > { %v8885_v12 = vpop.f32.mrf.mxu1  ;;  %v3176_v26 = vpop.f32.mrf.mxu0 }
 0x25a   : > { %v3032_v52 = vadd.f32 %v8884_v17, %v11254_v5  ;;  %v11374_v46 = vadd.f32 %v3176_v26, %v3016_v13  ;;  %v8757_v5 = vadd.f32 %v11272_v29, %v11266_v24 }
 0x25b   : > { %v8886_v16 = vpop.f32.mrf.mxu1  ;;  %v9553_v14 = vpop.f32.mrf.mxu0 }
 0x25c   : > { %v8887_v34 = vadd.f32 %v8886_v16, %v8885_v12  ;;  %v11378_v42 = vadd.f32 %v9553_v14, %v3027_v61  ;;  %v2722_v6 = vadd.f32 %v11172_v62, %v8757_v5  ;;  %v11398_v14 = vld [vmem:[%s12519_s3] ss:$0 sm:$0xff] }
 0x25d   : > { %v8888_v36 = vpop.f32.mrf.mxu1  ;;  %v11384_v7 = vpop.f32.mrf.mxu0 }
 0x25e   : > { %v11376_v2 = vadd.f32 %v8887_v34, %v2714_v60 }
 0x25f   : > { %v8889_v23 = vpop.f32.mrf.mxu1  ;;  %v9556_v13 = vpop.f32.mrf.mxu0 }
 0x260   : > { %v8890_v58 = vadd.f32 %v8889_v23, %v8888_v36 }
 0x261   : > { %v8891_v11 = vpop.f32.mrf.mxu1  ;;  %v3192_v61 = vpop.f32.mrf.mxu0 }
 0x262   : > { %v3040_v49 = vadd.f32 %v8890_v58, %v2719_v63  ;;  %v11389_v17 = vadd.f32 %v3192_v61, %v3032_v52 }
 0x263   : > { %v8892_v55 = vpop.f32.mrf.mxu1  ;;  %v9557_v27 = vpop.f32.mrf.mxu0 }
 0x264   : > { %v11387_v59 = vadd.f32 %v9556_v13, %v3040_v49  ;;  %v8893_v19 = vadd.f32 %v8892_v55, %v8891_v11  ;;  %v3084_v11 = vadd.f32 %v11291_v22, %v11184_v25 }
 0x265   : > { %v9576_v41 = vpop.f32.mrf.mxu1  ;;  %v11393_v24 = vpop.f32.mrf.mxu0 }
 0x266   : > { %v3043_v12 = vadd.f32 %v8893_v19, %v2722_v6 }
 0x267   : > { %v3915_v29 = vpop.f32.mrf.mxu1  ;;  %v8934_v16 = vpop.f32.mrf.mxu0 }
 0x268   : > { %v11391_v33 = vadd.f32 %v9557_v27, %v3043_v12 }
 0x269   : > { %v8935_v60 = vpop.f32.mrf.mxu0  ;;  %v9577_v34 = vpop.f32.mrf.mxu1 }
 0x26a   : > { %v8936_v26 = vadd.f32 %v8935_v60, %v8934_v16 }
 0x26b   : > { %v8937_v36 = vpop.f32.mrf.mxu0  ;;  %v3918_v5 = vpop.f32.mrf.mxu1 }
 0x26c   : > { %v3916_v62 = vadd.f32 %v8936_v26, %v3915_v29 }
 0x26d   : > { %v8938_v52 = vpop.f32.mrf.mxu0  ;;  %v11404_v27 = vpop.f32.mrf.mxu1 }
 0x26e   : > { %v4042_v23 = vadd.f32 %v3916_v62, %v11282_v28  ;;  %v8939_v63 = vadd.f32 %v8938_v52, %v8937_v36 }
 0x26f   : > { %v8940_v58 = vpop.f32.mrf.mxu0  ;;  %v3931_v22 = vpop.f32.mrf.mxu1 }
 0x270   : > { %v4081_v49 = vadd.f32 %v11398_v14, %v4042_v23  ;;  %v3919_v13 = vadd.f32 %v8939_v63, %v3918_v5 }
 0x271   : > { %v8941_v55 = vpop.f32.mrf.mxu0 }
 0x272   : > { %v4113_v6 = vmax.f32 %v4081_v49, 0.0  ;;  %v4043_v61 = vadd.f32 %v3919_v13, %v3084_v11  ;;  %v8942_v19 = vadd.f32 %v8941_v55, %v8940_v58  ;;  %v4561_v11 = vld [vmem:[#allocation2 + $0xc] sm:$0xf] }
 0x273   : > { %v8943_v12 = vpop.f32.mrf.mxu0 }
 0x274   : > { %v8613_v29 = vpack.c.bf16 %v4113_v6, %v4113_v6  ;;  %v4082_v16 = vadd.f32 %v11398_v14, %v4043_v61  ;;  %v3924_v28 = vadd.f32 %v9576_v41, %v8942_v19  ;;  %v11410_v19 = vpop.f32.mrf.mxu1 }
 0x275   : > { %v8944_v60 = vpop.f32.mrf.mxu0 }
 0x276   : > { %v4242_v26 = vshrl.u32 %v8613_v29, 16  ;;  %v4114_v36 = vmax.f32 %v4082_v16, 0.0  ;;  %v4044_v62 = vadd.f32 %v3924_v28, %v11277_v30  ;;  %v8945_v25 = vadd.f32 %v8944_v60, %v8943_v12 }
 0x277   : > { %v8946_v52 = vpop.f32.mrf.mxu0  ;;  %v4245_v63 = vshll.u32 %v8613_v29, 16  ;;  %v3100_v60 = vadd.f32 %v11307_v53, %v11202_v35  ;;  %v3934_v35 = vpop.f32.mrf.mxu1 }
 0x278   : > { %v4244_v23 = vrot.slane %v4242_v26, 7  ;;  %v8614_v5 = vpack.c.bf16 %v4114_v36, %v4114_v36  ;;  %v4083_v58 = vadd.f32 %v11398_v14, %v4044_v62  ;;  %v3927_v49 = vadd.f32 %v9577_v34, %v8945_v25  ;;  %v4565_v34 = vld [vmem:[#allocation2 + $0x14] sm:$0x1] }
 0x279   : > { %v8947_v13 = vpop.f32.mrf.mxu0 }
 0x27a   : > { %v4247_v55 = vor.u32 %v4245_v63, %v4244_v23  ;;  %v4250_v6 = vshrl.u32 %v8614_v5, 16  ;;  %v4115_v61 = vmax.f32 %v4083_v58, 0.0  ;;  %v4045_v41 = vadd.f32 %v3927_v49, %v11287_v1 }
 0x27b   : > { %v8948_v16 = vadd.f32 %v8947_v13, %v8946_v52  ;;  %v8949_v30 = vpop.f32.mrf.mxu0  ;;  %v4253_v29 = vshll.u32 %v8614_v5, 16  ;;  %v4248_v1 = vrot.slane %v4244_v23, 4  ;;  %v11419_v49 = vadd.f32 %v11325_v43, %v11225_v51 }
 0x27c   : > { %v4562_v12 = vsel %vm10619_vm6, %v4247_v55, %v4561_v11  ;;  %v4252_v28 = vrot.slane %v4250_v6, 7  ;;  %v8615_v26 = vpack.c.bf16 %v4115_v61, %v4115_v61  ;;  %v4084_v36 = vadd.f32 %v11398_v14, %v4045_v41  ;;  %v12560_v55 = vld [vmem:[#allocation18_spill] sm:$0xff] }
 0x27d   : > { %4563 = vst [vmem:[#allocation2 + $0xc] sm:$0xf] %v4562_v12  ;;  %v3932_v62 = vadd.f32 %v8948_v16, %v3931_v22  ;;  %v8950_v25 = vpop.f32.mrf.mxu0  ;;  %v11424_v6 = vadd.f32 %v11340_v8, %v12560_v55  ;;  %v11437_v8 = vadd.f32 %v11368_v54, %v11318_v45  ;;  %v11449_v54 = vpop.f32.mrf.mxu1 }
 0x27e   : > { %v4255_v63 = vor.u32 %v4253_v29, %v4252_v28  ;;  %v4257_v58 = vrot.slane %v4252_v28, 4  ;;  %v8951_v52 = vadd.f32 %v8950_v25, %v8949_v30  ;;  %v4259_v11 = vshrl.u32 %v8615_v26, 16  ;;  %v4568_v29 = vld [vmem:[#allocation2 + $0x18] sm:$0xf] }
 0x27f   : > { %v4116_v5 = vmax.f32 %v4084_v36, 0.0  ;;  %v4046_v13 = vadd.f32 %v3932_v62, %v11302_v15  ;;  %v8952_v53 = vpop.f32.mrf.mxu0  ;;  %v4262_v43 = vshll.u32 %v8615_v26, 16  ;;  %v11433_v28 = vadd.f32 %v11357_v31, %v11284_v37 }
 0x280   : > { %v4256_v23 = vsel %vm10611_vm5, %v4248_v1, %v4255_v63  ;;  %v4566_v41 = vsel %vm10625_vm8, %v4257_v58, %v4565_v34  ;;  %v3935_v16 = vadd.f32 %v8951_v52, %v3934_v35  ;;  %v4261_v51 = vrot.slane %v4259_v11, 7 }
 0x281   : > { %4564 = vst [vmem:[#allocation2 + $0x10] sm:$0xf] %v4256_v23  ;;  %4567 = vst [vmem:[#allocation2 + $0x14] sm:$0x1] %v4566_v41  ;;  %v8616_v30 = vpack.c.bf16 %v4116_v5, %v4116_v5  ;;  %v4085_v15 = vadd.f32 %v11398_v14, %v4046_v13  ;;  %v8953_v12 = vpop.f32.mrf.mxu0  ;;  %v11441_v62 = vadd.f32 %v11384_v7, %v11349_v18  ;;  %v4572_v13 = vld [vmem:[#allocation2 + $0x20] sm:$0x1] }
 0x282   : > { %v4047_v36 = vadd.f32 %v3935_v16, %v3100_v60  ;;  %v8954_v34 = vadd.f32 %v8953_v12, %v8952_v53  ;;  %v11445_v26 = vadd.f32 %v11393_v24, %v11376_v2  ;;  %v4264_v25 = vor.u32 %v4262_v43, %v4261_v51 }
 0x283   : > { %v4267_v1 = vshrl.u32 %v8616_v30, 16  ;;  %v8955_v63 = vpop.f32.mrf.mxu0  ;;  %v4265_v37 = vrot.slane %v4261_v51, 4  ;;  %v4117_v31 = vmax.f32 %v4085_v15, 0.0  ;;  %v4270_v11 = vshll.u32 %v8616_v30, 16 }
 0x284   : > { %v4086_v58 = vadd.f32 %v11398_v14, %v4047_v36  ;;  %v3940_v45 = vadd.f32 %v11404_v27, %v8954_v34  ;;  %v5338_v60 = vld [vmem:[#allocation2 + $0xc] sm:$0xe]  ;;  %v4569_v18 = vsel %vm10619_vm6, %v4264_v25, %v4568_v29  ;;  %v3947_v36 = vpop.f32.mrf.mxu1 }
 0x285   : > { %v4707_v52 = vld [vmem:[#allocation2 + $0xc] sm:$0xf]  ;;  %v4269_v7 = vrot.slane %v4267_v1, 7  ;;  %v8956_v2 = vpop.f32.mrf.mxu0  ;;  %v8386_v24 = vrot.slane %v5338_v60, 9  ;;  %4570 = vst [vmem:[#allocation2 + $0x18] sm:$0xf] %v4569_v18  ;;  %v8617_v35 = vpack.c.bf16 %v4117_v31, %v4117_v31 }
 0x286   : > { %4743 = vst [vmem:[#allocation3 + $0x18] sm:$0xf] %v4707_v52  ;;  %v11453_v5 = vld [vmem:[#allocation2 + $0xc] sm:$0xf]  ;;  %v4118_v53 = vmax.f32 %v4086_v58, 0.0  ;;  %v4048_v27 = vadd.f32 %v3940_v45, %v11296_v4  ;;  %v8957_v55 = vadd.f32 %v8956_v2, %v8955_v63 }
 0x287   : > { %v4272_v23 = vor.u32 %v4270_v11, %v4269_v7  ;;  %v4274_v41 = vrot.slane %v4269_v7, 4  ;;  %v8958_v16 = vpop.f32.mrf.mxu0  ;;  %v4856_v51 = vshrl.u32 %v11453_v5, 16  ;;  %v4859_v43 = vshll.u32 %v11453_v5, 16  ;;  %v4575_v11 = vld [vmem:[#allocation2 + $0x24] sm:$0xf] }
 0x288   : > { %v4276_v30 = vshrl.u32 %v8617_v35, 16  ;;  %v4279_v15 = vshll.u32 %v8617_v35, 16  ;;  %v8618_v12 = vpack.c.bf16 %v4118_v53, %v4118_v53  ;;  %v4087_v29 = vadd.f32 %v11398_v14, %v4048_v27  ;;  %v5339_v34 = vld [vmem:[#allocation2 + $0x10] sm:$0xf]  ;;  %v5340_v7 = vld [vmem:[#allocation2 + $0x14] sm:$0x1] }
 0x289   : > { %v4273_v25 = vsel %vm10611_vm5, %v4265_v37, %v4272_v23  ;;  %v4573_v4 = vsel %vm10625_vm8, %v4274_v41, %v4572_v13  ;;  %v3943_v1 = vadd.f32 %v11410_v19, %v8957_v55  ;;  %v8959_v63 = vpop.f32.mrf.mxu0  ;;  %v5452_v31 = vrot.slane %v5339_v34, 5  ;;  %v4708_v58 = vld [vmem:[#allocation2 + $0x10] sm:$0xf]  ;;  %v11467_v34 = vpop.f32.mrf.mxu1 }
 0x28a   : > { %4571 = vst [vmem:[#allocation2 + $0x1c] sm:$0xf] %v4273_v25  ;;  %4574 = vst [vmem:[#allocation2 + $0x20] sm:$0x1] %v4573_v4  ;;  %v4278_v45 = vrot.slane %v4276_v30, 7  ;;  %v4284_v60 = vshrl.u32 %v8618_v12, 16  ;;  %v8960_v37 = vadd.f32 %v8959_v63, %v8958_v16 }
 0x28b   : > { %v4287_v52 = vshll.u32 %v8618_v12, 16  ;;  %v4119_v18 = vmax.f32 %v4087_v29, 0.0  ;;  %4744 = vst [vmem:[#allocation3 + $0x24] sm:$0xf] %v4708_v58  ;;  %v4049_v2 = vadd.f32 %v3943_v1, %v11305_v56  ;;  %v8961_v35 = vpop.f32.mrf.mxu0  ;;  %v5453_v13 = vsel %vm10653_vm10, %v8386_v24, %v5452_v31  ;;  %v4579_v30 = vld [vmem:[#allocation2 + $0x2c] sm:$0x1] }
 0x28c   : > { %v5454_v19 = vrot.slane %v5452_v31, 4  ;;  %v4281_v27 = vor.u32 %v4279_v15, %v4278_v45  ;;  %v4282_v55 = vrot.slane %v4278_v45, 4  ;;  %v4286_v23 = vrot.slane %v4284_v60, 7  ;;  %5607 = vst [vmem:[#allocation3 + $0x20] sm:$0xf] %v5453_v13 }
 0x28d   : > { %v8619_v41 = vpack.c.bf16 %v4119_v18, %v4119_v18  ;;  %v4088_v12 = vadd.f32 %v11398_v14, %v4049_v2  ;;  %v3948_v29 = vadd.f32 %v8960_v37, %v3947_v36  ;;  %v8962_v25 = vpop.f32.mrf.mxu0  ;;  %v5455_v4 = vrot.slane %v5340_v7, 5  ;;  %v4709_v16 = vld [vmem:[#allocation2 + $0x18] sm:$0xf]  ;;  %v10082_v2 = vld [vmem:[#allocation9 + $0x78] sm:$0xff]   ;;  %v4582_v13 = vld [vmem:[#allocation2 + $0x30] sm:$0xf] }
 0x28e   : > { %v4858_v56 = vrot.slane %v4856_v51, 4  ;;  %v4576_v1 = vsel %vm10619_vm6, %v4281_v27, %v4575_v11  ;;  %v4289_v24 = vor.u32 %v4287_v52, %v4286_v23  ;;  %v4291_v63 = vrot.slane %v4286_v23, 4  ;;  %4745 = vst [vmem:[#allocation3 + $0x30] sm:$0xf] %v4709_v16  ;;  %v3950_v11 = vpop.f32.mrf.mxu1  ;;  %9190 = vmatprep.subr.bf16.mxu0 %v10082_v2 }
 0x28f   : > { %v4293_v15 = vshrl.u32 %v8619_v41, 16  ;;  %4577 = vst [vmem:[#allocation2 + $0x24] sm:$0xf] %v4576_v1  ;;  %v4296_v31 = vshll.u32 %v8619_v41, 16  ;;  %v4120_v58 = vmax.f32 %v4088_v12, 0.0  ;;  %v4050_v45 = vadd.f32 %v3948_v29, %v11316_v0  ;;  %v8964_v18 = vpop.f32.mrf.mxu0 }
 0x290   : > { %v8963_v60 = vadd.f32 %v8962_v25, %v8961_v35  ;;  %v4290_v36 = vsel %vm10611_vm5, %v4282_v55, %v4289_v24  ;;  %v4580_v51 = vsel %vm10625_vm8, %v4291_v63, %v4579_v30  ;;  %v5456_v52 = vsel %vm10653_vm10, %v5454_v19, %v5455_v4  ;;  %v4781_v29 = vld [vmem:[#allocation2 + $0x10] sm:$0xf] }
 0x291   : > { %v4295_v7 = vrot.slane %v4293_v15, 7  ;;  %v11479_v37 = vld [vmem:[#allocation2 + $0x1c] sm:$0xf]  ;;  %4578 = vst [vmem:[#allocation2 + $0x28] sm:$0xf] %v4290_v36  ;;  %v8620_v0 = vpack.c.bf16 %v4120_v58, %v4120_v58  ;;  %v4089_v35 = vadd.f32 %v11398_v14, %v4050_v45  ;;  %v8965_v23 = vpop.f32.mrf.mxu0  ;;  %v4861_v55 = vrot.slane %v4859_v43, 5 }
 0x292   : > { %4581 = vst [vmem:[#allocation2 + $0x2c] sm:$0x1] %v4580_v51  ;;  %v3951_v27 = vadd.f32 %v8963_v60, %v3950_v11  ;;  %5608 = vst [vmem:[#allocation3 + $0x2c] sm:$0xf] %v5456_v52  ;;  %v5459_v41 = vrot.slane %v11479_v37, 5  ;;  %v8966_v19 = vadd.f32 %v8965_v23, %v8964_v18  ;;  %v4865_v2 = vshll.u32 %v4781_v29, 16 }
 0x293   : > { %v4298_v30 = vor.u32 %v4296_v31, %v4295_v7  ;;  %v4299_v12 = vrot.slane %v4295_v7, 4  ;;  %v4710_v25 = vld [vmem:[#allocation2 + $0x1c] sm:$0xf]  ;;  %v4301_v4 = vshrl.u32 %v8620_v0, 16  ;;  %v4304_v16 = vshll.u32 %v8620_v0, 16  ;;  %v8967_v63 = vpop.f32.mrf.mxu0  ;;  %v11493_v31 = vpop.f32.mrf.mxu1 }
 0x294   : > { %v4121_v1 = vmax.f32 %v4089_v35, 0.0  ;;  %v4051_v24 = vadd.f32 %v3951_v27, %v11419_v49  ;;  %4746 = vst [vmem:[#allocation3 + $0x3c] sm:$0xf] %v4710_v25  ;;  %v11488_v15 = vrot.slane %v5459_v41, 4  ;;  %v3956_v43 = vadd.f32 %v11449_v54, %v8966_v19  ;;  %v4586_v36 = vld [vmem:[#allocation2 + $0x38] sm:$0x1] }
 0x295   : > { %v4583_v5 = vsel %vm10619_vm6, %v4298_v30, %v4582_v13  ;;  %v4862_v58 = vor.u32 %v4861_v55, %v4858_v56  ;;  %v4303_v45 = vrot.slane %v4301_v4, 7  ;;  %v8968_v49 = vpop.f32.mrf.mxu0  ;;  %v4869_v52 = vshrl.u32 %v4781_v29, 16  ;;  %v3963_v19 = vpop.f32.mrf.mxu1 }
 0x296   : > { %4584 = vst [vmem:[#allocation2 + $0x30] sm:$0xf] %v4583_v5  ;;  %v8621_v60 = vpack.c.bf16 %v4121_v1, %v4121_v1  ;;  %v4090_v18 = vadd.f32 %v11398_v14, %v4051_v24  ;;  %v4052_v51 = vadd.f32 %v3956_v43, %v11311_v44  ;;  %v8969_v7 = vadd.f32 %v8968_v49, %v8967_v63  ;;  %v4711_v0 = vld [vmem:[#allocation2 + $0x24] sm:$0xf]  ;;  %v4589_v1 = vld [vmem:[#allocation2 + $0x3c] sm:$0xf] }
 0x297   : > { %v4863_v11 = vrot.slane %v4862_v58, 4  ;;  %v4306_v13 = vor.u32 %v4304_v16, %v4303_v45  ;;  %v4308_v35 = vrot.slane %v4303_v45, 4  ;;  %v8970_v23 = vpop.f32.mrf.mxu0  ;;  %4747 = vst [vmem:[#allocation3 + $0x48] sm:$0xf] %v4711_v0  ;;  %v4867_v4 = vrot.slane %v4865_v2, 5 }
 0x298   : > { %v4310_v54 = vshrl.u32 %v8621_v60, 16  ;;  %v4313_v27 = vshll.u32 %v8621_v60, 16  ;;  %v4122_v56 = vmax.f32 %v4090_v18, 0.0  ;;  %v4091_v55 = vadd.f32 %v11398_v14, %v4052_v51  ;;  %v4782_v45 = vld [vmem:[#allocation2 + $0x14] sm:$0x1] }
 0x299   : > { %v3959_v30 = vadd.f32 %v11467_v34, %v8969_v7  ;;  %v10040_v25 = vld [vmem:[#allocation3 + $0x20] ss:$12 sps:$4 sm:$0xff]   ;;  %v4307_v44 = vsel %vm10611_vm5, %v4299_v12, %v4306_v13  ;;  %v4587_v29 = vsel %vm10625_vm8, %v4308_v35, %v4586_v36  ;;  %v8971_v24 = vpop.f32.mrf.mxu0  ;;  %v4871_v63 = vrot.slane %v4869_v52, 4  ;;  %v4712_v60 = vld [vmem:[#allocation2 + $0x28] sm:$0xf]  ;;  %v11507_v35 = vpop.f32.mrf.mxu1 }
 0x29a   : > { %v4312_v16 = vrot.slane %v4310_v54, 7  ;;  %4585 = vst [vmem:[#allocation2 + $0x34] sm:$0xf] %v4307_v44  ;;  %4588 = vst [vmem:[#allocation2 + $0x38] sm:$0x1] %v4587_v29  ;;  %v8622_v5 = vpack.c.bf16 %v4122_v56, %v4122_v56  ;;  %v4123_v43 = vmax.f32 %v4091_v55, 0.0  ;;  %9622 = vmatprep.mubr.bf16.mxu0 %v10040_v25  ;;  %v8972_v34 = vadd.f32 %v8971_v24, %v8970_v23 }
 0x29b   : > { %v4053_v58 = vadd.f32 %v3959_v30, %v11321_v50  ;;  %v8973_v12 = vpop.f32.mrf.mxu0  ;;  %v4868_v36 = vsel %vm10687_vm13, %v4863_v11, %v4867_v4  ;;  %v4872_v51 = vor.u32 %v4871_v63, %v4867_v4  ;;  %4748 = vst [vmem:[#allocation3 + $0x54] sm:$0xf] %v4712_v60  ;;  %v5341_v50 = vld [vmem:[#allocation2 + $0x18] sm:$0xe]  ;;  %v4875_v55 = vshll.u32 %v4782_v45, 16  ;;  %v3966_v45 = vpop.f32.mrf.mxu1 }
 0x29c   : > { %v4315_v18 = vor.u32 %v4313_v27, %v4312_v16  ;;  %v4316_v49 = vrot.slane %v4312_v16, 4  ;;  %v4318_v7 = vshrl.u32 %v8622_v5, 16  ;;  %v4321_v52 = vshll.u32 %v8622_v5, 16  ;;  %5301 = vst [vmem:[#allocation3 + $0x1c] sm:$0xf] %v4868_v36 }
 0x29d   : > { %v8623_v0 = vpack.c.bf16 %v4123_v43, %v4123_v43  ;;  %v4092_v13 = vadd.f32 %v11398_v14, %v4053_v58  ;;  %v4713_v54 = vld [vmem:[#allocation2 + $0x30] sm:$0xf]  ;;  %v3964_v23 = vadd.f32 %v8972_v34, %v3963_v19  ;;  %v4873_v56 = vrot.slane %v4872_v51, 4  ;;  %v8974_v30 = vpop.f32.mrf.mxu0  ;;  %v4593_v29 = vld [vmem:[#allocation2 + $0x44] sm:$0x1] }
 0x29e   : > { %v4590_v27 = vsel %vm10619_vm6, %v4315_v18, %v4589_v1  ;;  %4749 = vst [vmem:[#allocation3 + $0x60] sm:$0xf] %v4713_v54  ;;  %v4320_v11 = vrot.slane %v4318_v7, 7  ;;  %v4877_v24 = vrot.slane %v4875_v55, 5  ;;  %v8975_v63 = vadd.f32 %v8974_v30, %v8973_v12  ;;  %v4596_v19 = vld [vmem:[#allocation2 + $0x48] sm:$0xf] }
 0x29f   : > { %4591 = vst [vmem:[#allocation2 + $0x3c] sm:$0xf] %v4590_v27  ;;  %v4327_v25 = vshrl.u32 %v8623_v0, 16  ;;  %v4330_v4 = vshll.u32 %v8623_v0, 16  ;;  %v4124_v44 = vmax.f32 %v4092_v13, 0.0  ;;  %v4054_v16 = vadd.f32 %v3964_v23, %v11333_v32  ;;  %v8976_v5 = vpop.f32.mrf.mxu0 }
 0x2a0   : > { %v8387_v43 = vrot.slane %v5341_v50, 9  ;;  %v4323_v58 = vor.u32 %v4321_v52, %v4320_v11  ;;  %v4325_v60 = vrot.slane %v4320_v11, 4  ;;  %v4878_v36 = vsel %vm10687_vm13, %v4873_v56, %v4877_v24  ;;  %v5343_v7 = vld [vmem:[#allocation2 + $0x20] sm:$0x1]  ;;  %v4783_v0 = vld [vmem:[#allocation2 + $0x18] sm:$0xf] }
 0x2a1   : > { %v4329_v1 = vrot.slane %v4327_v25, 7  ;;  %v8624_v34 = vpack.c.bf16 %v4124_v44, %v4124_v44  ;;  %v4093_v18 = vadd.f32 %v11398_v14, %v4054_v16  ;;  %v3967_v51 = vadd.f32 %v8975_v63, %v3966_v45  ;;  %v8977_v12 = vpop.f32.mrf.mxu0  ;;  %v4714_v52 = vld [vmem:[#allocation2 + $0x34] sm:$0xf]  ;;  %5302 = vst [vmem:[#allocation3 + $0x28] sm:$0xf] %v4878_v36 }
 0x2a2   : > { %v5460_v32 = vsel %vm10653_vm10, %v8387_v43, %v5459_v41  ;;  %v4324_v13 = vsel %vm10611_vm5, %v4316_v49, %v4323_v58  ;;  %v4594_v50 = vsel %vm10625_vm8, %v4325_v60, %v4593_v29  ;;  %4750 = vst [vmem:[#allocation3 + $0x6c] sm:$0xf] %v4714_v52  ;;  %v11524_v30 = vld [vmem:[#allocation2 + $0x1c] sm:$0xf]  ;;  %v5462_v11 = vrot.slane %v5343_v7, 5 }
 0x2a3   : > { %v4332_v54 = vor.u32 %v4330_v4, %v4329_v1  ;;  %v4333_v27 = vrot.slane %v4329_v1, 4  ;;  %5609 = vst [vmem:[#allocation3 + $0x38] sm:$0xf] %v5460_v32  ;;  %4592 = vst [vmem:[#allocation2 + $0x40] sm:$0xf] %v4324_v13  ;;  %v4335_v37 = vshrl.u32 %v8624_v34, 16  ;;  %v4055_v41 = vadd.f32 %v3967_v51, %v11424_v6  ;;  %v8979_v55 = vpop.f32.mrf.mxu0 }
 0x2a4   : > { %4595 = vst [vmem:[#allocation2 + $0x44] sm:$0x1] %v4594_v50  ;;  %v4338_v23 = vshll.u32 %v8624_v34, 16  ;;  %v4125_v56 = vmax.f32 %v4093_v18, 0.0  ;;  %v8978_v25 = vadd.f32 %v8977_v12, %v8976_v5  ;;  %v4880_v4 = vshrl.u32 %v4783_v0, 16 }
 0x2a5   : > { %v4597_v49 = vsel %vm10619_vm6, %v4332_v54, %v4596_v19  ;;  %v4337_v44 = vrot.slane %v4335_v37, 7  ;;  %v4094_v16 = vadd.f32 %v11398_v14, %v4055_v41  ;;  %v4883_v24 = vshll.u32 %v4783_v0, 16  ;;  %v8980_v63 = vpop.f32.mrf.mxu0  ;;  %v4600_v58 = vld [vmem:[#allocation2 + $0x50] sm:$0x1]  ;;  %v4603_v51 = vld [vmem:[#allocation2 + $0x54] sm:$0xf] }
 0x2a6   : > { %4598 = vst [vmem:[#allocation2 + $0x48] sm:$0xf] %v4597_v49  ;;  %v8625_v29 = vpack.c.bf16 %v4125_v56, %v4125_v56  ;;  %v4715_v43 = vld [vmem:[#allocation2 + $0x3c] sm:$0xf]  ;;  %v5463_v6 = vsel %vm10653_vm10, %v11488_v15, %v5462_v11  ;;  %v3972_v60 = vadd.f32 %v11493_v31, %v8978_v25  ;;  %v4882_v1 = vrot.slane %v4880_v4, 4 }
 0x2a7   : > { %v4889_v19 = vshll.u32 %v11524_v30, 16  ;;  %4751 = vst [vmem:[#allocation3 + $0x78] sm:$0xf] %v4715_v43  ;;  %v4340_v5 = vor.u32 %v4338_v23, %v4337_v44  ;;  %v4342_v34 = vrot.slane %v4337_v44, 4  ;;  %5610 = vst [vmem:[#allocation3 + $0x44] sm:$0xf] %v5463_v6  ;;  %v11534_v36 = vpop.f32.mrf.mxu0  ;;  %v8981_v37 = vadd.f32 %v8980_v63, %v8979_v55  ;;  %v11554_v6 = vpop.f32.mrf.mxu1 }
 0x2a8   : > { %v4344_v45 = vshrl.u32 %v8625_v29, 16  ;;  %v4347_v18 = vshll.u32 %v8625_v29, 16  ;;  %v4126_v7 = vmax.f32 %v4094_v16, 0.0  ;;  %v4056_v32 = vadd.f32 %v3972_v60, %v11328_v20  ;;  %v4785_v12 = vld [vmem:[#allocation2 + $0x20] sm:$0x1] }
 0x2a9   : > { %v4885_v0 = vrot.slane %v4883_v24, 5  ;;  %v11537_v15 = vrot.slane %v4889_v19, 5  ;;  %v4341_v31 = vsel %vm10611_vm5, %v4333_v27, %v4340_v5  ;;  %v4601_v52 = vsel %vm10625_vm8, %v4342_v34, %v4600_v58  ;;  %v10041_v50 = vld [vmem:[#allocation3 + $0x18] ss:$12 sps:$4 sm:$0xff]   ;;  %v10043_v54 = vld [vmem:[#allocation3 + $0x1c] ss:$12 sps:$4 sm:$0xff]   ;;  %v11545_v23 = vpop.f32.mrf.mxu0 }
 0x2aa   : > { %v11543_v13 = vrot.slane %v4344_v45, 7  ;;  %4599 = vst [vmem:[#allocation2 + $0x4c] sm:$0xf] %v4341_v31  ;;  %4602 = vst [vmem:[#allocation2 + $0x50] sm:$0x1] %v4601_v52  ;;  %v8626_v20 = vpack.c.bf16 %v4126_v7, %v4126_v7  ;;  %v4095_v56 = vadd.f32 %v11398_v14, %v4056_v32  ;;  %v4893_v49 = vshrl.u32 %v11524_v30, 16  ;;  %6238 = vmatprep.mubr.bf16.mxu1 %v10043_v54 }
 0x2ab   : > { %v4886_v41 = vor.u32 %v4885_v0, %v4882_v1  ;;  %v5344_v11 = vld [vmem:[#allocation2 + $0x24] sm:$0xe]  ;;  %v10054_v27 = vld [vmem:[#allocation9 + $0xb0] sm:$0xff]   ;;  %v4899_v44 = vshll.u32 %v4785_v12, 16  ;;  %v3975_v55 = vadd.f32 %v11507_v35, %v8981_v37  ;;  %v5345_v29 = vld [vmem:[#allocation2 + $0x28] sm:$0xf]  ;;  %v11552_v16 = vpop.f32.mrf.mxu0  ;;  %6239 = vmatmul.mubr.bf16.vlgmr.msra.gmra.mxu1 %v10041_v50 }
 0x2ac   : > { %v4349_v25 = vor.u32 %v4347_v18, %v11543_v13  ;;  %v4350_v4 = vrot.slane %v11543_v13, 4  ;;  %v4716_v24 = vld [vmem:[#allocation2 + $0x40] sm:$0xf]  ;;  %v4352_v63 = vshrl.u32 %v8626_v20, 16  ;;  %v4355_v43 = vshll.u32 %v8626_v20, 16  ;;  %9655 = vmatpush3.bf16.msra.mxu1 %v11293_v47  ;;  %v11562_v45 = vld [vmem:[#allocation9 + $0xa8] sm:$0xff]  }
 0x2ad   : > { %v4127_v58 = vmax.f32 %v4095_v56, 0.0  ;;  %v4887_v30 = vrot.slane %v4886_v41, 4  ;;  %v5346_v60 = vld [vmem:[#allocation2 + $0x2c] sm:$0x1]  ;;  %4752 = vst [vmem:[#allocation3 + $0x84] sm:$0xf] %v4716_v24  ;;  %v4057_v5 = vadd.f32 %v3975_v55, %v11336_v39  ;;  %v11560_v34 = vpop.f32.mrf.mxu0  ;;  %9656 = vmatprep.subr.bf16.mxu1 %v10054_v27 }
 0x2ae   : > { %v4604_v1 = vsel %vm10619_vm6, %v4349_v25, %v4603_v51  ;;  %v4895_v19 = vrot.slane %v4893_v49, 4  ;;  %v4901_v35 = vrot.slane %v4899_v44, 5  ;;  %v10083_v18 = vld [vmem:[#allocation9 + $0x38] sm:$0xff]   ;;  %v10088_v7 = vld [vmem:[#allocation9 + $0x70] sm:$0xff]   ;;  %v4354_v32 = vrot.slane %v4352_v63, 7  ;;  %v3979_v25 = vpop.f32.mrf.mxu1 }
 0x2af   : > { %4605 = vst [vmem:[#allocation2 + $0x54] sm:$0xf] %v4604_v1  ;;  %v10046_v12 = vld [vmem:[#allocation3 + $0x38] ss:$12 sps:$4 sm:$0xff]   ;;  %v8627_v0 = vpack.c.bf16 %v4127_v58, %v4127_v58  ;;  %v4892_v51 = vsel %vm10687_vm13, %v4887_v30, %v11537_v15  ;;  %v8388_v31 = vrot.slane %v5344_v11, 9  ;;  %v4096_v39 = vadd.f32 %v11398_v14, %v4057_v5  ;;  %v11569_v54 = vpop.f32.mrf.mxu0  ;;  %v11575_v58 = vld [vmem:[#allocation9 + $0xa0] sm:$0xff]  }
 0x2b0   : > { %v4607_v47 = vld [vmem:[#allocation2 + $0x5c] sm:$0x1]  ;;  %v4896_v52 = vor.u32 %v4895_v19, %v11537_v15  ;;  %5303 = vst [vmem:[#allocation3 + $0x34] sm:$0xf] %v4892_v51  ;;  %v5466_v13 = vrot.slane %v5345_v29, 5  ;;  %v5469_v50 = vrot.slane %v5346_v60, 5  ;;  %v4357_v20 = vor.u32 %v4355_v43, %v4354_v32  ;;  %9623 = vmatmul.mubr.bf16.vlgmr.msra.gmra.mxu0 %v10046_v12  ;;  %9657 = vmatpush3.bf16.msra.mxu1 %v10054_v27 }
 0x2b1   : > { %v4717_v37 = vld [vmem:[#allocation2 + $0x48] sm:$0xf]  ;;  %v4359_v56 = vrot.slane %v4354_v32, 4  ;;  %v4361_v41 = vshrl.u32 %v8627_v0, 16  ;;  %v4364_v49 = vshll.u32 %v8627_v0, 16  ;;  %v4128_v24 = vmax.f32 %v4096_v39, 0.0  ;;  %v11573_v29 = vpop.f32.mrf.mxu0  ;;  %9191 = vmatpush3.bf16.msra.mxu0 %v10083_v18  ;;  %9658 = vmatprep.subr.bf16.mxu1 %v11562_v45 }
 0x2b2   : > { %v4786_v44 = vld [vmem:[#allocation2 + $0x24] sm:$0xf]  ;;  %4753 = vst [vmem:[#allocation3 + $0x90] sm:$0xf] %v4717_v37  ;;  %v4610_v11 = vld [vmem:[#allocation2 + $0x60] sm:$0xf]  ;;  %v5467_v15 = vsel %vm10653_vm10, %v8388_v31, %v5466_v13  ;;  %v4358_v30 = vsel %vm10611_vm5, %v4350_v4, %v4357_v20  ;;  %v8984_v19 = vadd.f32 %v11545_v23, %v11534_v36  ;;  %9192 = vmatprep.subr.bf16.mxu0 %v10088_v7 }
 0x2b3   : > { %v4897_v55 = vrot.slane %v4896_v52, 4  ;;  %v5468_v63 = vrot.slane %v5466_v13, 4  ;;  %v10089_v43 = vld [vmem:[#allocation9 + $0x30] sm:$0xff]   ;;  %v4608_v60 = vsel %vm10625_vm8, %v4359_v56, %v4607_v47  ;;  %v11581_v1 = vrot.slane %v4361_v41, 7  ;;  %5611 = vst [vmem:[#allocation3 + $0x50] sm:$0xf] %v5467_v15  ;;  %v11592_v36 = vpop.f32.mrf.mxu0  ;;  %v11596_v47 = vpop.f32.mrf.mxu1 }
 0x2b4   : > { %v4787_v5 = vld [vmem:[#allocation2 + $0x28] sm:$0xf]  ;;  %v4718_v27 = vld [vmem:[#allocation2 + $0x4c] sm:$0xf]  ;;  %v10095_v32 = vld [vmem:[#allocation9 + $0x68] sm:$0xff]   ;;  %v8628_v18 = vpack.c.bf16 %v4128_v24, %v4128_v24  ;;  %v4904_v51 = vshrl.u32 %v4786_v44, 16  ;;  %9659 = vmatpush3.bf16.msra.mxu1 %v11562_v45  ;;  %v8987_v45 = vadd.f32 %v11560_v34, %v11552_v16 }
 0x2b5   : > { %4606 = vst [vmem:[#allocation2 + $0x58] sm:$0xf] %v4358_v30  ;;  %4609 = vst [vmem:[#allocation2 + $0x5c] sm:$0x1] %v4608_v60  ;;  %v4902_v4 = vsel %vm10687_vm13, %v4897_v55, %v4901_v35  ;;  %v5470_v12 = vsel %vm10653_vm10, %v5468_v63, %v5469_v50  ;;  %v4788_v0 = vld [vmem:[#allocation2 + $0x2c] sm:$0x1]  ;;  %v4366_v23 = vor.u32 %v4364_v49, %v11581_v1  ;;  %v11600_v56 = vpop.f32.mrf.mxu0  ;;  %9193 = vmatpush3.bf16.msra.mxu0 %v10089_v43 }
 0x2b6   : > { %v11590_v31 = vld [vmem:[#allocation2 + $0x30] sm:$0xe]  ;;  %4754 = vst [vmem:[#allocation3 + $0x9c] sm:$0xf] %v4718_v27  ;;  %v4367_v7 = vrot.slane %v11581_v1, 4  ;;  %v3980_v35 = vadd.f32 %v8984_v19, %v3979_v25  ;;  %v4907_v52 = vshll.u32 %v4786_v44, 16  ;;  %9660 = vmatprep.subr.bf16.mxu1 %v11575_v58  ;;  %9194 = vmatprep.subr.bf16.mxu0 %v10095_v32 }
 0x2b7   : > { %5304 = vst [vmem:[#allocation3 + $0x40] sm:$0xf] %v4902_v4  ;;  %5612 = vst [vmem:[#allocation3 + $0x5c] sm:$0xf] %v5470_v12  ;;  %v11598_v39 = vld [vmem:[#allocation9 + $0x98] sm:$0xff]   ;;  %v4369_v13 = vshrl.u32 %v8628_v18, 16  ;;  %v4611_v55 = vsel %vm10619_vm6, %v4366_v23, %v4610_v11  ;;  %v11609_v19 = vpop.f32.mrf.mxu0 }
 0x2b8   : > { %v4372_v50 = vshll.u32 %v8628_v18, 16  ;;  %v4906_v37 = vrot.slane %v4904_v51, 4  ;;  %v4913_v20 = vshll.u32 %v4787_v5, 16  ;;  %v10096_v41 = vld [vmem:[#allocation9 + $0x28] sm:$0xff]   ;;  %v10101_v49 = vld [vmem:[#allocation9 + $0x60] sm:$0xff]   ;;  %v4058_v25 = vadd.f32 %v3980_v35, %v11347_v10  ;;  %v3982_v10 = vpop.f32.mrf.mxu1  ;;  %9661 = vmatpush3.bf16.msra.mxu1 %v11575_v58 }
 0x2b9   : > { %v4614_v24 = vld [vmem:[#allocation2 + $0x68] sm:$0x1]  ;;  %v4909_v44 = vrot.slane %v4907_v52, 5  ;;  %v4917_v15 = vshrl.u32 %v4787_v5, 16  ;;  %v4719_v63 = vld [vmem:[#allocation2 + $0x54] sm:$0xf]  ;;  %v11613_v35 = vpop.f32.mrf.mxu0  ;;  %9195 = vmatpush3.bf16.msra.mxu0 %v10096_v41  ;;  %9662 = vmatprep.subr.bf16.mxu1 %v11598_v39 }
 0x2ba   : > { %4612 = vst [vmem:[#allocation2 + $0x60] sm:$0xf] %v4611_v55  ;;  %v4371_v30 = vrot.slane %v4369_v13, 7  ;;  %v4915_v60 = vrot.slane %v4913_v20, 5  ;;  %v4923_v1 = vshll.u32 %v4788_v0, 16  ;;  %v4097_v11 = vadd.f32 %v11398_v14, %v4058_v25  ;;  %9196 = vmatprep.subr.bf16.mxu0 %v10101_v49  ;;  %v10102_v20 = vld [vmem:[#allocation9 + $0x20] sm:$0xff]  }
 0x2bb   : > { %v5348_v43 = vld [vmem:[#allocation2 + $0x34] sm:$0xf]  ;;  %4755 = vst [vmem:[#allocation3 + $0xa8] sm:$0xf] %v4719_v63  ;;  %v4910_v27 = vor.u32 %v4909_v44, %v4906_v37  ;;  %v4919_v5 = vrot.slane %v4917_v15, 4  ;;  %v8389_v18 = vrot.slane %v11590_v31, 9  ;;  %v3983_v0 = vadd.f32 %v8987_v45, %v3982_v10  ;;  %v11622_v15 = vpop.f32.mrf.mxu0 }
 0x2bc   : > { %v5349_v4 = vld [vmem:[#allocation2 + $0x38] sm:$0x1]  ;;  %v4789_v32 = vld [vmem:[#allocation2 + $0x30] sm:$0xf]  ;;  %v4374_v12 = vor.u32 %v4372_v50, %v4371_v30  ;;  %v4376_v51 = vrot.slane %v4371_v30, 4  ;;  %v4925_v23 = vrot.slane %v4923_v1, 5  ;;  %9663 = vmatpush3.bf16.msra.mxu1 %v11598_v39 }
 0x2bd   : > { %v4129_v16 = vmax.f32 %v4097_v11, 0.0  ;;  %v4911_v34 = vrot.slane %v4910_v27, 4  ;;  %v4920_v52 = vor.u32 %v4919_v5, %v4915_v60  ;;  %v5473_v13 = vrot.slane %v5348_v43, 5  ;;  %v10094_v37 = vld [vmem:[#allocation9 + $0x90] sm:$0xff]   ;;  %v10108_v31 = vld [vmem:[#allocation9 + $0x58] sm:$0xff]   ;;  %v11631_v10 = vpop.f32.mrf.mxu0  ;;  %9197 = vmatpush3.bf16.msra.mxu0 %v10102_v20 }
 0x2be   : > { %v10047_v55 = vld [vmem:[#allocation3 + $0x30] ss:$12 sps:$4 sm:$0xff]   ;;  %v10049_v50 = vld [vmem:[#allocation3 + $0x34] ss:$12 sps:$4 sm:$0xff]   ;;  %v4375_v25 = vsel %vm10611_vm5, %v4367_v7, %v4374_v12  ;;  %v4615_v44 = vsel %vm10625_vm8, %v4376_v51, %v4614_v24  ;;  %v4059_v58 = vadd.f32 %v3983_v0, %v11433_v28  ;;  %v5476_v41 = vrot.slane %v5349_v4, 5  ;;  %9664 = vmatprep.subr.bf16.mxu1 %v10094_v37  ;;  %9198 = vmatprep.subr.bf16.mxu0 %v10108_v31 }
 0x2bf   : > { %4613 = vst [vmem:[#allocation2 + $0x64] sm:$0xf] %v4375_v25  ;;  %4616 = vst [vmem:[#allocation2 + $0x68] sm:$0x1] %v4615_v44  ;;  %v10050_v63 = vld [vmem:[#allocation3 + $0x50] ss:$12 sps:$4 sm:$0xff]   ;;  %v8629_v30 = vpack.c.bf16 %v4129_v16, %v4129_v16  ;;  %v4916_v49 = vsel %vm10687_vm13, %v4911_v34, %v4915_v60  ;;  %v5474_v45 = vsel %vm10653_vm10, %v8389_v18, %v5473_v13  ;;  %6246 = vmatprep.mubr.bf16.mxu1 %v10049_v50  ;;  %v11639_v39 = vpop.f32.mrf.mxu0 }
 0x2c0   : > { %v4921_v1 = vrot.slane %v4920_v52, 4  ;;  %5305 = vst [vmem:[#allocation3 + $0x4c] sm:$0xf] %v4916_v49  ;;  %v4098_v7 = vadd.f32 %v11398_v14, %v4059_v58  ;;  %v5475_v24 = vrot.slane %v5473_v13, 4  ;;  %5613 = vst [vmem:[#allocation3 + $0x68] sm:$0xf] %v5474_v45  ;;  %v8990_v28 = vadd.f32 %v11573_v29, %v11569_v54  ;;  %6247 = vmatmul.mubr.bf16.gmra.mxu1 %v10047_v55 }
 0x2c1   : > { %v4790_v43 = vld [vmem:[#allocation2 + $0x34] sm:$0xf]  ;;  %v4928_v11 = vshrl.u32 %v4789_v32, 16  ;;  %v4720_v27 = vld [vmem:[#allocation2 + $0x58] sm:$0xf]  ;;  %9626 = vmatprep.mubr.bf16.mxu0 %v10050_v63  ;;  %v4378_v60 = vshrl.u32 %v8629_v30, 16  ;;  %v11646_v58 = vpop.f32.mrf.mxu0  ;;  %9665 = vmatpush3.bf16.msra.mxu1 %v10094_v37 }
 0x2c2   : > { %v4381_v5 = vshll.u32 %v8629_v30, 16  ;;  %v4926_v4 = vsel %vm10687_vm13, %v4921_v1, %v4925_v23  ;;  %v4791_v14 = vld [vmem:[#allocation2 + $0x38] sm:$0x1]  ;;  %v4931_v18 = vshll.u32 %v4789_v32, 16  ;;  %4756 = vst [vmem:[#allocation3 + $0xb4] sm:$0xf] %v4720_v27  ;;  %v5477_v29 = vsel %vm10653_vm10, %v5475_v24, %v5476_v41 }
 0x2c3   : > { %v10107_v12 = vld [vmem:[#allocation9 + $0x88] sm:$0xff]   ;;  %5306 = vst [vmem:[#allocation3 + $0x58] sm:$0xf] %v4926_v4  ;;  %v4130_v54 = vmax.f32 %v4098_v7, 0.0  ;;  %v3988_v51 = vadd.f32 %v11554_v6, %v8990_v28  ;;  %v4930_v0 = vrot.slane %v4928_v11, 4  ;;  %v10109_v16 = vld [vmem:[#allocation9 + $0x18] sm:$0xff]   ;;  %v8993_v6 = vadd.f32 %v11600_v56, %v11592_v36  ;;  %v11658_v24 = vpop.f32.mrf.mxu0 }
 0x2c4   : > { %v11641_v34 = vrot.slane %v4378_v60, 7  ;;  %5614 = vst [vmem:[#allocation3 + $0x74] sm:$0xf] %v5477_v29  ;;  %v4933_v23 = vrot.slane %v4931_v18, 5  ;;  %v4937_v32 = vshll.u32 %v4790_v43, 16  ;;  %v4941_v52 = vshrl.u32 %v4790_v43, 16  ;;  %9666 = vmatprep.subr.bf16.mxu1 %v10107_v12  ;;  %9199 = vmatpush3.bf16.msra.mxu0 %v10109_v16  ;;  %v11663_v18 = vpop.f32.mrf.mxu1 }
 0x2c5   : > { %v4721_v13 = vld [vmem:[#allocation2 + $0x60] sm:$0xf]  ;;  %v4617_v55 = vld [vmem:[#allocation2 + $0x6c] sm:$0xf]  ;;  %v8630_v50 = vpack.c.bf16 %v4130_v54, %v4130_v54  ;;  %v4060_v25 = vadd.f32 %v3988_v51, %v11343_v21  ;;  %v4947_v44 = vshll.u32 %v4791_v14, 16  ;;  %v10114_v20 = vld [vmem:[#allocation9 + $0x50] sm:$0xff]   ;;  %9667 = vmatpush3.bf16.msra.mxu1 %v10107_v12 }
 0x2c6   : > { %4757 = vst [vmem:[#allocation3 + $0xc0] sm:$0xf] %v4721_v13  ;;  %v4383_v41 = vor.u32 %v4381_v5, %v11641_v34  ;;  %v4384_v63 = vrot.slane %v11641_v34, 4  ;;  %v4934_v30 = vor.u32 %v4933_v23, %v4930_v0  ;;  %v4939_v49 = vrot.slane %v4937_v32, 5  ;;  %v5350_v31 = vld [vmem:[#allocation2 + $0x3c] sm:$0xe]  ;;  %9200 = vmatprep.subr.bf16.mxu0 %v10114_v20  ;;  %v11665_v0 = vpop.f32.mrf.mxu0 }
 0x2c7   : > { %v11650_v1 = vld [vmem:[#allocation9 + $0x80] sm:$0xff]   ;;  %v4386_v21 = vshrl.u32 %v8630_v50, 16  ;;  %v4389_v45 = vshll.u32 %v8630_v50, 16  ;;  %v11655_v36 = vld [vmem:[%s12519_s3] ss:$0 sm:$0xff]  ;;  %v4943_v37 = vrot.slane %v4941_v52, 4  ;;  %v3991_v5 = vadd.f32 %v11596_v47, %v8993_v6 }
 0x2c8   : > { %v4099_v56 = vadd.f32 %v11655_v36, %v4060_v25  ;;  %v5351_v7 = vld [vmem:[#allocation2 + $0x40] sm:$0xf]  ;;  %v10115_v28 = vld [vmem:[#allocation9 + $0x10] sm:$0xff]   ;;  %v4618_v43 = vsel %vm10619_vm6, %v4383_v41, %v4617_v55  ;;  %v4621_v11 = vld [vmem:[#allocation2 + $0x74] sm:$0x1]  ;;  %v4935_v27 = vrot.slane %v4934_v30, 4  ;;  %v8996_v52 = vadd.f32 %v11613_v35, %v11609_v19  ;;  %9668 = vmatprep.subr.bf16.mxu1 %v11650_v1  ;;  %v11673_v12 = vpop.f32.mrf.mxu0 }
 0x2c9   : > { %v4949_v60 = vrot.slane %v4947_v44, 5  ;;  %4619 = vst [vmem:[#allocation2 + $0x6c] sm:$0xf] %v4618_v43  ;;  %v4388_v4 = vrot.slane %v4386_v21, 7  ;;  %v4944_v54 = vor.u32 %v4943_v37, %v4939_v49  ;;  %v5352_v29 = vld [vmem:[#allocation2 + $0x44] sm:$0x1]  ;;  %v4061_v32 = vadd.f32 %v3991_v5, %v11351_v57  ;;  %9201 = vmatpush3.bf16.msra.mxu0 %v10115_v28  ;;  %9669 = vmatpush3.bf16.msra.mxu1 %v11650_v1 }
 0x2ca   : > { %v4131_v14 = vmax.f32 %v4099_v56, 0.0  ;;  %v8390_v51 = vrot.slane %v5350_v31, 9  ;;  %v10051_v16 = vld [vmem:[#allocation3 + $0x48] ss:$12 sps:$4 sm:$0xff]   ;;  %v10053_v34 = vld [vmem:[#allocation3 + $0x4c] ss:$12 sps:$4 sm:$0xff]   ;;  %v4940_v23 = vsel %vm10687_vm13, %v4935_v27, %v4939_v49  ;;  %v3995_v56 = vpop.f32.mrf.mxu1 }
 0x2cb   : > { %v5480_v47 = vrot.slane %v5351_v7, 5  ;;  %v4792_v13 = vld [vmem:[#allocation2 + $0x3c] sm:$0xf]  ;;  %v4391_v55 = vor.u32 %v4389_v45, %v4388_v4  ;;  %v4393_v50 = vrot.slane %v4388_v4, 4  ;;  %v10055_v25 = vld [vmem:[#allocation3 + $0x68] ss:$12 sps:$4 sm:$0xff]   ;;  %6254 = vmatprep.mubr.bf16.mxu1 %v10053_v34  ;;  %v4100_v20 = vadd.f32 %v11655_v36, %v4061_v32  ;;  %v11682_v7 = vpop.f32.mrf.mxu0 }
 0x2cc   : > { %v8631_v44 = vpack.c.bf16 %v4131_v14, %v4131_v14  ;;  %v4945_v6 = vrot.slane %v4944_v54, 4  ;;  %5307 = vst [vmem:[#allocation3 + $0x64] sm:$0xf] %v4940_v23  ;;  %v5483_v19 = vrot.slane %v5352_v29, 5  ;;  %v4793_v35 = vld [vmem:[#allocation2 + $0x40] sm:$0xf]  ;;  %6255 = vmatmul.mubr.bf16.gmra.mxu1 %v10051_v16  ;;  %9627 = vmatmul.mubr.bf16.gmra.mxu0 %v10055_v25  ;;  %v3996_v5 = vadd.f32 %v8996_v52, %v3995_v56  ;;  %v11696_v25 = vpop.f32.mrf.mxu1 }
 0x2cd   : > { %v5481_v57 = vsel %vm10653_vm10, %v8390_v51, %v5480_v47  ;;  %v5482_v41 = vrot.slane %v5480_v47, 4  ;;  %v4722_v30 = vld [vmem:[#allocation2 + $0x64] sm:$0xf]  ;;  %v4392_v49 = vsel %vm10611_vm5, %v4384_v63, %v4391_v55  ;;  %v4622_v31 = vsel %vm10625_vm8, %v4393_v50, %v4621_v11  ;;  %v10121_v28 = vld [vmem:[#allocation9 + $0x48] sm:$0xff]   ;;  %v10127_v4 = vld [vmem:[#allocation9 + $0x40] sm:$0xff]   ;;  %v11691_v34 = vpop.f32.mrf.mxu0 }
 0x2ce   : > { %v4395_v21 = vshrl.u32 %v8631_v44, 16  ;;  %v4398_v45 = vshll.u32 %v8631_v44, 16  ;;  %5615 = vst [vmem:[#allocation3 + $0x80] sm:$0xf] %v5481_v57  ;;  %v4794_v37 = vld [vmem:[#allocation2 + $0x44] sm:$0x1]  ;;  %v4950_v63 = vsel %vm10687_vm13, %v4945_v6, %v4949_v60  ;;  %9202 = vmatprep.subr.bf16.mxu0 %v10121_v28  ;;  %v4062_v23 = vadd.f32 %v3996_v5, %v11362_v9  ;;  %v3998_v5 = vpop.f32.mrf.mxu1 }
 0x2cf   : > { %4758 = vst [vmem:[#allocation3 + $0xcc] sm:$0xf] %v4722_v30  ;;  %v10122_v43 = vld [vmem:[#allocation9 + $0x8] sm:$0xff]   ;;  %4620 = vst [vmem:[#allocation2 + $0x70] sm:$0xf] %v4392_v49  ;;  %v4132_v27 = vmax.f32 %v4100_v20, 0.0  ;;  %v5484_v11 = vsel %vm10653_vm10, %v5482_v41, %v5483_v19 }
 0x2d0   : > { %4623 = vst [vmem:[#allocation2 + $0x74] sm:$0x1] %v4622_v31  ;;  %v11689_v14 = vrot.slane %v4395_v21, 7  ;;  %v4624_v54 = vld [vmem:[#allocation2 + $0x78] sm:$0xf]  ;;  %v4952_v29 = vshrl.u32 %v4792_v13, 16  ;;  %9203 = vmatpush3.bf16.msra.mxu0 %v10122_v43  ;;  %v4101_v9 = vadd.f32 %v11655_v36, %v4062_v23  ;;  %v8999_v43 = vadd.f32 %v11631_v10, %v11622_v15 }
 0x2d1   : > { %5308 = vst [vmem:[#allocation3 + $0x70] sm:$0xf] %v4950_v63  ;;  %5616 = vst [vmem:[#allocation3 + $0x8c] sm:$0xf] %v5484_v11  ;;  %v4955_v51 = vshll.u32 %v4792_v13, 16  ;;  %v4961_v16 = vshll.u32 %v4793_v35, 16  ;;  %v8632_v60 = vpack.c.bf16 %v4132_v27, %v4132_v27  ;;  %9204 = vmatprep.subr.bf16.mxu0 %v10127_v4 }
 0x2d2   : > { %v4965_v32 = vshrl.u32 %v4793_v35, 16  ;;  %v4971_v47 = vshll.u32 %v4794_v37, 16  ;;  %v5353_v52 = vld [vmem:[#allocation2 + $0x48] sm:$0xe]  ;;  %v4723_v55 = vld [vmem:[#allocation2 + $0x6c] sm:$0xf]  ;;  %v4400_v1 = vor.u32 %v4398_v45, %v11689_v14  ;;  %v11699_v35 = vpop.f32.mrf.mxu0 }
 0x2d3   : > { %v4401_v50 = vrot.slane %v11689_v14, 4  ;;  %v4954_v44 = vrot.slane %v4952_v29, 4  ;;  %v4957_v13 = vrot.slane %v4955_v51, 5  ;;  %v5354_v6 = vld [vmem:[#allocation2 + $0x4c] sm:$0xf]  ;;  %v4403_v20 = vshrl.u32 %v8632_v60, 16 }
 0x2d4   : > { %4759 = vst [vmem:[#allocation3 + $0xd8] sm:$0xf] %v4723_v55  ;;  %v4406_v57 = vshll.u32 %v8632_v60, 16  ;;  %v4963_v41 = vrot.slane %v4961_v16, 5  ;;  %v5355_v19 = vld [vmem:[#allocation2 + $0x50] sm:$0x1]  ;;  %v4625_v30 = vsel %vm10619_vm6, %v4400_v1, %v4624_v54  ;;  %v3999_v55 = vadd.f32 %v8999_v43, %v3998_v5  ;;  %v11705_v1 = vpop.f32.mrf.mxu0 }
 0x2d5   : > { %v4628_v49 = vld [vmem:[#allocation2 + $0x80] sm:$0x1]  ;;  %v4958_v31 = vor.u32 %v4957_v13, %v4954_v44  ;;  %v4967_v21 = vrot.slane %v4965_v32, 4  ;;  %v4973_v45 = vrot.slane %v4971_v47, 5  ;;  %v10128_v56 = vld [vmem:[#allocation9] sm:$0xff]   ;;  %v4405_v37 = vrot.slane %v4403_v20, 7 }
 0x2d6   : > { %4626 = vst [vmem:[#allocation2 + $0x78] sm:$0xf] %v4625_v30  ;;  %v4133_v28 = vmax.f32 %v4101_v9, 0.0  ;;  %v8391_v63 = vrot.slane %v5353_v52, 9  ;;  %v4795_v27 = vld [vmem:[#allocation2 + $0x48] sm:$0xf]  ;;  %9205 = vmatpush3.bf16.msra.mxu0 %v10128_v56 }
 0x2d7   : > { %v10133_v11 = vld [vmem:[#allocation9 + $0x1f8] sm:$0xff]   ;;  %v4959_v4 = vrot.slane %v4958_v31, 4  ;;  %v4968_v14 = vor.u32 %v4967_v21, %v4963_v41  ;;  %v5487_v29 = vrot.slane %v5354_v6, 5  ;;  %v5490_v51 = vrot.slane %v5355_v19, 5  ;;  %v4796_v54 = vld [vmem:[#allocation2 + $0x4c] sm:$0xf] }
 0x2d8   : > { %v10056_v16 = vld [vmem:[#allocation3 + $0x60] ss:$12 sps:$4 sm:$0xff]   ;;  %v10058_v60 = vld [vmem:[#allocation3 + $0x64] ss:$12 sps:$4 sm:$0xff]   ;;  %v4408_v23 = vor.u32 %v4406_v57, %v4405_v37  ;;  %v4410_v32 = vrot.slane %v4405_v37, 4  ;;  %v8633_v47 = vpack.c.bf16 %v4133_v28, %v4133_v28  ;;  %9326 = vmatprep.subr.bf16.mxu1 %v10133_v11  ;;  %v4063_v31 = vadd.f32 %v3999_v55, %v11437_v8 }
 0x2d9   : > { %v10059_v15 = vld [vmem:[#allocation3 + $0x80] ss:$12 sps:$4 sm:$0xff]   ;;  %v4964_v10 = vsel %vm10687_vm13, %v4959_v4, %v4963_v41  ;;  %v4969_v52 = vrot.slane %v4968_v14, 4  ;;  %v5488_v44 = vsel %vm10653_vm10, %v8391_v63, %v5487_v29  ;;  %v5489_v13 = vrot.slane %v5487_v29, 4  ;;  %6262 = vmatprep.mubr.bf16.mxu1 %v10058_v60  ;;  %v4797_v19 = vld [vmem:[#allocation2 + $0x50] sm:$0x1]  ;;  %v11724_v63 = vpop.f32.mrf.mxu0 }
 0x2da   : > { %v4409_v6 = vsel %vm10611_vm5, %v4401_v50, %v4408_v23  ;;  %v4629_v20 = vsel %vm10625_vm8, %v4410_v32, %v4628_v49  ;;  %v4412_v57 = vshrl.u32 %v8633_v47, 16  ;;  %v4415_v9 = vshll.u32 %v8633_v47, 16  ;;  %5309 = vst [vmem:[#allocation3 + $0x7c] sm:$0xf] %v4964_v10  ;;  %5617 = vst [vmem:[#allocation3 + $0x98] sm:$0xf] %v5488_v44  ;;  %6263 = vmatmul.mubr.bf16.gmra.mxu1 %v10056_v16  ;;  %v11730_v16 = vpop.f32.mrf.mxu1 }
 0x2db   : > { %v4724_v30 = vld [vmem:[#allocation2 + $0x70] sm:$0xf]  ;;  %4627 = vst [vmem:[#allocation2 + $0x7c] sm:$0xf] %v4409_v6  ;;  %4630 = vst [vmem:[#allocation2 + $0x80] sm:$0x1] %v4629_v20  ;;  %9630 = vmatprep.mubr.bf16.mxu0 %v10059_v15  ;;  %v4974_v41 = vsel %vm10687_vm13, %v4969_v52, %v4973_v45  ;;  %v5491_v50 = vsel %vm10653_vm10, %v5489_v13, %v5490_v51  ;;  %v9002_v37 = vadd.f32 %v11646_v58, %v11639_v39  ;;  %v11737_v52 = vpop.f32.mrf.mxu0 }
 0x2dc   : > { %v4976_v21 = vshrl.u32 %v4795_v27, 16  ;;  %4760 = vst [vmem:[#allocation3 + $0xe4] sm:$0xf] %v4724_v30  ;;  %v11720_v49 = vrot.slane %v4412_v57, 7  ;;  %v4631_v56 = vld [vmem:[#allocation2 + $0x84] sm:$0xf]  ;;  %v4102_v45 = vadd.f32 %v11655_v36, %v4063_v31 }
 0x2dd   : > { %5310 = vst [vmem:[#allocation3 + $0x88] sm:$0xf] %v4974_v41  ;;  %5618 = vst [vmem:[#allocation3 + $0xa4] sm:$0xf] %v5491_v50  ;;  %v4979_v28 = vshll.u32 %v4795_v27, 16  ;;  %v4985_v43 = vshll.u32 %v4796_v54, 16  ;;  %v4004_v51 = vadd.f32 %v11663_v18, %v9002_v37  ;;  %v9005_v18 = vadd.f32 %v11665_v0, %v11658_v24  ;;  %v4011_v41 = vpop.f32.mrf.mxu1 }
 0x2de   : > { %v4978_v8 = vrot.slane %v4976_v21, 4  ;;  %v4989_v11 = vshrl.u32 %v4796_v54, 16  ;;  %v4995_v5 = vshll.u32 %v4797_v19, 16  ;;  %v5356_v4 = vld [vmem:[#allocation2 + $0x54] sm:$0xe]  ;;  %v4417_v14 = vor.u32 %v4415_v9, %v11720_v49  ;;  %v10135_v44 = vld [vmem:[#allocation9 + $0x238] sm:$0xff]  }
 0x2df   : > { %v4418_v29 = vrot.slane %v11720_v49, 4  ;;  %v4981_v60 = vrot.slane %v4979_v28, 5  ;;  %v5357_v39 = vld [vmem:[#allocation2 + $0x58] sm:$0xf]  ;;  %v4134_v27 = vmax.f32 %v4102_v45, 0.0  ;;  %v4987_v23 = vrot.slane %v4985_v43, 5  ;;  %9702 = vmatprep.subr.bf16.mxu0 %v10135_v44 }
 0x2e0   : > { %v4725_v58 = vld [vmem:[#allocation2 + $0x78] sm:$0xf]  ;;  %v4991_v32 = vrot.slane %v4989_v11, 4  ;;  %v4997_v47 = vrot.slane %v4995_v5, 5  ;;  %v5358_v55 = vld [vmem:[#allocation2 + $0x5c] sm:$0x1]  ;;  %v4632_v54 = vsel %vm10619_vm6, %v4417_v14, %v4631_v56  ;;  %v4064_v15 = vadd.f32 %v4004_v51, %v11359_v40  ;;  %v11750_v11 = vpop.f32.mrf.mxu0 }
 0x2e1   : > { %4761 = vst [vmem:[#allocation3 + $0xf0] sm:$0xf] %v4725_v58  ;;  %v4982_v10 = vor.u32 %v4981_v60, %v4978_v8  ;;  %4633 = vst [vmem:[#allocation2 + $0x84] sm:$0xf] %v4632_v54  ;;  %v8634_v13 = vpack.c.bf16 %v4134_v27, %v4134_v27  ;;  %v8392_v20 = vrot.slane %v5356_v4, 9  ;;  %v5494_v57 = vrot.slane %v5357_v39, 5  ;;  %v11753_v60 = vpop.f32.mrf.mxu1 }
 0x2e2   : > { %v4992_v6 = vor.u32 %v4991_v32, %v4987_v23  ;;  %v4103_v9 = vadd.f32 %v11655_v36, %v4064_v15  ;;  %v4007_v30 = vadd.f32 %v11696_v25, %v9005_v18  ;;  %v5497_v31 = vrot.slane %v5358_v55, 5  ;;  %v4798_v40 = vld [vmem:[#allocation2 + $0x54] sm:$0xf]  ;;  %v10060_v50 = vld [vmem:[#allocation3 + $0x78] ss:$12 sps:$4 sm:$0xff]  }
 0x2e3   : > { %v4983_v19 = vrot.slane %v4982_v10, 4  ;;  %v4420_v24 = vshrl.u32 %v8634_v13, 16  ;;  %v5495_v0 = vsel %vm10653_vm10, %v8392_v20, %v5494_v57  ;;  %v9008_v56 = vadd.f32 %v11682_v7, %v11673_v12  ;;  %v4726_v7 = vld [vmem:[#allocation2 + $0x7c] sm:$0xf]  ;;  %v4635_v51 = vld [vmem:[#allocation2 + $0x8c] sm:$0x1] }
 0x2e4   : > { %v10062_v21 = vld [vmem:[#allocation3 + $0x7c] ss:$12 sps:$4 sm:$0xff]   ;;  %v9011_v37 = vadd.f32 %v11699_v35, %v11691_v34  ;;  %v4423_v28 = vshll.u32 %v8634_v13, 16  ;;  %v10064_v43 = vld [vmem:[#allocation3 + $0x98] ss:$12 sps:$4 sm:$0xff]   ;;  %v4135_v45 = vmax.f32 %v4103_v9, 0.0  ;;  %v4065_v8 = vadd.f32 %v4007_v30, %v11364_v3  ;;  %v11760_v13 = vpop.f32.mrf.mxu0 }
 0x2e5   : > { %v4988_v25 = vsel %vm10687_vm13, %v4983_v19, %v4987_v23  ;;  %5619 = vst [vmem:[#allocation3 + $0xb0] sm:$0xf] %v5495_v0  ;;  %6270 = vmatprep.mubr.bf16.mxu1 %v10062_v21  ;;  %v4422_v5 = vrot.slane %v4420_v24, 7  ;;  %v4993_v4 = vrot.slane %v4992_v6, 4  ;;  %v5496_v14 = vrot.slane %v5494_v57, 4  ;;  %9631 = vmatmul.mubr.bf16.gmra.mxu0 %v10064_v43 }
 0x2e6   : > { %5311 = vst [vmem:[#allocation3 + $0x94] sm:$0xf] %v4988_v25  ;;  %v4012_v12 = vadd.f32 %v9008_v56, %v4011_v41  ;;  %6271 = vmatmul.mubr.bf16.gmra.mxu1 %v10060_v50  ;;  %v8635_v34 = vpack.c.bf16 %v4135_v45, %v4135_v45  ;;  %v4104_v35 = vadd.f32 %v11655_v36, %v4065_v8  ;;  %v5000_v39 = vshrl.u32 %v4798_v40, 16  ;;  %v4799_v55 = vld [vmem:[#allocation2 + $0x58] sm:$0xf]  ;;  %v11769_v45 = vpop.f32.mrf.mxu0 }
 0x2e7   : > { %v5003_v3 = vshll.u32 %v4798_v40, 16  ;;  %4762 = vst [vmem:[#allocation3 + $0xfc] sm:$0xf] %v4726_v7  ;;  %v4425_v58 = vor.u32 %v4423_v28, %v4422_v5  ;;  %v4427_v27 = vrot.slane %v4422_v5, 4  ;;  %v4998_v23 = vsel %vm10687_vm13, %v4993_v4, %v4997_v47  ;;  %v4800_v44 = vld [vmem:[#allocation2 + $0x5c] sm:$0x1] }
 0x2e8   : > { %v5498_v32 = vsel %vm10653_vm10, %v5496_v14, %v5497_v31  ;;  %v4429_v54 = vshrl.u32 %v8635_v34, 16  ;;  %v4432_v15 = vshll.u32 %v8635_v34, 16  ;;  %5312 = vst [vmem:[#allocation3 + $0xa0] sm:$0xf] %v4998_v23  ;;  %v4136_v10 = vmax.f32 %v4104_v35, 0.0  ;;  %v4014_v31 = vpop.f32.mrf.mxu1 }
 0x2e9   : > { %5620 = vst [vmem:[#allocation3 + $0xbc] sm:$0xf] %v5498_v32  ;;  %v4066_v18 = vadd.f32 %v4012_v12, %v11374_v46  ;;  %v4426_v6 = vsel %vm10611_vm5, %v4418_v29, %v4425_v58  ;;  %v4636_v47 = vsel %vm10625_vm8, %v4427_v27, %v4635_v51  ;;  %v5002_v20 = vrot.slane %v5000_v39, 4  ;;  %v4727_v9 = vld [vmem:[#allocation2 + $0x84] sm:$0xf] }
 0x2ea   : > { %v5005_v57 = vrot.slane %v5003_v3, 5  ;;  %4634 = vst [vmem:[#allocation2 + $0x88] sm:$0xf] %v4426_v6  ;;  %4637 = vst [vmem:[#allocation2 + $0x8c] sm:$0x1] %v4636_v47  ;;  %v4431_v19 = vrot.slane %v4429_v54, 7  ;;  %v8636_v41 = vpack.c.bf16 %v4136_v10, %v4136_v10  ;;  %v4015_v24 = vadd.f32 %v9011_v37, %v4014_v31  ;;  %v11777_v6 = vpop.f32.mrf.mxu0 }
 0x2eb   : > { %v4638_v30 = vld [vmem:[#allocation2 + $0x90] sm:$0xf]  ;;  %v4105_v46 = vadd.f32 %v11655_v36, %v4066_v18  ;;  %v5009_v40 = vshll.u32 %v4799_v55, 16  ;;  %v5359_v50 = vld [vmem:[#allocation2 + $0x60] sm:$0xe]  ;;  %v5013_v21 = vshrl.u32 %v4799_v55, 16 }
 0x2ec   : > { %4763 = vst [vmem:[#allocation3 + $0x108] sm:$0xf] %v4727_v9  ;;  %v5006_v49 = vor.u32 %v5005_v57, %v5002_v20  ;;  %v5019_v29 = vshll.u32 %v4800_v44, 16  ;;  %v4434_v0 = vor.u32 %v4432_v15, %v4431_v19  ;;  %v4435_v56 = vrot.slane %v4431_v19, 4  ;;  %v5360_v14 = vld [vmem:[#allocation2 + $0x64] sm:$0xf] }
 0x2ed   : > { %v4437_v28 = vshrl.u32 %v8636_v41, 16  ;;  %v4440_v43 = vshll.u32 %v8636_v41, 16  ;;  %v4137_v25 = vmax.f32 %v4105_v46, 0.0  ;;  %v5011_v5 = vrot.slane %v5009_v40, 5  ;;  %v4642_v51 = vld [vmem:[#allocation2 + $0x98] sm:$0x1] }
 0x2ee   : > { %v5007_v8 = vrot.slane %v5006_v49, 4  ;;  %v5015_v4 = vrot.slane %v5013_v21, 4  ;;  %v4639_v12 = vsel %vm10619_vm6, %v4434_v0, %v4638_v30  ;;  %v5021_v34 = vrot.slane %v5019_v29, 5  ;;  %v5361_v37 = vld [vmem:[#allocation2 + $0x68] sm:$0x1] }
 0x2ef   : > { %v4439_v7 = vrot.slane %v4437_v28, 7  ;;  %v4067_v35 = vadd.f32 %v4015_v24, %v11441_v62  ;;  %4640 = vst [vmem:[#allocation2 + $0x90] sm:$0xf] %v4639_v12  ;;  %v10065_v39 = vld [vmem:[#allocation3 + $0x90] ss:$12 sps:$4 sm:$0xff]   ;;  %v8637_v58 = vpack.c.bf16 %v4137_v25, %v4137_v25  ;;  %v8393_v32 = vrot.slane %v5359_v50, 9  ;;  %v11789_v25 = vpop.f32.mrf.mxu0 }
 0x2f0   : > { %v10067_v3 = vld [vmem:[#allocation3 + $0x94] ss:$12 sps:$4 sm:$0xff]   ;;  %v5012_v27 = vsel %vm10687_vm13, %v5007_v8, %v5011_v5  ;;  %v5016_v23 = vor.u32 %v5015_v4, %v5011_v5  ;;  %v4801_v55 = vld [vmem:[#allocation2 + $0x60] sm:$0xf]  ;;  %v10068_v10 = vld [vmem:[#allocation3 + $0xb0] ss:$12 sps:$4 sm:$0xff]   ;;  %v9014_v29 = vadd.f32 %v11724_v63, %v11705_v1 }
 0x2f1   : > { %v4442_v54 = vor.u32 %v4440_v43, %v4439_v7  ;;  %v4444_v15 = vrot.slane %v4439_v7, 4  ;;  %5313 = vst [vmem:[#allocation3 + $0xac] sm:$0xf] %v5012_v27  ;;  %v4106_v18 = vadd.f32 %v11655_v36, %v4067_v35  ;;  %v5501_v44 = vrot.slane %v5360_v14, 5  ;;  %6278 = vmatprep.mubr.bf16.mxu1 %v10067_v3  ;;  %v4802_v9 = vld [vmem:[#allocation2 + $0x64] sm:$0xf]  ;;  %9634 = vmatprep.mubr.bf16.mxu0 %v10068_v10  ;;  %v11797_v3 = vpop.f32.mrf.mxu1  ;;  %v11801_v10 = vpop.f32.mrf.mxu0 }
 0x2f2   : > { %v4446_v62 = vshrl.u32 %v8637_v58, 16  ;;  %v4449_v47 = vshll.u32 %v8637_v58, 16  ;;  %v5017_v20 = vrot.slane %v5016_v23, 4  ;;  %v5504_v57 = vrot.slane %v5361_v37, 5  ;;  %6279 = vmatmul.mubr.bf16.gmra.mxu1 %v10065_v39  ;;  %v4728_v31 = vld [vmem:[#allocation2 + $0x88] sm:$0xf] }
 0x2f3   : > { %v4443_v19 = vsel %vm10611_vm5, %v4435_v56, %v4442_v54  ;;  %v4643_v30 = vsel %vm10625_vm8, %v4444_v15, %v4642_v51  ;;  %v4138_v41 = vmax.f32 %v4106_v18, 0.0  ;;  %v5502_v46 = vsel %vm10653_vm10, %v8393_v32, %v5501_v44  ;;  %v4645_v50 = vld [vmem:[#allocation2 + $0x9c] sm:$0xf]  ;;  %4764 = vst [vmem:[#allocation3 + $0x114] sm:$0xf] %v4728_v31 }
 0x2f4   : > { %4641 = vst [vmem:[#allocation2 + $0x94] sm:$0xf] %v4443_v19  ;;  %4644 = vst [vmem:[#allocation2 + $0x98] sm:$0x1] %v4643_v30  ;;  %v4448_v40 = vrot.slane %v4446_v62, 7  ;;  %v5022_v49 = vsel %vm10687_vm13, %v5017_v20, %v5021_v34  ;;  %v5503_v21 = vrot.slane %v5501_v44, 4  ;;  %v4020_v14 = vadd.f32 %v11730_v16, %v9014_v29 }
 0x2f5   : > { %5621 = vst [vmem:[#allocation3 + $0xc8] sm:$0xf] %v5502_v46  ;;  %5314 = vst [vmem:[#allocation3 + $0xb8] sm:$0xf] %v5022_v49  ;;  %v8638_v24 = vpack.c.bf16 %v4138_v41, %v4138_v41  ;;  %v4803_v0 = vld [vmem:[#allocation2 + $0x68] sm:$0x1]  ;;  %v9017_v54 = vadd.f32 %v11750_v11, %v11737_v52 }
 0x2f6   : > { %v5024_v56 = vshrl.u32 %v4801_v55, 16  ;;  %v5027_v28 = vshll.u32 %v4801_v55, 16  ;;  %v5033_v43 = vshll.u32 %v4802_v9, 16  ;;  %v4451_v8 = vor.u32 %v4449_v47, %v4448_v40  ;;  %v5362_v12 = vld [vmem:[#allocation2 + $0x6c] sm:$0xe] }
 0x2f7   : > { %v4452_v5 = vrot.slane %v4448_v40, 4  ;;  %v5505_v4 = vsel %vm10653_vm10, %v5503_v21, %v5504_v57  ;;  %v4454_v7 = vshrl.u32 %v8638_v24, 16  ;;  %v4457_v51 = vshll.u32 %v8638_v24, 16  ;;  %v5363_v34 = vld [vmem:[#allocation2 + $0x70] sm:$0xf]  ;;  %v4027_v40 = vpop.f32.mrf.mxu1 }
 0x2f8   : > { %5622 = vst [vmem:[#allocation3 + $0xd4] sm:$0xf] %v5505_v4  ;;  %v5026_v1 = vrot.slane %v5024_v56, 4  ;;  %v5029_v63 = vrot.slane %v5027_v28, 5  ;;  %v4646_v35 = vsel %vm10619_vm6, %v4451_v8, %v4645_v50  ;;  %v4649_v37 = vld [vmem:[#allocation2 + $0xa4] sm:$0x1]  ;;  %v4068_v39 = vadd.f32 %v4020_v14, %v11371_v38 }
 0x2f9   : > { %v5035_v58 = vrot.slane %v5033_v43, 5  ;;  %v5037_v27 = vshrl.u32 %v4802_v9, 16  ;;  %v4729_v23 = vld [vmem:[#allocation2 + $0x90] sm:$0xf]  ;;  %4647 = vst [vmem:[#allocation2 + $0x9c] sm:$0xf] %v4646_v35  ;;  %v4023_v11 = vadd.f32 %v11753_v60, %v9017_v54  ;;  %v11824_v35 = vpop.f32.mrf.mxu1 }
 0x2fa   : > { %v4456_v16 = vrot.slane %v4454_v7, 7  ;;  %v5030_v32 = vor.u32 %v5029_v63, %v5026_v1  ;;  %v5043_v55 = vshll.u32 %v4803_v0, 16  ;;  %v5364_v15 = vld [vmem:[#allocation2 + $0x74] sm:$0x1]  ;;  %4765 = vst [vmem:[#allocation3 + $0x120] sm:$0xf] %v4729_v23  ;;  %v4107_v18 = vadd.f32 %v11655_v36, %v4068_v39  ;;  %v11815_v0 = vpop.f32.mrf.mxu0 }
 0x2fb   : > { %v5039_v44 = vrot.slane %v5037_v27, 4  ;;  %v8394_v38 = vrot.slane %v5362_v12, 9  ;;  %v5508_v62 = vrot.slane %v5363_v34, 5  ;;  %v4804_v47 = vld [vmem:[#allocation2 + $0x6c] sm:$0xf]  ;;  %v4069_v43 = vadd.f32 %v4023_v11, %v11378_v42 }
 0x2fc   : > { %v11804_v20 = vld [vmem:[#allocation2 + $0x70] sm:$0xf]  ;;  %v4459_v57 = vor.u32 %v4457_v51, %v4456_v16  ;;  %v4461_v9 = vrot.slane %v4456_v16, 4  ;;  %v5031_v19 = vrot.slane %v5030_v32, 4  ;;  %v5045_v30 = vrot.slane %v5043_v55, 5 }
 0x2fd   : > { %v10069_v41 = vld [vmem:[#allocation3 + $0xa8] ss:$12 sps:$4 sm:$0xff]   ;;  %v10071_v46 = vld [vmem:[#allocation3 + $0xac] ss:$12 sps:$4 sm:$0xff]   ;;  %v4139_v31 = vmax.f32 %v4107_v18, 0.0  ;;  %v5040_v52 = vor.u32 %v5039_v44, %v5035_v58  ;;  %v5509_v50 = vsel %vm10653_vm10, %v8394_v38, %v5508_v62  ;;  %v5510_v24 = vrot.slane %v5508_v62, 4 }
 0x2fe   : > { %v4460_v49 = vsel %vm10611_vm5, %v4452_v5, %v4459_v57  ;;  %v4650_v21 = vsel %vm10625_vm8, %v4461_v9, %v4649_v37  ;;  %v5036_v29 = vsel %vm10687_vm13, %v5031_v19, %v5035_v58  ;;  %5623 = vst [vmem:[#allocation3 + $0xe0] sm:$0xf] %v5509_v50  ;;  %6286 = vmatprep.mubr.bf16.mxu1 %v10071_v46  ;;  %v5511_v8 = vrot.slane %v5364_v15, 5  ;;  %v4730_v7 = vld [vmem:[#allocation2 + $0x94] sm:$0xf]  ;;  %v9027_v58 = vpop.f32.mrf.mxu0  ;;  %v4030_v9 = vpop.f32.mrf.mxu1 }
 0x2ff   : > { %4648 = vst [vmem:[#allocation2 + $0xa0] sm:$0xf] %v4460_v49  ;;  %4651 = vst [vmem:[#allocation2 + $0xa4] sm:$0x1] %v4650_v21  ;;  %v10073_v60 = vld [vmem:[#allocation3 + $0xc8] ss:$12 sps:$4 sm:$0xff]   ;;  %v8639_v56 = vpack.c.bf16 %v4139_v31, %v4139_v31  ;;  %6287 = vmatmul.mubr.bf16.gmra.mxu1 %v10069_v41  ;;  %v9020_v5 = vadd.f32 %v11769_v45, %v11760_v13  ;;  %v4108_v34 = vadd.f32 %v11655_v36, %v4069_v43 }
 0x300   : > { %v5041_v28 = vrot.slane %v5040_v52, 4  ;;  %5315 = vst [vmem:[#allocation3 + $0xc4] sm:$0xf] %v5036_v29  ;;  %v5048_v4 = vshrl.u32 %v4804_v47, 16  ;;  %v5051_v14 = vshll.u32 %v4804_v47, 16  ;;  %v5057_v12 = vshll.u32 %v11804_v20, 16  ;;  %9635 = vmatmul.mubr.bf16.gmra.mxu0 %v10073_v60  ;;  %v9028_v52 = vpop.f32.mrf.mxu0 }
 0x301   : > { %v4463_v51 = vshrl.u32 %v8639_v56, 16  ;;  %v4466_v1 = vshll.u32 %v8639_v56, 16  ;;  %v4806_v42 = vld [vmem:[#allocation2 + $0x74] sm:$0x1]  ;;  %4766 = vst [vmem:[#allocation3 + $0x12c] sm:$0xf] %v4730_v7  ;;  %v5512_v13 = vsel %vm10653_vm10, %v5510_v24, %v5511_v8  ;;  %v4028_v45 = vadd.f32 %v9020_v5, %v4027_v40 }
 0x302   : > { %v5046_v63 = vsel %vm10687_vm13, %v5041_v28, %v5045_v30  ;;  %v5050_v37 = vrot.slane %v5048_v4, 4  ;;  %v5053_v39 = vrot.slane %v5051_v14, 5  ;;  %v4731_v27 = vld [vmem:[#allocation2 + $0x9c] sm:$0xf]  ;;  %v4140_v16 = vmax.f32 %v4108_v34, 0.0 }
 0x303   : > { %5316 = vst [vmem:[#allocation3 + $0xd0] sm:$0xf] %v5046_v63  ;;  %v4465_v23 = vrot.slane %v4463_v51, 7  ;;  %5624 = vst [vmem:[#allocation3 + $0xec] sm:$0xf] %v5512_v13  ;;  %v5059_v32 = vrot.slane %v5057_v12, 5  ;;  %v4070_v15 = vadd.f32 %v4028_v45, %v11389_v17  ;;  %v9023_v38 = vadd.f32 %v11789_v25, %v11777_v6 }
 0x304   : > { %v5061_v55 = vshrl.u32 %v11804_v20, 16  ;;  %4767 = vst [vmem:[#allocation3 + $0x138] sm:$0xf] %v4731_v27  ;;  %v4652_v54 = vld [vmem:[#allocation2 + $0xa8] sm:$0xf]  ;;  %v5054_v18 = vor.u32 %v5053_v39, %v5050_v37  ;;  %v5067_v44 = vshll.u32 %v4806_v42, 16  ;;  %v8640_v57 = vpack.c.bf16 %v4140_v16, %v4140_v16 }
 0x305   : > { %v4468_v62 = vor.u32 %v4466_v1, %v4465_v23  ;;  %v4469_v47 = vrot.slane %v4465_v23, 4  ;;  %v5365_v30 = vld [vmem:[#allocation2 + $0x78] sm:$0xe]  ;;  %v4109_v41 = vadd.f32 %v11655_v36, %v4070_v15  ;;  %v4031_v20 = vadd.f32 %v9023_v38, %v4030_v9  ;;  %v5366_v49 = vld [vmem:[#allocation2 + $0x7c] sm:$0xf] }
 0x306   : > { %v5063_v19 = vrot.slane %v5061_v55, 4  ;;  %v5055_v46 = vrot.slane %v5054_v18, 4  ;;  %v5069_v31 = vrot.slane %v5067_v44, 5  ;;  %v4471_v11 = vshrl.u32 %v8640_v57, 16  ;;  %v4732_v6 = vld [vmem:[#allocation2 + $0xa0] sm:$0xf] }
 0x307   : > { %v4653_v17 = vsel %vm10619_vm6, %v4468_v62, %v4652_v54  ;;  %v4474_v40 = vshll.u32 %v8640_v57, 16  ;;  %v4656_v25 = vld [vmem:[#allocation2 + $0xb0] sm:$0x1]  ;;  %v4141_v21 = vmax.f32 %v4109_v41, 0.0  ;;  %v4071_v24 = vadd.f32 %v4031_v20, %v11445_v26  ;;  %v5367_v60 = vld [vmem:[#allocation2 + $0x80] sm:$0x1] }
 0x308   : > { %v5064_v50 = vor.u32 %v5063_v19, %v5059_v32  ;;  %4654 = vst [vmem:[#allocation2 + $0xa8] sm:$0xf] %v4653_v17  ;;  %v5060_v29 = vsel %vm10687_vm13, %v5055_v46, %v5059_v32  ;;  %v8395_v56 = vrot.slane %v5365_v30, 9  ;;  %4768 = vst [vmem:[#allocation3 + $0x144] sm:$0xf] %v4732_v6  ;;  %v4473_v8 = vrot.slane %v4471_v11, 7 }
 0x309   : > { %v10074_v28 = vld [vmem:[#allocation3 + $0xc0] ss:$12 sps:$4 sm:$0xff]   ;;  %5317 = vst [vmem:[#allocation3 + $0xdc] sm:$0xf] %v5060_v29  ;;  %v9026_v5 = vadd.f32 %v11815_v0, %v11801_v10  ;;  %v9029_v4 = vadd.f32 %v9028_v52, %v9027_v58  ;;  %v8641_v12 = vpack.c.bf16 %v4141_v21, %v4141_v21  ;;  %v4110_v51 = vadd.f32 %v11655_v36, %v4071_v24  ;;  %v4808_v39 = vld [vmem:[#allocation2 + $0x7c] sm:$0xf] }
 0x30a   : > { %v11838_v43 = vld [vmem:[#allocation3 + $0xc4] ss:$12 sps:$4 sm:$0xff]   ;;  %v11842_v14 = vld [vmem:[#allocation3 + $0xe0] ss:$12 sps:$4 sm:$0xff]   ;;  %v5065_v7 = vrot.slane %v5064_v50, 4  ;;  %v5515_v1 = vrot.slane %v5366_v49, 5  ;;  %v4476_v26 = vor.u32 %v4474_v40, %v4473_v8 }
 0x30b   : > { %6294 = vmatprep.mubr.bf16.mxu1 %v11838_v43  ;;  %v4478_v63 = vrot.slane %v4473_v8, 4  ;;  %v5518_v34 = vrot.slane %v5367_v60, 5  ;;  %v4036_v42 = vadd.f32 %v11797_v3, %v9026_v5  ;;  %v4807_v13 = vld [vmem:[#allocation2 + $0x78] sm:$0xf]  ;;  %9638 = vmatprep.mubr.bf16.mxu0 %v11842_v14  ;;  %v4480_v10 = vshrl.u32 %v8641_v12, 16 }
 0x30c   : > { %6295 = vmatmul.mubr.bf16.gmra.mxu1 %v10074_v28  ;;  %v4483_v0 = vshll.u32 %v8641_v12, 16  ;;  %v5070_v45 = vsel %vm10687_vm13, %v5065_v7, %v5069_v31  ;;  %v4142_v37 = vmax.f32 %v4110_v51, 0.0  ;;  %v4477_v36 = vsel %vm10611_vm5, %v4469_v47, %v4476_v26  ;;  %v4659_v27 = vld [vmem:[#allocation2 + $0xb4] sm:$0xf]  ;;  %v4809_v16 = vld [vmem:[#allocation2 + $0x80] sm:$0x1] }
 0x30d   : > { %v4657_v58 = vsel %vm10625_vm8, %v4478_v63, %v4656_v25  ;;  %5318 = vst [vmem:[#allocation3 + $0xe8] sm:$0xf] %v5070_v45  ;;  %v5516_v3 = vsel %vm10653_vm10, %v8395_v56, %v5515_v1  ;;  %v5517_v23 = vrot.slane %v5515_v1, 4  ;;  %4655 = vst [vmem:[#allocation2 + $0xac] sm:$0xf] %v4477_v36  ;;  %v4482_v32 = vrot.slane %v4480_v10, 7 }
 0x30e   : > { %4658 = vst [vmem:[#allocation2 + $0xb0] sm:$0x1] %v4657_v58  ;;  %v8642_v55 = vpack.c.bf16 %v4142_v37, %v4142_v37  ;;  %5625 = vst [vmem:[#allocation3 + $0xf8] sm:$0xf] %v5516_v3  ;;  %v4072_v54 = vadd.f32 %v4036_v42, %v11387_v59  ;;  %v5072_v15 = vshrl.u32 %v4807_v13, 16  ;;  %v5075_v44 = vshll.u32 %v4807_v13, 16 }
 0x30f   : > { %v5519_v18 = vsel %vm10653_vm10, %v5517_v23, %v5518_v34  ;;  %v5081_v38 = vshll.u32 %v4808_v39, 16  ;;  %v5085_v62 = vshrl.u32 %v4808_v39, 16  ;;  %v5368_v47 = vld [vmem:[#allocation2 + $0x84] sm:$0xe]  ;;  %v4485_v57 = vor.u32 %v4483_v0, %v4482_v32  ;;  %v4733_v41 = vld [vmem:[#allocation2 + $0xa8] sm:$0xf] }
 0x310   : > { %v4486_v9 = vrot.slane %v4482_v32, 4  ;;  %v4488_v19 = vshrl.u32 %v8642_v55, 16  ;;  %v4491_v30 = vshll.u32 %v8642_v55, 16  ;;  %5626 = vst [vmem:[#allocation3 + $0x104] sm:$0xf] %v5519_v18  ;;  %v5074_v20 = vrot.slane %v5072_v15, 4 }
 0x311   : > { %v4663_v46 = vld [vmem:[#allocation2 + $0xbc] sm:$0x1]  ;;  %v10246_v31 = vld [vmem:[%s12519_s3] ss:$0 sm:$0xff]  ;;  %v5077_v52 = vrot.slane %v5075_v44, 5  ;;  %v5083_v17 = vrot.slane %v5081_v38, 5  ;;  %v4660_v11 = vsel %vm10619_vm6, %v4485_v57, %v4659_v27  ;;  %v4039_v29 = vadd.f32 %v11824_v35, %v9029_v4 }
 0x312   : > { %v4111_v59 = vadd.f32 %v10246_v31, %v4072_v54  ;;  %4769 = vst [vmem:[#allocation3 + $0x150] sm:$0xf] %v4733_v41  ;;  %v4490_v40 = vrot.slane %v4488_v19, 7  ;;  %v5087_v50 = vrot.slane %v5085_v62, 4  ;;  %v5091_v49 = vshll.u32 %v4809_v16, 16 }
 0x313   : > { %v5369_v6 = vld [vmem:[#allocation2 + $0x88] sm:$0xf]  ;;  %4661 = vst [vmem:[#allocation2 + $0xb4] sm:$0xf] %v4660_v11  ;;  %v5078_v21 = vor.u32 %v5077_v52, %v5074_v20  ;;  %v5370_v24 = vld [vmem:[#allocation2 + $0x8c] sm:$0x1]  ;;  %v4073_v63 = vadd.f32 %v4039_v29, %v11391_v33 }
 0x314   : > { %v4143_v25 = vmax.f32 %v4111_v59, 0.0  ;;  %v8396_v60 = vrot.slane %v5368_v47, 9  ;;  %v11865_v56 = vld [vmem:[#allocation3 + $0xd8] ss:$12 sps:$4 sm:$0xff]   ;;  %v11867_v28 = vld [vmem:[#allocation3 + $0xdc] ss:$12 sps:$4 sm:$0xff]   ;;  %v4493_v8 = vor.u32 %v4491_v30, %v4490_v40  ;;  %v5088_v12 = vor.u32 %v5087_v50, %v5083_v17 }
 0x315   : > { %v4495_v5 = vrot.slane %v4490_v40, 4  ;;  %v4810_v7 = vld [vmem:[#allocation2 + $0x84] sm:$0xf]  ;;  %v5079_v1 = vrot.slane %v5078_v21, 4  ;;  %v5093_v26 = vrot.slane %v5091_v49, 5  ;;  %6302 = vmatprep.mubr.bf16.mxu1 %v11867_v28  ;;  %v5522_v13 = vrot.slane %v5369_v6, 5 }
 0x316   : > { %v8643_v51 = vpack.c.bf16 %v4143_v25, %v4143_v25  ;;  %v4811_v34 = vld [vmem:[#allocation2 + $0x88] sm:$0xf]  ;;  %v4494_v35 = vsel %vm10611_vm5, %v4486_v9, %v4493_v8  ;;  %v5089_v42 = vrot.slane %v5088_v12, 4  ;;  %v4812_v10 = vld [vmem:[#allocation2 + $0x8c] sm:$0x1]  ;;  %6303 = vmatmul.mubr.bf16.gmra.mxu1 %v11865_v56  ;;  %v4112_v36 = vadd.f32 %v10246_v31, %v4073_v63 }
 0x317   : > { %v4664_v4 = vsel %vm10625_vm8, %v4495_v5, %v4663_v46  ;;  %v4734_v0 = vld [vmem:[#allocation2 + $0xac] sm:$0xf]  ;;  %4662 = vst [vmem:[#allocation2 + $0xb8] sm:$0xf] %v4494_v35  ;;  %v11876_v45 = vld [vmem:[#allocation3 + $0xf8] ss:$12 sps:$4 sm:$0xff]   ;;  %v5084_v39 = vsel %vm10687_vm13, %v5079_v1, %v5083_v17  ;;  %v5523_v3 = vsel %vm10653_vm10, %v8396_v60, %v5522_v13 }
 0x318   : > { %4665 = vst [vmem:[#allocation2 + $0xbc] sm:$0x1] %v4664_v4  ;;  %v4497_v33 = vshrl.u32 %v8643_v51, 16  ;;  %v4500_v37 = vshll.u32 %v8643_v51, 16  ;;  %4770 = vst [vmem:[#allocation3 + $0x15c] sm:$0xf] %v4734_v0  ;;  %v5094_v27 = vsel %vm10687_vm13, %v5089_v42, %v5093_v26  ;;  %9639 = vmatmul.mubr.bf16.gmra.mxu0 %v11876_v45 }
 0x319   : > { %v4666_v58 = vld [vmem:[#allocation2 + $0xc0] sm:$0xf]  ;;  %5319 = vst [vmem:[#allocation3 + $0xf4] sm:$0xf] %v5084_v39  ;;  %v5524_v23 = vrot.slane %v5522_v13, 4  ;;  %v5525_v16 = vrot.slane %v5370_v24, 5 }
 0x31a   : > { %v5371_v32 = vld [vmem:[#allocation2 + $0x90] sm:$0xe]  ;;  %v4499_v55 = vrot.slane %v4497_v33, 7  ;;  %5320 = vst [vmem:[#allocation3 + $0x100] sm:$0xf] %v5094_v27  ;;  %v4144_v54 = vmax.f32 %v4112_v36, 0.0 }
 0x31b   : > { %5627 = vst [vmem:[#allocation3 + $0x110] sm:$0xf] %v5523_v3  ;;  %v5096_v15 = vshrl.u32 %v4810_v7, 16  ;;  %v5099_v18 = vshll.u32 %v4810_v7, 16  ;;  %v5526_v44 = vsel %vm10653_vm10, %v5524_v23, %v5525_v16  ;;  %v5105_v38 = vshll.u32 %v4811_v34, 16 }
 0x31c   : > { %v5109_v62 = vshrl.u32 %v4811_v34, 16  ;;  %v5115_v47 = vshll.u32 %v4812_v10, 16  ;;  %v5372_v57 = vld [vmem:[#allocation2 + $0x94] sm:$0xf]  ;;  %v4813_v9 = vld [vmem:[#allocation2 + $0x90] sm:$0xf]  ;;  %v4502_v19 = vor.u32 %v4500_v37, %v4499_v55  ;;  %v8644_v41 = vpack.c.bf16 %v4144_v54, %v4144_v54 }
 0x31d   : > { %v4503_v30 = vrot.slane %v4499_v55, 4  ;;  %5628 = vst [vmem:[#allocation3 + $0x11c] sm:$0xf] %v5526_v44  ;;  %v5098_v46 = vrot.slane %v5096_v15, 4  ;;  %v5373_v31 = vld [vmem:[#allocation2 + $0x98] sm:$0x1] }
 0x31e   : > { %v4735_v59 = vld [vmem:[#allocation2 + $0xb4] sm:$0xf]  ;;  %v5101_v20 = vrot.slane %v5099_v18, 5  ;;  %v5107_v52 = vrot.slane %v5105_v38, 5  ;;  %v5111_v17 = vrot.slane %v5109_v62, 4  ;;  %v5117_v11 = vrot.slane %v5115_v47, 5 }
 0x31f   : > { %v4814_v40 = vld [vmem:[#allocation2 + $0x94] sm:$0xf]  ;;  %4771 = vst [vmem:[#allocation3 + $0x168] sm:$0xf] %v4735_v59  ;;  %v4667_v50 = vsel %vm10619_vm6, %v4502_v19, %v4666_v58  ;;  %v4505_v49 = vshrl.u32 %v8644_v41, 16  ;;  %v4508_v6 = vshll.u32 %v8644_v41, 16 }
 0x320   : > { %v8397_v25 = vrot.slane %v5371_v32, 9  ;;  %4668 = vst [vmem:[#allocation2 + $0xc0] sm:$0xf] %v4667_v50  ;;  %v4670_v21 = vld [vmem:[#allocation2 + $0xc8] sm:$0x1]  ;;  %v5102_v29 = vor.u32 %v5101_v20, %v5098_v46  ;;  %v5112_v24 = vor.u32 %v5111_v17, %v5107_v52  ;;  %v5529_v60 = vrot.slane %v5372_v57, 5 }
 0x321   : > { %v5532_v8 = vrot.slane %v5373_v31, 5  ;;  %v4507_v5 = vrot.slane %v4505_v49, 7  ;;  %v4815_v12 = vld [vmem:[#allocation2 + $0x98] sm:$0x1]  ;;  %v5120_v7 = vshrl.u32 %v4813_v9, 16  ;;  %v5123_v51 = vshll.u32 %v4813_v9, 16 }
 0x322   : > { %v5129_v1 = vshll.u32 %v4814_v40, 16  ;;  %v11889_v26 = vld [vmem:[#allocation3 + $0xf0] ss:$12 sps:$4 sm:$0xff]   ;;  %v11891_v63 = vld [vmem:[#allocation3 + $0xf4] ss:$12 sps:$4 sm:$0xff]   ;;  %v5103_v48 = vrot.slane %v5102_v29, 4  ;;  %v5530_v34 = vsel %vm10653_vm10, %v8397_v25, %v5529_v60 }
 0x323   : > { %v5374_v35 = vld [vmem:[#allocation2 + $0x9c] sm:$0xe]  ;;  %v5375_v4 = vld [vmem:[#allocation2 + $0xa0] sm:$0xf]  ;;  %v5376_v42 = vld [vmem:[#allocation2 + $0xa4] sm:$0x1]  ;;  %v4510_v10 = vor.u32 %v4508_v6, %v4507_v5  ;;  %6310 = vmatprep.mubr.bf16.mxu1 %v11891_v63 }
 0x324   : > { %v4816_v13 = vld [vmem:[#allocation2 + $0x9c] sm:$0xf]  ;;  %v4512_v0 = vrot.slane %v4507_v5, 4  ;;  %v5113_v33 = vrot.slane %v5112_v24, 4  ;;  %v5531_v37 = vrot.slane %v5529_v60, 4  ;;  %v5108_v36 = vsel %vm10687_vm13, %v5103_v48, %v5107_v52  ;;  %6311 = vmatmul.mubr.bf16.gmra.mxu1 %v11889_v26 }
 0x325   : > { %5629 = vst [vmem:[#allocation3 + $0x128] sm:$0xf] %v5530_v34  ;;  %v11896_v39 = vld [vmem:[#allocation3 + $0x110] ss:$12 sps:$4 sm:$0xff]   ;;  %v5122_v58 = vrot.slane %v5120_v7, 4  ;;  %v5125_v27 = vrot.slane %v5123_v51, 5  ;;  %v4511_v3 = vsel %vm10611_vm5, %v4503_v30, %v4510_v10 }
 0x326   : > { %v4671_v23 = vsel %vm10625_vm8, %v4512_v0, %v4670_v21  ;;  %v5118_v16 = vsel %vm10687_vm13, %v5113_v33, %v5117_v11  ;;  %5321 = vst [vmem:[#allocation3 + $0x10c] sm:$0xf] %v5108_v36  ;;  %v5533_v32 = vsel %vm10653_vm10, %v5531_v37, %v5532_v8  ;;  %v4817_v55 = vld [vmem:[#allocation2 + $0xa0] sm:$0xf]  ;;  %v4736_v54 = vld [vmem:[#allocation2 + $0xb8] sm:$0xf]  ;;  %9642 = vmatprep.mubr.bf16.mxu0 %v11896_v39 }
 0x327   : > { %4669 = vst [vmem:[#allocation2 + $0xc4] sm:$0xf] %v4511_v3  ;;  %4672 = vst [vmem:[#allocation2 + $0xc8] sm:$0x1] %v4671_v23  ;;  %v5126_v22 = vor.u32 %v5125_v27, %v5122_v58  ;;  %v5131_v61 = vrot.slane %v5129_v1, 5  ;;  %v5133_v15 = vshrl.u32 %v4814_v40, 16 }
 0x328   : > { %5322 = vst [vmem:[#allocation3 + $0x118] sm:$0xf] %v5118_v16  ;;  %5630 = vst [vmem:[#allocation3 + $0x134] sm:$0xf] %v5533_v32  ;;  %v5139_v18 = vshll.u32 %v4815_v12, 16  ;;  %v8398_v38 = vrot.slane %v5374_v35, 9 }
 0x329   : > { %v4818_v44 = vld [vmem:[#allocation2 + $0xa4] sm:$0x1]  ;;  %4772 = vst [vmem:[#allocation3 + $0x174] sm:$0xf] %v4736_v54  ;;  %v5536_v62 = vrot.slane %v5375_v4, 5  ;;  %v5539_v47 = vrot.slane %v5376_v42, 5 }
 0x32a   : > { %v5144_v57 = vshrl.u32 %v4816_v13, 16  ;;  %v5377_v9 = vld [vmem:[#allocation2 + $0xa8] sm:$0xe]  ;;  %v5127_v19 = vrot.slane %v5126_v22, 4  ;;  %v5135_v30 = vrot.slane %v5133_v15, 4  ;;  %v5141_v41 = vrot.slane %v5139_v18, 5 }
 0x32b   : > { %v5147_v46 = vshll.u32 %v4816_v13, 16  ;;  %v4737_v31 = vld [vmem:[#allocation2 + $0xc0] sm:$0xf]  ;;  %v5537_v59 = vsel %vm10653_vm10, %v8398_v38, %v5536_v62  ;;  %v5538_v20 = vrot.slane %v5536_v62, 4  ;;  %v5153_v17 = vshll.u32 %v4817_v55, 16 }
 0x32c   : > { %v5146_v52 = vrot.slane %v5144_v57, 4  ;;  %v5378_v11 = vld [vmem:[#allocation2 + $0xac] sm:$0xf]  ;;  %4773 = vst [vmem:[#allocation3 + $0x180] sm:$0xf] %v4737_v31  ;;  %v5132_v40 = vsel %vm10687_vm13, %v5127_v19, %v5131_v61  ;;  %v5136_v50 = vor.u32 %v5135_v30, %v5131_v61  ;;  %v5157_v6 = vshrl.u32 %v4817_v55, 16 }
 0x32d   : > { %5631 = vst [vmem:[#allocation3 + $0x140] sm:$0xf] %v5537_v59  ;;  %v5149_v49 = vrot.slane %v5147_v46, 5  ;;  %v5379_v25 = vld [vmem:[#allocation2 + $0xb0] sm:$0x1]  ;;  %v5540_v29 = vsel %vm10653_vm10, %v5538_v20, %v5539_v47  ;;  %v5155_v24 = vrot.slane %v5153_v17, 5 }
 0x32e   : > { %v4819_v21 = vld [vmem:[#allocation2 + $0xa8] sm:$0xf]  ;;  %5323 = vst [vmem:[#allocation3 + $0x124] sm:$0xf] %v5132_v40  ;;  %v5163_v60 = vshll.u32 %v4818_v44, 16  ;;  %v8399_v8 = vrot.slane %v5377_v9, 9 }
 0x32f   : > { %v4820_v5 = vld [vmem:[#allocation2 + $0xac] sm:$0xf]  ;;  %v5137_v12 = vrot.slane %v5136_v50, 4  ;;  %5632 = vst [vmem:[#allocation3 + $0x14c] sm:$0xf] %v5540_v29  ;;  %v5150_v7 = vor.u32 %v5149_v49, %v5146_v52  ;;  %v5159_v51 = vrot.slane %v5157_v6, 4 }
 0x330   : > { %v5543_v1 = vrot.slane %v5378_v11, 5  ;;  %v4821_v48 = vld [vmem:[#allocation2 + $0xb0] sm:$0x1]  ;;  %v11916_v34 = vld [vmem:[#allocation3 + $0x108] ss:$12 sps:$4 sm:$0xff]   ;;  %v5165_v4 = vrot.slane %v5163_v60, 5 }
 0x331   : > { %v11918_v35 = vld [vmem:[#allocation3 + $0x10c] ss:$12 sps:$4 sm:$0xff]   ;;  %v5380_v42 = vld [vmem:[#allocation2 + $0xb4] sm:$0xe]  ;;  %v11920_v13 = vld [vmem:[#allocation3 + $0x128] ss:$12 sps:$4 sm:$0xff]   ;;  %v5142_v10 = vsel %vm10687_vm13, %v5137_v12, %v5141_v41  ;;  %v5160_v33 = vor.u32 %v5159_v51, %v5155_v24 }
 0x332   : > { %v5151_v0 = vrot.slane %v5150_v7, 4  ;;  %v5544_v37 = vsel %vm10653_vm10, %v8399_v8, %v5543_v1  ;;  %v5381_v36 = vld [vmem:[#allocation2 + $0xb8] sm:$0xf]  ;;  %6318 = vmatprep.mubr.bf16.mxu1 %v11918_v35  ;;  %5324 = vst [vmem:[#allocation3 + $0x130] sm:$0xf] %v5142_v10  ;;  %v5545_v58 = vrot.slane %v5543_v1, 4  ;;  %9643 = vmatmul.mubr.bf16.gmra.mxu0 %v11920_v13 }
 0x333   : > { %v5546_v27 = vrot.slane %v5379_v25, 5  ;;  %5633 = vst [vmem:[#allocation3 + $0x158] sm:$0xf] %v5544_v37  ;;  %v5168_v3 = vshrl.u32 %v4819_v21, 16  ;;  %v5171_v23 = vshll.u32 %v4819_v21, 16  ;;  %6319 = vmatmul.mubr.bf16.gmra.mxu1 %v11916_v34  ;;  %v5161_v54 = vrot.slane %v5160_v33, 4 }
 0x334   : > { %v5382_v16 = vld [vmem:[#allocation2 + $0xbc] sm:$0x1]  ;;  %v4822_v32 = vld [vmem:[#allocation2 + $0xb4] sm:$0xf]  ;;  %v5156_v55 = vsel %vm10687_vm13, %v5151_v0, %v5155_v24  ;;  %v5177_v22 = vshll.u32 %v4820_v5, 16  ;;  %v5181_v61 = vshrl.u32 %v4820_v5, 16 }
 0x335   : > { %v4823_v15 = vld [vmem:[#allocation2 + $0xb8] sm:$0xf]  ;;  %5325 = vst [vmem:[#allocation3 + $0x13c] sm:$0xf] %v5156_v55  ;;  %v5547_v18 = vsel %vm10653_vm10, %v5545_v58, %v5546_v27  ;;  %v5170_v44 = vrot.slane %v5168_v3, 4  ;;  %v5173_v38 = vrot.slane %v5171_v23, 5  ;;  %v5166_v47 = vsel %vm10687_vm13, %v5161_v54, %v5165_v4 }
 0x336   : > { %v5187_v62 = vshll.u32 %v4821_v48, 16  ;;  %5634 = vst [vmem:[#allocation3 + $0x164] sm:$0xf] %v5547_v18  ;;  %v5179_v57 = vrot.slane %v5177_v22, 5  ;;  %v5183_v9 = vrot.slane %v5181_v61, 4  ;;  %v8400_v19 = vrot.slane %v5380_v42, 9 }
 0x337   : > { %v4738_v30 = vld [vmem:[#allocation2 + $0xc4] sm:$0xf]  ;;  %5326 = vst [vmem:[#allocation3 + $0x148] sm:$0xf] %v5166_v47  ;;  %v5174_v46 = vor.u32 %v5173_v38, %v5170_v44  ;;  %v5550_v59 = vrot.slane %v5381_v36, 5  ;;  %v5553_v17 = vrot.slane %v5382_v16, 5 }
 0x338   : > { %v11935_v41 = vld [vmem:[#allocation3 + $0x140] ss:$12 sps:$4 sm:$0xff]   ;;  %v5189_v31 = vrot.slane %v5187_v62, 5  ;;  %v4824_v20 = vld [vmem:[#allocation2 + $0xbc] sm:$0x1]  ;;  %v5184_v52 = vor.u32 %v5183_v9, %v5179_v57  ;;  %v5192_v11 = vshrl.u32 %v4822_v32, 16 }
 0x339   : > { %4774 = vst [vmem:[#allocation3 + $0x18c] sm:$0xf] %v4738_v30  ;;  %v5195_v40 = vshll.u32 %v4822_v32, 16  ;;  %v5383_v50 = vld [vmem:[#allocation2 + $0xc0] sm:$0xe]  ;;  %9646 = vmatprep.mubr.bf16.mxu0 %v11935_v41  ;;  %v5175_v49 = vrot.slane %v5174_v46, 4  ;;  %v5551_v6 = vsel %vm10653_vm10, %v8400_v19, %v5550_v59 }
 0x33a   : > { %v5552_v25 = vrot.slane %v5550_v59, 4  ;;  %v5201_v21 = vshll.u32 %v4823_v15, 16  ;;  %v5384_v29 = vld [vmem:[#allocation2 + $0xc4] sm:$0xf]  ;;  %v11942_v60 = vld [vmem:[#allocation3 + $0x124] ss:$12 sps:$4 sm:$0xff]  }
 0x33b   : > { %v11940_v24 = vld [vmem:[#allocation3 + $0x120] ss:$12 sps:$4 sm:$0xff]   ;;  %v5185_v8 = vrot.slane %v5184_v52, 4  ;;  %5635 = vst [vmem:[#allocation3 + $0x170] sm:$0xf] %v5551_v6  ;;  %v5180_v5 = vsel %vm10687_vm13, %v5175_v49, %v5179_v57  ;;  %v5194_v7 = vrot.slane %v5192_v11, 4  ;;  %6326 = vmatprep.mubr.bf16.mxu1 %v11942_v60 }
 0x33c   : > { %v5554_v12 = vsel %vm10653_vm10, %v5552_v25, %v5553_v17  ;;  %v5197_v51 = vrot.slane %v5195_v40, 5  ;;  %v4825_v1 = vld [vmem:[#allocation2 + $0xc0] sm:$0xf]  ;;  %5327 = vst [vmem:[#allocation3 + $0x154] sm:$0xf] %v5180_v5  ;;  %v5203_v4 = vrot.slane %v5201_v21, 5  ;;  %6327 = vmatmul.mubr.bf16.gmra.mxu1 %v11940_v24 }
 0x33d   : > { %v5190_v48 = vsel %vm10687_vm13, %v5185_v8, %v5189_v31  ;;  %5636 = vst [vmem:[#allocation3 + $0x17c] sm:$0xf] %v5554_v12  ;;  %v5205_v42 = vshrl.u32 %v4823_v15, 16  ;;  %v5211_v10 = vshll.u32 %v4824_v20, 16  ;;  %v5385_v0 = vld [vmem:[#allocation2 + $0xc8] sm:$0x1] }
 0x33e   : > { %v11952_v33 = vld [vmem:[#allocation3 + $0x158] ss:$12 sps:$4 sm:$0xff]   ;;  %5328 = vst [vmem:[#allocation3 + $0x160] sm:$0xf] %v5190_v48  ;;  %v5198_v37 = vor.u32 %v5197_v51, %v5194_v7  ;;  %v8401_v36 = vrot.slane %v5383_v50, 9  ;;  %v5557_v58 = vrot.slane %v5384_v29, 5 }
 0x33f   : > { %v11954_v27 = vld [vmem:[#allocation3 + $0x13c] ss:$12 sps:$4 sm:$0xff]   ;;  %v5207_v3 = vrot.slane %v5205_v42, 4  ;;  %v4826_v23 = vld [vmem:[#allocation2 + $0xc4] sm:$0xf]  ;;  %9647 = vmatmul.mubr.bf16.gmra.mxu0 %v11952_v33  ;;  %v5560_v15 = vrot.slane %v5385_v0, 5 }
 0x340   : > { %v5199_v16 = vrot.slane %v5198_v37, 4  ;;  %v5558_v32 = vsel %vm10653_vm10, %v8401_v36, %v5557_v58  ;;  %v5559_v55 = vrot.slane %v5557_v58, 4  ;;  %v4827_v54 = vld [vmem:[#allocation2 + $0xc8] sm:$0x1]  ;;  %v11959_v22 = vld [vmem:[#allocation3 + $0x138] ss:$12 sps:$4 sm:$0xff]   ;;  %6334 = vmatprep.mubr.bf16.mxu1 %v11954_v27 }
 0x341   : > { %v5208_v61 = vor.u32 %v5207_v3, %v5203_v4  ;;  %5637 = vst [vmem:[#allocation3 + $0x188] sm:$0xf] %v5558_v32  ;;  %v5216_v18 = vshrl.u32 %v4825_v1, 16  ;;  %v5219_v44 = vshll.u32 %v4825_v1, 16  ;;  %v5213_v62 = vrot.slane %v5211_v10, 5  ;;  %v10140_v48 = vld [vmem:[#allocation9 + $0x230] sm:$0xff]  }
 0x342   : > { %v5204_v38 = vsel %vm10687_vm13, %v5199_v16, %v5203_v4  ;;  %v5225_v47 = vshll.u32 %v4826_v23, 16  ;;  %v5229_v57 = vshrl.u32 %v4826_v23, 16  ;;  %v5561_v19 = vsel %vm10653_vm10, %v5559_v55, %v5560_v15  ;;  %v11975_v49 = vld [vmem:[#allocation3 + $0x150] ss:$12 sps:$4 sm:$0xff]   ;;  %v10129_v7 = vld [vmem:[#allocation3] ss:$12 sps:$4 sm:$0xff]  }
 0x343   : > { %v5209_v9 = vrot.slane %v5208_v61, 4  ;;  %5329 = vst [vmem:[#allocation3 + $0x16c] sm:$0xf] %v5204_v38  ;;  %v5218_v30 = vrot.slane %v5216_v18, 4  ;;  %v5221_v46 = vrot.slane %v5219_v44, 5  ;;  %v5235_v40 = vshll.u32 %v4827_v54, 16 }
 0x344   : > { %v11966_v31 = vld [vmem:[#allocation3 + $0x170] ss:$12 sps:$4 sm:$0xff]   ;;  %5638 = vst [vmem:[#allocation3 + $0x194] sm:$0xf] %v5561_v19  ;;  %v5227_v59 = vrot.slane %v5225_v47, 5  ;;  %v5231_v11 = vrot.slane %v5229_v57, 4  ;;  %6335 = vmatmul.mubr.bf16.gmra.mxu1 %v11959_v22 }
 0x345   : > { %v11968_v20 = vld [vmem:[#allocation3 + $0x154] ss:$12 sps:$4 sm:$0xff]   ;;  %v5214_v52 = vsel %vm10687_vm13, %v5209_v9, %v5213_v62  ;;  %v5222_v17 = vor.u32 %v5221_v46, %v5218_v30  ;;  %9650 = vmatprep.mubr.bf16.mxu0 %v11966_v31  ;;  %v5237_v21 = vrot.slane %v5235_v40, 5  ;;  %v10131_v29 = vld [vmem:[#allocation3 + $0x4] ss:$12 sps:$4 sm:$0xff]   ;;  %v10248_v4 = vld [vmem:[#allocation9 + $0x238] sm:$0xff]  }
 0x346   : > { %5330 = vst [vmem:[#allocation3 + $0x178] sm:$0xf] %v5214_v52  ;;  %6342 = vmatprep.mubr.bf16.mxu1 %v11968_v20  ;;  %v5232_v50 = vor.u32 %v5231_v11, %v5227_v59  ;;  %v11985_v51 = vld [vmem:[#allocation3 + $0x168] ss:$12 sps:$4 sm:$0xff]   ;;  %v10145_v42 = vld [vmem:[#allocation9 + $0x228] sm:$0xff]   ;;  %v10136_v16 = vld [vmem:[#allocation9 + $0x1f0] sm:$0xff]  }
 0x347   : > { %v5223_v53 = vrot.slane %v5222_v17, 4  ;;  %v10247_v2 = vld [vmem:[#allocation3 + $0x1c] ss:$12 sps:$4 sm:$0xff]   ;;  %v11991_v10 = vld [vmem:[#allocation3 + $0x180] ss:$12 sps:$4 sm:$0xff]   ;;  %v10150_v37 = vld [vmem:[#allocation9 + $0x220] sm:$0xff]  }
 0x348   : > { %v5233_v25 = vrot.slane %v5232_v50, 4  ;;  %v10132_v0 = vld [vmem:[#allocation3 + $0x8] ss:$12 sps:$4 sm:$0xff]   ;;  %v10249_v36 = vld [vmem:[#allocation3 + $0x18] ss:$12 sps:$4 sm:$0xff]  }
 0x349   : > { %v5228_v6 = vsel %vm10687_vm13, %v5223_v53, %v5227_v59  ;;  %v10250_v58 = vld [vmem:[#allocation3 + $0x34] ss:$12 sps:$4 sm:$0xff]   ;;  %v10159_v3 = vld [vmem:[#allocation9 + $0x218] sm:$0xff]   ;;  %v10251_v32 = vld [vmem:[#allocation3 + $0x30] ss:$12 sps:$4 sm:$0xff]  }
 0x34a   : > { %5331 = vst [vmem:[#allocation3 + $0x184] sm:$0xf] %v5228_v6  ;;  %v5238_v5 = vsel %vm10687_vm13, %v5233_v25, %v5237_v21  ;;  %v10134_v23 = vld [vmem:[#allocation9 + $0x1b8] sm:$0xff]   ;;  %v10166_v55 = vld [vmem:[#allocation9 + $0x210] sm:$0xff]   ;;  %v10138_v44 = vld [vmem:[#allocation9 + $0x1e8] sm:$0xff]  }
 0x34b   : > { %v10123_v8 = vld [vmem:[#allocation3 + $0x188] ss:$12 sps:$4 sm:$0xff]   ;;  %5332 = vst [vmem:[#allocation3 + $0x190] sm:$0xf] %v5238_v5  ;;  %v10252_v54 = vld [vmem:[#allocation3 + $0x20] ss:$12 sps:$4 sm:$0xff]  }
 0x34c   : > { %9651 = vmatmul.mubr.bf16.gmra.mxu0 %v10123_v8  ;;  %6343 = vmatmul.mubr.bf16.gmra.mxu1 %v11975_v49  ;;  %v10253_v61 = vld [vmem:[#allocation3 + $0x4c] ss:$12 sps:$4 sm:$0xff]   ;;  %v10137_v18 = vld [vmem:[#allocation9 + $0x1b0] sm:$0xff]   ;;  %v10141_v47 = vld [vmem:[#allocation9 + $0x1e0] sm:$0xff]  }
 0x34d   : > { %v11981_v12 = vld [vmem:[#allocation3 + $0x16c] ss:$12 sps:$4 sm:$0xff]   ;;  %6720 = vmatprep.mubr.bf16.mxu0 %v10131_v29  ;;  %v10255_v57 = vld [vmem:[#allocation3 + $0x48] ss:$12 sps:$4 sm:$0xff]   ;;  %v10256_v19 = vld [vmem:[#allocation3 + $0x50] ss:$12 sps:$4 sm:$0xff]  }
 0x34e   : > { %6350 = vmatprep.mubr.bf16.mxu1 %v11981_v12  ;;  %v10254_v15 = vld [vmem:[#allocation3 + $0x38] ss:$12 sps:$4 sm:$0xff]   ;;  %v10180_v9 = vld [vmem:[#allocation9 + $0x200] sm:$0xff]   ;;  %v10143_v52 = vld [vmem:[#allocation9 + $0x1d8] sm:$0xff]  }
 0x34f   : > { %v10173_v38 = vld [vmem:[#allocation9 + $0x208] sm:$0xff]   ;;  %v10257_v30 = vld [vmem:[#allocation3 + $0x64] ss:$12 sps:$4 sm:$0xff]   ;;  %v10258_v46 = vld [vmem:[#allocation3 + $0x68] ss:$12 sps:$4 sm:$0xff]  }
 0x350   : > { %v10139_v62 = vld [vmem:[#allocation9 + $0x1a8] sm:$0xff]   ;;  %v10142_v59 = vld [vmem:[#allocation9 + $0x1a0] sm:$0xff]   ;;  %v10144_v17 = vld [vmem:[#allocation9 + $0x198] sm:$0xff]  }
 0x351   : > { %v10146_v11 = vld [vmem:[#allocation9 + $0x1d0] sm:$0xff]   ;;  %v10261_v50 = vld [vmem:[#allocation3 + $0x7c] ss:$12 sps:$4 sm:$0xff]   ;;  %v10151_v5 = vld [vmem:[#allocation9 + $0x1c0] sm:$0xff]  }
 0x352   : > { %v11987_v1 = vld [vmem:[#allocation3 + $0x184] ss:$12 sps:$4 sm:$0xff]   ;;  %v10259_v40 = vld [vmem:[#allocation3 + $0x60] ss:$12 sps:$4 sm:$0xff]   ;;  %v10148_v21 = vld [vmem:[#allocation9 + $0x1c8] sm:$0xff]  }
 0x353   : > { %v10260_v53 = vld [vmem:[#allocation3 + $0x80] ss:$12 sps:$4 sm:$0xff]   ;;  %v10262_v6 = vld [vmem:[#allocation3 + $0x98] ss:$12 sps:$4 sm:$0xff]  }
 0x354   : > { %6721 = vmatmul.mubr.bf16.vlgmr.msra.gmra.mxu0 %v10129_v7  ;;  %6351 = vmatmul.mubr.bf16.gmra.mxu1 %v11985_v51  ;;  %v10147_v25 = vld [vmem:[#allocation9 + $0x190] sm:$0xff]   ;;  %v10149_v29 = vld [vmem:[#allocation9 + $0x188] sm:$0xff]  }
 0x355   : > { %6728 = vmatprep.mubr.bf16.mxu0 %v10247_v2  ;;  %6358 = vmatprep.mubr.bf16.mxu1 %v11987_v1  ;;  %v10263_v7 = vld [vmem:[#allocation3 + $0x78] ss:$12 sps:$4 sm:$0xff]   ;;  %v10264_v2 = vld [vmem:[#allocation3 + $0xb0] ss:$12 sps:$4 sm:$0xff]  }
 0x356   : > { %9703 = vmatpush3.bf16.msra.mxu0 %v10248_v4  ;;  %v10265_v4 = vld [vmem:[#allocation3 + $0x94] ss:$12 sps:$4 sm:$0xff]  }
 0x357   : > { %9704 = vmatprep.subr.bf16.mxu0 %v10140_v48 }
 0x35a   : > { %9705 = vmatpush3.bf16.msra.mxu0 %v10140_v48 }
 0x35b   : > { %9706 = vmatprep.subr.bf16.mxu0 %v10145_v42 }
 0x35c   : > { %6729 = vmatmul.mubr.bf16.gmra.mxu0 %v10249_v36  ;;  %6359 = vmatmul.mubr.bf16.gmra.mxu1 %v11991_v10 }
 0x35d   : > { %6736 = vmatprep.mubr.bf16.mxu0 %v10250_v58  ;;  %9670 = vmatprep.mubr.bf16.mxu1 %v10132_v0  ;;  %v10266_v0 = vld [vmem:[#allocation3 + $0xc8] ss:$12 sps:$4 sm:$0xff]  }
 0x35e   : > { %9707 = vmatpush3.bf16.msra.mxu0 %v10145_v42 }
 0x35f   : > { %9708 = vmatprep.subr.bf16.mxu0 %v10150_v37 }
 0x362   : > { %9709 = vmatpush3.bf16.msra.mxu0 %v10150_v37  ;;  %v10152_v37 = vld [vmem:[#allocation9 + $0x180] sm:$0xff]  }
 0x363   : > { %9710 = vmatprep.subr.bf16.mxu0 %v10159_v3 }
 0x364   : > { %6737 = vmatmul.mubr.bf16.gmra.mxu0 %v10251_v32  ;;  %9671 = vmatmul.mubr.bf16.vlgmr.msra.gmra.mxu1 %v10252_v54  ;;  %v10268_v32 = vld [vmem:[#allocation3 + $0xac] ss:$12 sps:$4 sm:$0xff]   ;;  %v10269_v54 = vld [vmem:[#allocation3 + $0xa8] ss:$12 sps:$4 sm:$0xff]  }
 0x365   : > { %6744 = vmatprep.mubr.bf16.mxu0 %v10253_v61  ;;  %9327 = vmatpush3.bf16.msra.mxu1 %v10134_v23  ;;  %v10267_v23 = vld [vmem:[#allocation3 + $0x90] ss:$12 sps:$4 sm:$0xff]  }
 0x366   : > { %9674 = vmatprep.mubr.bf16.mxu1 %v10254_v15  ;;  %9328 = vmatprep.subr.bf16.mxu1 %v10136_v16 }
 0x367   : > { %9711 = vmatpush3.bf16.msra.mxu0 %v10159_v3 }
 0x368   : > { %9712 = vmatprep.subr.bf16.mxu0 %v10166_v55 }
 0x369   : > { %9329 = vmatpush3.bf16.msra.mxu1 %v10137_v18 }
 0x36a   : > { %9330 = vmatprep.subr.bf16.mxu1 %v10138_v44 }
 0x36b   : > { %9713 = vmatpush3.bf16.msra.mxu0 %v10166_v55  ;;  %v9070_v8 = vpop.f32.mrf.mxu1 }
 0x36c   : > { %6745 = vmatmul.mubr.bf16.gmra.mxu0 %v10255_v57  ;;  %9714 = vmatprep.subr.bf16.mxu0 %v10173_v38 }
 0x36d   : > { %9675 = vmatmul.mubr.bf16.gmra.mxu1 %v10256_v19  ;;  %6752 = vmatprep.mubr.bf16.mxu0 %v10257_v30  ;;  %v9071_v48 = vpop.f32.mrf.mxu1 }
 0x36e   : > { %9678 = vmatprep.mubr.bf16.mxu1 %v10258_v46  ;;  %9331 = vmatpush3.bf16.msra.mxu1 %v10139_v62  ;;  %v9072_v42 = vadd.f32 %v9071_v48, %v9070_v8 }
 0x36f   : > { %9332 = vmatprep.subr.bf16.mxu1 %v10141_v47  ;;  %9715 = vmatpush3.bf16.msra.mxu0 %v10173_v38  ;;  %v11996_v16 = vpop.f32.mrf.mxu1 }
 0x370   : > { %9716 = vmatprep.subr.bf16.mxu0 %v10180_v9  ;;  %v9624_v36 = vpop.f32.mrf.mxu0 }
 0x371   : > { %v12000_v55 = vpop.f32.mrf.mxu1 }
 0x372   : > { %9333 = vmatpush3.bf16.msra.mxu1 %v10142_v59  ;;  %v6401_v58 = vpop.f32.mrf.mxu0  ;;  %v10155_v59 = vld [vmem:[#allocation3 + $0x34] ss:$12 sps:$4 sm:$0xff]  }
 0x373   : > { %9334 = vmatprep.subr.bf16.mxu1 %v10143_v52  ;;  %9717 = vmatpush3.bf16.msra.mxu0 %v10180_v9  ;;  %v11994_v3 = vadd.f32 %v9072_v42, %v6401_v58  ;;  %v10169_v58 = vld [vmem:[#allocation3 + $0x94] ss:$12 sps:$4 sm:$0xff]  }
 0x374   : > { %6753 = vmatmul.mubr.bf16.gmra.mxu0 %v10259_v40  ;;  %v9625_v38 = vpop.f32.mrf.mxu0 }
 0x375   : > { %9679 = vmatmul.mubr.bf16.gmra.mxu1 %v10260_v53  ;;  %6760 = vmatprep.mubr.bf16.mxu0 %v10261_v50 }
 0x376   : > { %9682 = vmatprep.mubr.bf16.mxu1 %v10262_v6  ;;  %9335 = vmatpush3.bf16.msra.mxu1 %v10144_v17  ;;  %v12009_v57 = vpop.f32.mrf.mxu0 }
 0x377   : > { %9336 = vmatprep.subr.bf16.mxu1 %v10146_v11  ;;  %v10158_v11 = vld [vmem:[#allocation3 + $0x4c] ss:$12 sps:$4 sm:$0xff]  }
 0x37a   : > { %9337 = vmatpush3.bf16.msra.mxu1 %v10147_v25  ;;  %v10156_v25 = vld [vmem:[#allocation3 + $0x48] ss:$12 sps:$4 sm:$0xff]  }
 0x37b   : > { %9338 = vmatprep.subr.bf16.mxu1 %v10148_v21  ;;  %v10162_v21 = vld [vmem:[#allocation3 + $0x64] ss:$12 sps:$4 sm:$0xff]  }
 0x37c   : > { %6761 = vmatmul.mubr.bf16.gmra.mxu0 %v10263_v7 }
 0x37d   : > { %9683 = vmatmul.mubr.bf16.gmra.mxu1 %v10264_v2  ;;  %6768 = vmatprep.mubr.bf16.mxu0 %v10265_v4  ;;  %v10160_v4 = vld [vmem:[#allocation3 + $0x60] ss:$12 sps:$4 sm:$0xff]  }
 0x37e   : > { %9686 = vmatprep.mubr.bf16.mxu1 %v10266_v0  ;;  %9339 = vmatpush3.bf16.msra.mxu1 %v10149_v29  ;;  %v10165_v0 = vld [vmem:[#allocation3 + $0x7c] ss:$12 sps:$4 sm:$0xff]  }
 0x37f   : > { %9340 = vmatprep.subr.bf16.mxu1 %v10151_v5 }
 0x380   : > { %v9076_v61 = vpop.f32.mrf.mxu1 }
 0x382   : > { %9341 = vmatpush3.bf16.msra.mxu1 %v10152_v37  ;;  %v9077_v15 = vpop.f32.mrf.mxu1 }
 0x383   : > { %v9078_v18 = vadd.f32 %v9077_v15, %v9076_v61 }
 0x384   : > { %6769 = vmatmul.mubr.bf16.gmra.mxu0 %v10267_v23  ;;  %v9079_v44 = vpop.f32.mrf.mxu1 }
 0x385   : > { %9687 = vmatmul.mubr.bf16.gmra.mxu1 %v11842_v14  ;;  %6776 = vmatprep.mubr.bf16.mxu0 %v10268_v32  ;;  %v12005_v14 = vadd.f32 %v9624_v36, %v9078_v18  ;;  %v10163_v36 = vld [vmem:[#allocation3 + $0x78] ss:$12 sps:$4 sm:$0xff]   ;;  %v10167_v18 = vld [vmem:[#allocation3 + $0x90] ss:$12 sps:$4 sm:$0xff]  }
 0x386   : > { %9690 = vmatprep.mubr.bf16.mxu1 %v11876_v45  ;;  %v9080_v62 = vpop.f32.mrf.mxu1  ;;  %v10270_v45 = vld [vmem:[#allocation3 + $0xc0] ss:$12 sps:$4 sm:$0xff]  }
 0x387   : > { %v9081_v47 = vadd.f32 %v9080_v62, %v9079_v44 }
 0x38c   : > { %6777 = vmatmul.mubr.bf16.gmra.mxu0 %v10269_v54 }
 0x38d   : > { %9691 = vmatmul.mubr.bf16.gmra.mxu1 %v11896_v39  ;;  %6784 = vmatprep.mubr.bf16.mxu0 %v11838_v43  ;;  %v12011_v39 = vadd.f32 %v9625_v38, %v9081_v47  ;;  %v9082_v43 = vpop.f32.mrf.mxu1  ;;  %v10172_v38 = vld [vmem:[#allocation3 + $0xac] ss:$12 sps:$4 sm:$0xff]  }
 0x38e   : > { %9694 = vmatprep.mubr.bf16.mxu1 %v11920_v13  ;;  %v9628_v13 = vpop.f32.mrf.mxu0 }
 0x38f   : > { %v9083_v9 = vpop.f32.mrf.mxu1 }
 0x390   : > { %v6417_v19 = vpop.f32.mrf.mxu0  ;;  %v9084_v30 = vadd.f32 %v9083_v9, %v9082_v43 }
 0x391   : > { %v9085_v46 = vpop.f32.mrf.mxu1 }
 0x392   : > { %v12015_v52 = vadd.f32 %v9084_v30, %v6417_v19  ;;  %v9629_v50 = vpop.f32.mrf.mxu0  ;;  %v10170_v19 = vld [vmem:[#allocation3 + $0xa8] ss:$12 sps:$4 sm:$0xff]   ;;  %v10181_v30 = vld [vmem:[#allocation3 + $0x38] ss:$12 sps:$4 sm:$0xff]  }
 0x394   : > { %6785 = vmatmul.mubr.bf16.gmra.mxu0 %v10270_v45  ;;  %v12026_v29 = vpop.f32.mrf.mxu0 }
 0x395   : > { %9695 = vmatmul.mubr.bf16.gmra.mxu1 %v11935_v41  ;;  %6792 = vmatprep.mubr.bf16.mxu0 %v11867_v28  ;;  %v9086_v28 = vpop.f32.mrf.mxu1 }
 0x396   : > { %9698 = vmatprep.mubr.bf16.mxu1 %v11952_v33  ;;  %v12019_v41 = vadd.f32 %v9086_v28, %v9085_v46  ;;  %v10153_v33 = vld [vmem:[#allocation3 + $0x30] ss:$12 sps:$4 sm:$0xff]  }
 0x397   : > { %v10176_v28 = vld [vmem:[#allocation3 + $0xc4] ss:$12 sps:$4 sm:$0xff]  }
 0x39a   : > { %v9088_v17 = vpop.f32.mrf.mxu1 }
 0x39c   : > { %6793 = vmatmul.mubr.bf16.gmra.mxu0 %v11865_v56  ;;  %v9089_v40 = vpop.f32.mrf.mxu1 }
 0x39d   : > { %9699 = vmatmul.mubr.bf16.gmra.mxu1 %v11966_v31  ;;  %6800 = vmatprep.mubr.bf16.mxu0 %v11891_v63  ;;  %v9090_v56 = vadd.f32 %v9089_v40, %v9088_v17 }
 0x39e   : > { %7555 = vmatprep.mubr.bf16.mxu1 %v10155_v59  ;;  %v9091_v53 = vpop.f32.mrf.mxu1 }
 0x39f   : > { %v12023_v31 = vadd.f32 %v9628_v13, %v9090_v56 }
 0x3a0   : > { %v9092_v63 = vpop.f32.mrf.mxu1 }
 0x3a1   : > { %v9093_v6 = vadd.f32 %v9092_v63, %v9091_v53  ;;  %v10185_v53 = vld [vmem:[#allocation3 + $0x50] ss:$12 sps:$4 sm:$0xff]   ;;  %v10186_v63 = vld [vmem:[#allocation3 + $0x68] ss:$12 sps:$4 sm:$0xff]  }
 0x3a3   : > { %v12028_v8 = vadd.f32 %v9629_v50, %v9093_v6  ;;  %v10174_v50 = vld [vmem:[#allocation3 + $0xc0] ss:$12 sps:$4 sm:$0xff]   ;;  %v10179_v6 = vld [vmem:[#allocation3 + $0xdc] ss:$12 sps:$4 sm:$0xff]  }
 0x3a4   : > { %6801 = vmatmul.mubr.bf16.gmra.mxu0 %v11889_v26 }
 0x3a5   : > { %7556 = vmatmul.mubr.bf16.vlgmr.msra.gmra.mxu1 %v10153_v33  ;;  %6808 = vmatprep.mubr.bf16.mxu0 %v11918_v35  ;;  %v9632_v35 = vpop.f32.mrf.mxu0 }
 0x3a6   : > { %7563 = vmatprep.mubr.bf16.mxu1 %v10158_v11  ;;  %v9094_v26 = vpop.f32.mrf.mxu1 }
 0x3a7   : > { %v6433_v7 = vpop.f32.mrf.mxu0 }
 0x3a8   : > { %v9095_v5 = vpop.f32.mrf.mxu1 }
 0x3a9   : > { %v9096_v48 = vadd.f32 %v9095_v5, %v9094_v26  ;;  %v9633_v15 = vpop.f32.mrf.mxu0 }
 0x3aa   : > { %v9097_v2 = vpop.f32.mrf.mxu1 }
 0x3ab   : > { %v12031_v42 = vadd.f32 %v9096_v48, %v6433_v7  ;;  %v10190_v48 = vld [vmem:[#allocation3 + $0x80] ss:$12 sps:$4 sm:$0xff]  }
 0x3ac   : > { %6809 = vmatmul.mubr.bf16.gmra.mxu0 %v11916_v34  ;;  %v9098_v34 = vpop.f32.mrf.mxu1 }
 0x3ad   : > { %7564 = vmatmul.mubr.bf16.gmra.mxu1 %v10156_v25  ;;  %6816 = vmatprep.mubr.bf16.mxu0 %v11942_v60  ;;  %v12035_v37 = vadd.f32 %v9098_v34, %v9097_v2  ;;  %v10177_v2 = vld [vmem:[#allocation3 + $0xd8] ss:$12 sps:$4 sm:$0xff]   ;;  %v10184_v34 = vld [vmem:[#allocation3 + $0xf4] ss:$12 sps:$4 sm:$0xff]  }
 0x3ae   : > { %7571 = vmatprep.mubr.bf16.mxu1 %v10162_v21 }
 0x3b2   : > { %v9100_v60 = vpop.f32.mrf.mxu1 }
 0x3b4   : > { %6817 = vmatmul.mubr.bf16.gmra.mxu0 %v11940_v24  ;;  %v9101_v23 = vpop.f32.mrf.mxu1 }
 0x3b5   : > { %7572 = vmatmul.mubr.bf16.gmra.mxu1 %v10160_v4  ;;  %6824 = vmatprep.mubr.bf16.mxu0 %v11954_v27  ;;  %v9102_v32 = vadd.f32 %v9101_v23, %v9100_v60 }
 0x3b6   : > { %7579 = vmatprep.mubr.bf16.mxu1 %v10165_v0  ;;  %v9103_v54 = vpop.f32.mrf.mxu1  ;;  %v10191_v0 = vld [vmem:[#allocation3 + $0x98] ss:$12 sps:$4 sm:$0xff]  }
 0x3b7   : > { %v12039_v24 = vadd.f32 %v9632_v35, %v9102_v32 }
 0x3b8   : > { %v9104_v61 = vpop.f32.mrf.mxu1 }
 0x3b9   : > { %v9105_v27 = vadd.f32 %v9104_v61, %v9103_v54 }
 0x3bb   : > { %v12041_v44 = vadd.f32 %v9633_v15, %v9105_v27  ;;  %v10195_v15 = vld [vmem:[#allocation3 + $0xb0] ss:$12 sps:$4 sm:$0xff]  }
 0x3bc   : > { %6825 = vmatmul.mubr.bf16.gmra.mxu0 %v11959_v22  ;;  %v12044_v22 = vpop.f32.mrf.mxu0  ;;  %v10182_v27 = vld [vmem:[#allocation3 + $0xf0] ss:$12 sps:$4 sm:$0xff]  }
 0x3bd   : > { %7580 = vmatmul.mubr.bf16.gmra.mxu1 %v10163_v36  ;;  %6832 = vmatprep.mubr.bf16.mxu0 %v11968_v20 }
 0x3be   : > { %7587 = vmatprep.mubr.bf16.mxu1 %v10169_v58 }
 0x3bf   : > { %v9106_v62 = vpop.f32.mrf.mxu1 }
 0x3c0   : > { %v9636_v47 = vpop.f32.mrf.mxu0 }
 0x3c1   : > { %v9107_v45 = vpop.f32.mrf.mxu1 }
 0x3c2   : > { %v9108_v43 = vadd.f32 %v9107_v45, %v9106_v62  ;;  %v6449_v13 = vpop.f32.mrf.mxu0  ;;  %v10196_v62 = vld [vmem:[#allocation3 + $0xc8] ss:$12 sps:$4 sm:$0xff]  }
 0x3c3   : > { %v9109_v9 = vpop.f32.mrf.mxu1 }
 0x3c4   : > { %6833 = vmatmul.mubr.bf16.gmra.mxu0 %v11975_v49  ;;  %v12047_v46 = vadd.f32 %v9108_v43, %v6449_v13  ;;  %v9637_v59 = vpop.f32.mrf.mxu0 }
 0x3c5   : > { %7588 = vmatmul.mubr.bf16.gmra.mxu1 %v10167_v18  ;;  %6840 = vmatprep.mubr.bf16.mxu0 %v11981_v12  ;;  %v9110_v33 = vpop.f32.mrf.mxu1 }
 0x3c6   : > { %7595 = vmatprep.mubr.bf16.mxu1 %v10172_v38  ;;  %v9111_v17 = vadd.f32 %v9110_v33, %v9109_v9  ;;  %v6452_v11 = vpop.f32.mrf.mxu0  ;;  %v10194_v33 = vld [vmem:[#allocation3 + $0x124] ss:$12 sps:$4 sm:$0xff]  }
 0x3c8   : > { %v12050_v40 = vadd.f32 %v9111_v17, %v6452_v11 }
 0x3cc   : > { %6841 = vmatmul.mubr.bf16.gmra.mxu0 %v11985_v51  ;;  %v9112_v56 = vpop.f32.mrf.mxu1 }
 0x3cd   : > { %7596 = vmatmul.mubr.bf16.gmra.mxu1 %v10170_v19  ;;  %9718 = vmatprep.mubr.bf16.mxu0 %v10181_v30  ;;  %v10200_v19 = vld [vmem:[#allocation3 + $0xe0] ss:$12 sps:$4 sm:$0xff]   ;;  %v10187_v30 = vld [vmem:[#allocation3 + $0x108] ss:$12 sps:$4 sm:$0xff]  }
 0x3ce   : > { %7603 = vmatprep.mubr.bf16.mxu1 %v10176_v28  ;;  %v9113_v25 = vpop.f32.mrf.mxu1  ;;  %v10201_v28 = vld [vmem:[#allocation3 + $0xf8] ss:$12 sps:$4 sm:$0xff]  }
 0x3cf   : > { %v9114_v21 = vadd.f32 %v9113_v25, %v9112_v56  ;;  %v10192_v25 = vld [vmem:[#allocation3 + $0x120] ss:$12 sps:$4 sm:$0xff]  }
 0x3d0   : > { %v9115_v26 = vpop.f32.mrf.mxu1 }
 0x3d1   : > { %v12052_v35 = vadd.f32 %v9636_v47, %v9114_v21  ;;  %v10189_v47 = vld [vmem:[#allocation3 + $0x10c] ss:$12 sps:$4 sm:$0xff]   ;;  %v10203_v21 = vld [vmem:[#allocation3 + $0x128] ss:$12 sps:$4 sm:$0xff]  }
 0x3d2   : > { %v9116_v5 = vpop.f32.mrf.mxu1 }
 0x3d3   : > { %v9117_v7 = vadd.f32 %v9116_v5, %v9115_v26  ;;  %v10199_v5 = vld [vmem:[#allocation3 + $0x13c] ss:$12 sps:$4 sm:$0xff]  }
 0x3d4   : > { %9719 = vmatmul.mubr.bf16.vlgmr.msra.gmra.mxu0 %v10185_v53 }
 0x3d5   : > { %7604 = vmatmul.mubr.bf16.gmra.mxu1 %v10174_v50  ;;  %9722 = vmatprep.mubr.bf16.mxu0 %v10186_v63  ;;  %v12054_v4 = vadd.f32 %v9637_v59, %v9117_v7 }
 0x3d6   : > { %7611 = vmatprep.mubr.bf16.mxu1 %v10179_v6  ;;  %v9118_v60 = vpop.f32.mrf.mxu1  ;;  %v10202_v6 = vld [vmem:[#allocation3 + $0x110] ss:$12 sps:$4 sm:$0xff]  }
 0x3d8   : > { %v9119_v36 = vpop.f32.mrf.mxu1  ;;  %v9640_v58 = vpop.f32.mrf.mxu0 }
 0x3d9   : > { %v9120_v23 = vadd.f32 %v9119_v36, %v9118_v60 }
 0x3da   : > { %v9121_v32 = vpop.f32.mrf.mxu1  ;;  %v6465_v54 = vpop.f32.mrf.mxu0 }
 0x3db   : > { %v12056_v61 = vadd.f32 %v9120_v23, %v6465_v54  ;;  %v10197_v54 = vld [vmem:[#allocation3 + $0x138] ss:$12 sps:$4 sm:$0xff]  }
 0x3dc   : > { %9723 = vmatmul.mubr.bf16.gmra.mxu0 %v10190_v48  ;;  %v9122_v18 = vpop.f32.mrf.mxu1  ;;  %v9641_v38 = vpop.f32.mrf.mxu0 }
 0x3dd   : > { %7612 = vmatmul.mubr.bf16.gmra.mxu1 %v10177_v2  ;;  %9726 = vmatprep.mubr.bf16.mxu0 %v10191_v0  ;;  %v9123_v45 = vadd.f32 %v9122_v18, %v9121_v32  ;;  %v10204_v32 = vld [vmem:[#allocation3 + $0x140] ss:$12 sps:$4 sm:$0xff]  }
 0x3de   : > { %7619 = vmatprep.mubr.bf16.mxu1 %v10184_v34  ;;  %v6468_v43 = vpop.f32.mrf.mxu0 }
 0x3df   : > { %v12058_v13 = vadd.f32 %v9123_v45, %v6468_v43 }
 0x3e4   : > { %9727 = vmatmul.mubr.bf16.gmra.mxu0 %v10195_v15  ;;  %v9124_v9 = vpop.f32.mrf.mxu1 }
 0x3e5   : > { %7620 = vmatmul.mubr.bf16.gmra.mxu1 %v10182_v27  ;;  %9730 = vmatprep.mubr.bf16.mxu0 %v10196_v62  ;;  %v10205_v27 = vld [vmem:[#allocation3 + $0x158] ss:$12 sps:$4 sm:$0xff]  }
 0x3e6   : > { %7627 = vmatprep.mubr.bf16.mxu1 %v10189_v47  ;;  %v9125_v59 = vpop.f32.mrf.mxu1 }
 0x3e7   : > { %v9126_v17 = vadd.f32 %v9125_v59, %v9124_v9 }
 0x3e8   : > { %v9127_v11 = vpop.f32.mrf.mxu1 }
 0x3e9   : > { %v12060_v56 = vadd.f32 %v9640_v58, %v9126_v17 }
 0x3ea   : > { %v9128_v53 = vpop.f32.mrf.mxu1 }
 0x3eb   : > { %v9129_v50 = vadd.f32 %v9128_v53, %v9127_v11 }
 0x3ec   : > { %9731 = vmatmul.mubr.bf16.gmra.mxu0 %v10200_v19 }
 0x3ed   : > { %7628 = vmatmul.mubr.bf16.gmra.mxu1 %v10187_v30  ;;  %9734 = vmatprep.mubr.bf16.mxu0 %v10201_v28  ;;  %v12062_v63 = vadd.f32 %v9641_v38, %v9129_v50  ;;  %v10206_v30 = vld [vmem:[#allocation3 + $0x170] ss:$12 sps:$4 sm:$0xff]   ;;  %v10207_v28 = vld [vmem:[#allocation3 + $0x188] ss:$12 sps:$4 sm:$0xff]  }
 0x3ee   : > { %7635 = vmatprep.mubr.bf16.mxu1 %v10194_v33 }
 0x3f2   : > { %v9644_v7 = vpop.f32.mrf.mxu0 }
 0x3f3   : > { %v9130_v26 = vpop.f32.mrf.mxu1 }
 0x3f4   : > { %9735 = vmatmul.mubr.bf16.gmra.mxu0 %v10202_v6  ;;  %v6481_v2 = vpop.f32.mrf.mxu0  ;;  %v10208_v6 = vld [vmem:[#allocation3 + $0x1a0] ss:$12 sps:$4 sm:$0xff]  }
 0x3f5   : > { %7636 = vmatmul.mubr.bf16.gmra.mxu1 %v10192_v25  ;;  %9738 = vmatprep.mubr.bf16.mxu0 %v10203_v21  ;;  %v9131_v48 = vpop.f32.mrf.mxu1 }
 0x3f6   : > { %7643 = vmatprep.mubr.bf16.mxu1 %v10199_v5  ;;  %v9132_v0 = vadd.f32 %v9131_v48, %v9130_v26  ;;  %v9645_v60 = vpop.f32.mrf.mxu0 }
 0x3f7   : > { %v9133_v34 = vpop.f32.mrf.mxu1 }
 0x3f8   : > { %v12064_v36 = vadd.f32 %v9132_v0, %v6481_v2  ;;  %v6484_v23 = vpop.f32.mrf.mxu0 }
 0x3f9   : > { %v9134_v58 = vpop.f32.mrf.mxu1 }
 0x3fa   : > { %v9135_v15 = vadd.f32 %v9134_v58, %v9133_v34 }
 0x3fc   : > { %9739 = vmatmul.mubr.bf16.gmra.mxu0 %v10204_v32  ;;  %v9136_v18 = vpop.f32.mrf.mxu1  ;;  %v12066_v38 = vadd.f32 %v9135_v15, %v6484_v23  ;;  %v10211_v32 = vld [vmem:[#allocation3 + $0x19c] ss:$12 sps:$4 sm:$0xff]  }
 0x3fd   : > { %7644 = vmatmul.mubr.bf16.gmra.mxu1 %v10197_v54  ;;  %9742 = vmatprep.mubr.bf16.mxu0 %v10205_v27 }
 0x3fe   : > { %7651 = vmatprep.mubr.bf16.mxu1 %v11968_v20  ;;  %v9137_v62 = vpop.f32.mrf.mxu1 }
 0x3ff   : > { %v9648_v47 = vpop.f32.mrf.mxu0  ;;  %v9138_v45 = vadd.f32 %v9137_v62, %v9136_v18 }
 0x400   : > { %v9139_v43 = vpop.f32.mrf.mxu1 }
 0x401   : > { %v12069_v9 = vadd.f32 %v9644_v7, %v9138_v45  ;;  %v6497_v19 = vpop.f32.mrf.mxu0 }
 0x402   : > { %v9140_v59 = vpop.f32.mrf.mxu1 }
 0x403   : > { %v9141_v33 = vadd.f32 %v9140_v59, %v9139_v43  ;;  %v9649_v20 = vpop.f32.mrf.mxu0 }
 0x404   : > { %9743 = vmatmul.mubr.bf16.gmra.mxu0 %v10206_v30  ;;  %v9142_v17 = vpop.f32.mrf.mxu1 }
 0x405   : > { %7652 = vmatmul.mubr.bf16.gmra.mxu1 %v11975_v49  ;;  %9746 = vmatprep.mubr.bf16.mxu0 %v10207_v28  ;;  %v12072_v11 = vadd.f32 %v9645_v60, %v9141_v33  ;;  %v6500_v26 = vpop.f32.mrf.mxu0  ;;  %v10209_v28 = vld [vmem:[#allocation3 + $0x198] ss:$12 sps:$4 sm:$0xff]  }
 0x406   : > { %7659 = vmatprep.mubr.bf16.mxu1 %v11981_v12  ;;  %v9143_v53 = vpop.f32.mrf.mxu1 }
 0x407   : > { %v9144_v50 = vadd.f32 %v9143_v53, %v9142_v17 }
 0x408   : > { %v9145_v25 = vpop.f32.mrf.mxu1 }
 0x409   : > { %v12075_v21 = vadd.f32 %v9144_v50, %v6497_v19 }
 0x40a   : > { %v9146_v5 = vpop.f32.mrf.mxu1 }
 0x40b   : > { %v9147_v7 = vadd.f32 %v9146_v5, %v9145_v25 }
 0x40c   : > { %v9652_v48 = vpop.f32.mrf.mxu0  ;;  %9747 = vmatmul.mubr.bf16.gmra.mxu0 %v10208_v6  ;;  %v9148_v2 = vpop.f32.mrf.mxu1 }
 0x40d   : > { %7660 = vmatmul.mubr.bf16.gmra.mxu1 %v11985_v51  ;;  %v12078_v49 = vadd.f32 %v9147_v7, %v6500_v26 }
 0x40e   : > { %7667 = vmatprep.mubr.bf16.mxu1 %v11987_v1  ;;  %v6513_v12 = vpop.f32.mrf.mxu0  ;;  %v9149_v0 = vpop.f32.mrf.mxu1  ;;  %v9075_v1 = vadd.f32 %v12000_v55, %v11996_v16 }
 0x40f   : > { %v9150_v34 = vadd.f32 %v9149_v0, %v9148_v2 }
 0x410   : > { %v9653_v60 = vpop.f32.mrf.mxu0  ;;  %v9151_v58 = vpop.f32.mrf.mxu1 }
 0x411   : > { %v12081_v23 = vadd.f32 %v9648_v47, %v9150_v34 }
 0x412   : > { %v6516_v54 = vpop.f32.mrf.mxu0  ;;  %v9152_v15 = vpop.f32.mrf.mxu1 }
 0x413   : > { %v9153_v27 = vadd.f32 %v9152_v15, %v9151_v58 }
 0x414   : > { %v9206_v18 = vpop.f32.mrf.mxu0  ;;  %v9154_v62 = vpop.f32.mrf.mxu1 }
 0x415   : > { %7668 = vmatmul.mubr.bf16.gmra.mxu1 %v11991_v10  ;;  %v12084_v51 = vadd.f32 %v9649_v20, %v9153_v27  ;;  %v6405_v10 = vadd.f32 %v9075_v1, %v12009_v57 }
 0x416   : > { %7675 = vmatprep.mubr.bf16.mxu1 %v10211_v32  ;;  %v9207_v45 = vpop.f32.mrf.mxu0  ;;  %v9155_v43 = vpop.f32.mrf.mxu1 }
 0x417   : > { %v9208_v19 = vadd.f32 %v9207_v45, %v9206_v18  ;;  %v9156_v30 = vadd.f32 %v9155_v43, %v9154_v62 }
 0x418   : > { %v9209_v47 = vpop.f32.mrf.mxu0  ;;  %v9157_v59 = vpop.f32.mrf.mxu1 }
 0x419   : > { %v6723_v33 = vadd.f32 %v9208_v19, %v11994_v3  ;;  %v12089_v17 = vadd.f32 %v9156_v30, %v6513_v12 }
 0x41a   : > { %v9210_v53 = vpop.f32.mrf.mxu0  ;;  %v9158_v20 = vpop.f32.mrf.mxu1 }
 0x41b   : > { %v9211_v50 = vadd.f32 %v9210_v53, %v9209_v47  ;;  %v9159_v6 = vadd.f32 %v9158_v20, %v9157_v59 }
 0x41c   : > { %v9212_v25 = vpop.f32.mrf.mxu0  ;;  %v9160_v26 = vpop.f32.mrf.mxu1 }
 0x41d   : > { %7676 = vmatmul.mubr.bf16.gmra.mxu1 %v10209_v28  ;;  %v6726_v16 = vadd.f32 %v9211_v50, %v6405_v10  ;;  %v12092_v55 = vadd.f32 %v9159_v6, %v6516_v54  ;;  %v6421_v10 = vadd.f32 %v12019_v41, %v12026_v29 }
 0x41e   : > { %v9213_v5 = vpop.f32.mrf.mxu0  ;;  %v9161_v7 = vpop.f32.mrf.mxu1 }
 0x41f   : > { %v9214_v2 = vadd.f32 %v9213_v5, %v9212_v25  ;;  %v9162_v0 = vadd.f32 %v9161_v7, %v9160_v26 }
 0x420   : > { %v9215_v34 = vpop.f32.mrf.mxu0  ;;  %v9163_v3 = vpop.f32.mrf.mxu1 }
 0x421   : > { %v6731_v12 = vadd.f32 %v9214_v2, %v12005_v14  ;;  %v12095_v58 = vadd.f32 %v9652_v48, %v9162_v0 }
 0x422   : > { %v9216_v57 = vpop.f32.mrf.mxu0  ;;  %v9164_v32 = vpop.f32.mrf.mxu1 }
 0x423   : > { %v9217_v15 = vadd.f32 %v9216_v57, %v9215_v34  ;;  %v9165_v27 = vadd.f32 %v9164_v32, %v9163_v3 }
 0x424   : > { %v9218_v18 = vpop.f32.mrf.mxu0  ;;  %v9672_v62 = vpop.f32.mrf.mxu1 }
 0x425   : > { %v6734_v45 = vadd.f32 %v9217_v15, %v12011_v39  ;;  %v12098_v54 = vadd.f32 %v9653_v60, %v9165_v27  ;;  %v12100_v43 = vadd.f32 %v9672_v62, %v6731_v12 }
 0x426   : > { %v9219_v1 = vpop.f32.mrf.mxu0  ;;  %v6883_v19 = vpop.f32.mrf.mxu1 }
 0x427   : > { %v9220_v30 = vadd.f32 %v9219_v1, %v9218_v18  ;;  %v12102_v47 = vadd.f32 %v6883_v19, %v6723_v33 }
 0x428   : > { %v9221_v14 = vpop.f32.mrf.mxu0  ;;  %v9673_v48 = vpop.f32.mrf.mxu1 }
 0x429   : > { %v6739_v59 = vadd.f32 %v9220_v30, %v12015_v52  ;;  %v12105_v53 = vadd.f32 %v9673_v48, %v6734_v45  ;;  %v6437_v30 = vadd.f32 %v12035_v37, %v12044_v22 }
 0x42a   : > { %v9222_v28 = vpop.f32.mrf.mxu0  ;;  %v6886_v39 = vpop.f32.mrf.mxu1 }
 0x42b   : > { %v9223_v60 = vadd.f32 %v9222_v28, %v9221_v14  ;;  %v12109_v20 = vadd.f32 %v6886_v39, %v6726_v16 }
 0x42c   : > { %v9224_v50 = vpop.f32.mrf.mxu0 }
 0x42d   : > { %v9676_v6 = vpop.f32.mrf.mxu1  ;;  %v6742_v25 = vadd.f32 %v9223_v60, %v6421_v10 }
 0x42e   : > { %v9225_v26 = vpop.f32.mrf.mxu0 }
 0x42f   : > { %v6899_v33 = vpop.f32.mrf.mxu1  ;;  %v9226_v5 = vadd.f32 %v9225_v26, %v9224_v50 }
 0x430   : > { %v9227_v7 = vpop.f32.mrf.mxu0  ;;  %v12111_v2 = vadd.f32 %v6899_v33, %v6739_v59 }
 0x431   : > { %v9677_v52 = vpop.f32.mrf.mxu1  ;;  %v6747_v0 = vadd.f32 %v9226_v5, %v12023_v31 }
 0x432   : > { %v9228_v34 = vpop.f32.mrf.mxu0 }
 0x433   : > { %v6902_v3 = vpop.f32.mrf.mxu1  ;;  %v9229_v12 = vadd.f32 %v9228_v34, %v9227_v7  ;;  %v12114_v41 = vadd.f32 %v9676_v6, %v6747_v0 }
 0x434   : > { %v9230_v29 = vpop.f32.mrf.mxu0  ;;  %v12116_v16 = vadd.f32 %v6902_v3, %v6742_v25 }
 0x435   : > { %v9680_v57 = vpop.f32.mrf.mxu1  ;;  %v6750_v32 = vadd.f32 %v9229_v12, %v12028_v8 }
 0x436   : > { %v9231_v15 = vpop.f32.mrf.mxu0 }
 0x437   : > { %v6915_v27 = vpop.f32.mrf.mxu1  ;;  %v9232_v18 = vadd.f32 %v9231_v15, %v9230_v29  ;;  %v12119_v62 = vadd.f32 %v9677_v52, %v6750_v32 }
 0x438   : > { %v9233_v45 = vpop.f32.mrf.mxu0 }
 0x439   : > { %v9681_v1 = vpop.f32.mrf.mxu1  ;;  %v6755_v31 = vadd.f32 %v9232_v18, %v12031_v42 }
 0x43a   : > { %v9234_v19 = vpop.f32.mrf.mxu0 }
 0x43b   : > { %v6918_v14 = vpop.f32.mrf.mxu1  ;;  %v9235_v48 = vadd.f32 %v9234_v19, %v9233_v45  ;;  %v12124_v59 = vadd.f32 %v6915_v27, %v6755_v31 }
 0x43c   : > { %v9236_v28 = vpop.f32.mrf.mxu0 }
 0x43d   : > { %v9684_v10 = vpop.f32.mrf.mxu1  ;;  %v6758_v8 = vadd.f32 %v9235_v48, %v6437_v30 }
 0x43e   : > { %v9237_v39 = vpop.f32.mrf.mxu0 }
 0x43f   : > { %v6931_v60 = vpop.f32.mrf.mxu1  ;;  %v9238_v50 = vadd.f32 %v9237_v39, %v9236_v28  ;;  %v12126_v6 = vadd.f32 %v6918_v14, %v6758_v8 }
 0x440   : > { %v9239_v25 = vpop.f32.mrf.mxu0 }
 0x441   : > { %v9685_v26 = vpop.f32.mrf.mxu1  ;;  %v6763_v42 = vadd.f32 %v9238_v50, %v12039_v24 }
 0x442   : > { %v9240_v33 = vpop.f32.mrf.mxu0 }
 0x443   : > { %v6934_v5 = vpop.f32.mrf.mxu1  ;;  %v9241_v7 = vadd.f32 %v9240_v33, %v9239_v25  ;;  %v12129_v37 = vadd.f32 %v9680_v57, %v6763_v42 }
 0x444   : > { %v9242_v22 = vpop.f32.mrf.mxu0 }
 0x445   : > { %v9688_v52 = vpop.f32.mrf.mxu1  ;;  %v6766_v0 = vadd.f32 %v9241_v7, %v12041_v44 }
 0x446   : > { %v9243_v34 = vpop.f32.mrf.mxu0 }
 0x447   : > { %v6947_v3 = vpop.f32.mrf.mxu1  ;;  %v9244_v12 = vadd.f32 %v9243_v34, %v9242_v22  ;;  %v12132_v29 = vadd.f32 %v9681_v1, %v6766_v0 }
 0x448   : > { %v9245_v32 = vpop.f32.mrf.mxu0 }
 0x449   : > { %v9689_v15 = vpop.f32.mrf.mxu1  ;;  %v6771_v27 = vadd.f32 %v9244_v12, %v12047_v46 }
 0x44a   : > { %v9246_v18 = vpop.f32.mrf.mxu0 }
 0x44b   : > { %v6950_v24 = vpop.f32.mrf.mxu1  ;;  %v9247_v45 = vadd.f32 %v9246_v18, %v9245_v32  ;;  %v12135_v31 = vadd.f32 %v6931_v60, %v6771_v27 }
 0x44c   : > { %v9248_v57 = vpop.f32.mrf.mxu0 }
 0x44d   : > { %v12137_v19 = vpop.f32.mrf.mxu1  ;;  %v6774_v30 = vadd.f32 %v9247_v45, %v12050_v40 }
 0x44e   : > { %v9249_v44 = vpop.f32.mrf.mxu0 }
 0x44f   : > { %v6963_v14 = vpop.f32.mrf.mxu1  ;;  %v9250_v48 = vadd.f32 %v9249_v44, %v9248_v57  ;;  %v12140_v28 = vadd.f32 %v6934_v5, %v6774_v30 }
 0x450   : > { %v9251_v1 = vpop.f32.mrf.mxu0 }
 0x451   : > { %v12142_v8 = vpop.f32.mrf.mxu1  ;;  %v6779_v46 = vadd.f32 %v9250_v48, %v12052_v35 }
 0x452   : > { %v9252_v39 = vpop.f32.mrf.mxu0 }
 0x453   : > { %v6966_v50 = vpop.f32.mrf.mxu1  ;;  %v9253_v25 = vadd.f32 %v9252_v39, %v9251_v1  ;;  %v12145_v60 = vadd.f32 %v9684_v10, %v6779_v46 }
 0x454   : > { %v9254_v42 = vpop.f32.mrf.mxu0 }
 0x455   : > { %v12147_v33 = vpop.f32.mrf.mxu1  ;;  %v6782_v40 = vadd.f32 %v9253_v25, %v12054_v4 }
 0x456   : > { %v9255_v7 = vpop.f32.mrf.mxu0 }
 0x457   : > { %v12150_v22 = vpop.f32.mrf.mxu1  ;;  %v9256_v5 = vadd.f32 %v9255_v7, %v9254_v42  ;;  %v12152_v0 = vadd.f32 %v9685_v26, %v6782_v40 }
 0x458   : > { %v9257_v34 = vpop.f32.mrf.mxu0 }
 0x459   : > { %v12154_v12 = vpop.f32.mrf.mxu1  ;;  %v6787_v35 = vadd.f32 %v9256_v5, %v12056_v61 }
 0x45a   : > { %v9258_v32 = vpop.f32.mrf.mxu0 }
 0x45b   : > { %v12157_v27 = vpop.f32.mrf.mxu1  ;;  %v9259_v10 = vadd.f32 %v9258_v32, %v9257_v34  ;;  %v12159_v18 = vadd.f32 %v6947_v3, %v6787_v35 }
 0x45c   : > { %v9260_v45 = vpop.f32.mrf.mxu0 }
 0x45d   : > { %v12161_v57 = vpop.f32.mrf.mxu1  ;;  %v6790_v4 = vadd.f32 %v9259_v10, %v12058_v13 }
 0x45e   : > { %v9261_v30 = vpop.f32.mrf.mxu0 }
 0x45f   : > { %v12164_v44 = vpop.f32.mrf.mxu1  ;;  %v9262_v26 = vadd.f32 %v9261_v30, %v9260_v45  ;;  %v12166_v48 = vadd.f32 %v6950_v24, %v6790_v4 }
 0x460   : > { %v9263_v1 = vpop.f32.mrf.mxu0 }
 0x461   : > { %v12168_v46 = vpop.f32.mrf.mxu1  ;;  %v6795_v61 = vadd.f32 %v9262_v26, %v12060_v56 }
 0x462   : > { %v9264_v39 = vpop.f32.mrf.mxu0 }
 0x463   : > { %v12171_v25 = vpop.f32.mrf.mxu1  ;;  %v9265_v3 = vadd.f32 %v9264_v39, %v9263_v1  ;;  %v12173_v42 = vadd.f32 %v9688_v52, %v6795_v61 }
 0x464   : > { %v9266_v40 = vpop.f32.mrf.mxu0 }
 0x465   : > { %v12175_v7 = vpop.f32.mrf.mxu1  ;;  %v6798_v13 = vadd.f32 %v9265_v3, %v12062_v63 }
 0x466   : > { %v9267_v5 = vpop.f32.mrf.mxu0 }
 0x467   : > { %v12178_v34 = vpop.f32.mrf.mxu1  ;;  %v9268_v24 = vadd.f32 %v9267_v5, %v9266_v40  ;;  %v12180_v35 = vadd.f32 %v9689_v15, %v6798_v13 }
 0x468   : > { %v9269_v32 = vpop.f32.mrf.mxu0 }
 0x469   : > { %v12182_v10 = vpop.f32.mrf.mxu1  ;;  %v6803_v56 = vadd.f32 %v9268_v24, %v12064_v36 }
 0x46a   : > { %v9270_v45 = vpop.f32.mrf.mxu0 }
 0x46b   : > { %v12185_v4 = vpop.f32.mrf.mxu1  ;;  %v9271_v52 = vadd.f32 %v9270_v45, %v9269_v32  ;;  %v12187_v30 = vadd.f32 %v6963_v14, %v6803_v56 }
 0x46c   : > { %v9272_v26 = vpop.f32.mrf.mxu0 }
 0x46d   : > { %v12189_v1 = vpop.f32.mrf.mxu1  ;;  %v6806_v63 = vadd.f32 %v9271_v52, %v12066_v38 }
 0x46e   : > { %v9273_v61 = vpop.f32.mrf.mxu0 }
 0x46f   : > { %v12192_v39 = vpop.f32.mrf.mxu1  ;;  %v9274_v15 = vadd.f32 %v9273_v61, %v9272_v26  ;;  %v12194_v3 = vadd.f32 %v6966_v50, %v6806_v63 }
 0x470   : > { %v9275_v40 = vpop.f32.mrf.mxu0 }
 0x471   : > { %v12196_v13 = vpop.f32.mrf.mxu1  ;;  %v6811_v36 = vadd.f32 %v9274_v15, %v12069_v9 }
 0x472   : > { %v9276_v5 = vpop.f32.mrf.mxu0 }
 0x473   : > { %v12199_v24 = vpop.f32.mrf.mxu1  ;;  %v9277_v14 = vadd.f32 %v9276_v5, %v9275_v40  ;;  %v12202_v32 = vadd.f32 %v12137_v19, %v6811_v36 }
 0x474   : > { %v9278_v56 = vpop.f32.mrf.mxu0 }
 0x475   : > { %v12204_v38 = vpop.f32.mrf.mxu1  ;;  %v6814_v45 = vadd.f32 %v9277_v14, %v12072_v11 }
 0x476   : > { %v9279_v52 = vpop.f32.mrf.mxu0 }
 0x477   : > { %v12207_v50 = vpop.f32.mrf.mxu1  ;;  %v9280_v26 = vadd.f32 %v9279_v52, %v9278_v56  ;;  %v12210_v63 = vadd.f32 %v12142_v8, %v6814_v45 }
 0x478   : > { %v9281_v9 = vpop.f32.mrf.mxu0 }
 0x479   : > { %12565 = vst [vmem:[#allocation18_spill] sm:$0xff] %v12210_v63  ;;  %v12212_v61 = vpop.f32.mrf.mxu1  ;;  %v6819_v15 = vadd.f32 %v9280_v26, %v12075_v21 }
 0x47a   : > { %v9282_v40 = vpop.f32.mrf.mxu0 }
 0x47b   : > { %v12215_v19 = vpop.f32.mrf.mxu1  ;;  %v9283_v36 = vadd.f32 %v9282_v40, %v9281_v9  ;;  %v12218_v5 = vadd.f32 %v12150_v22, %v6819_v15 }
 0x47c   : > { %v9284_v11 = vpop.f32.mrf.mxu0 }
 0x47d   : > { %12566 = vst [vmem:[#allocation14_spill] sm:$0xff] %v12218_v5  ;;  %v12220_v14 = vpop.f32.mrf.mxu1  ;;  %v6822_v56 = vadd.f32 %v9283_v36, %v12078_v49 }
 0x47e   : > { %v9285_v52 = vpop.f32.mrf.mxu0 }
 0x47f   : > { %v12223_v8 = vpop.f32.mrf.mxu1  ;;  %v9286_v45 = vadd.f32 %v9285_v52, %v9284_v11  ;;  %v12226_v63 = vadd.f32 %v12157_v27, %v6822_v56 }
 0x480   : > { %v9287_v21 = vpop.f32.mrf.mxu0 }
 0x481   : > { %12567 = vst [vmem:[#allocation15_spill] sm:$0xff] %v12226_v63  ;;  %v12228_v26 = vpop.f32.mrf.mxu1  ;;  %v6827_v9 = vadd.f32 %v9286_v45, %v12081_v23 }
 0x482   : > { %v9288_v40 = vpop.f32.mrf.mxu0 }
 0x483   : > { %v12231_v22 = vpop.f32.mrf.mxu1  ;;  %v9289_v15 = vadd.f32 %v9288_v40, %v9287_v21  ;;  %v12234_v5 = vadd.f32 %v12147_v33, %v6827_v9 }
 0x484   : > { %v9290_v49 = vpop.f32.mrf.mxu0 }
 0x485   : > { %12568 = vst [vmem:[#allocation16_spill] sm:$0xff] %v12234_v5  ;;  %v12236_v36 = vpop.f32.mrf.mxu1  ;;  %v6830_v11 = vadd.f32 %v9289_v15, %v12084_v51 }
 0x486   : > { %v9291_v52 = vpop.f32.mrf.mxu0 }
 0x487   : > { %v12239_v27 = vpop.f32.mrf.mxu1  ;;  %v9292_v56 = vadd.f32 %v9291_v52, %v9290_v49  ;;  %v12242_v63 = vadd.f32 %v12154_v12, %v6830_v11 }
 0x488   : > { %v9293_v23 = vpop.f32.mrf.mxu0 }
 0x489   : > { %12569 = vst [vmem:[#allocation17_spill] sm:$0xff] %v12242_v63  ;;  %v12244_v45 = vpop.f32.mrf.mxu1  ;;  %v6835_v21 = vadd.f32 %v9292_v56, %v12089_v17 }
 0x48a   : > { %v9294_v40 = vpop.f32.mrf.mxu0 }
 0x48b   : > { %v12247_v33 = vpop.f32.mrf.mxu1  ;;  %v9295_v9 = vadd.f32 %v9294_v40, %v9293_v23  ;;  %v12250_v5 = vadd.f32 %v12164_v44, %v6835_v21  ;;  %v9350_v44 = vadd.f32 %v12192_v39, %v12189_v1  ;;  %v12278_v1 = vld [vmem:[%s12520_s4] ss:$0 sm:$0xff] }
 0x48c   : > { %v9296_v51 = vpop.f32.mrf.mxu0 }
 0x48d   : > { %v12252_v15 = vpop.f32.mrf.mxu1  ;;  %v6838_v49 = vadd.f32 %v9295_v9, %v12092_v55 }
 0x48e   : > { %v9297_v52 = vpop.f32.mrf.mxu0 }
 0x48f   : > { %v12255_v12 = vpop.f32.mrf.mxu1  ;;  %v9298_v11 = vadd.f32 %v9297_v52, %v9296_v51  ;;  %v12258_v63 = vadd.f32 %v12171_v25, %v6838_v49  ;;  %v9344_v25 = vadd.f32 %v12178_v34, %v12175_v7 }
 0x490   : > { %v9299_v17 = vpop.f32.mrf.mxu0 }
 0x491   : > { %v12260_v56 = vpop.f32.mrf.mxu1  ;;  %v6843_v23 = vadd.f32 %v9298_v11, %v12095_v58 }
 0x492   : > { %v9300_v40 = vpop.f32.mrf.mxu0 }
 0x493   : > { %v12265_v21 = vpop.f32.mrf.mxu1  ;;  %v12268_v55 = vadd.f32 %v12161_v57, %v6843_v23  ;;  %v9301_v9 = vadd.f32 %v9300_v40, %v9299_v17  ;;  %v9353_v57 = vadd.f32 %v12199_v24, %v12196_v13  ;;  %v9347_v40 = vadd.f32 %v12185_v4, %v12182_v10 }
 0x494   : > { %v9720_v51 = vpop.f32.mrf.mxu0  ;;  %v9356_v10 = vadd.f32 %v12207_v50, %v12204_v38  ;;  %v9362_v4 = vadd.f32 %v12223_v8, %v12220_v14 }
 0x495   : > { %12570 = vst [vmem:[#allocation19_spill] sm:$0xff] %v12268_v55  ;;  %v12272_v49 = vpop.f32.mrf.mxu1  ;;  %v6846_v52 = vadd.f32 %v9301_v9, %v12098_v54  ;;  %v7727_v58 = vadd.f32 %v9720_v51, %v9350_v44  ;;  %v4675_v54 = vld [vmem:[%s10595_s30 + $0x10] sm:$0xff]  ;;  %v4673_v51 = vld [vmem:[%s10595_s30] sm:$0xff] }
 0x496   : > { %v7718_v39 = vpop.f32.mrf.mxu0 }
 0x497   : > { %v12282_v11 = vpop.f32.mrf.mxu1  ;;  %v12285_v17 = vadd.f32 %v12168_v46, %v6846_v52  ;;  %v7847_v7 = vadd.f32 %v7727_v58, %v12100_v43  ;;  %v7719_v34 = vadd.f32 %v9344_v25, %v7718_v39 }
 0x498   : > { %v9721_v23 = vpop.f32.mrf.mxu0 }
 0x499   : > { %v12291_v44 = vpop.f32.mrf.mxu1  ;;  %v7886_v9 = vadd.f32 %v12278_v1, %v7847_v7  ;;  %v7845_v13 = vadd.f32 %v7719_v34, %v12102_v47  ;;  %v7730_v24 = vadd.f32 %v9721_v23, %v9353_v57  ;;  %v4676_v47 = vld [vmem:[%s10595_s30 + $0x18] sm:$0xff] }
 0x49a   : > { %v7721_v55 = vpop.f32.mrf.mxu0 }
 0x49b   : > { %v12296_v46 = vpop.f32.mrf.mxu1  ;;  %v7918_v43 = vadd.f32 %v7886_v9, %v4675_v54  ;;  %v7884_v25 = vadd.f32 %v12278_v1, %v7845_v13  ;;  %v7848_v52 = vadd.f32 %v7730_v24, %v12105_v53  ;;  %v7722_v58 = vadd.f32 %v9347_v40, %v7721_v55  ;;  %v4674_v55 = vld [vmem:[%s10595_s30 + $0x8] sm:$0xff] }
 0x49c   : > { %v9724_v39 = vpop.f32.mrf.mxu0  ;;  %v9365_v53 = vadd.f32 %v12231_v22, %v12228_v26  ;;  %v9359_v26 = vadd.f32 %v12215_v19, %v12212_v61  ;;  %v4677_v61 = vld [vmem:[%s10595_s30 + $0x20] sm:$0xff] }
 0x49d   : > { %v12305_v57 = vpop.f32.mrf.mxu1  ;;  %v7950_v7 = vmax.f32 %v7918_v43, 0.0  ;;  %v7916_v34 = vadd.f32 %v7884_v25, %v4673_v51  ;;  %v7887_v54 = vadd.f32 %v12278_v1, %v7848_v52  ;;  %v7846_v23 = vadd.f32 %v7722_v58, %v12109_v20  ;;  %v4679_v25 = vld [vmem:[%s10595_s30 + $0x30] sm:$0xff] }
 0x49e   : > { %v7743_v40 = vadd.f32 %v9724_v39, %v9362_v4  ;;  %v7734_v38 = vpop.f32.mrf.mxu0 }
 0x49f   : > { %v9385_v50 = vpop.f32.mrf.mxu1  ;;  %7982 = vst [vmem:[%s12314_s7 + $0x10] sm:$0xff] %v7950_v7  ;;  %v7948_v14 = vmax.f32 %v7916_v34, 0.0  ;;  %v7919_v8 = vadd.f32 %v7887_v54, %v4676_v47  ;;  %v7885_v9 = vadd.f32 %v12278_v1, %v7846_v23  ;;  %v7735_v20 = vadd.f32 %v9356_v10, %v7734_v38  ;;  %v4680_v54 = vld [vmem:[%s10595_s30 + $0x38] sm:$0xff] }
 0x4a0   : > { %v7851_v22 = vadd.f32 %v7743_v40, %v12114_v41  ;;  %v9725_v13 = vpop.f32.mrf.mxu0  ;;  %v9374_v10 = vadd.f32 %v12255_v12, %v12252_v15  ;;  %v9368_v38 = vadd.f32 %v12239_v27, %v12236_v36  ;;  %v4683_v36 = vld [vmem:[%s10595_s30 + $0x50] sm:$0xff] }
 0x4a1   : > { %v12321_v24 = vpop.f32.mrf.mxu1  ;;  %7980 = vst [vmem:[%s12314_s7] sm:$0xff] %v7948_v14  ;;  %v7951_v51 = vmax.f32 %v7919_v8, 0.0  ;;  %v7917_v43 = vadd.f32 %v7885_v9, %v4674_v55  ;;  %v7849_v52 = vadd.f32 %v7735_v20, %v12111_v2  ;;  %v7746_v58 = vadd.f32 %v9725_v13, %v9365_v53  ;;  %v4678_v8 = vld [vmem:[%s10595_s30 + $0x28] sm:$0xff] }
 0x4a2   : > { %v7890_v4 = vadd.f32 %v12278_v1, %v7851_v22  ;;  %v7737_v19 = vpop.f32.mrf.mxu0 }
 0x4a3   : > { %v12330_v41 = vpop.f32.mrf.mxu1  ;;  %7983 = vst [vmem:[%s12314_s7 + $0x18] sm:$0xff] %v7951_v51  ;;  %v7949_v47 = vmax.f32 %v7917_v43, 0.0  ;;  %v7888_v39 = vadd.f32 %v12278_v1, %v7849_v52  ;;  %v7852_v7 = vadd.f32 %v7746_v58, %v12119_v62  ;;  %v7738_v34 = vadd.f32 %v9359_v26, %v7737_v19  ;;  %v4681_v19 = vld [vmem:[%s10595_s30 + $0x40] sm:$0xff] }
 0x4a4   : > { %v7922_v2 = vadd.f32 %v7890_v4, %v4679_v25  ;;  %v9728_v23 = vpop.f32.mrf.mxu0  ;;  %v9377_v62 = vadd.f32 %v12265_v21, %v12260_v56 }
 0x4a5   : > { %v12336_v53 = vpop.f32.mrf.mxu1  ;;  %7981 = vst [vmem:[%s12314_s7 + $0x8] sm:$0xff] %v7949_v47  ;;  %v7920_v15 = vadd.f32 %v7888_v39, %v4677_v61  ;;  %v7891_v12 = vadd.f32 %v12278_v1, %v7852_v7  ;;  %v7850_v55 = vadd.f32 %v7738_v34, %v12116_v16  ;;  %v7759_v40 = vadd.f32 %v9728_v23, %v9374_v10 }
 0x4a6   : > { %v7954_v14 = vmax.f32 %v7922_v2, 0.0  ;;  %v7750_v9 = vpop.f32.mrf.mxu0  ;;  %v9371_v16 = vadd.f32 %v12247_v33, %v12244_v45  ;;  %v9380_v7 = vadd.f32 %v12282_v11, %v12272_v49 }
 0x4a7   : > { %v12346_v20 = vpop.f32.mrf.mxu1  ;;  %v7952_v26 = vmax.f32 %v7920_v15, 0.0  ;;  %v7923_v22 = vadd.f32 %v7891_v12, %v4680_v54  ;;  %v7889_v13 = vadd.f32 %v12278_v1, %v7850_v55  ;;  %v7855_v51 = vadd.f32 %v7759_v40, %v12129_v37 }
 0x4a8   : > { %7986 = vst [vmem:[%s12314_s7 + $0x30] sm:$0xff] %v7954_v14  ;;  %v7751_v27 = vadd.f32 %v9368_v38, %v7750_v9  ;;  %v9729_v56 = vpop.f32.mrf.mxu0  ;;  %v9386_v37 = vadd.f32 %v9385_v50, %v12305_v57  ;;  %v4684_v57 = vld [vmem:[%s10595_s30 + $0x58] sm:$0xff]  ;;  %v9383_v14 = vadd.f32 %v12296_v46, %v12291_v44  ;;  %v4687_v9 = vld [vmem:[%s10595_s30 + $0x70] sm:$0xff] }
 0x4a9   : > { %v12354_v21 = vpop.f32.mrf.mxu1  ;;  %7984 = vst [vmem:[%s12314_s7 + $0x20] sm:$0xff] %v7952_v26  ;;  %v7955_v43 = vmax.f32 %v7923_v22, 0.0  ;;  %v7921_v25 = vadd.f32 %v7889_v13, %v4678_v8  ;;  %v7894_v52 = vadd.f32 %v12278_v1, %v7855_v51  ;;  %v7762_v58 = vadd.f32 %v9729_v56, %v9377_v62 }
 0x4aa   : > { %v7853_v10 = vadd.f32 %v7751_v27, %v12124_v59  ;;  %v7753_v45 = vpop.f32.mrf.mxu0  ;;  %v4685_v27 = vld [vmem:[%s10595_s30 + $0x60] sm:$0xff] }
 0x4ab   : > { %v12360_v33 = vpop.f32.mrf.mxu1  ;;  %7987 = vst [vmem:[%s12314_s7 + $0x38] sm:$0xff] %v7955_v43  ;;  %v7953_v4 = vmax.f32 %v7921_v25, 0.0  ;;  %v7926_v61 = vadd.f32 %v7894_v52, %v4683_v36  ;;  %v7856_v47 = vadd.f32 %v7762_v58, %v12132_v29  ;;  %v7754_v39 = vadd.f32 %v9371_v16, %v7753_v45  ;;  %v4682_v29 = vld [vmem:[%s10595_s30 + $0x48] sm:$0xff] }
 0x4ac   : > { %v7892_v34 = vadd.f32 %v12278_v1, %v7853_v10  ;;  %v9732_v50 = vpop.f32.mrf.mxu0  ;;  %v9392_v52 = vadd.f32 %v12346_v20, %v12336_v53 }
 0x4ad   : > { %v9396_v59 = vpop.f32.mrf.mxu1  ;;  %7985 = vst [vmem:[%s12314_s7 + $0x28] sm:$0xff] %v7953_v4  ;;  %v7958_v2 = vmax.f32 %v7926_v61, 0.0  ;;  %v7895_v54 = vadd.f32 %v12278_v1, %v7856_v47  ;;  %v7854_v23 = vadd.f32 %v7754_v39, %v12126_v6  ;;  %v7775_v15 = vadd.f32 %v9732_v50, %v9386_v37  ;;  %v4688_v4 = vld [vmem:[%s10595_s30 + $0x78] sm:$0xff] }
 0x4ae   : > { %v7924_v12 = vadd.f32 %v7892_v34, %v4681_v19  ;;  %v7766_v55 = vpop.f32.mrf.mxu0  ;;  %v9389_v6 = vadd.f32 %v12330_v41, %v12321_v24 }
 0x4af   : > { %v9397_v40 = vpop.f32.mrf.mxu1  ;;  %7990 = vst [vmem:[%s12314_s7 + $0x50] sm:$0xff] %v7958_v2  ;;  %v7927_v49 = vadd.f32 %v7895_v54, %v4684_v57  ;;  %v7893_v11 = vadd.f32 %v12278_v1, %v7854_v23  ;;  %v7859_v38 = vadd.f32 %v7775_v15, %v12145_v60  ;;  %v7767_v62 = vadd.f32 %v9380_v7, %v7766_v55  ;;  %v4686_v7 = vld [vmem:[%s10595_s30 + $0x68] sm:$0xff]  ;;  %v4691_v2 = vld [vmem:[%s10595_s30 + $0x90] sm:$0xff] }
 0x4b0   : > { %v7956_v8 = vmax.f32 %v7924_v12, 0.0  ;;  %v9733_v26 = vpop.f32.mrf.mxu0  ;;  %v9398_v60 = vadd.f32 %v9397_v40, %v9396_v59  ;;  %v9395_v55 = vadd.f32 %v12360_v33, %v12354_v21 }
 0x4b1   : > { %v9399_v22 = vpop.f32.mrf.mxu1  ;;  %v7959_v13 = vmax.f32 %v7927_v49, 0.0  ;;  %v7925_v51 = vadd.f32 %v7893_v11, %v4682_v29  ;;  %v7898_v16 = vadd.f32 %v12278_v1, %v7859_v38  ;;  %v7857_v36 = vadd.f32 %v7767_v62, %v12135_v31 }
 0x4b2   : > { %7988 = vst [vmem:[%s12314_s7 + $0x40] sm:$0xff] %v7956_v8  ;;  %v7778_v44 = vadd.f32 %v9733_v26, %v9389_v6  ;;  %v7769_v46 = vpop.f32.mrf.mxu0  ;;  %v4692_v8 = vld [vmem:[%s10595_s30 + $0x98] sm:$0xff] }
 0x4b3   : > { %v9400_v56 = vpop.f32.mrf.mxu1  ;;  %7991 = vst [vmem:[%s12314_s7 + $0x58] sm:$0xff] %v7959_v13  ;;  %v7957_v24 = vmax.f32 %v7925_v51, 0.0  ;;  %v7930_v41 = vadd.f32 %v7898_v16, %v4687_v9  ;;  %v7896_v43 = vadd.f32 %v12278_v1, %v7857_v36  ;;  %v7770_v25 = vadd.f32 %v9383_v14, %v7769_v46 }
 0x4b4   : > { %v7860_v31 = vadd.f32 %v7778_v44, %v12152_v0  ;;  %v9736_v58 = vpop.f32.mrf.mxu0  ;;  %v9401_v47 = vadd.f32 %v9400_v56, %v9399_v22 }
 0x4b5   : > { %v9402_v37 = vpop.f32.mrf.mxu1  ;;  %7989 = vst [vmem:[%s12314_s7 + $0x48] sm:$0xff] %v7957_v24  ;;  %v7962_v10 = vmax.f32 %v7930_v41, 0.0  ;;  %v7928_v45 = vadd.f32 %v7896_v43, %v4685_v27  ;;  %v7858_v61 = vadd.f32 %v7770_v25, %v12140_v28  ;;  %v7791_v19 = vadd.f32 %v9736_v58, %v9398_v60  ;;  %v4690_v27 = vld [vmem:[%s10595_s30 + $0x88] sm:$0xff]  ;;  %v4693_v58 = vld [vmem:[%s10595_s30 + $0xa0] sm:$0xff] }
 0x4b6   : > { %v7899_v39 = vadd.f32 %v12278_v1, %v7860_v31  ;;  %v7782_v34 = vpop.f32.mrf.mxu0 }
 0x4b7   : > { %v9403_v57 = vpop.f32.mrf.mxu1  ;;  %7994 = vst [vmem:[%s12314_s7 + $0x70] sm:$0xff] %v7962_v10  ;;  %v7960_v0 = vmax.f32 %v7928_v45, 0.0  ;;  %v7897_v53 = vadd.f32 %v12278_v1, %v7858_v61  ;;  %v7863_v20 = vadd.f32 %v7791_v19, %v12173_v42  ;;  %v7783_v50 = vadd.f32 %v9392_v52, %v7782_v34  ;;  %v4689_v42 = vld [vmem:[%s10595_s30 + $0x80] sm:$0xff]  ;;  %v4695_v34 = vld [vmem:[%s10595_s30 + $0xb0] sm:$0xff] }
 0x4b8   : > { %v7931_v59 = vadd.f32 %v7899_v39, %v4688_v4  ;;  %v9737_v54 = vpop.f32.mrf.mxu0  ;;  %v9404_v26 = vadd.f32 %v9403_v57, %v9402_v37 }
 0x4b9   : > { %v9405_v28 = vpop.f32.mrf.mxu1  ;;  %7992 = vst [vmem:[%s12314_s7 + $0x60] sm:$0xff] %v7960_v0  ;;  %v7929_v23 = vadd.f32 %v7897_v53, %v4686_v7  ;;  %v7902_v15 = vadd.f32 %v12278_v1, %v7863_v20  ;;  %v7861_v12 = vadd.f32 %v7783_v50, %v12159_v18  ;;  %v7794_v29 = vadd.f32 %v9737_v54, %v9401_v47  ;;  %v4694_v20 = vld [vmem:[%s10595_s30 + $0xa8] sm:$0xff] }
 0x4ba   : > { %v7963_v40 = vmax.f32 %v7931_v59, 0.0  ;;  %v7785_v49 = vpop.f32.mrf.mxu0 }
 0x4bb   : > { %v9406_v11 = vpop.f32.mrf.mxu1  ;;  %v7961_v38 = vmax.f32 %v7929_v23, 0.0  ;;  %v7934_v62 = vadd.f32 %v7902_v15, %v4691_v2  ;;  %v7900_v14 = vadd.f32 %v12278_v1, %v7861_v12  ;;  %v7864_v6 = vadd.f32 %v7794_v29, %v12180_v35  ;;  %v12571_v23 = vld [vmem:[#allocation18_spill] sm:$0xff] }
 0x4bc   : > { %7995 = vst [vmem:[%s12314_s7 + $0x78] sm:$0xff] %v7963_v40  ;;  %v7786_v18 = vadd.f32 %v9395_v55, %v7785_v49  ;;  %v9740_v9 = vpop.f32.mrf.mxu0  ;;  %v9407_v41 = vadd.f32 %v9406_v11, %v9405_v28 }
 0x4bd   : > { %v9408_v22 = vpop.f32.mrf.mxu1  ;;  %7993 = vst [vmem:[%s12314_s7 + $0x68] sm:$0xff] %v7961_v38  ;;  %v7966_v21 = vmax.f32 %v7934_v62, 0.0  ;;  %v7932_v33 = vadd.f32 %v7900_v14, %v4689_v42  ;;  %v7903_v13 = vadd.f32 %v12278_v1, %v7864_v6 }
 0x4be   : > { %v7862_v51 = vadd.f32 %v7786_v18, %v12166_v48  ;;  %v7798_v16 = vpop.f32.mrf.mxu0 }
 0x4bf   : > { %v9409_v36 = vpop.f32.mrf.mxu1  ;;  %7998 = vst [vmem:[%s12314_s7 + $0x90] sm:$0xff] %v7966_v21  ;;  %v7964_v35 = vmax.f32 %v7932_v33, 0.0  ;;  %v7935_v60 = vadd.f32 %v7903_v13, %v4692_v8  ;;  %v7799_v44 = vadd.f32 %v9404_v26, %v7798_v16  ;;  %v12572_v8 = vld [vmem:[#allocation14_spill] sm:$0xff] }
 0x4c0   : > { %v9410_v46 = vadd.f32 %v9409_v36, %v9408_v22  ;;  %v7901_v56 = vadd.f32 %v12278_v1, %v7862_v51  ;;  %v9741_v24 = vpop.f32.mrf.mxu0  ;;  %v4697_v26 = vld [vmem:[%s10595_s30 + $0xc0] sm:$0xff] }
 0x4c1   : > { %v9411_v43 = vpop.f32.mrf.mxu1  ;;  %7996 = vst [vmem:[%s12314_s7 + $0x80] sm:$0xff] %v7964_v35  ;;  %v7967_v25 = vmax.f32 %v7935_v60, 0.0  ;;  %v7865_v48 = vadd.f32 %v7799_v44, %v12187_v30  ;;  %v12573_v35 = vld [vmem:[#allocation15_spill] sm:$0xff] }
 0x4c2   : > { %v7933_v52 = vadd.f32 %v7901_v56, %v4690_v27  ;;  %v7807_v31 = vadd.f32 %v9740_v9, %v9410_v46  ;;  %v7801_v37 = vpop.f32.mrf.mxu0  ;;  %v4698_v44 = vld [vmem:[%s10595_s30 + $0xc8] sm:$0xff] }
 0x4c3   : > { %v9412_v10 = vpop.f32.mrf.mxu1  ;;  %7999 = vst [vmem:[%s12314_s7 + $0x98] sm:$0xff] %v7967_v25  ;;  %v7904_v45 = vadd.f32 %v12278_v1, %v7865_v48  ;;  %v7802_v4 = vadd.f32 %v9407_v41, %v7801_v37  ;;  %v12574_v25 = vld [vmem:[#allocation16_spill] sm:$0xff] }
 0x4c4   : > { %v9413_v61 = vadd.f32 %v9412_v10, %v9411_v43  ;;  %v7965_v19 = vmax.f32 %v7933_v52, 0.0  ;;  %v7867_v47 = vadd.f32 %v7807_v31, %v12202_v32  ;;  %v9744_v39 = vpop.f32.mrf.mxu0 }
 0x4c5   : > { %v9414_v7 = vpop.f32.mrf.mxu1  ;;  %v7936_v30 = vadd.f32 %v7904_v45, %v4693_v58  ;;  %v7866_v57 = vadd.f32 %v7802_v4, %v12194_v3  ;;  %v4696_v3 = vld [vmem:[%s10595_s30 + $0xb8] sm:$0xff]  ;;  %v4699_v58 = vld [vmem:[%s10595_s30 + $0xd0] sm:$0xff] }
 0x4c6   : > { %7997 = vst [vmem:[%s12314_s7 + $0x88] sm:$0xff] %v7965_v19  ;;  %v7906_v0 = vadd.f32 %v12278_v1, %v7867_v47  ;;  %v7810_v53 = vadd.f32 %v9741_v24, %v9413_v61  ;;  %v7814_v50 = vpop.f32.mrf.mxu0 }
 0x4c7   : > { %v9415_v59 = vpop.f32.mrf.mxu1  ;;  %v7968_v2 = vmax.f32 %v7936_v30, 0.0  ;;  %v7905_v54 = vadd.f32 %v12278_v1, %v7866_v57  ;;  %v4700_v30 = vld [vmem:[%s10595_s30 + $0xd8] sm:$0xff] }
 0x4c8   : > { %v9416_v32 = vadd.f32 %v9415_v59, %v9414_v7  ;;  %v7938_v28 = vadd.f32 %v7906_v0, %v4695_v34  ;;  %v7868_v15 = vadd.f32 %v7810_v53, %v12571_v23  ;;  %v9745_v12 = vpop.f32.mrf.mxu0 }
 0x4c9   : > { %v9417_v29 = vpop.f32.mrf.mxu1  ;;  %8000 = vst [vmem:[%s12314_s7 + $0xa0] sm:$0xff] %v7968_v2  ;;  %v7937_v55 = vadd.f32 %v7905_v54, %v4694_v20 }
 0x4ca   : > { %v7970_v40 = vmax.f32 %v7938_v28, 0.0  ;;  %v7907_v42 = vadd.f32 %v12278_v1, %v7868_v15  ;;  %v7815_v49 = vadd.f32 %v9416_v32, %v7814_v50  ;;  %v7817_v62 = vpop.f32.mrf.mxu0  ;;  %v4701_v28 = vld [vmem:[%s10595_s30 + $0xe0] sm:$0xff] }
 0x4cb   : > { %v9418_v11 = vpop.f32.mrf.mxu1  ;;  %v7969_v38 = vmax.f32 %v7937_v55, 0.0 }
 0x4cc   : > { %8002 = vst [vmem:[%s12314_s7 + $0xb0] sm:$0xff] %v7970_v40  ;;  %v9419_v14 = vadd.f32 %v9418_v11, %v9417_v29  ;;  %v7939_v6 = vadd.f32 %v7907_v42, %v4696_v3  ;;  %v7869_v18 = vadd.f32 %v7815_v49, %v12572_v8  ;;  %v9748_v51 = vpop.f32.mrf.mxu0  ;;  %v4702_v49 = vld [vmem:[%s10595_s30 + $0xe8] sm:$0xff] }
 0x4cd   : > { %v9420_v9 = vpop.f32.mrf.mxu1  ;;  %8001 = vst [vmem:[%s12314_s7 + $0xa8] sm:$0xff] %v7969_v38  ;;  %v12576_v8 = vld [vmem:[#allocation19_spill] sm:$0xff] }
 0x4ce   : > { %v7971_v22 = vmax.f32 %v7939_v6, 0.0  ;;  %v7908_v21 = vadd.f32 %v12278_v1, %v7869_v18  ;;  %v7818_v33 = vadd.f32 %v9419_v14, %v7817_v62  ;;  %v7830_v43 = vpop.f32.mrf.mxu0 }
 0x4cf   : > { %v9421_v13 = vpop.f32.mrf.mxu1 }
 0x4d0   : > { %8003 = vst [vmem:[%s12314_s7 + $0xb8] sm:$0xff] %v7971_v22  ;;  %v9422_v16 = vadd.f32 %v9421_v13, %v9420_v9  ;;  %v7940_v36 = vadd.f32 %v7908_v21, %v4697_v26  ;;  %v7870_v60 = vadd.f32 %v7818_v33, %v12573_v35  ;;  %v9749_v19 = vpop.f32.mrf.mxu0  ;;  %v4703_v26 = vld [vmem:[%s10595_s30 + $0xf0] sm:$0xff] }
 0x4d1   : > { %v9423_v27 = vpop.f32.mrf.mxu1 }
 0x4d2   : > { %v7823_v46 = vadd.f32 %v9744_v39, %v9422_v16  ;;  %v7972_v56 = vmax.f32 %v7940_v36, 0.0  ;;  %v7909_v24 = vadd.f32 %v12278_v1, %v7870_v60  ;;  %v12575_v39 = vld [vmem:[#allocation17_spill] sm:$0xff]  ;;  %v7833_v59 = vpop.f32.mrf.mxu0 }
 0x4d3   : > { %v9424_v41 = vpop.f32.mrf.mxu1 }
 0x4d4   : > { %v7871_v48 = vadd.f32 %v7823_v46, %v12574_v25  ;;  %8004 = vst [vmem:[%s12314_s7 + $0xc0] sm:$0xff] %v7972_v56  ;;  %v9425_v52 = vadd.f32 %v9424_v41, %v9423_v27  ;;  %v7941_v31 = vadd.f32 %v7909_v24, %v4698_v44 }
 0x4d5   : > { %v9426_v37 = vpop.f32.mrf.mxu1 }
 0x4d6   : > { %v7910_v10 = vadd.f32 %v12278_v1, %v7871_v48  ;;  %v7826_v45 = vadd.f32 %v9745_v12, %v9425_v52  ;;  %v7973_v4 = vmax.f32 %v7941_v31, 0.0 }
 0x4d7   : > { %v9427_v61 = vpop.f32.mrf.mxu1 }
 0x4d8   : > { %v7942_v47 = vadd.f32 %v7910_v10, %v4699_v58  ;;  %v7872_v7 = vadd.f32 %v7826_v45, %v12575_v39  ;;  %8005 = vst [vmem:[%s12314_s7 + $0xc8] sm:$0xff] %v7973_v4  ;;  %v9428_v34 = vadd.f32 %v9427_v61, %v9426_v37 }
 0x4d9   : > { %v9429_v57 = vpop.f32.mrf.mxu1 }
 0x4da   : > { %v7974_v0 = vmax.f32 %v7942_v47, 0.0  ;;  %v7911_v53 = vadd.f32 %v12278_v1, %v7872_v7  ;;  %v7831_v20 = vadd.f32 %v9428_v34, %v7830_v43 }
 0x4db   : > { %v9430_v50 = vpop.f32.mrf.mxu1 }
 0x4dc   : > { %8006 = vst [vmem:[%s12314_s7 + $0xd0] sm:$0xff] %v7974_v0  ;;  %v7943_v2 = vadd.f32 %v7911_v53, %v4700_v30  ;;  %v7873_v54 = vadd.f32 %v7831_v20, %v12250_v5  ;;  %v9431_v32 = vadd.f32 %v9430_v50, %v9429_v57 }
 0x4dd   : > { %v9432_v23 = vpop.f32.mrf.mxu1 }
 0x4de   : > { %v7975_v15 = vmax.f32 %v7943_v2, 0.0  ;;  %v7912_v12 = vadd.f32 %v12278_v1, %v7873_v54  ;;  %v7834_v29 = vadd.f32 %v9431_v32, %v7833_v59 }
 0x4df   : > { %v9433_v3 = vpop.f32.mrf.mxu1 }
 0x4e0   : > { %8007 = vst [vmem:[%s12314_s7 + $0xd8] sm:$0xff] %v7975_v15  ;;  %v7944_v55 = vadd.f32 %v7912_v12, %v4701_v28  ;;  %v7874_v40 = vadd.f32 %v7834_v29, %v12258_v63  ;;  %v9434_v42 = vadd.f32 %v9433_v3, %v9432_v23 }
 0x4e1   : > { %v9435_v11 = vpop.f32.mrf.mxu1 }
 0x4e2   : > { %v7976_v5 = vmax.f32 %v7944_v55, 0.0  ;;  %v7913_v38 = vadd.f32 %v12278_v1, %v7874_v40  ;;  %v7839_v62 = vadd.f32 %v9748_v51, %v9434_v42  ;;  %v4704_v51 = vld [vmem:[%s10595_s30 + $0xf8] sm:$0xff]  ;;  %s8013_s30 = scalar_lea.sflag [#allocation6], %s10589_s16 }
 0x4e3   : > { %v9436_v14 = vpop.f32.mrf.mxu1 }
 0x4e4   : > { %8008 = vst [vmem:[%s12314_s7 + $0xe0] sm:$0xff] %v7976_v5  ;;  %v7945_v6 = vadd.f32 %v7913_v38, %v4702_v49  ;;  %v7875_v18 = vadd.f32 %v7839_v62, %v12576_v8  ;;  %v9437_v9 = vadd.f32 %v9436_v14, %v9435_v11 }
 0x4e6   : > { %v7977_v63 = vmax.f32 %v7945_v6, 0.0  ;;  %v7914_v22 = vadd.f32 %v12278_v1, %v7875_v18  ;;  %v7842_v21 = vadd.f32 %v9749_v19, %v9437_v9 }
 0x4e8   : > { %8009 = vst [vmem:[%s12314_s7 + $0xe8] sm:$0xff] %v7977_v63  ;;  %v7946_v33 = vadd.f32 %v7914_v22, %v4703_v26  ;;  %v7876_v13 = vadd.f32 %v7842_v21, %v12285_v17 }
 0x4ea   : > { %v7978_v16 = vmax.f32 %v7946_v33, 0.0  ;;  %v7915_v36 = vadd.f32 %v12278_v1, %v7876_v13 }
 0x4ec   : > { %8010 = vst [vmem:[%s12314_s7 + $0xf0] sm:$0xff] %v7978_v16  ;;  %v7947_v35 = vadd.f32 %v7915_v36, %v4704_v51 }
 0x4ee   : > { %v7979_v60 = vmax.f32 %v7947_v35, 0.0 }
 0x4f0   : > { %8011 = vst [vmem:[%s12314_s7 + $0xf8] sm:$0xff] %v7979_v60 }
 0x4f1   : > { %10364 = shalt.err (!%p10361_p9)
}
 0x4f2   : > { %s10365_s10 = scalar_lea.hbm %s12470_s29, 4096  ;;  %s10369_s28 = scalar_lea.hbm %s12521_s5, 8192 }
 0x4f3   : > { %p10366_p13 = scmp.ne.s32.totalorder %s12470_s29, %s10365_s10  ;;  %p10370_p4 = scmp.lt.s32.totalorder %s12470_s29, %s12521_s5 }
 0x4f4   : > { %p10371_p8 = scmp.lt.s32.totalorder %s10369_s28, %s10365_s10 }
 0x4f5   : > { %p10367_p5 = pnand %p10366_p13, %p12577_p10 }
 0x4f6   : > { %p10372_p3 = por %p10371_p8, %p10370_p4 }
 0x4f7   : > { %p10368_p0 = pneg %p10367_p5 }
 0x4f9   : > { %p10373_p11 = pnand %p10372_p3, %p10368_p0 }
 0x4fb   : > { %10376 = shalt.err (!%p10373_p11)
}
 0x4fc   : > { %s10430_s9 = smov 128   ;;  %s10431_s14 = smov 8  }
 0x4fd   : > { %9760 = dma.vmem_to_hbm [thread:$0]  (%p12577_p10), %s12472_s13, 4096, %s12470_s29, %s8013_s30, %s10430_s9, %s10430_s9, %s10431_s14  }
 0x4fe PF: > { %s8041_s17 = sand.u32 1, %s10407_s18   ;;  %p12578_p1 = scmp.ne.s32.totalorder %s12535_s25, 0 }
 0x4ff   : > { %p12579_p2 = scmp.ge.s32.totalorder %s10419_s21, 2  ;;  %s8042_s24 = scalar_lea.sflag [#allocation6], %s8041_s17 }
 0x501   : > { %p9774_p6 = pnand %p12579_p2, %p12578_p1 }
 0x503   : > { %p9775_p12 = pneg %p9774_p6 }
 0x505   : > { %10402 = dma.done.wait (%p9775_p12), %s8042_s24, 4096  }
 0x506   : > { %10404 = vsyncadd (%p9775_p12), %s8042_s24, 4294963200  ;;  %p19_p7 = scmp.ge.s32.totalorder %s10534_s15, 4   ;;  %s12580_s18 = smov %s10411_s19 }
 0x507   : > { %s12581_s19 = smov %s10415_s20  ;;  %s12582_s20 = smov %s10550_s27 }
 0x508   : > { %s12583_s21 = smov %s10534_s15  ;;  %21 = sbr.rel (!%p19_p7) target bundleno = 6 (0x6), region = 98 }
 0x50d   :  { %8047 = vsyncpa [#allocation5], 1 }
 0x50e   :  { %8049 = vsyncpa [#allocation5 + $0x1], 1 }
 0x50f   :  { %8050 = vsyncpa [#allocation8], 1 }
 0x510   :  { %8051 = vsyncpa [#allocation6], 1 }
 0x511   :  { %8053 = vsyncpa [#allocation6 + $0x1], 1 }

</bundles_post_ra>
